<compile_context>
chip_gen: v5e
topology: v5e:2x2
jax: 0.10.0
libtpu: 0.0.40
codegen_flags: <defaults>
</compile_context>

<pallas_src>
import functools
import math

import jax
import jax.numpy as jnp
from jax.experimental import pallas as pl
from jax.experimental.pallas import tpu as pltpu

H = 128                       # LSTM hidden size (fixed by the module)
FC1, FC2 = 400, 300           # logical MLP head widths
FC1_PAD, FC2_PAD = 512, 384   # lane-dense (multiple-of-128) padded widths
UNROLL_T_MAX = 16             # full Python unroll up to here, fori_loop beyond


def _critic_kernel(
    xu_ref,                   # (T*Bp, D_in) f32  time-major LSTM input, batch padded
    w_ih0_ref,                # (D_in, 4H)   f32  layer-0 input weights (i,f,o,g order)
    w_rec_ref,                # (3H, 4H)     bf16 [w_hh0 ; w_ih1 ; w_hh1]
    w_fc1_ref,                # (H, FC1_PAD)       bf16
    w_fc2_ref,                # (FC1_PAD, FC2_PAD) bf16
    fpack_ref,                # (8, 4H) f32 rows: b0, b1, b_fc1, b_fc2, w_out, b_out
    o_ref,                    # (Bp, 1) f32
    *, T, Bp,
):
    f32 = jnp.float32
    bf16 = jnp.bfloat16

    # ---- unpack the small f32 pack (single operand instead of six) ----
    b0 = fpack_ref[0:1, :]                                       # (1, 4H)
    b1 = jnp.broadcast_to(fpack_ref[1:2, :], (Bp, 4 * H))        # broadcast once
    b_fc1 = fpack_ref[2:3, :]                                    # (1, FC1_PAD) (4H == FC1_PAD)
    b_fc2 = fpack_ref[3:4, :FC2_PAD]                             # (1, FC2_PAD)
    w_out = fpack_ref[4:5, :FC2_PAD]                             # (1, FC2_PAD)
    b_out = fpack_ref[5:6, 0:1]                                  # (1, 1)

    # ---- hoisted layer-0 input projection: one matmul covers all timesteps ----
    gates_x = jnp.dot(xu_ref[...], w_ih0_ref[...],
                      preferred_element_type=f32) + b0           # (T*Bp, 4H)

    # Recurrent weights loaded once (sublane-aligned static slices).
    w_hh0 = w_rec_ref[0 * H:1 * H, :]
    w_ih1 = w_rec_ref[1 * H:2 * H, :]
    w_hh1 = w_rec_ref[2 * H:3 * H, :]

    def gate_math(gates, c):
        # Gate columns pre-permuted to (i, f, o, g): one wide sigmoid + one tanh.
        ifo = jax.nn.sigmoid(gates[:, :3 * H])
        g = jnp.tanh(gates[:, 3 * H:])
        i = ifo[:, 0 * H:1 * H]
        f = ifo[:, 1 * H:2 * H]
        o = ifo[:, 2 * H:3 * H]
        c_new = f * c + i * g
        h_new = o * jnp.tanh(c_new)
        return h_new, c_new

    h0 = jnp.zeros((Bp, H), f32)
    c0 = jnp.zeros((Bp, H), f32)
    h1 = jnp.zeros((Bp, H), f32)
    c1 = jnp.zeros((Bp, H), f32)
    g1_off = b1                # == h1 @ w_hh1 + b1 with h1 = 0

    if T <= UNROLL_T_MAX:
        # Fully-unrolled time loop: static, sublane-aligned slices; cross-step
        # instruction interleaving by the scheduler.
        for t in range(T):
            g0 = gates_x[t * Bp:(t + 1) * Bp, :]
            if t > 0:                                   # h0 == 0 at t == 0
                g0 = g0 + jnp.dot(h0.astype(bf16), w_hh0,
                                  preferred_element_type=f32)
            h0, c0 = gate_math(g0, c0)
            # Dropout(p=0.1) between LSTM layers: training-only -> identity.
            # Layer 1 critical path: only h0_new @ w_ih1 (K=128); the h1 part
            # (g1_off) was computed off-path at the end of the previous step.
            g1 = jnp.dot(h0.astype(bf16), w_ih1,
                         preferred_element_type=f32) + g1_off
            h1, c1 = gate_math(g1, c1)
            if t + 1 < T:                               # not needed after last step
                g1_off = jnp.dot(h1.astype(bf16), w_hh1,
                                 preferred_element_type=f32) + b1
    else:
        # Long sequences: bounded live ranges / instruction memory.
        gates_x3 = gates_x.reshape(T, Bp, 4 * H)

        def body(t, carry):
            h0, c0, h1, c1, g1_off = carry
            g0 = jax.lax.dynamic_index_in_dim(gates_x3, t, axis=0, keepdims=False)
            g0 = g0 + jnp.dot(h0.astype(bf16), w_hh0, preferred_element_type=f32)
            h0, c0 = gate_math(g0, c0)
            g1 = jnp.dot(h0.astype(bf16), w_ih1,
                         preferred_element_type=f32) + g1_off
            h1, c1 = gate_math(g1, c1)
            g1_off = jnp.dot(h1.astype(bf16), w_hh1,
                             preferred_element_type=f32) + b1
            return h0, c0, h1, c1, g1_off

        h0, c0, h1, c1, g1_off = jax.lax.fori_loop(
            0, T, body, (h0, c0, h1, c1, g1_off), unroll=2)

    # ---- MLP head on the last-timestep top-layer hidden state ----
    x = jnp.maximum(
        jnp.dot(h1.astype(bf16), w_fc1_ref[...],
                preferred_element_type=f32) + b_fc1, 0.0)        # (Bp, FC1_PAD)
    x = jnp.maximum(
        jnp.dot(x.astype(bf16), w_fc2_ref[...],
                preferred_element_type=f32) + b_fc2, 0.0)        # (Bp, FC2_PAD)
    # N=1 output column: VPU multiply + lane reduction (no MXU pass).
    # Padded tail columns of x and w_out are exactly zero -> no contribution.
    q = jnp.sum(x * w_out, axis=-1, keepdims=True) + b_out       # (Bp, 1)
    o_ref[...] = q.astype(o_ref.dtype)


def init_params(key, state_dim, action_dim):
    """Deterministic init mirroring the module's shapes / bounds (not its RNG).

    Note: the module applies fan_in_uniform_init to biases too, with
    fan_in = bias.size(-1), so the bias bounds 1/sqrt(400), 1/sqrt(300), 1.0
    below are intentional (they match the spec, not nn.Linear defaults).
    Gate order here is the PyTorch order (i, f, g, o); prepare_params permutes.
    """
    d_in = state_dim + action_dim
    ks = jax.random.split(key, 14)

    def u(k, shape, bound):
        return jax.random.uniform(k, shape, jnp.float32, -bound, bound)

    lb = 1.0 / math.sqrt(H)  # default PyTorch LSTM init bound
    p = {}
    # LSTM layer 0 (weights stored transposed: (in, 4H)); PyTorch adds b_ih + b_hh.
    p["w_ih0"] = u(ks[0], (d_in, 4 * H), lb)
    p["w_hh0"] = u(ks[1], (H, 4 * H), lb)
    p["b0"] = u(ks[2], (1, 4 * H), lb) + u(ks[3], (1, 4 * H), lb)
    # LSTM layer 1
    p["w_ih1"] = u(ks[4], (H, 4 * H), lb)
    p["w_hh1"] = u(ks[5], (H, 4 * H), lb)
    p["b1"] = u(ks[6], (1, 4 * H), lb) + u(ks[7], (1, 4 * H), lb)
    # fc1: weight (400,128)->(128,400) bound 1/sqrt(128); bias bound 1/sqrt(400)
    p["w_fc1"] = u(ks[8], (H, FC1), 1.0 / math.sqrt(H))
    p["b_fc1"] = u(ks[9], (1, FC1), 1.0 / math.sqrt(FC1))
    # fc2: weight bound 1/sqrt(400); bias bound 1/sqrt(300)
    p["w_fc2"] = u(ks[10], (FC1, FC2), 1.0 / math.sqrt(FC1))
    p["b_fc2"] = u(ks[11], (1, FC2), 1.0 / math.sqrt(FC2))
    # out: weight bound 1/sqrt(300); bias bound 1/sqrt(1) = 1.0
    p["w_out"] = u(ks[12], (FC2, 1), 1.0 / math.sqrt(FC2))
    p["b_out"] = u(ks[13], (1, 1), 1.0)
    return p


def _permute_gates(w):
    """Permute 4H gate columns (i, f, g, o) -> (i, f, o, g) along the last axis."""
    i, f, g, o = jnp.split(w, 4, axis=-1)
    return jnp.concatenate([i, f, o, g], axis=-1)


def prepare_params(p):
    """One-time packing of module params into kernel layout:
       - permute gate columns to (i, f, o, g) for one wide sigmoid per layer
       - pack the three recurrent weights into one bf16 (3H, 4H) buffer
         (bf16 MXU operands: fewer MXU passes, half the weight DMA bytes)
       - zero-pad MLP head widths to lane multiples (400 -> 512, 300 -> 384)
       - pack all biases + the output row + output bias into one (8, 512) f32
         array (fewer kernel operands / DMAs).
    """
    f32, bf16 = jnp.float32, jnp.bfloat16

    fpack = jnp.zeros((8, 4 * H), f32)
    fpack = fpack.at[0, :].set(_permute_gates(p["b0"]).reshape(-1))
    fpack = fpack.at[1, :].set(_permute_gates(p["b1"]).reshape(-1))
    fpack = fpack.at[2, :FC1].set(p["b_fc1"].reshape(-1))
    fpack = fpack.at[3, :FC2].set(p["b_fc2"].reshape(-1))
    fpack = fpack.at[4, :FC2].set(p["w_out"].reshape(-1))
    fpack = fpack.at[5, 0].set(p["b_out"].reshape(()))

    kp = {
        "w_ih0": _permute_gates(p["w_ih0"]).astype(f32),           # (D_in, 4H)
        "w_rec": jnp.concatenate(
            [_permute_gates(p["w_hh0"]),
             _permute_gates(p["w_ih1"]),
             _permute_gates(p["w_hh1"])], axis=0).astype(bf16),    # (3H, 4H)
        "w_fc1": jnp.pad(p["w_fc1"],
                         ((0, 0), (0, FC1_PAD - FC1))).astype(bf16),
        "w_fc2": jnp.pad(p["w_fc2"],
                         ((0, FC1_PAD - FC1), (0, FC2_PAD - FC2))).astype(bf16),
        "fpack": fpack,
    }
    return kp


def critic_forward(x, u, kparams):
    # Replicate the PyTorch dim handling.
    if x.ndim == 1:
        x = x.reshape(1, -1)
    if u.ndim == 1:
        u = u.reshape(1, -1)
    if x.ndim == 2:
        x = x[:, None, :]
    if u.ndim == 2:
        u = u[:, None, :]
    xu = jnp.concatenate([x, u], axis=-1).astype(jnp.float32)        # (B, T, D_in)
    B, T, d_in = xu.shape

    # Pad the batch (sublane) dimension to a multiple of 8: every per-step
    # operand becomes one aligned vreg. Padded rows never mix with real rows.
    Bp = max(8, ((B + 7) // 8) * 8)
    if Bp != B:
        xu = jnp.pad(xu, ((0, Bp - B), (0, 0), (0, 0)))
    xu_tm = jnp.transpose(xu, (1, 0, 2)).reshape(T * Bp, d_in)       # time-major, flat

    vmem = pl.BlockSpec(memory_space=pltpu.MemorySpace.VMEM)
    inputs = (
        xu_tm,
        kparams["w_ih0"], kparams["w_rec"],
        kparams["w_fc1"], kparams["w_fc2"],
        kparams["fpack"],
    )
    # Total resident VMEM ~1 MiB -> single gridless invocation on every
    # generation. For large Bp on v7x, add a grid over Bp-blocks with
    # dimension_semantics=("parallel",) to use both TensorCores.
    out = pl.pallas_call(
        functools.partial(_critic_kernel, T=T, Bp=Bp),
        out_shape=jax.ShapeDtypeStruct((Bp, 1), jnp.float32),
        in_specs=[vmem] * len(inputs),
        out_specs=vmem,
    )(*inputs)
    return out[:B]                                                   # (B, 1)


if __name__ == "__main__":
    key = jax.random.PRNGKey(0)
    kp, kx, ku = jax.random.split(key, 3)

    state_dim, action_dim = 6, 2
    B, T = 2, 8

    params = prepare_params(init_params(kp, state_dim, action_dim))
    x = jax.random.normal(kx, (B, T, state_dim), jnp.float32)
    u = jax.random.normal(ku, (B, T, action_dim), jnp.float32)

    q = critic_forward(x, u, params)
    jax.block_until_ready(q)
    assert q.shape == (B, 1) and q.dtype == jnp.float32
    print("KERNEL_OK")
</pallas_src>

<mosaic_0001>
module attributes {stable_mosaic.version = 11 : i64} {
  func.func @_critic_kernel(%arg0: memref<64x8xf32, #tpu.memory_space<vmem>>, %arg1: memref<8x512xf32, #tpu.memory_space<vmem>>, %arg2: memref<384x512xbf16, #tpu.memory_space<vmem>>, %arg3: memref<128x512xbf16, #tpu.memory_space<vmem>>, %arg4: memref<512x384xbf16, #tpu.memory_space<vmem>>, %arg5: memref<8x512xf32, #tpu.memory_space<vmem>>, %arg6: memref<8x1xf32, #tpu.memory_space<vmem>>) attributes {dimension_semantics = [], scalar_prefetch = 0 : i64, scratch_operands = 0 : i64, tpu.core_type = #tpu.core_type<tc>} {
    %c0 = arith.constant 0 : index
    %c0_0 = arith.constant 0 : index
    %0 = vector.load %arg5[%c0, %c0_0] : memref<8x512xf32, #tpu.memory_space<vmem>>, vector<1x512xf32>
    %c1 = arith.constant 1 : index
    %c0_1 = arith.constant 0 : index
    %1 = vector.load %arg5[%c1, %c0_1] : memref<8x512xf32, #tpu.memory_space<vmem>>, vector<1x512xf32>
    %2 = vector.shape_cast %1 : vector<1x512xf32> to vector<1x512xf32>
    %3 = vector.broadcast %2 : vector<1x512xf32> to vector<8x512xf32>
    %c2 = arith.constant 2 : index
    %c0_2 = arith.constant 0 : index
    %4 = vector.load %arg5[%c2, %c0_2] : memref<8x512xf32, #tpu.memory_space<vmem>>, vector<1x512xf32>
    %c3 = arith.constant 3 : index
    %c0_3 = arith.constant 0 : index
    %5 = vector.load %arg5[%c3, %c0_3] : memref<8x512xf32, #tpu.memory_space<vmem>>, vector<1x384xf32>
    %c4 = arith.constant 4 : index
    %c0_4 = arith.constant 0 : index
    %6 = vector.load %arg5[%c4, %c0_4] : memref<8x512xf32, #tpu.memory_space<vmem>>, vector<1x384xf32>
    %c5 = arith.constant 5 : index
    %c0_5 = arith.constant 0 : index
    %7 = vector.load %arg5[%c5, %c0_5] : memref<8x512xf32, #tpu.memory_space<vmem>>, vector<1x1xf32>
    %c0_6 = arith.constant 0 : index
    %c0_7 = arith.constant 0 : index
    %8 = vector.load %arg0[%c0_6, %c0_7] : memref<64x8xf32, #tpu.memory_space<vmem>>, vector<64x8xf32>
    %c0_8 = arith.constant 0 : index
    %c0_9 = arith.constant 0 : index
    %9 = vector.load %arg1[%c0_8, %c0_9] : memref<8x512xf32, #tpu.memory_space<vmem>>, vector<8x512xf32>
    %cst = arith.constant dense<0.000000e+00> : vector<64x512xf32>
    %10 = tpu.matmul %8, %9, %cst {dimension_numbers = #tpu.dot_dimension_numbers<[1], [0], [0], [1], [0, 0, 1, 1], [], []>} : vector<64x8xf32>, vector<8x512xf32>, vector<64x512xf32> -> vector<64x512xf32>
    %11 = vector.broadcast %0 : vector<1x512xf32> to vector<64x512xf32>
    %12 = arith.addf %10, %11 : vector<64x512xf32>
    %c0_10 = arith.constant 0 : index
    %c0_11 = arith.constant 0 : index
    %13 = vector.load %arg2[%c0_10, %c0_11] : memref<384x512xbf16, #tpu.memory_space<vmem>>, vector<128x512xbf16>
    %c128 = arith.constant 128 : index
    %c0_12 = arith.constant 0 : index
    %14 = vector.load %arg2[%c128, %c0_12] : memref<384x512xbf16, #tpu.memory_space<vmem>>, vector<128x512xbf16>
    %c256 = arith.constant 256 : index
    %c0_13 = arith.constant 0 : index
    %15 = vector.load %arg2[%c256, %c0_13] : memref<384x512xbf16, #tpu.memory_space<vmem>>, vector<128x512xbf16>
    %cst_14 = arith.constant 0.000000e+00 : f32
    %16 = vector.broadcast %cst_14 : f32 to vector<8x128xf32>
    %cst_15 = arith.constant 0.000000e+00 : f32
    %17 = vector.broadcast %cst_15 : f32 to vector<8x128xf32>
    %18 = vector.extract_strided_slice %12 {offsets = [0, 0], sizes = [8, 512], strides = [1, 1]} : vector<64x512xf32> to vector<8x512xf32>
    %19 = vector.extract_strided_slice %18 {offsets = [0, 0], sizes = [8, 384], strides = [1, 1]} : vector<8x512xf32> to vector<8x384xf32>
    %20 = arith.negf %19 : vector<8x384xf32>
    %21 = math.exp %20 : vector<8x384xf32>
    %cst_16 = arith.constant 1.000000e+00 : f32
    %22 = vector.broadcast %cst_16 : f32 to vector<8x384xf32>
    %23 = arith.addf %22, %21 : vector<8x384xf32>
    %24 = arith.divf %22, %23 : vector<8x384xf32>
    %25 = vector.extract_strided_slice %18 {offsets = [0, 384], sizes = [8, 128], strides = [1, 1]} : vector<8x512xf32> to vector<8x128xf32>
    %26 = math.tanh %25 : vector<8x128xf32>
    %27 = vector.extract_strided_slice %24 {offsets = [0, 0], sizes = [8, 128], strides = [1, 1]} : vector<8x384xf32> to vector<8x128xf32>
    %28 = vector.extract_strided_slice %24 {offsets = [0, 128], sizes = [8, 128], strides = [1, 1]} : vector<8x384xf32> to vector<8x128xf32>
    %29 = vector.extract_strided_slice %24 {offsets = [0, 256], sizes = [8, 128], strides = [1, 1]} : vector<8x384xf32> to vector<8x128xf32>
    %30 = arith.mulf %28, %16 : vector<8x128xf32>
    %31 = arith.mulf %27, %26 : vector<8x128xf32>
    %32 = arith.addf %30, %31 : vector<8x128xf32>
    %33 = math.tanh %32 : vector<8x128xf32>
    %34 = arith.mulf %29, %33 : vector<8x128xf32>
    %35 = arith.truncf %34 : vector<8x128xf32> to vector<8x128xbf16>
    %cst_17 = arith.constant dense<0.000000e+00> : vector<8x512xf32>
    %36 = tpu.matmul %35, %14, %cst_17 {dimension_numbers = #tpu.dot_dimension_numbers<[1], [0], [0], [1], [0, 0, 1, 1], [], []>} : vector<8x128xbf16>, vector<128x512xbf16>, vector<8x512xf32> -> vector<8x512xf32>
    %37 = arith.addf %36, %3 : vector<8x512xf32>
    %38 = vector.extract_strided_slice %37 {offsets = [0, 0], sizes = [8, 384], strides = [1, 1]} : vector<8x512xf32> to vector<8x384xf32>
    %39 = arith.negf %38 : vector<8x384xf32>
    %40 = math.exp %39 : vector<8x384xf32>
    %cst_18 = arith.constant 1.000000e+00 : f32
    %41 = vector.broadcast %cst_18 : f32 to vector<8x384xf32>
    %42 = arith.addf %41, %40 : vector<8x384xf32>
    %43 = arith.divf %41, %42 : vector<8x384xf32>
    %44 = vector.extract_strided_slice %37 {offsets = [0, 384], sizes = [8, 128], strides = [1, 1]} : vector<8x512xf32> to vector<8x128xf32>
    %45 = math.tanh %44 : vector<8x128xf32>
    %46 = vector.extract_strided_slice %43 {offsets = [0, 0], sizes = [8, 128], strides = [1, 1]} : vector<8x384xf32> to vector<8x128xf32>
    %47 = vector.extract_strided_slice %43 {offsets = [0, 128], sizes = [8, 128], strides = [1, 1]} : vector<8x384xf32> to vector<8x128xf32>
    %48 = vector.extract_strided_slice %43 {offsets = [0, 256], sizes = [8, 128], strides = [1, 1]} : vector<8x384xf32> to vector<8x128xf32>
    %49 = arith.mulf %47, %17 : vector<8x128xf32>
    %50 = arith.mulf %46, %45 : vector<8x128xf32>
    %51 = arith.addf %49, %50 : vector<8x128xf32>
    %52 = math.tanh %51 : vector<8x128xf32>
    %53 = arith.mulf %48, %52 : vector<8x128xf32>
    %54 = arith.truncf %53 : vector<8x128xf32> to vector<8x128xbf16>
    %cst_19 = arith.constant dense<0.000000e+00> : vector<8x512xf32>
    %55 = tpu.matmul %54, %15, %cst_19 {dimension_numbers = #tpu.dot_dimension_numbers<[1], [0], [0], [1], [0, 0, 1, 1], [], []>} : vector<8x128xbf16>, vector<128x512xbf16>, vector<8x512xf32> -> vector<8x512xf32>
    %56 = arith.addf %55, %3 : vector<8x512xf32>
    %57 = vector.extract_strided_slice %12 {offsets = [8, 0], sizes = [8, 512], strides = [1, 1]} : vector<64x512xf32> to vector<8x512xf32>
    %58 = arith.truncf %34 : vector<8x128xf32> to vector<8x128xbf16>
    %cst_20 = arith.constant dense<0.000000e+00> : vector<8x512xf32>
    %59 = tpu.matmul %58, %13, %cst_20 {dimension_numbers = #tpu.dot_dimension_numbers<[1], [0], [0], [1], [0, 0, 1, 1], [], []>} : vector<8x128xbf16>, vector<128x512xbf16>, vector<8x512xf32> -> vector<8x512xf32>
    %60 = arith.addf %57, %59 : vector<8x512xf32>
    %61 = vector.extract_strided_slice %60 {offsets = [0, 0], sizes = [8, 384], strides = [1, 1]} : vector<8x512xf32> to vector<8x384xf32>
    %62 = arith.negf %61 : vector<8x384xf32>
    %63 = math.exp %62 : vector<8x384xf32>
    %cst_21 = arith.constant 1.000000e+00 : f32
    %64 = vector.broadcast %cst_21 : f32 to vector<8x384xf32>
    %65 = arith.addf %64, %63 : vector<8x384xf32>
    %66 = arith.divf %64, %65 : vector<8x384xf32>
    %67 = vector.extract_strided_slice %60 {offsets = [0, 384], sizes = [8, 128], strides = [1, 1]} : vector<8x512xf32> to vector<8x128xf32>
    %68 = math.tanh %67 : vector<8x128xf32>
    %69 = vector.extract_strided_slice %66 {offsets = [0, 0], sizes = [8, 128], strides = [1, 1]} : vector<8x384xf32> to vector<8x128xf32>
    %70 = vector.extract_strided_slice %66 {offsets = [0, 128], sizes = [8, 128], strides = [1, 1]} : vector<8x384xf32> to vector<8x128xf32>
    %71 = vector.extract_strided_slice %66 {offsets = [0, 256], sizes = [8, 128], strides = [1, 1]} : vector<8x384xf32> to vector<8x128xf32>
    %72 = arith.mulf %70, %32 : vector<8x128xf32>
    %73 = arith.mulf %69, %68 : vector<8x128xf32>
    %74 = arith.addf %72, %73 : vector<8x128xf32>
    %75 = math.tanh %74 : vector<8x128xf32>
    %76 = arith.mulf %71, %75 : vector<8x128xf32>
    %77 = arith.truncf %76 : vector<8x128xf32> to vector<8x128xbf16>
    %cst_22 = arith.constant dense<0.000000e+00> : vector<8x512xf32>
    %78 = tpu.matmul %77, %14, %cst_22 {dimension_numbers = #tpu.dot_dimension_numbers<[1], [0], [0], [1], [0, 0, 1, 1], [], []>} : vector<8x128xbf16>, vector<128x512xbf16>, vector<8x512xf32> -> vector<8x512xf32>
    %79 = arith.addf %78, %56 : vector<8x512xf32>
    %80 = vector.extract_strided_slice %79 {offsets = [0, 0], sizes = [8, 384], strides = [1, 1]} : vector<8x512xf32> to vector<8x384xf32>
    %81 = arith.negf %80 : vector<8x384xf32>
    %82 = math.exp %81 : vector<8x384xf32>
    %cst_23 = arith.constant 1.000000e+00 : f32
    %83 = vector.broadcast %cst_23 : f32 to vector<8x384xf32>
    %84 = arith.addf %83, %82 : vector<8x384xf32>
    %85 = arith.divf %83, %84 : vector<8x384xf32>
    %86 = vector.extract_strided_slice %79 {offsets = [0, 384], sizes = [8, 128], strides = [1, 1]} : vector<8x512xf32> to vector<8x128xf32>
    %87 = math.tanh %86 : vector<8x128xf32>
    %88 = vector.extract_strided_slice %85 {offsets = [0, 0], sizes = [8, 128], strides = [1, 1]} : vector<8x384xf32> to vector<8x128xf32>
    %89 = vector.extract_strided_slice %85 {offsets = [0, 128], sizes = [8, 128], strides = [1, 1]} : vector<8x384xf32> to vector<8x128xf32>
    %90 = vector.extract_strided_slice %85 {offsets = [0, 256], sizes = [8, 128], strides = [1, 1]} : vector<8x384xf32> to vector<8x128xf32>
    %91 = arith.mulf %89, %51 : vector<8x128xf32>
    %92 = arith.mulf %88, %87 : vector<8x128xf32>
    %93 = arith.addf %91, %92 : vector<8x128xf32>
    %94 = math.tanh %93 : vector<8x128xf32>
    %95 = arith.mulf %90, %94 : vector<8x128xf32>
    %96 = arith.truncf %95 : vector<8x128xf32> to vector<8x128xbf16>
    %cst_24 = arith.constant dense<0.000000e+00> : vector<8x512xf32>
    %97 = tpu.matmul %96, %15, %cst_24 {dimension_numbers = #tpu.dot_dimension_numbers<[1], [0], [0], [1], [0, 0, 1, 1], [], []>} : vector<8x128xbf16>, vector<128x512xbf16>, vector<8x512xf32> -> vector<8x512xf32>
    %98 = arith.addf %97, %3 : vector<8x512xf32>
    %99 = vector.extract_strided_slice %12 {offsets = [16, 0], sizes = [8, 512], strides = [1, 1]} : vector<64x512xf32> to vector<8x512xf32>
    %100 = arith.truncf %76 : vector<8x128xf32> to vector<8x128xbf16>
    %cst_25 = arith.constant dense<0.000000e+00> : vector<8x512xf32>
    %101 = tpu.matmul %100, %13, %cst_25 {dimension_numbers = #tpu.dot_dimension_numbers<[1], [0], [0], [1], [0, 0, 1, 1], [], []>} : vector<8x128xbf16>, vector<128x512xbf16>, vector<8x512xf32> -> vector<8x512xf32>
    %102 = arith.addf %99, %101 : vector<8x512xf32>
    %103 = vector.extract_strided_slice %102 {offsets = [0, 0], sizes = [8, 384], strides = [1, 1]} : vector<8x512xf32> to vector<8x384xf32>
    %104 = arith.negf %103 : vector<8x384xf32>
    %105 = math.exp %104 : vector<8x384xf32>
    %cst_26 = arith.constant 1.000000e+00 : f32
    %106 = vector.broadcast %cst_26 : f32 to vector<8x384xf32>
    %107 = arith.addf %106, %105 : vector<8x384xf32>
    %108 = arith.divf %106, %107 : vector<8x384xf32>
    %109 = vector.extract_strided_slice %102 {offsets = [0, 384], sizes = [8, 128], strides = [1, 1]} : vector<8x512xf32> to vector<8x128xf32>
    %110 = math.tanh %109 : vector<8x128xf32>
    %111 = vector.extract_strided_slice %108 {offsets = [0, 0], sizes = [8, 128], strides = [1, 1]} : vector<8x384xf32> to vector<8x128xf32>
    %112 = vector.extract_strided_slice %108 {offsets = [0, 128], sizes = [8, 128], strides = [1, 1]} : vector<8x384xf32> to vector<8x128xf32>
    %113 = vector.extract_strided_slice %108 {offsets = [0, 256], sizes = [8, 128], strides = [1, 1]} : vector<8x384xf32> to vector<8x128xf32>
    %114 = arith.mulf %112, %74 : vector<8x128xf32>
    %115 = arith.mulf %111, %110 : vector<8x128xf32>
    %116 = arith.addf %114, %115 : vector<8x128xf32>
    %117 = math.tanh %116 : vector<8x128xf32>
    %118 = arith.mulf %113, %117 : vector<8x128xf32>
    %119 = arith.truncf %118 : vector<8x128xf32> to vector<8x128xbf16>
    %cst_27 = arith.constant dense<0.000000e+00> : vector<8x512xf32>
    %120 = tpu.matmul %119, %14, %cst_27 {dimension_numbers = #tpu.dot_dimension_numbers<[1], [0], [0], [1], [0, 0, 1, 1], [], []>} : vector<8x128xbf16>, vector<128x512xbf16>, vector<8x512xf32> -> vector<8x512xf32>
    %121 = arith.addf %120, %98 : vector<8x512xf32>
    %122 = vector.extract_strided_slice %121 {offsets = [0, 0], sizes = [8, 384], strides = [1, 1]} : vector<8x512xf32> to vector<8x384xf32>
    %123 = arith.negf %122 : vector<8x384xf32>
    %124 = math.exp %123 : vector<8x384xf32>
    %cst_28 = arith.constant 1.000000e+00 : f32
    %125 = vector.broadcast %cst_28 : f32 to vector<8x384xf32>
    %126 = arith.addf %125, %124 : vector<8x384xf32>
    %127 = arith.divf %125, %126 : vector<8x384xf32>
    %128 = vector.extract_strided_slice %121 {offsets = [0, 384], sizes = [8, 128], strides = [1, 1]} : vector<8x512xf32> to vector<8x128xf32>
    %129 = math.tanh %128 : vector<8x128xf32>
    %130 = vector.extract_strided_slice %127 {offsets = [0, 0], sizes = [8, 128], strides = [1, 1]} : vector<8x384xf32> to vector<8x128xf32>
    %131 = vector.extract_strided_slice %127 {offsets = [0, 128], sizes = [8, 128], strides = [1, 1]} : vector<8x384xf32> to vector<8x128xf32>
    %132 = vector.extract_strided_slice %127 {offsets = [0, 256], sizes = [8, 128], strides = [1, 1]} : vector<8x384xf32> to vector<8x128xf32>
    %133 = arith.mulf %131, %93 : vector<8x128xf32>
    %134 = arith.mulf %130, %129 : vector<8x128xf32>
    %135 = arith.addf %133, %134 : vector<8x128xf32>
    %136 = math.tanh %135 : vector<8x128xf32>
    %137 = arith.mulf %132, %136 : vector<8x128xf32>
    %138 = arith.truncf %137 : vector<8x128xf32> to vector<8x128xbf16>
    %cst_29 = arith.constant dense<0.000000e+00> : vector<8x512xf32>
    %139 = tpu.matmul %138, %15, %cst_29 {dimension_numbers = #tpu.dot_dimension_numbers<[1], [0], [0], [1], [0, 0, 1, 1], [], []>} : vector<8x128xbf16>, vector<128x512xbf16>, vector<8x512xf32> -> vector<8x512xf32>
    %140 = arith.addf %139, %3 : vector<8x512xf32>
    %141 = vector.extract_strided_slice %12 {offsets = [24, 0], sizes = [8, 512], strides = [1, 1]} : vector<64x512xf32> to vector<8x512xf32>
    %142 = arith.truncf %118 : vector<8x128xf32> to vector<8x128xbf16>
    %cst_30 = arith.constant dense<0.000000e+00> : vector<8x512xf32>
    %143 = tpu.matmul %142, %13, %cst_30 {dimension_numbers = #tpu.dot_dimension_numbers<[1], [0], [0], [1], [0, 0, 1, 1], [], []>} : vector<8x128xbf16>, vector<128x512xbf16>, vector<8x512xf32> -> vector<8x512xf32>
    %144 = arith.addf %141, %143 : vector<8x512xf32>
    %145 = vector.extract_strided_slice %144 {offsets = [0, 0], sizes = [8, 384], strides = [1, 1]} : vector<8x512xf32> to vector<8x384xf32>
    %146 = arith.negf %145 : vector<8x384xf32>
    %147 = math.exp %146 : vector<8x384xf32>
    %cst_31 = arith.constant 1.000000e+00 : f32
    %148 = vector.broadcast %cst_31 : f32 to vector<8x384xf32>
    %149 = arith.addf %148, %147 : vector<8x384xf32>
    %150 = arith.divf %148, %149 : vector<8x384xf32>
    %151 = vector.extract_strided_slice %144 {offsets = [0, 384], sizes = [8, 128], strides = [1, 1]} : vector<8x512xf32> to vector<8x128xf32>
    %152 = math.tanh %151 : vector<8x128xf32>
    %153 = vector.extract_strided_slice %150 {offsets = [0, 0], sizes = [8, 128], strides = [1, 1]} : vector<8x384xf32> to vector<8x128xf32>
    %154 = vector.extract_strided_slice %150 {offsets = [0, 128], sizes = [8, 128], strides = [1, 1]} : vector<8x384xf32> to vector<8x128xf32>
    %155 = vector.extract_strided_slice %150 {offsets = [0, 256], sizes = [8, 128], strides = [1, 1]} : vector<8x384xf32> to vector<8x128xf32>
    %156 = arith.mulf %154, %116 : vector<8x128xf32>
    %157 = arith.mulf %153, %152 : vector<8x128xf32>
    %158 = arith.addf %156, %157 : vector<8x128xf32>
    %159 = math.tanh %158 : vector<8x128xf32>
    %160 = arith.mulf %155, %159 : vector<8x128xf32>
    %161 = arith.truncf %160 : vector<8x128xf32> to vector<8x128xbf16>
    %cst_32 = arith.constant dense<0.000000e+00> : vector<8x512xf32>
    %162 = tpu.matmul %161, %14, %cst_32 {dimension_numbers = #tpu.dot_dimension_numbers<[1], [0], [0], [1], [0, 0, 1, 1], [], []>} : vector<8x128xbf16>, vector<128x512xbf16>, vector<8x512xf32> -> vector<8x512xf32>
    %163 = arith.addf %162, %140 : vector<8x512xf32>
    %164 = vector.extract_strided_slice %163 {offsets = [0, 0], sizes = [8, 384], strides = [1, 1]} : vector<8x512xf32> to vector<8x384xf32>
    %165 = arith.negf %164 : vector<8x384xf32>
    %166 = math.exp %165 : vector<8x384xf32>
    %cst_33 = arith.constant 1.000000e+00 : f32
    %167 = vector.broadcast %cst_33 : f32 to vector<8x384xf32>
    %168 = arith.addf %167, %166 : vector<8x384xf32>
    %169 = arith.divf %167, %168 : vector<8x384xf32>
    %170 = vector.extract_strided_slice %163 {offsets = [0, 384], sizes = [8, 128], strides = [1, 1]} : vector<8x512xf32> to vector<8x128xf32>
    %171 = math.tanh %170 : vector<8x128xf32>
    %172 = vector.extract_strided_slice %169 {offsets = [0, 0], sizes = [8, 128], strides = [1, 1]} : vector<8x384xf32> to vector<8x128xf32>
    %173 = vector.extract_strided_slice %169 {offsets = [0, 128], sizes = [8, 128], strides = [1, 1]} : vector<8x384xf32> to vector<8x128xf32>
    %174 = vector.extract_strided_slice %169 {offsets = [0, 256], sizes = [8, 128], strides = [1, 1]} : vector<8x384xf32> to vector<8x128xf32>
    %175 = arith.mulf %173, %135 : vector<8x128xf32>
    %176 = arith.mulf %172, %171 : vector<8x128xf32>
    %177 = arith.addf %175, %176 : vector<8x128xf32>
    %178 = math.tanh %177 : vector<8x128xf32>
    %179 = arith.mulf %174, %178 : vector<8x128xf32>
    %180 = arith.truncf %179 : vector<8x128xf32> to vector<8x128xbf16>
    %cst_34 = arith.constant dense<0.000000e+00> : vector<8x512xf32>
    %181 = tpu.matmul %180, %15, %cst_34 {dimension_numbers = #tpu.dot_dimension_numbers<[1], [0], [0], [1], [0, 0, 1, 1], [], []>} : vector<8x128xbf16>, vector<128x512xbf16>, vector<8x512xf32> -> vector<8x512xf32>
    %182 = arith.addf %181, %3 : vector<8x512xf32>
    %183 = vector.extract_strided_slice %12 {offsets = [32, 0], sizes = [8, 512], strides = [1, 1]} : vector<64x512xf32> to vector<8x512xf32>
    %184 = arith.truncf %160 : vector<8x128xf32> to vector<8x128xbf16>
    %cst_35 = arith.constant dense<0.000000e+00> : vector<8x512xf32>
    %185 = tpu.matmul %184, %13, %cst_35 {dimension_numbers = #tpu.dot_dimension_numbers<[1], [0], [0], [1], [0, 0, 1, 1], [], []>} : vector<8x128xbf16>, vector<128x512xbf16>, vector<8x512xf32> -> vector<8x512xf32>
    %186 = arith.addf %183, %185 : vector<8x512xf32>
    %187 = vector.extract_strided_slice %186 {offsets = [0, 0], sizes = [8, 384], strides = [1, 1]} : vector<8x512xf32> to vector<8x384xf32>
    %188 = arith.negf %187 : vector<8x384xf32>
    %189 = math.exp %188 : vector<8x384xf32>
    %cst_36 = arith.constant 1.000000e+00 : f32
    %190 = vector.broadcast %cst_36 : f32 to vector<8x384xf32>
    %191 = arith.addf %190, %189 : vector<8x384xf32>
    %192 = arith.divf %190, %191 : vector<8x384xf32>
    %193 = vector.extract_strided_slice %186 {offsets = [0, 384], sizes = [8, 128], strides = [1, 1]} : vector<8x512xf32> to vector<8x128xf32>
    %194 = math.tanh %193 : vector<8x128xf32>
    %195 = vector.extract_strided_slice %192 {offsets = [0, 0], sizes = [8, 128], strides = [1, 1]} : vector<8x384xf32> to vector<8x128xf32>
    %196 = vector.extract_strided_slice %192 {offsets = [0, 128], sizes = [8, 128], strides = [1, 1]} : vector<8x384xf32> to vector<8x128xf32>
    %197 = vector.extract_strided_slice %192 {offsets = [0, 256], sizes = [8, 128], strides = [1, 1]} : vector<8x384xf32> to vector<8x128xf32>
    %198 = arith.mulf %196, %158 : vector<8x128xf32>
    %199 = arith.mulf %195, %194 : vector<8x128xf32>
    %200 = arith.addf %198, %199 : vector<8x128xf32>
    %201 = math.tanh %200 : vector<8x128xf32>
    %202 = arith.mulf %197, %201 : vector<8x128xf32>
    %203 = arith.truncf %202 : vector<8x128xf32> to vector<8x128xbf16>
    %cst_37 = arith.constant dense<0.000000e+00> : vector<8x512xf32>
    %204 = tpu.matmul %203, %14, %cst_37 {dimension_numbers = #tpu.dot_dimension_numbers<[1], [0], [0], [1], [0, 0, 1, 1], [], []>} : vector<8x128xbf16>, vector<128x512xbf16>, vector<8x512xf32> -> vector<8x512xf32>
    %205 = arith.addf %204, %182 : vector<8x512xf32>
    %206 = vector.extract_strided_slice %205 {offsets = [0, 0], sizes = [8, 384], strides = [1, 1]} : vector<8x512xf32> to vector<8x384xf32>
    %207 = arith.negf %206 : vector<8x384xf32>
    %208 = math.exp %207 : vector<8x384xf32>
    %cst_38 = arith.constant 1.000000e+00 : f32
    %209 = vector.broadcast %cst_38 : f32 to vector<8x384xf32>
    %210 = arith.addf %209, %208 : vector<8x384xf32>
    %211 = arith.divf %209, %210 : vector<8x384xf32>
    %212 = vector.extract_strided_slice %205 {offsets = [0, 384], sizes = [8, 128], strides = [1, 1]} : vector<8x512xf32> to vector<8x128xf32>
    %213 = math.tanh %212 : vector<8x128xf32>
    %214 = vector.extract_strided_slice %211 {offsets = [0, 0], sizes = [8, 128], strides = [1, 1]} : vector<8x384xf32> to vector<8x128xf32>
    %215 = vector.extract_strided_slice %211 {offsets = [0, 128], sizes = [8, 128], strides = [1, 1]} : vector<8x384xf32> to vector<8x128xf32>
    %216 = vector.extract_strided_slice %211 {offsets = [0, 256], sizes = [8, 128], strides = [1, 1]} : vector<8x384xf32> to vector<8x128xf32>
    %217 = arith.mulf %215, %177 : vector<8x128xf32>
    %218 = arith.mulf %214, %213 : vector<8x128xf32>
    %219 = arith.addf %217, %218 : vector<8x128xf32>
    %220 = math.tanh %219 : vector<8x128xf32>
    %221 = arith.mulf %216, %220 : vector<8x128xf32>
    %222 = arith.truncf %221 : vector<8x128xf32> to vector<8x128xbf16>
    %cst_39 = arith.constant dense<0.000000e+00> : vector<8x512xf32>
    %223 = tpu.matmul %222, %15, %cst_39 {dimension_numbers = #tpu.dot_dimension_numbers<[1], [0], [0], [1], [0, 0, 1, 1], [], []>} : vector<8x128xbf16>, vector<128x512xbf16>, vector<8x512xf32> -> vector<8x512xf32>
    %224 = arith.addf %223, %3 : vector<8x512xf32>
    %225 = vector.extract_strided_slice %12 {offsets = [40, 0], sizes = [8, 512], strides = [1, 1]} : vector<64x512xf32> to vector<8x512xf32>
    %226 = arith.truncf %202 : vector<8x128xf32> to vector<8x128xbf16>
    %cst_40 = arith.constant dense<0.000000e+00> : vector<8x512xf32>
    %227 = tpu.matmul %226, %13, %cst_40 {dimension_numbers = #tpu.dot_dimension_numbers<[1], [0], [0], [1], [0, 0, 1, 1], [], []>} : vector<8x128xbf16>, vector<128x512xbf16>, vector<8x512xf32> -> vector<8x512xf32>
    %228 = arith.addf %225, %227 : vector<8x512xf32>
    %229 = vector.extract_strided_slice %228 {offsets = [0, 0], sizes = [8, 384], strides = [1, 1]} : vector<8x512xf32> to vector<8x384xf32>
    %230 = arith.negf %229 : vector<8x384xf32>
    %231 = math.exp %230 : vector<8x384xf32>
    %cst_41 = arith.constant 1.000000e+00 : f32
    %232 = vector.broadcast %cst_41 : f32 to vector<8x384xf32>
    %233 = arith.addf %232, %231 : vector<8x384xf32>
    %234 = arith.divf %232, %233 : vector<8x384xf32>
    %235 = vector.extract_strided_slice %228 {offsets = [0, 384], sizes = [8, 128], strides = [1, 1]} : vector<8x512xf32> to vector<8x128xf32>
    %236 = math.tanh %235 : vector<8x128xf32>
    %237 = vector.extract_strided_slice %234 {offsets = [0, 0], sizes = [8, 128], strides = [1, 1]} : vector<8x384xf32> to vector<8x128xf32>
    %238 = vector.extract_strided_slice %234 {offsets = [0, 128], sizes = [8, 128], strides = [1, 1]} : vector<8x384xf32> to vector<8x128xf32>
    %239 = vector.extract_strided_slice %234 {offsets = [0, 256], sizes = [8, 128], strides = [1, 1]} : vector<8x384xf32> to vector<8x128xf32>
    %240 = arith.mulf %238, %200 : vector<8x128xf32>
    %241 = arith.mulf %237, %236 : vector<8x128xf32>
    %242 = arith.addf %240, %241 : vector<8x128xf32>
    %243 = math.tanh %242 : vector<8x128xf32>
    %244 = arith.mulf %239, %243 : vector<8x128xf32>
    %245 = arith.truncf %244 : vector<8x128xf32> to vector<8x128xbf16>
    %cst_42 = arith.constant dense<0.000000e+00> : vector<8x512xf32>
    %246 = tpu.matmul %245, %14, %cst_42 {dimension_numbers = #tpu.dot_dimension_numbers<[1], [0], [0], [1], [0, 0, 1, 1], [], []>} : vector<8x128xbf16>, vector<128x512xbf16>, vector<8x512xf32> -> vector<8x512xf32>
    %247 = arith.addf %246, %224 : vector<8x512xf32>
    %248 = vector.extract_strided_slice %247 {offsets = [0, 0], sizes = [8, 384], strides = [1, 1]} : vector<8x512xf32> to vector<8x384xf32>
    %249 = arith.negf %248 : vector<8x384xf32>
    %250 = math.exp %249 : vector<8x384xf32>
    %cst_43 = arith.constant 1.000000e+00 : f32
    %251 = vector.broadcast %cst_43 : f32 to vector<8x384xf32>
    %252 = arith.addf %251, %250 : vector<8x384xf32>
    %253 = arith.divf %251, %252 : vector<8x384xf32>
    %254 = vector.extract_strided_slice %247 {offsets = [0, 384], sizes = [8, 128], strides = [1, 1]} : vector<8x512xf32> to vector<8x128xf32>
    %255 = math.tanh %254 : vector<8x128xf32>
    %256 = vector.extract_strided_slice %253 {offsets = [0, 0], sizes = [8, 128], strides = [1, 1]} : vector<8x384xf32> to vector<8x128xf32>
    %257 = vector.extract_strided_slice %253 {offsets = [0, 128], sizes = [8, 128], strides = [1, 1]} : vector<8x384xf32> to vector<8x128xf32>
    %258 = vector.extract_strided_slice %253 {offsets = [0, 256], sizes = [8, 128], strides = [1, 1]} : vector<8x384xf32> to vector<8x128xf32>
    %259 = arith.mulf %257, %219 : vector<8x128xf32>
    %260 = arith.mulf %256, %255 : vector<8x128xf32>
    %261 = arith.addf %259, %260 : vector<8x128xf32>
    %262 = math.tanh %261 : vector<8x128xf32>
    %263 = arith.mulf %258, %262 : vector<8x128xf32>
    %264 = arith.truncf %263 : vector<8x128xf32> to vector<8x128xbf16>
    %cst_44 = arith.constant dense<0.000000e+00> : vector<8x512xf32>
    %265 = tpu.matmul %264, %15, %cst_44 {dimension_numbers = #tpu.dot_dimension_numbers<[1], [0], [0], [1], [0, 0, 1, 1], [], []>} : vector<8x128xbf16>, vector<128x512xbf16>, vector<8x512xf32> -> vector<8x512xf32>
    %266 = arith.addf %265, %3 : vector<8x512xf32>
    %267 = vector.extract_strided_slice %12 {offsets = [48, 0], sizes = [8, 512], strides = [1, 1]} : vector<64x512xf32> to vector<8x512xf32>
    %268 = arith.truncf %244 : vector<8x128xf32> to vector<8x128xbf16>
    %cst_45 = arith.constant dense<0.000000e+00> : vector<8x512xf32>
    %269 = tpu.matmul %268, %13, %cst_45 {dimension_numbers = #tpu.dot_dimension_numbers<[1], [0], [0], [1], [0, 0, 1, 1], [], []>} : vector<8x128xbf16>, vector<128x512xbf16>, vector<8x512xf32> -> vector<8x512xf32>
    %270 = arith.addf %267, %269 : vector<8x512xf32>
    %271 = vector.extract_strided_slice %270 {offsets = [0, 0], sizes = [8, 384], strides = [1, 1]} : vector<8x512xf32> to vector<8x384xf32>
    %272 = arith.negf %271 : vector<8x384xf32>
    %273 = math.exp %272 : vector<8x384xf32>
    %cst_46 = arith.constant 1.000000e+00 : f32
    %274 = vector.broadcast %cst_46 : f32 to vector<8x384xf32>
    %275 = arith.addf %274, %273 : vector<8x384xf32>
    %276 = arith.divf %274, %275 : vector<8x384xf32>
    %277 = vector.extract_strided_slice %270 {offsets = [0, 384], sizes = [8, 128], strides = [1, 1]} : vector<8x512xf32> to vector<8x128xf32>
    %278 = math.tanh %277 : vector<8x128xf32>
    %279 = vector.extract_strided_slice %276 {offsets = [0, 0], sizes = [8, 128], strides = [1, 1]} : vector<8x384xf32> to vector<8x128xf32>
    %280 = vector.extract_strided_slice %276 {offsets = [0, 128], sizes = [8, 128], strides = [1, 1]} : vector<8x384xf32> to vector<8x128xf32>
    %281 = vector.extract_strided_slice %276 {offsets = [0, 256], sizes = [8, 128], strides = [1, 1]} : vector<8x384xf32> to vector<8x128xf32>
    %282 = arith.mulf %280, %242 : vector<8x128xf32>
    %283 = arith.mulf %279, %278 : vector<8x128xf32>
    %284 = arith.addf %282, %283 : vector<8x128xf32>
    %285 = math.tanh %284 : vector<8x128xf32>
    %286 = arith.mulf %281, %285 : vector<8x128xf32>
    %287 = arith.truncf %286 : vector<8x128xf32> to vector<8x128xbf16>
    %cst_47 = arith.constant dense<0.000000e+00> : vector<8x512xf32>
    %288 = tpu.matmul %287, %14, %cst_47 {dimension_numbers = #tpu.dot_dimension_numbers<[1], [0], [0], [1], [0, 0, 1, 1], [], []>} : vector<8x128xbf16>, vector<128x512xbf16>, vector<8x512xf32> -> vector<8x512xf32>
    %289 = arith.addf %288, %266 : vector<8x512xf32>
    %290 = vector.extract_strided_slice %289 {offsets = [0, 0], sizes = [8, 384], strides = [1, 1]} : vector<8x512xf32> to vector<8x384xf32>
    %291 = arith.negf %290 : vector<8x384xf32>
    %292 = math.exp %291 : vector<8x384xf32>
    %cst_48 = arith.constant 1.000000e+00 : f32
    %293 = vector.broadcast %cst_48 : f32 to vector<8x384xf32>
    %294 = arith.addf %293, %292 : vector<8x384xf32>
    %295 = arith.divf %293, %294 : vector<8x384xf32>
    %296 = vector.extract_strided_slice %289 {offsets = [0, 384], sizes = [8, 128], strides = [1, 1]} : vector<8x512xf32> to vector<8x128xf32>
    %297 = math.tanh %296 : vector<8x128xf32>
    %298 = vector.extract_strided_slice %295 {offsets = [0, 0], sizes = [8, 128], strides = [1, 1]} : vector<8x384xf32> to vector<8x128xf32>
    %299 = vector.extract_strided_slice %295 {offsets = [0, 128], sizes = [8, 128], strides = [1, 1]} : vector<8x384xf32> to vector<8x128xf32>
    %300 = vector.extract_strided_slice %295 {offsets = [0, 256], sizes = [8, 128], strides = [1, 1]} : vector<8x384xf32> to vector<8x128xf32>
    %301 = arith.mulf %299, %261 : vector<8x128xf32>
    %302 = arith.mulf %298, %297 : vector<8x128xf32>
    %303 = arith.addf %301, %302 : vector<8x128xf32>
    %304 = math.tanh %303 : vector<8x128xf32>
    %305 = arith.mulf %300, %304 : vector<8x128xf32>
    %306 = arith.truncf %305 : vector<8x128xf32> to vector<8x128xbf16>
    %cst_49 = arith.constant dense<0.000000e+00> : vector<8x512xf32>
    %307 = tpu.matmul %306, %15, %cst_49 {dimension_numbers = #tpu.dot_dimension_numbers<[1], [0], [0], [1], [0, 0, 1, 1], [], []>} : vector<8x128xbf16>, vector<128x512xbf16>, vector<8x512xf32> -> vector<8x512xf32>
    %308 = arith.addf %307, %3 : vector<8x512xf32>
    %309 = vector.extract_strided_slice %12 {offsets = [56, 0], sizes = [8, 512], strides = [1, 1]} : vector<64x512xf32> to vector<8x512xf32>
    %310 = arith.truncf %286 : vector<8x128xf32> to vector<8x128xbf16>
    %cst_50 = arith.constant dense<0.000000e+00> : vector<8x512xf32>
    %311 = tpu.matmul %310, %13, %cst_50 {dimension_numbers = #tpu.dot_dimension_numbers<[1], [0], [0], [1], [0, 0, 1, 1], [], []>} : vector<8x128xbf16>, vector<128x512xbf16>, vector<8x512xf32> -> vector<8x512xf32>
    %312 = arith.addf %309, %311 : vector<8x512xf32>
    %313 = vector.extract_strided_slice %312 {offsets = [0, 0], sizes = [8, 384], strides = [1, 1]} : vector<8x512xf32> to vector<8x384xf32>
    %314 = arith.negf %313 : vector<8x384xf32>
    %315 = math.exp %314 : vector<8x384xf32>
    %cst_51 = arith.constant 1.000000e+00 : f32
    %316 = vector.broadcast %cst_51 : f32 to vector<8x384xf32>
    %317 = arith.addf %316, %315 : vector<8x384xf32>
    %318 = arith.divf %316, %317 : vector<8x384xf32>
    %319 = vector.extract_strided_slice %312 {offsets = [0, 384], sizes = [8, 128], strides = [1, 1]} : vector<8x512xf32> to vector<8x128xf32>
    %320 = math.tanh %319 : vector<8x128xf32>
    %321 = vector.extract_strided_slice %318 {offsets = [0, 0], sizes = [8, 128], strides = [1, 1]} : vector<8x384xf32> to vector<8x128xf32>
    %322 = vector.extract_strided_slice %318 {offsets = [0, 128], sizes = [8, 128], strides = [1, 1]} : vector<8x384xf32> to vector<8x128xf32>
    %323 = vector.extract_strided_slice %318 {offsets = [0, 256], sizes = [8, 128], strides = [1, 1]} : vector<8x384xf32> to vector<8x128xf32>
    %324 = arith.mulf %322, %284 : vector<8x128xf32>
    %325 = arith.mulf %321, %320 : vector<8x128xf32>
    %326 = arith.addf %324, %325 : vector<8x128xf32>
    %327 = math.tanh %326 : vector<8x128xf32>
    %328 = arith.mulf %323, %327 : vector<8x128xf32>
    %329 = arith.truncf %328 : vector<8x128xf32> to vector<8x128xbf16>
    %cst_52 = arith.constant dense<0.000000e+00> : vector<8x512xf32>
    %330 = tpu.matmul %329, %14, %cst_52 {dimension_numbers = #tpu.dot_dimension_numbers<[1], [0], [0], [1], [0, 0, 1, 1], [], []>} : vector<8x128xbf16>, vector<128x512xbf16>, vector<8x512xf32> -> vector<8x512xf32>
    %331 = arith.addf %330, %308 : vector<8x512xf32>
    %332 = vector.extract_strided_slice %331 {offsets = [0, 0], sizes = [8, 384], strides = [1, 1]} : vector<8x512xf32> to vector<8x384xf32>
    %333 = arith.negf %332 : vector<8x384xf32>
    %334 = math.exp %333 : vector<8x384xf32>
    %cst_53 = arith.constant 1.000000e+00 : f32
    %335 = vector.broadcast %cst_53 : f32 to vector<8x384xf32>
    %336 = arith.addf %335, %334 : vector<8x384xf32>
    %337 = arith.divf %335, %336 : vector<8x384xf32>
    %338 = vector.extract_strided_slice %331 {offsets = [0, 384], sizes = [8, 128], strides = [1, 1]} : vector<8x512xf32> to vector<8x128xf32>
    %339 = math.tanh %338 : vector<8x128xf32>
    %340 = vector.extract_strided_slice %337 {offsets = [0, 0], sizes = [8, 128], strides = [1, 1]} : vector<8x384xf32> to vector<8x128xf32>
    %341 = vector.extract_strided_slice %337 {offsets = [0, 128], sizes = [8, 128], strides = [1, 1]} : vector<8x384xf32> to vector<8x128xf32>
    %342 = vector.extract_strided_slice %337 {offsets = [0, 256], sizes = [8, 128], strides = [1, 1]} : vector<8x384xf32> to vector<8x128xf32>
    %343 = arith.mulf %341, %303 : vector<8x128xf32>
    %344 = arith.mulf %340, %339 : vector<8x128xf32>
    %345 = arith.addf %343, %344 : vector<8x128xf32>
    %346 = math.tanh %345 : vector<8x128xf32>
    %347 = arith.mulf %342, %346 : vector<8x128xf32>
    %348 = arith.truncf %347 : vector<8x128xf32> to vector<8x128xbf16>
    %c0_54 = arith.constant 0 : index
    %c0_55 = arith.constant 0 : index
    %349 = vector.load %arg3[%c0_54, %c0_55] : memref<128x512xbf16, #tpu.memory_space<vmem>>, vector<128x512xbf16>
    %cst_56 = arith.constant dense<0.000000e+00> : vector<8x512xf32>
    %350 = tpu.matmul %348, %349, %cst_56 {dimension_numbers = #tpu.dot_dimension_numbers<[1], [0], [0], [1], [0, 0, 1, 1], [], []>} : vector<8x128xbf16>, vector<128x512xbf16>, vector<8x512xf32> -> vector<8x512xf32>
    %351 = vector.broadcast %4 : vector<1x512xf32> to vector<8x512xf32>
    %352 = arith.addf %350, %351 : vector<8x512xf32>
    %cst_57 = arith.constant 0.000000e+00 : f32
    %353 = vector.broadcast %cst_57 : f32 to vector<8x512xf32>
    %354 = arith.maximumf %352, %353 : vector<8x512xf32>
    %355 = arith.truncf %354 : vector<8x512xf32> to vector<8x512xbf16>
    %c0_58 = arith.constant 0 : index
    %c0_59 = arith.constant 0 : index
    %356 = vector.load %arg4[%c0_58, %c0_59] : memref<512x384xbf16, #tpu.memory_space<vmem>>, vector<512x384xbf16>
    %cst_60 = arith.constant dense<0.000000e+00> : vector<8x384xf32>
    %357 = tpu.matmul %355, %356, %cst_60 {dimension_numbers = #tpu.dot_dimension_numbers<[1], [0], [0], [1], [0, 0, 1, 1], [], []>} : vector<8x512xbf16>, vector<512x384xbf16>, vector<8x384xf32> -> vector<8x384xf32>
    %358 = vector.broadcast %5 : vector<1x384xf32> to vector<8x384xf32>
    %359 = arith.addf %357, %358 : vector<8x384xf32>
    %cst_61 = arith.constant 0.000000e+00 : f32
    %360 = vector.broadcast %cst_61 : f32 to vector<8x384xf32>
    %361 = arith.maximumf %359, %360 : vector<8x384xf32>
    %362 = vector.broadcast %6 : vector<1x384xf32> to vector<8x384xf32>
    %363 = arith.mulf %361, %362 : vector<8x384xf32>
    %cst_62 = arith.constant dense<0.000000e+00> : vector<8xf32>
    %364 = vector.multi_reduction <add>, %363, %cst_62 [1] : vector<8x384xf32> to vector<8xf32>
    %365 = vector.shape_cast %364 : vector<8xf32> to vector<8x1xf32>
    %366 = vector.broadcast %7 : vector<1x1xf32> to vector<8x1xf32>
    %367 = arith.addf %365, %366 : vector<8x1xf32>
    %c0_63 = arith.constant 0 : index
    %c0_64 = arith.constant 0 : index
    %368 = vector.load %arg6[%c0_63, %c0_64] : memref<8x1xf32, #tpu.memory_space<vmem>>, vector<8x1xf32>
    tpu.vector_store %arg6[%c0_63, %c0_64], %367 {strides = array<i32>} : memref<8x1xf32, #tpu.memory_space<vmem>>, vector<8x1xf32>,
    return
  }
}

</mosaic_0001>

<bundles_post_ra>
// kernel: tpu_custom_call.1
= control target key start
LH: loop header
LB: loop body
LE: loop exit
PB: predicated region body
PF: predicated region fallthrough
CT: control target
= control target key end

     0   :  { %11 = vsyncpa [#allocation3], 0  ;;  %s7263_s0 = inlined_call_operand.vmem [shape: f32[64,8], index: 0, kind: input, shape index: {}]   ;;  %s7264_s1 = inlined_call_operand.vmem [shape: f32[8,512], index: 1, kind: input, shape index: {}]   ;;  %s7265_s2 = inlined_call_operand.hbm [shape: bf16[384,512], index: 2, kind: input, shape index: {}]   ;;  %s7266_s3 = inlined_call_operand.hbm [shape: bf16[128,512], index: 3, kind: input, shape index: {}]   ;;  %s7267_s4 = inlined_call_operand.hbm [shape: bf16[512,384], index: 4, kind: input, shape index: {}]   ;;  %s7268_s5 = inlined_call_operand.vmem [shape: f32[8,512], index: 5, kind: input, shape index: {}]   ;;  %s7269_s6 = inlined_call_operand.vmem [shape: f32[8,1], index: 6, kind: output, shape index: {}]  }
   0x1   :  { %12 = vsyncpa [#allocation5], 0  ;;  %s34_s23 = sshll.u32 %s7266_s3, 4  ;;  %s5704_s24 = smov [#allocation4]   ;;  %s35_s23 = int_to_ptr.hbm [resolvable:$true] %s34_s23 }
   0x2   :  { %s36_s25 = sshll.u32 %s5704_s24, 4  ;;  %s21_s28 = sshll.u32 %s7265_s2, 4  ;;  %s37_s25 = int_to_ptr.vmem [resolvable:$true] %s36_s25  ;;  %s22_s28 = int_to_ptr.hbm [resolvable:$true] %s21_s28 }
   0x3   :  { %s5705_s29 = smov 256   ;;  %s5706_s30 = smov 16  }
   0x4   :  { %42 = dma.hbm_to_vmem [thread:$0]  %s35_s23, 4096, %s37_s25, [#allocation5], %s5705_s29, %s5705_s29, %s5706_s30  }
   0x5   :  { %s5707_s7 = smov [#allocation2]   ;;  %s47_s11 = sshll.u32 %s7267_s4, 4  ;;  %s48_s11 = int_to_ptr.hbm [resolvable:$true] %s47_s11 }
   0x6   :  { %s23_s8 = sshll.u32 %s5707_s7, 4  ;;  %s5708_s3 = smov [#allocation6]   ;;  %s24_s8 = int_to_ptr.vmem [resolvable:$true] %s23_s8 }
   0x7   :  { %29 = dma.hbm_to_vmem [thread:$0]  %s22_s28, 12288, %s24_s8, [#allocation3], %s5705_s29, %s5705_s29, %s5706_s30  }
   0x8   :  { %s49_s12 = sshll.u32 %s5708_s3, 4  ;;  %s5709_s13 = smov 192   ;;  %s50_s12 = int_to_ptr.vmem [resolvable:$true] %s49_s12 }
   0x9   :  { %s5710_s14 = smov 12  }
   0xa   :  { %55 = dma.hbm_to_vmem [thread:$0]  %s48_s11, 12288, %s50_s12, [#allocation5], %s5709_s13, %s5709_s13, %s5710_s14  }
   0xb   :  { %5700 = dma.done.wait [#allocation3], 12288  }
   0xc   :  { %5701 = vsyncadd [#allocation3], 4294955008 }
   0xd   :  { %5702 = dma.done.wait [#allocation5], 16384  }
   0xe   :  { %5703 = vsyncadd [#allocation5], 4294950912  ;;  %vm110_vm0 = vcmask 64512   ;;  %v97_v0 = vld [vmem:[%s7264_s1] sm:$0xff]  ;;  %v98_v1 = vld [vmem:[%s7264_s1 + $0x8] sm:$0xff] }
   0xf   :  { %v99_v2 = vld [vmem:[%s7264_s1 + $0x10] sm:$0xff]  ;;  %150 = vmatpush.msra.mxu0 %v97_v0  ;;  %191 = vmatpush.msra.mxu1 %v98_v1  ;;  %v89_v3 = vld [vmem:[%s7263_s0] sm:$0xff]  ;;  %v100_v4 = vld [vmem:[%s7264_s1 + $0x18] sm:$0xff] }
  0x10   :  { %v4314_v5 = vld [vmem:[#allocation2 + $0x1e0] sm:$0xf]  ;;  %232 = vmatpush.msra.mxu2 %v99_v2  ;;  %4165 = vmatmul.msk.f32.vlgmr.msra.gmra.mxu0 %vm110_vm0, %v89_v3  ;;  %v5203_v6 = vld [vmem:[#allocation2 + $0x1ec] sm:$0xf0]  ;;  %v5201_v7 = vld [vmem:[#allocation2 + $0x1e4] sm:$0xf] }
  0x11   :  { %v4316_v8 = vld [vmem:[#allocation2 + $0x1f0] sm:$0xf0]  ;;  %4173 = vmatmul.msk.f32.vlgmr.msra.gmra.mxu1 %vm110_vm0, %v89_v3  ;;  %4181 = vmatmul.msk.f32.vlgmr.msra.gmra.mxu2 %vm110_vm0, %v89_v3  ;;  %v5773_v9 = vor.u32 %v5203_v6, %v4314_v5  ;;  %v4322_v11 = vld [vmem:[#allocation2 + $0x1e8] sm:$0xf]  ;;  %v5204_v12 = vld [vmem:[#allocation2 + $0x1f4] sm:$0xf0] }
  0x12   :  { %v5775_v10 = vor.u32 %v5201_v7, %v4316_v8  ;;  %273 = vmatpush.msra.mxu3 %v100_v4  ;;  %v5777_v13 = vor.u32 %v5204_v12, %v4322_v11  ;;  %v4298_v14 = vld [vmem:[#allocation2 + $0x1c0] sm:$0xf]  ;;  %v5199_v15 = vld [vmem:[#allocation2 + $0x1cc] sm:$0xf0]  ;;  %v5197_v16 = vld [vmem:[#allocation2 + $0x1c4] sm:$0xf] }
  0x13   :  { %4189 = vmatmul.msk.f32.vlgmr.msra.gmra.mxu3 %vm110_vm0, %v89_v3  ;;  %619 = vmatpush.bf16.msrb.mxu0 %v5773_v9  ;;  %v5781_v17 = vor.u32 %v5199_v15, %v4298_v14  ;;  %v4300_v18 = vld [vmem:[#allocation2 + $0x1d0] sm:$0xf0]  ;;  %v4306_v19 = vld [vmem:[#allocation2 + $0x1c8] sm:$0xf]  ;;  %v5200_v20 = vld [vmem:[#allocation2 + $0x1d4] sm:$0xf0] }
  0x14   :  { %632 = vmatpush.bf16.msrb.mxu1 %v5775_v10  ;;  %645 = vmatpush.bf16.msrb.mxu2 %v5777_v13  ;;  %v90_v21 = vld [vmem:[%s7263_s0 + $0x8] sm:$0xff]  ;;  %v5788_v22 = vor.u32 %v5197_v16, %v4300_v18  ;;  %v4324_v24 = vld [vmem:[#allocation2 + $0x1f8] sm:$0xf0]  ;;  %v4282_v26 = vld [vmem:[#allocation2 + $0x1a0] sm:$0xf]  ;;  %v5792_v29 = vor.u32 %v5200_v20, %v4306_v19 }
  0x15   :  { %v5202_v23 = vld [vmem:[#allocation2 + $0x1ec] sm:$0xf]  ;;  %v5195_v27 = vld [vmem:[#allocation2 + $0x1ac] sm:$0xf0]  ;;  %v5193_v28 = vld [vmem:[#allocation2 + $0x1a4] sm:$0xf] }
  0x16   :  { %v5790_v25 = vor.u32 %v5202_v23, %v4324_v24  ;;  %v4284_v30 = vld [vmem:[#allocation2 + $0x1b0] sm:$0xf0]  ;;  %v5796_v31 = vor.u32 %v5195_v27, %v4282_v26  ;;  %v92_v34 = vld [vmem:[%s7263_s0 + $0x18] sm:$0xff]  ;;  %v93_v35 = vld [vmem:[%s7263_s0 + $0x20] sm:$0xff] }
  0x17   :  { %620 = vmatpush.bf16.msrb.mxu0 %v5781_v17  ;;  %v5800_v32 = vor.u32 %v5193_v28, %v4284_v30  ;;  %v91_v33 = vld [vmem:[%s7263_s0 + $0x10] sm:$0xff]  ;;  %v5198_v36 = vld [vmem:[#allocation2 + $0x1cc] sm:$0xf]  ;;  %v4308_v37 = vld [vmem:[#allocation2 + $0x1d8] sm:$0xf0] }
  0x18   :  { %658 = vmatpush.bf16.msrb.mxu3 %v5790_v25  ;;  %4166 = vmatmul.msk.f32.gmra.mxu0 %vm110_vm0, %v90_v21  ;;  %v5829_v38 = vor.u32 %v5198_v36, %v4308_v37  ;;  %v4290_v39 = vld [vmem:[#allocation2 + $0x1a8] sm:$0xf]  ;;  %v5196_v40 = vld [vmem:[#allocation2 + $0x1b4] sm:$0xf0]  ;;  %v5194_v41 = vld [vmem:[#allocation2 + $0x1ac] sm:$0xf] }
  0x19   :  { %633 = vmatpush.bf16.msrb.mxu1 %v5788_v22  ;;  %4182 = vmatmul.msk.f32.gmra.mxu2 %vm110_vm0, %v90_v21  ;;  %v5832_v42 = vor.u32 %v5196_v40, %v4290_v39  ;;  %v4292_v43 = vld [vmem:[#allocation2 + $0x1b8] sm:$0xf0]  ;;  %v94_v45 = vld [vmem:[%s7263_s0 + $0x28] sm:$0xff]  ;;  %v4266_v47 = vld [vmem:[#allocation2 + $0x180] sm:$0xf] }
  0x1a   :  { %4174 = vmatmul.msk.f32.gmra.mxu1 %vm110_vm0, %v90_v21  ;;  %646 = vmatpush.bf16.msrb.mxu2 %v5792_v29  ;;  %v5834_v44 = vor.u32 %v5194_v41, %v4292_v43  ;;  %v5842_v46 = vld [vmem:[%s7268_s5] ss:$8 sm:$0xf]  ;;  %v5189_v49 = vld [vmem:[#allocation2 + $0x184] sm:$0xf] }
  0x1b   :  { %4190 = vmatmul.msk.f32.gmra.mxu3 %vm110_vm0, %v90_v21  ;;  %621 = vmatpush.bf16.msrb.mxu0 %v5796_v31  ;;  %v5191_v48 = vld [vmem:[#allocation2 + $0x18c] sm:$0xf0]  ;;  %v4268_v51 = vld [vmem:[#allocation2 + $0x190] sm:$0xf0]  ;;  %v4274_v52 = vld [vmem:[#allocation2 + $0x188] sm:$0xf] }
  0x1c   :  { %659 = vmatpush.bf16.msrb.mxu3 %v5829_v38  ;;  %7454 = vst [vmem:[#allocation9_spill] sm:$0xff] %v5834_v44  ;;  %v5848_v50 = vor.u32 %v5191_v48, %v4266_v47  ;;  %v5192_v53 = vld [vmem:[#allocation2 + $0x194] sm:$0xf0]  ;;  %v5852_v54 = vor.u32 %v5189_v49, %v4268_v51  ;;  %v5190_v56 = vld [vmem:[#allocation2 + $0x18c] sm:$0xf]  ;;  %v5857_v58 = vperm.slane %v5842_v46, 0 }
  0x1d   :  { %634 = vmatpush.bf16.msrb.mxu1 %v5800_v32  ;;  %v5854_v55 = vor.u32 %v5192_v53, %v4274_v52  ;;  %v4276_v57 = vld [vmem:[#allocation2 + $0x198] sm:$0xf0]  ;;  %v5860_v59 = vperm.slane %v5842_v46, 1  ;;  %v4250_v61 = vld [vmem:[#allocation2 + $0x160] sm:$0xf]  ;;  %v95_v8 = vld [vmem:[%s7263_s0 + $0x30] sm:$0xff] }
  0x1e   :  { %647 = vmatpush.bf16.msrb.mxu2 %v5832_v42  ;;  %7455 = vst [vmem:[#allocation10_spill] sm:$0xff] %v5848_v50  ;;  %v5863_v60 = vor.u32 %v5190_v56, %v4276_v57  ;;  %v5187_v62 = vld [vmem:[#allocation2 + $0x16c] sm:$0xf0]  ;;  %v5185_v63 = vld [vmem:[#allocation2 + $0x164] sm:$0xf]  ;;  %v5882_v16 = vperm.slane %v5842_v46, 2 }
  0x1f   :  { %7456 = vst [vmem:[#allocation11_spill] sm:$0xff] %v5852_v54  ;;  %622 = vmatpush.bf16.msrb.mxu0 %v5848_v50  ;;  %v5867_v0 = vor.u32 %v5187_v62, %v4250_v61  ;;  %v4252_v1 = vld [vmem:[#allocation2 + $0x170] sm:$0xf0]  ;;  %v4258_v2 = vld [vmem:[#allocation2 + $0x168] sm:$0xf]  ;;  %v96_v56 = vld [vmem:[%s7263_s0 + $0x38] sm:$0xff] }
  0x20   :  { %4167 = vmatmul.msk.f32.gmra.mxu0 %vm110_vm0, %v91_v33  ;;  %660 = vmatpush.bf16.msrb.mxu3 %v5834_v44  ;;  %7457 = vst [vmem:[#allocation12_spill] sm:$0xff] %v5854_v55  ;;  %v5188_v3 = vld [vmem:[#allocation2 + $0x174] sm:$0xf0]  ;;  %v5870_v4 = vor.u32 %v5185_v63, %v4252_v1  ;;  %v5186_v6 = vld [vmem:[#allocation2 + $0x16c] sm:$0xf] }
  0x21   :  { %4183 = vmatmul.msk.f32.gmra.mxu2 %vm110_vm0, %v91_v33  ;;  %7458 = vst [vmem:[#allocation13_spill] sm:$0xff] %v5857_v58  ;;  %635 = vmatpush.bf16.msrb.mxu1 %v5852_v54  ;;  %v5872_v5 = vor.u32 %v5188_v3, %v4258_v2  ;;  %v4260_v7 = vld [vmem:[#allocation2 + $0x178] sm:$0xf0]  ;;  %v4234_v19 = vld [vmem:[#allocation2 + $0x140] sm:$0xf] }
  0x22   :  { %4175 = vmatmul.msk.f32.gmra.mxu1 %vm110_vm0, %v91_v33  ;;  %7459 = vst [vmem:[#allocation14_spill] sm:$0xff] %v5860_v59  ;;  %648 = vmatpush.bf16.msrb.mxu2 %v5854_v55  ;;  %v5878_v12 = vor.u32 %v5186_v6, %v4260_v7  ;;  %v5183_v20 = vld [vmem:[#allocation2 + $0x14c] sm:$0xf0]  ;;  %v5181_v21 = vld [vmem:[#allocation2 + $0x144] sm:$0xf] }
  0x23   :  { %4191 = vmatmul.msk.f32.gmra.mxu3 %vm110_vm0, %v91_v33  ;;  %7460 = vst [vmem:[#allocation15_spill] sm:$0xff] %v5863_v60  ;;  %623 = vmatpush.bf16.msrb.mxu0 %v5867_v0  ;;  %v5889_v24 = vor.u32 %v5183_v20, %v4234_v19  ;;  %v4236_v26 = vld [vmem:[#allocation2 + $0x150] sm:$0xf0]  ;;  %v4242_v27 = vld [vmem:[#allocation2 + $0x148] sm:$0xf] }
  0x24   :  { %7461 = vst [vmem:[#allocation16_spill] sm:$0xff] %v5867_v0  ;;  %661 = vmatpush.bf16.msrb.mxu3 %v5863_v60  ;;  %v5893_v30 = vor.u32 %v5181_v21, %v4236_v26  ;;  %v5184_v33 = vld [vmem:[#allocation2 + $0x154] sm:$0xf0]  ;;  %v4244_v36 = vld [vmem:[#allocation2 + $0x158] sm:$0xf0] }
  0x25   :  { %7462 = vst [vmem:[#allocation17_spill] sm:$0xff] %v5870_v4  ;;  %636 = vmatpush.bf16.msrb.mxu1 %v5870_v4  ;;  %v4218_v37 = vld [vmem:[#allocation2 + $0x120] sm:$0xf]  ;;  %v5179_v39 = vld [vmem:[#allocation2 + $0x12c] sm:$0xf0] }
  0x26   :  { %7463 = vst [vmem:[#allocation18_spill] sm:$0xff] %v5872_v5  ;;  %649 = vmatpush.bf16.msrb.mxu2 %v5872_v5  ;;  %v5177_v40 = vld [vmem:[#allocation2 + $0x124] sm:$0xf]  ;;  %v4220_v47 = vld [vmem:[#allocation2 + $0x130] sm:$0xf0] }
  0x27   :  { %7464 = vst [vmem:[#allocation19_spill] sm:$0xff] %v5878_v12  ;;  %624 = vmatpush.bf16.msrb.mxu0 %v5889_v24  ;;  %v4226_v48 = vld [vmem:[#allocation2 + $0x128] sm:$0xf]  ;;  %v5180_v49 = vld [vmem:[#allocation2 + $0x134] sm:$0xf0]  ;;  %v5906_v52 = vor.u32 %v5177_v40, %v4220_v47 }
  0x28   :  { %4168 = vmatmul.msk.f32.gmra.mxu0 %vm110_vm0, %v92_v34  ;;  %7465 = vst [vmem:[#allocation20_spill] sm:$0xff] %v5882_v16  ;;  %662 = vmatpush.bf16.msrb.mxu3 %v5878_v12  ;;  %v5908_v53 = vor.u32 %v5180_v49, %v4226_v48  ;;  %v5178_v57 = vld [vmem:[#allocation2 + $0x12c] sm:$0xf]  ;;  %v4228_v61 = vld [vmem:[#allocation2 + $0x138] sm:$0xf0] }
  0x29   :  { %4184 = vmatmul.msk.f32.gmra.mxu2 %vm110_vm0, %v92_v34  ;;  %7466 = vst [vmem:[#allocation21_spill] sm:$0xff] %v5889_v24  ;;  %637 = vmatpush.bf16.msrb.mxu1 %v5893_v30  ;;  %v5915_v62 = vor.u32 %v5178_v57, %v4228_v61  ;;  %v4202_v1 = vld [vmem:[#allocation2 + $0x100] sm:$0xf]  ;;  %v5175_v2 = vld [vmem:[#allocation2 + $0x10c] sm:$0xf0] }
  0x2a   :  { %4176 = vmatmul.msk.f32.gmra.mxu1 %vm110_vm0, %v92_v34  ;;  %7467 = vst [vmem:[#allocation22_spill] sm:$0xff] %v5893_v30  ;;  %v5921_v6 = vor.u32 %v5175_v2, %v4202_v1  ;;  %v5173_v7 = vld [vmem:[#allocation2 + $0x104] sm:$0xf]  ;;  %v5176_v19 = vld [vmem:[#allocation2 + $0x114] sm:$0xf0] }
  0x2b   :  { %4192 = vmatmul.msk.f32.gmra.mxu3 %vm110_vm0, %v92_v34  ;;  %v5182_v34 = vld [vmem:[#allocation2 + $0x14c] sm:$0xf]  ;;  %7471 = vst [vmem:[#allocation26_spill] sm:$0xff] %v5906_v52  ;;  %v4212_v26 = vld [vmem:[#allocation2 + $0x118] sm:$0xf0] }
  0x2c   :  { %v5900_v41 = vor.u32 %v5182_v34, %v4244_v36  ;;  %7472 = vst [vmem:[#allocation27_spill] sm:$0xff] %v5908_v53 }
  0x2d   :  { %7473 = vst [vmem:[#allocation28_spill] sm:$0xff] %v5915_v62  ;;  %638 = vmatpush.bf16.msrb.mxu1 %v5906_v52 }
  0x2e   :  { %7469 = vst [vmem:[#allocation24_spill] sm:$0xff] %v5900_v41  ;;  %663 = vmatpush.bf16.msrb.mxu3 %v5900_v41 }
  0x2f   :  { %7474 = vst [vmem:[#allocation29_spill] sm:$0xff] %v5921_v6 }
  0x30   :  { %4169 = vmatmul.msk.f32.gmra.mxu0 %vm110_vm0, %v93_v35 }
  0x31   :  { %4185 = vmatmul.msk.f32.gmra.mxu2 %vm110_vm0, %v93_v35 }
  0x32   :  { %4177 = vmatmul.msk.f32.gmra.mxu1 %vm110_vm0, %v93_v35  ;;  %664 = vmatpush.bf16.msrb.mxu3 %v5915_v62 }
  0x33   :  { %4193 = vmatmul.msk.f32.gmra.mxu3 %vm110_vm0, %v93_v35  ;;  %v5897_v35 = vor.u32 %v5184_v33, %v4242_v27  ;;  %v5932_v27 = vperm.slane %v5842_v46, 3 }
  0x35   :  { %7468 = vst [vmem:[#allocation23_spill] sm:$0xff] %v5897_v35  ;;  %650 = vmatpush.bf16.msrb.mxu2 %v5897_v35 }
  0x36   :  { %7477 = vst [vmem:[#allocation32_spill] sm:$0xff] %v5932_v27 }
  0x38   :  { %4170 = vmatmul.msk.f32.gmra.mxu0 %vm110_vm0, %v94_v45 }
  0x39   :  { %4186 = vmatmul.msk.f32.gmra.mxu2 %vm110_vm0, %v94_v45 }
  0x3a   :  { %4178 = vmatmul.msk.f32.gmra.mxu1 %vm110_vm0, %v94_v45  ;;  %651 = vmatpush.bf16.msrb.mxu2 %v5908_v53 }
  0x3b   :  { %4194 = vmatmul.msk.f32.gmra.mxu3 %vm110_vm0, %v94_v45  ;;  %v5903_v45 = vor.u32 %v5179_v39, %v4218_v37 }
  0x3d   :  { %7470 = vst [vmem:[#allocation25_spill] sm:$0xff] %v5903_v45  ;;  %625 = vmatpush.bf16.msrb.mxu0 %v5903_v45 }
  0x40   :  { %4171 = vmatmul.msk.f32.gmra.mxu0 %vm110_vm0, %v95_v8 }
  0x41   :  { %4187 = vmatmul.msk.f32.gmra.mxu2 %vm110_vm0, %v95_v8  ;;  %626 = vmatpush.bf16.msrb.mxu0 %v5921_v6 }
  0x42   :  { %4179 = vmatmul.msk.f32.gmra.mxu1 %vm110_vm0, %v95_v8 }
  0x43   :  { %4195 = vmatmul.msk.f32.gmra.mxu3 %vm110_vm0, %v95_v8  ;;  %v4204_v8 = vld [vmem:[#allocation2 + $0x110] sm:$0xf0] }
  0x48   :  { %4172 = vmatmul.msk.f32.gmra.mxu0 %vm110_vm0, %v96_v56 }
  0x49   :  { %4188 = vmatmul.msk.f32.gmra.mxu2 %vm110_vm0, %v96_v56 }
  0x4a   :  { %4180 = vmatmul.msk.f32.gmra.mxu1 %vm110_vm0, %v96_v56 }
  0x4b   :  { %4196 = vmatmul.msk.f32.gmra.mxu3 %vm110_vm0, %v96_v56 }
  0x8d   :  { %v152_v11 = vpop.f32.mrf.mxu0 }
  0x8e   :  { %v153_v14 = vadd.f32 %v152_v11, %v5857_v58  ;;  %v193_v15 = vpop.f32.mrf.mxu1  ;;  %v4210_v11 = vld [vmem:[#allocation2 + $0x108] sm:$0xf]  ;;  %v5213_v58 = vld [vmem:[#allocation2 + $0x244] sm:$0xf] }
  0x8f   :  { %v194_v18 = vadd.f32 %v193_v15, %v5860_v59  ;;  %v5929_v21 = vor.u32 %v5176_v19, %v4210_v11 }
  0x90   :  { %v4197_v23 = vmul.f32 -1.442695, %v153_v14 }
  0x91   :  { %v4198_v28 = vmul.f32 -1.442695, %v194_v18  ;;  %v5925_v18 = vor.u32 %v5173_v7, %v4204_v8  ;;  %7476 = vst [vmem:[#allocation31_spill] sm:$0xff] %v5929_v21  ;;  %652 = vmatpush.bf16.msrb.mxu2 %v5929_v21 }
  0x92   :  { %5372 = vpow2.f32 %v4197_v23  ;;  %v5174_v23 = vld [vmem:[#allocation2 + $0x10c] sm:$0xf] }
  0x93   :  { %5374 = vpow2.f32 %v4198_v28  ;;  %7475 = vst [vmem:[#allocation30_spill] sm:$0xff] %v5925_v18  ;;  %639 = vmatpush.bf16.msrb.mxu1 %v5925_v18  ;;  %v5936_v33 = vor.u32 %v5174_v23, %v4212_v26 }
  0x94   :  { %v234_v43 = vpop.f32.mrf.mxu2 }
  0x95   :  { %v235_v51 = vadd.f32 %v234_v43, %v5882_v16  ;;  %7478 = vst [vmem:[#allocation33_spill] sm:$0xff] %v5936_v33  ;;  %665 = vmatpush.bf16.msrb.mxu3 %v5936_v33  ;;  %v5217_v16 = vld [vmem:[#allocation2 + $0x264] sm:$0xf] }
  0x96   :  { %v275_v28 = vpop.f32.mrf.mxu3 }
  0x97   :  { %v4199_v63 = vmul.f32 -1.442695, %v235_v51  ;;  %v276_v36 = vadd.f32 %v275_v28, %v5932_v27  ;;  %v4381_v27 = vld [vmem:[#allocation2 + $0x260] sm:$0xf] }
  0x98   :  { %v5373_v3 = vpop.eup %5372 }
  0x99   :  { %v5375_v14 = vpop.eup %5374  ;;  %v404_v15 = vadd.f32 1.0, %v5373_v3  ;;  %5376 = vpow2.f32 %v4199_v63 }
  0x9a   :  { %v405_v20 = vadd.f32 1.0, %v5375_v14 }
  0x9b   :  { %5378 = vrcp.f32 %v404_v15  ;;  %v418_v49 = vand.u32 2147483648, %v404_v15  ;;  %v416_v57 = vand.u32 2147483647, %v404_v15  ;;  %vm412_vm3 = vweird.f32 %v404_v15 }
  0x9c   :  { %5380 = vrcp.f32 %v405_v20  ;;  %v433_v51 = vand.u32 2147483648, %v405_v20  ;;  %v431_v63 = vand.u32 2147483647, %v405_v20  ;;  %vm427_vm4 = vweird.f32 %v405_v20 }
  0x9d   :  { %v419_v8 = vor.u32 1.1754944e-38, %v418_v49  ;;  %vm417_vm6 = vcmp.eq.f32.partialorder %v416_v57, 8.507059e+37 }
  0x9e   :  { %v434_v14 = vor.u32 1.1754944e-38, %v433_v51  ;;  %vm432_vm8 = vcmp.eq.f32.partialorder %v431_v63, 8.507059e+37  ;;  %v5953_v63 = vpop.f32.mrf.mxu2 }
  0x9f   :  { %v5377_v34 = vpop.eup %5376  ;;  %7482 = vst [vmem:[#allocation37_spill] sm:$0xff] %v5953_v63  ;;  %v5219_v63 = vld [vmem:[#allocation2 + $0x26c] sm:$0xf0] }
  0xa0   :  { %v406_v37 = vadd.f32 1.0, %v5377_v34 }
  0xa1   :  { %v5379_v39 = vpop.eup %5378 }
  0xa2   :  { %v5381_v40 = vpop.eup %5380  ;;  %v408_v43 = vmul.f32 %v5379_v39, %v404_v15  ;;  %5382 = vrcp.f32 %v406_v37  ;;  %vm413_vm1 = vweird.f32 %v5379_v39  ;;  %vm442_vm10 = vweird.f32 %v406_v37 }
  0xa3   :  { %v423_v46 = vmul.f32 %v5381_v40, %v405_v20  ;;  %5384 = vtanh.f32 %v276_v36  ;;  %vm428_vm2 = vweird.f32 %v5381_v40  ;;  %vm414_vm5 = vmor %vm412_vm3, %vm413_vm1  ;;  %v448_v20 = vand.u32 2147483648, %v406_v37 }
  0xa4   :  { %v409_v47 = vsub.f32 1.0, %v408_v43  ;;  %vm429_vm7 = vmor %vm427_vm4, %vm428_vm2 }
  0xa5   :  { %v424_v48 = vsub.f32 1.0, %v423_v46  ;;  %v449_v49 = vor.u32 1.1754944e-38, %v448_v20  ;;  %v5233_v20 = vld [vmem:[#allocation2 + $0x2e4] sm:$0xf] }
  0xa6   :  { %v410_v56 = vmul.f32 %v5379_v39, %v409_v47 }
  0xa7   :  { %v425_v61 = vmul.f32 %v5381_v40, %v424_v48  ;;  %v446_v48 = vand.u32 2147483647, %v406_v37 }
  0xa8   :  { %v5383_v1 = vpop.eup %5382  ;;  %v411_v2 = vadd.f32 %v5379_v39, %v410_v56 }
  0xa9   :  { %v5385_v3 = vpop.eup %5384  ;;  %v438_v7 = vmul.f32 %v5383_v1, %v406_v37  ;;  %v426_v11 = vadd.f32 %v5381_v40, %v425_v61  ;;  %vm443_vm9 = vweird.f32 %v5383_v1  ;;  %vm447_vm12 = vcmp.eq.f32.partialorder %v446_v48, 8.507059e+37  ;;  %v5949_v61 = vpop.f32.mrf.mxu0  ;;  %v4447_v48 = vld [vmem:[#allocation2 + $0x2f0] sm:$0xf0] }
  0xaa   :  { %v415_v19 = vsel %vm414_vm5, %v5379_v39, %v411_v2  ;;  %vm444_vm11 = vmor %vm442_vm10, %vm443_vm9  ;;  %7480 = vst [vmem:[#allocation35_spill] sm:$0xff] %v5949_v61  ;;  %v5951_v37 = vpop.f32.mrf.mxu1 }
  0xab   :  { %v439_v23 = vsub.f32 1.0, %v438_v7  ;;  %v420_v26 = vsel %vm417_vm6, %v419_v8, %v415_v19  ;;  %v430_v28 = vsel %vm429_vm7, %v5381_v40, %v426_v11  ;;  %7481 = vst [vmem:[#allocation36_spill] sm:$0xff] %v5951_v37  ;;  %v5961_v7 = vpop.f32.mrf.mxu2 }
  0xac   :  { %v435_v34 = vsel %vm432_vm8, %v434_v14, %v430_v28  ;;  %v454_v36 = vmul.f32 %v5385_v3, %v420_v26  ;;  %7486 = vst [vmem:[#allocation41_spill] sm:$0xff] %v5961_v7  ;;  %v5226_v7 = vld [vmem:[#allocation2 + $0x2ac] sm:$0xf] }
  0xad   :  { %v440_v43 = vmul.f32 %v5383_v1, %v439_v23  ;;  %v453_v46 = vmul.f32 0.0, %v435_v34 }
  0xaf   :  { %v5940_v47 = vadd.f32 %v454_v36, %v453_v46  ;;  %v441_v15 = vadd.f32 %v5383_v1, %v440_v43  ;;  %v4445_v43 = vld [vmem:[#allocation2 + $0x2e0] sm:$0xf]  ;;  %v5235_v46 = vld [vmem:[#allocation2 + $0x2ec] sm:$0xf0] }
  0xb1   :  { %7479 = vst [vmem:[#allocation34_spill] sm:$0xff] %v5940_v47  ;;  %5386 = vtanh.f32 %v5940_v47  ;;  %v445_v39 = vsel %vm444_vm11, %v5383_v1, %v441_v15  ;;  %v5955_v1 = vpop.f32.mrf.mxu3  ;;  %v5957_v2 = vpop.f32.mrf.mxu0  ;;  %v5981_v15 = vor.u32 %v5235_v46, %v4445_v43  ;;  %v4429_v43 = vld [vmem:[#allocation2 + $0x2c0] sm:$0xf]  ;;  %v5231_v46 = vld [vmem:[#allocation2 + $0x2cc] sm:$0xf0] }
  0xb2   :  { %v450_v40 = vsel %vm447_vm12, %v449_v49, %v445_v39  ;;  %7483 = vst [vmem:[#allocation38_spill] sm:$0xff] %v5955_v1  ;;  %v5959_v3 = vpop.f32.mrf.mxu1  ;;  %v4453_v39 = vld [vmem:[#allocation2 + $0x2e8] sm:$0xf]  ;;  %v5221_v47 = vld [vmem:[#allocation2 + $0x284] sm:$0xf] }
  0xb3   :  { %7484 = vst [vmem:[#allocation39_spill] sm:$0xff] %v5957_v2  ;;  %v5969_v19 = vpop.f32.mrf.mxu2  ;;  %895 = vmatpush.bf16.msra.mxu0 %v5981_v15 }
  0xb4   :  { %7485 = vst [vmem:[#allocation40_spill] sm:$0xff] %v5959_v3  ;;  %v4423_v3 = vld [vmem:[#allocation2 + $0x2b8] sm:$0xf0] }
  0xb5   :  { %7490 = vst [vmem:[#allocation45_spill] sm:$0xff] %v5969_v19 }
  0xb6   :  { %7496 = vst [vmem:[#allocation51_spill] sm:$0xff] %v5981_v15 }
  0xb7   :  { %v5387_v51 = vpop.eup %5386 }
  0xb8   :  { %v457_v56 = vmul.f32 %v5387_v51, %v450_v40  ;;  %v5987_v40 = vor.u32 %v5233_v20, %v4447_v48  ;;  %v5997_v20 = vor.u32 %v5231_v46, %v4429_v43  ;;  %v4431_v48 = vld [vmem:[#allocation2 + $0x2d0] sm:$0xf0] }
  0xb9   :  { %v5963_v8 = vpop.f32.mrf.mxu3  ;;  %v5965_v11 = vpop.f32.mrf.mxu0 }
  0xba   :  { %v5943_v57 = vpack.c.bf16 %v457_v56, %v457_v56  ;;  %7487 = vst [vmem:[#allocation42_spill] sm:$0xff] %v5963_v8  ;;  %v5967_v14 = vpop.f32.mrf.mxu1  ;;  %v5236_v56 = vld [vmem:[#allocation2 + $0x2f4] sm:$0xf0]  ;;  %908 = vmatpush.bf16.msra.mxu1 %v5987_v40  ;;  %896 = vmatpush.bf16.msra.mxu0 %v5997_v20  ;;  %v5225_v8 = vld [vmem:[#allocation2 + $0x2a4] sm:$0xf] }
  0xbb   :  { %7488 = vst [vmem:[#allocation43_spill] sm:$0xff] %v5965_v11  ;;  %v5977_v34 = vpop.f32.mrf.mxu2  ;;  %v5227_v11 = vld [vmem:[#allocation2 + $0x2ac] sm:$0xf0] }
  0xbc   :  { %627 = vmatmul.bf16.vlgmr.msrb.gmra.mxu0 %v5943_v57  ;;  %640 = vmatmul.bf16.vlgmr.msrb.gmra.mxu1 %v5943_v57  ;;  %7489 = vst [vmem:[#allocation44_spill] sm:$0xff] %v5967_v14  ;;  %v4413_v14 = vld [vmem:[#allocation2 + $0x2a0] sm:$0xf] }
  0xbd   :  { %653 = vmatmul.bf16.vlgmr.msrb.gmra.mxu2 %v5943_v57  ;;  %666 = vmatmul.bf16.vlgmr.msrb.gmra.mxu3 %v5943_v57  ;;  %7494 = vst [vmem:[#allocation49_spill] sm:$0xff] %v5977_v34  ;;  %v5990_v34 = vor.u32 %v5236_v56, %v4453_v39 }
  0xbe   :  { %7499 = vst [vmem:[#allocation54_spill] sm:$0xff] %v5987_v40  ;;  %v4471_v40 = vld [vmem:[#allocation2 + $0x18] sm:$0xf0] }
  0xbf   :  { %7500 = vst [vmem:[#allocation55_spill] sm:$0xff] %v5990_v34  ;;  %921 = vmatpush.bf16.msra.mxu2 %v5990_v34 }
  0xc0   :  { %7502 = vst [vmem:[#allocation57_spill] sm:$0xff] %v5997_v20 }
  0xc1   :  { %v5971_v23 = vpop.f32.mrf.mxu3  ;;  %v5973_v26 = vpop.f32.mrf.mxu0 }
  0xc2   :  { %7491 = vst [vmem:[#allocation46_spill] sm:$0xff] %v5971_v23  ;;  %v5975_v28 = vpop.f32.mrf.mxu1  ;;  %v5229_v23 = vld [vmem:[#allocation2 + $0x2c4] sm:$0xf] }
  0xc3   :  { %7492 = vst [vmem:[#allocation47_spill] sm:$0xff] %v5973_v26  ;;  %v5234_v26 = vld [vmem:[#allocation2 + $0x2ec] sm:$0xf]  ;;  %v5999_v19 = vor.u32 %v5229_v23, %v4431_v48  ;;  %v6007_v43 = vpop.f32.mrf.mxu2  ;;  %v6013_v23 = vor.u32 %v5227_v11, %v4413_v14  ;;  %v5228_v48 = vld [vmem:[#allocation2 + $0x2b4] sm:$0xf0] }
  0xc4   :  { %7493 = vst [vmem:[#allocation48_spill] sm:$0xff] %v5975_v28  ;;  %v4455_v28 = vld [vmem:[#allocation2 + $0x2f8] sm:$0xf0]  ;;  %v4397_v11 = vld [vmem:[#allocation2 + $0x280] sm:$0xf] }
  0xc5   :  { %7503 = vst [vmem:[#allocation58_spill] sm:$0xff] %v5999_v19  ;;  %909 = vmatpush.bf16.msra.mxu1 %v5999_v19  ;;  %897 = vmatpush.bf16.msra.mxu0 %v6013_v23  ;;  %v5223_v14 = vld [vmem:[#allocation2 + $0x28c] sm:$0xf0]  ;;  %v4479_v19 = vld [vmem:[#allocation2 + $0x30] sm:$0xf0] }
  0xc6   :  { %7506 = vst [vmem:[#allocation61_spill] sm:$0xff] %v6007_v43  ;;  %v6020_v43 = vor.u32 %v5226_v7, %v4423_v3 }
  0xc7   :  { %7508 = vst [vmem:[#allocation63_spill] sm:$0xff] %v6013_v23  ;;  %v4557_v23 = vld [vmem:[#allocation2 + $0xc0] sm:$0xf] }
  0xc8   :  { %7511 = vst [vmem:[#allocation66_spill] sm:$0xff] %v6020_v43 }
  0xc9   :  { %v5979_v36 = vpop.f32.mrf.mxu3  ;;  %v5983_v49 = vpop.f32.mrf.mxu0 }
  0xca   :  { %7495 = vst [vmem:[#allocation50_spill] sm:$0xff] %v5979_v36  ;;  %v5985_v51 = vpop.f32.mrf.mxu1  ;;  %v5992_v36 = vor.u32 %v5234_v26, %v4455_v28  ;;  %v5230_v26 = vld [vmem:[#allocation2 + $0x2cc] sm:$0xf]  ;;  %v4439_v28 = vld [vmem:[#allocation2 + $0x2d8] sm:$0xf0] }
  0xcb   :  { %7497 = vst [vmem:[#allocation52_spill] sm:$0xff] %v5983_v49  ;;  %v5232_v49 = vld [vmem:[#allocation2 + $0x2d4] sm:$0xf0]  ;;  %v6004_v56 = vor.u32 %v5230_v26, %v4439_v28  ;;  %v6047_v37 = vpop.f32.mrf.mxu2 }
  0xcc   :  { %7498 = vst [vmem:[#allocation53_spill] sm:$0xff] %v5985_v51  ;;  %934 = vmatpush.bf16.msra.mxu3 %v5992_v36  ;;  %v4437_v51 = vld [vmem:[#allocation2 + $0x2c8] sm:$0xf] }
  0xcd   :  { %7501 = vst [vmem:[#allocation56_spill] sm:$0xff] %v5992_v36  ;;  %v6001_v39 = vor.u32 %v5232_v49, %v4437_v51  ;;  %v4415_v49 = vld [vmem:[#allocation2 + $0x2b0] sm:$0xf0]  ;;  %v4421_v51 = vld [vmem:[#allocation2 + $0x2a8] sm:$0xf] }
  0xce   :  { %7505 = vst [vmem:[#allocation60_spill] sm:$0xff] %v6004_v56  ;;  %v6015_v26 = vor.u32 %v5225_v8, %v4415_v49  ;;  %v6017_v28 = vor.u32 %v5228_v48, %v4421_v51  ;;  %v6029_v8 = vor.u32 %v5223_v14, %v4397_v11  ;;  %v4399_v49 = vld [vmem:[#allocation2 + $0x290] sm:$0xf0]  ;;  %v4405_v51 = vld [vmem:[#allocation2 + $0x288] sm:$0xf]  ;;  %v6041_v11 = vor.u32 %v5219_v63, %v4381_v27 }
  0xcf   :  { %7504 = vst [vmem:[#allocation59_spill] sm:$0xff] %v6001_v39  ;;  %922 = vmatpush.bf16.msra.mxu2 %v6001_v39  ;;  %v5224_v48 = vld [vmem:[#allocation2 + $0x294] sm:$0xf0]  ;;  %v6031_v3 = vor.u32 %v5221_v47, %v4399_v49  ;;  %v4383_v47 = vld [vmem:[#allocation2 + $0x270] sm:$0xf0] }
  0xd0   :  { %935 = vmatpush.bf16.msra.mxu3 %v6004_v56  ;;  %7509 = vst [vmem:[#allocation64_spill] sm:$0xff] %v6015_v26  ;;  %910 = vmatpush.bf16.msra.mxu1 %v6015_v26  ;;  %v6033_v7 = vor.u32 %v5224_v48, %v4405_v51  ;;  %v4389_v14 = vld [vmem:[#allocation2 + $0x268] sm:$0xf]  ;;  %v5220_v49 = vld [vmem:[#allocation2 + $0x274] sm:$0xf0]  ;;  %v6043_v51 = vor.u32 %v5217_v16, %v4383_v47 }
  0xd1   :  { %v6009_v46 = vpop.f32.mrf.mxu3  ;;  %7510 = vst [vmem:[#allocation65_spill] sm:$0xff] %v6017_v28  ;;  %898 = vmatpush.bf16.msra.mxu0 %v6029_v8  ;;  %v6045_v48 = vor.u32 %v5220_v49, %v4389_v14  ;;  %v4365_v27 = vld [vmem:[#allocation2 + $0x240] sm:$0xf]  ;;  %v5215_v63 = vld [vmem:[#allocation2 + $0x24c] sm:$0xf0] }
  0xd2   :  { %7507 = vst [vmem:[#allocation62_spill] sm:$0xff] %v6009_v46  ;;  %v6022_v46 = vpop.f32.mrf.mxu0  ;;  %v6024_v2 = vpop.f32.mrf.mxu1  ;;  %v6057_v16 = vor.u32 %v5215_v63, %v4365_v27  ;;  %v4367_v47 = vld [vmem:[#allocation2 + $0x250] sm:$0xf0]  ;;  %v4373_v14 = vld [vmem:[#allocation2 + $0x248] sm:$0xf] }
  0xd3   :  { %7512 = vst [vmem:[#allocation67_spill] sm:$0xff] %v6022_v46  ;;  %923 = vmatpush.bf16.msra.mxu2 %v6017_v28  ;;  %v5222_v46 = vld [vmem:[#allocation2 + $0x28c] sm:$0xf]  ;;  %v5216_v49 = vld [vmem:[#allocation2 + $0x254] sm:$0xf0] }
  0xd4   :  { %7513 = vst [vmem:[#allocation68_spill] sm:$0xff] %v6024_v2  ;;  %936 = vmatpush.bf16.msra.mxu3 %v6020_v43  ;;  %v4407_v2 = vld [vmem:[#allocation2 + $0x298] sm:$0xf0]  ;;  %911 = vmatpush.bf16.msra.mxu1 %v6031_v3  ;;  %v4349_v63 = vld [vmem:[#allocation2 + $0x220] sm:$0xf] }
  0xd5   :  { %7514 = vst [vmem:[#allocation69_spill] sm:$0xff] %v6029_v8  ;;  %v6036_v1 = vor.u32 %v5222_v46, %v4407_v2  ;;  %v5218_v2 = vld [vmem:[#allocation2 + $0x26c] sm:$0xf]  ;;  %v4391_v46 = vld [vmem:[#allocation2 + $0x278] sm:$0xf0]  ;;  %899 = vmatpush.bf16.msra.mxu0 %v6041_v11 }
  0xd6   :  { %7515 = vst [vmem:[#allocation70_spill] sm:$0xff] %v6031_v3  ;;  %v6052_v61 = vor.u32 %v5218_v2, %v4391_v46  ;;  %v6063_v2 = vor.u32 %v5213_v58, %v4367_v47  ;;  %v6065_v46 = vor.u32 %v5216_v49, %v4373_v14  ;;  %v4351_v47 = vld [vmem:[#allocation2 + $0x230] sm:$0xf0]  ;;  %v4357_v14 = vld [vmem:[#allocation2 + $0x228] sm:$0xf] }
  0xd7   :  { %7516 = vst [vmem:[#allocation71_spill] sm:$0xff] %v6033_v7  ;;  %924 = vmatpush.bf16.msra.mxu2 %v6033_v7  ;;  %v5212_v49 = vld [vmem:[#allocation2 + $0x234] sm:$0xf0]  ;;  %v4335_v7 = vld [vmem:[#allocation2 + $0x210] sm:$0xf0] }
  0xd8   :  { %7517 = vst [vmem:[#allocation72_spill] sm:$0xff] %v6036_v1  ;;  %937 = vmatpush.bf16.msra.mxu3 %v6036_v1  ;;  %912 = vmatpush.bf16.msra.mxu1 %v6043_v51  ;;  %v6082_v1 = vor.u32 %v5212_v49, %v4357_v14  ;;  %v6097_v14 = vpop.f32.mrf.mxu2  ;;  %v4341_v3 = vld [vmem:[#allocation2 + $0x208] sm:$0xf]  ;;  %v4343_v8 = vld [vmem:[#allocation2 + $0x218] sm:$0xf0] }
  0xd9   :  { %7518 = vst [vmem:[#allocation73_spill] sm:$0xff] %v6041_v11  ;;  %v6049_v59 = vpop.f32.mrf.mxu3  ;;  %v4375_v11 = vld [vmem:[#allocation2 + $0x258] sm:$0xf0]  ;;  %900 = vmatpush.bf16.msra.mxu0 %v6057_v16  ;;  %v4573_v43 = vld [vmem:[#allocation2 + $0xe0] sm:$0xf] }
  0xda   :  { %7519 = vst [vmem:[#allocation74_spill] sm:$0xff] %v6043_v51  ;;  %v5214_v51 = vld [vmem:[#allocation2 + $0x24c] sm:$0xf]  ;;  %v4575_v28 = vld [vmem:[#allocation2 + $0xf0] sm:$0xf0] }
  0xdb   :  { %7520 = vst [vmem:[#allocation75_spill] sm:$0xff] %v6045_v48  ;;  %925 = vmatpush.bf16.msra.mxu2 %v6045_v48  ;;  %v6070_v48 = vld [vmem:[%s7268_s5 + $0x1] ss:$8 sm:$0xf]  ;;  %v6073_v27 = vor.u32 %v5214_v51, %v4375_v11  ;;  %v5210_v11 = vld [vmem:[#allocation2 + $0x22c] sm:$0xf] }
  0xdc   :  { %7521 = vst [vmem:[#allocation76_spill] sm:$0xff] %v6047_v37  ;;  %938 = vmatpush.bf16.msra.mxu3 %v6052_v61  ;;  %v6059_v37 = vpop.f32.mrf.mxu0  ;;  %913 = vmatpush.bf16.msra.mxu1 %v6063_v2  ;;  %v4359_v51 = vld [vmem:[#allocation2 + $0x238] sm:$0xf0]  ;;  %v5158_v56 = vld [vmem:[#allocation2 + $0x8c] sm:$0xf] }
  0xdd   :  { %7522 = vst [vmem:[#allocation77_spill] sm:$0xff] %v6049_v59  ;;  %v6061_v59 = vpop.f32.mrf.mxu1  ;;  %v4535_v39 = vld [vmem:[#allocation2 + $0x98] sm:$0xf0] }
  0xde   :  { %7523 = vst [vmem:[#allocation78_spill] sm:$0xff] %v6052_v61 }
  0xdf   :  { %7524 = vst [vmem:[#allocation79_spill] sm:$0xff] %v6057_v16  ;;  %926 = vmatpush.bf16.msra.mxu2 %v6065_v46  ;;  %v6088_v16 = vperm.slane %v6070_v48, 1 }
  0xe0   :  { %7525 = vst [vmem:[#allocation80_spill] sm:$0xff] %v6059_v37  ;;  %v5211_v37 = vld [vmem:[#allocation2 + $0x22c] sm:$0xf0]  ;;  %939 = vmatpush.bf16.msra.mxu3 %v6073_v27 }
  0xe1   :  { %7526 = vst [vmem:[#allocation81_spill] sm:$0xff] %v6061_v59  ;;  %v5209_v59 = vld [vmem:[#allocation2 + $0x224] sm:$0xf]  ;;  %v6078_v58 = vor.u32 %v5211_v37, %v4349_v63  ;;  %v6094_v37 = vor.u32 %v5210_v11, %v4359_v51  ;;  %v5207_v63 = vld [vmem:[#allocation2 + $0x20c] sm:$0xf0]  ;;  %v6099_v49 = vpop.f32.mrf.mxu3 }
  0xe2   :  { %7527 = vst [vmem:[#allocation82_spill] sm:$0xff] %v6063_v2  ;;  %v6080_v61 = vor.u32 %v5209_v59, %v4351_v47  ;;  %v6085_v2 = vperm.slane %v6070_v48, 0  ;;  %v4333_v59 = vld [vmem:[#allocation2 + $0x200] sm:$0xf]  ;;  %v5205_v47 = vld [vmem:[#allocation2 + $0x204] sm:$0xf] }
  0xe3   :  { %7528 = vst [vmem:[#allocation83_spill] sm:$0xff] %v6065_v46  ;;  %v6091_v46 = vperm.slane %v6070_v48, 2  ;;  %901 = vmatpush.bf16.msra.mxu0 %v6078_v58  ;;  %927 = vmatpush.bf16.msra.mxu2 %v6082_v1  ;;  %v6105_v11 = vor.u32 %v5205_v47, %v4335_v7  ;;  %v5170_v47 = vld [vmem:[#allocation2 + $0xec] sm:$0xf] }
  0xe4   :  { %7529 = vst [vmem:[#allocation84_spill] sm:$0xff] %v6073_v27  ;;  %914 = vmatpush.bf16.msra.mxu1 %v6080_v61  ;;  %940 = vmatpush.bf16.msra.mxu3 %v6094_v37  ;;  %v6103_v27 = vor.u32 %v5207_v63, %v4333_v59 }
  0xe5   :  { %7530 = vst [vmem:[#allocation85_spill] sm:$0xff] %v6078_v58  ;;  %v5208_v58 = vld [vmem:[#allocation2 + $0x214] sm:$0xf0] }
  0xe6   :  { %7531 = vst [vmem:[#allocation86_spill] sm:$0xff] %v6080_v61  ;;  %v6107_v51 = vor.u32 %v5208_v58, %v4341_v3  ;;  %v5206_v61 = vld [vmem:[#allocation2 + $0x20c] sm:$0xf]  ;;  %v4581_v3 = vld [vmem:[#allocation2 + $0xe8] sm:$0xf] }
  0xe7   :  { %7532 = vst [vmem:[#allocation87_spill] sm:$0xff] %v6082_v1  ;;  %902 = vmatpush.bf16.msra.mxu0 %v6103_v27  ;;  %v5169_v1 = vld [vmem:[#allocation2 + $0xe4] sm:$0xf]  ;;  %v5172_v58 = vld [vmem:[#allocation2 + $0xf4] sm:$0xf0] }
  0xe8   :  { %7533 = vst [vmem:[#allocation88_spill] sm:$0xff] %v6085_v2  ;;  %915 = vmatpush.bf16.msra.mxu1 %v6105_v11  ;;  %v6115_v7 = vor.u32 %v5169_v1, %v4575_v28  ;;  %928 = vmatpush.bf16.msra.mxu2 %v6107_v51  ;;  %v5165_v28 = vld [vmem:[#allocation2 + $0xc4] sm:$0xf] }
  0xe9   :  { %7534 = vst [vmem:[#allocation89_spill] sm:$0xff] %v6088_v16 }
  0xea   :  { %7535 = vst [vmem:[#allocation90_spill] sm:$0xff] %v6091_v46 }
  0xeb   :  { %7536 = vst [vmem:[#allocation91_spill] sm:$0xff] %v6094_v37 }
  0xec   :  { %7537 = vst [vmem:[#allocation92_spill] sm:$0xff] %v6097_v14  ;;  %v6110_v14 = vor.u32 %v5206_v61, %v4343_v8  ;;  %v6121_v61 = vor.u32 %v5172_v58, %v4581_v3  ;;  %v4583_v8 = vld [vmem:[#allocation2 + $0xf8] sm:$0xf0]  ;;  %1120 = vmatpush.bf16.msrb.mxu1 %v6115_v7  ;;  %v5168_v58 = vld [vmem:[#allocation2 + $0xd4] sm:$0xf0] }
  0xed   :  { %7538 = vst [vmem:[#allocation93_spill] sm:$0xff] %v6099_v49  ;;  %v5171_v49 = vld [vmem:[#allocation2 + $0xec] sm:$0xf0]  ;;  %v6125_v1 = vor.u32 %v5170_v47, %v4583_v8  ;;  %v4541_v47 = vld [vmem:[#allocation2 + $0xa0] sm:$0xf] }
  0xee   :  { %7539 = vst [vmem:[#allocation94_spill] sm:$0xff] %v6103_v27  ;;  %v6113_v63 = vor.u32 %v5171_v49, %v4573_v43  ;;  %941 = vmatpush.bf16.msra.mxu3 %v6110_v14  ;;  %v4565_v49 = vld [vmem:[#allocation2 + $0xc8] sm:$0xf]  ;;  %1133 = vmatpush.bf16.msrb.mxu2 %v6121_v61  ;;  %v5161_v8 = vld [vmem:[#allocation2 + $0xa4] sm:$0xf] }
  0xef   :  { %7540 = vst [vmem:[#allocation95_spill] sm:$0xff] %v6105_v11  ;;  %v5167_v11 = vld [vmem:[#allocation2 + $0xcc] sm:$0xf0] }
  0xf0   :  { %7541 = vst [vmem:[#allocation96_spill] sm:$0xff] %v6107_v51  ;;  %1107 = vmatpush.bf16.msrb.mxu0 %v6113_v63  ;;  %v6127_v43 = vor.u32 %v5167_v11, %v4557_v23  ;;  %v5163_v11 = vld [vmem:[#allocation2 + $0xac] sm:$0xf0]  ;;  %v5160_v51 = vld [vmem:[#allocation2 + $0x94] sm:$0xf0] }
  0xf1   :  { %7542 = vst [vmem:[#allocation97_spill] sm:$0xff] %v6110_v14  ;;  %v4543_v14 = vld [vmem:[#allocation2 + $0xb0] sm:$0xf0] }
  0xf2   :  { %7543 = vst [vmem:[#allocation98_spill] sm:$0xff] %v6113_v63  ;;  %1146 = vmatpush.bf16.msrb.mxu3 %v6125_v1  ;;  %v5166_v63 = vld [vmem:[#allocation2 + $0xcc] sm:$0xf] }
  0xf3   :  { %7544 = vst [vmem:[#allocation99_spill] sm:$0xff] %v6115_v7  ;;  %v4567_v7 = vld [vmem:[#allocation2 + $0xd8] sm:$0xf0] }
  0xf4   :  { %7545 = vst [vmem:[#allocation100_spill] sm:$0xff] %v6121_v61  ;;  %v6135_v23 = vor.u32 %v5166_v63, %v4567_v7  ;;  %1108 = vmatpush.bf16.msrb.mxu0 %v6127_v43  ;;  %v4551_v7 = vld [vmem:[#allocation2 + $0xb8] sm:$0xf0] }
  0xf5   :  { %7546 = vst [vmem:[#allocation101_spill] sm:$0xff] %v6125_v1 }
  0xf6   :  { %7547 = vst [vmem:[#allocation102_spill] sm:$0xff] %v6127_v43  ;;  %1147 = vmatpush.bf16.msrb.mxu3 %v6135_v23 }
  0xf7   :  { %7550 = vst [vmem:[#allocation105_spill] sm:$0xff] %v6135_v23  ;;  %v5145_v23 = vld [vmem:[#allocation2 + $0x24] sm:$0xf] }
 0x139   :  { %v628_v37 = vpop.f32.mrf.mxu0  ;;  %v641_v59 = vpop.f32.mrf.mxu1 }
 0x13a   :  { %v629_v26 = vadd.f32 %v628_v37, %v6085_v2  ;;  %v642_v27 = vadd.f32 %v641_v59, %v6088_v16  ;;  %v4559_v37 = vld [vmem:[#allocation2 + $0xd0] sm:$0xf0]  ;;  %v6133_v2 = vor.u32 %v5168_v58, %v4565_v49  ;;  %v5162_v49 = vld [vmem:[#allocation2 + $0xac] sm:$0xf] }
 0x13b   :  { %v6130_v3 = vor.u32 %v5165_v28, %v4559_v37  ;;  %v4549_v28 = vld [vmem:[#allocation2 + $0xa8] sm:$0xf]  ;;  %v5164_v37 = vld [vmem:[#allocation2 + $0xb4] sm:$0xf0] }
 0x13c   :  { %v4328_v59 = vmul.f32 -1.442695, %v629_v26  ;;  %v4329_v16 = vmul.f32 -1.442695, %v642_v27  ;;  %7549 = vst [vmem:[#allocation104_spill] sm:$0xff] %v6133_v2  ;;  %v6139_v26 = vor.u32 %v5163_v11, %v4541_v47  ;;  %v6141_v27 = vor.u32 %v5161_v8, %v4543_v14  ;;  %1134 = vmatpush.bf16.msrb.mxu2 %v6133_v2 }
 0x13d   :  { %7548 = vst [vmem:[#allocation103_spill] sm:$0xff] %v6130_v3  ;;  %1121 = vmatpush.bf16.msrb.mxu1 %v6130_v3  ;;  %v6144_v63 = vor.u32 %v5164_v37, %v4549_v28  ;;  %v6148_v14 = vor.u32 %v5162_v49, %v4551_v7  ;;  %v5157_v47 = vld [vmem:[#allocation2 + $0x84] sm:$0xf]  ;;  %v4527_v11 = vld [vmem:[#allocation2 + $0x90] sm:$0xf0] }
 0x13e   :  { %5388 = vpow2.f32 %v4328_v59  ;;  %7551 = vst [vmem:[#allocation106_spill] sm:$0xff] %v6139_v26  ;;  %v4525_v59 = vld [vmem:[#allocation2 + $0x80] sm:$0xf]  ;;  %v4533_v8 = vld [vmem:[#allocation2 + $0x88] sm:$0xf]  ;;  %1109 = vmatpush.bf16.msrb.mxu0 %v6139_v26  ;;  %v6154_v37 = vor.u32 %v5157_v47, %v4527_v11 }
 0x13f   :  { %5390 = vpow2.f32 %v4329_v16  ;;  %7552 = vst [vmem:[#allocation107_spill] sm:$0xff] %v6141_v27  ;;  %v5159_v16 = vld [vmem:[#allocation2 + $0x8c] sm:$0xf0]  ;;  %1148 = vmatpush.bf16.msrb.mxu3 %v6148_v14  ;;  %v5153_v47 = vld [vmem:[#allocation2 + $0x64] sm:$0xf] }
 0x140   :  { %v654_v58 = vpop.f32.mrf.mxu2  ;;  %v667_v1 = vpop.f32.mrf.mxu3  ;;  %7553 = vst [vmem:[#allocation108_spill] sm:$0xff] %v6144_v63  ;;  %v6152_v28 = vor.u32 %v5159_v16, %v4525_v59  ;;  %1135 = vmatpush.bf16.msrb.mxu2 %v6144_v63  ;;  %v6168_v59 = vperm.slane %v6070_v48, 3  ;;  %v4511_v11 = vld [vmem:[#allocation2 + $0x70] sm:$0xf0] }
 0x141   :  { %v655_v43 = vadd.f32 %v654_v58, %v6091_v46  ;;  %v630_v61 = vpop.f32.mrf.mxu0  ;;  %v643_v3 = vpop.f32.mrf.mxu1  ;;  %7554 = vst [vmem:[#allocation109_spill] sm:$0xff] %v6148_v14  ;;  %1122 = vmatpush.bf16.msrb.mxu1 %v6141_v27  ;;  %v5147_v14 = vld [vmem:[#allocation2 + $0x2c] sm:$0xf0] }
 0x142   :  { %7555 = vst [vmem:[#allocation110_spill] sm:$0xff] %v6152_v28  ;;  %v6157_v3 = vor.u32 %v5160_v51, %v4533_v8  ;;  %1110 = vmatpush.bf16.msrb.mxu0 %v6152_v28  ;;  %v4509_v51 = vld [vmem:[#allocation2 + $0x60] sm:$0xf]  ;;  %v6178_v8 = vor.u32 %v5153_v47, %v4511_v11  ;;  %v5151_v47 = vld [vmem:[#allocation2 + $0x4c] sm:$0xf0] }
 0x143   :  { %v4330_v2 = vmul.f32 -1.442695, %v655_v43  ;;  %7556 = vst [vmem:[#allocation111_spill] sm:$0xff] %v6154_v37  ;;  %v6162_v43 = vor.u32 %v5158_v56, %v4535_v39  ;;  %v5155_v39 = vld [vmem:[#allocation2 + $0x6c] sm:$0xf0] }
 0x144   :  { %v5389_v61 = vpop.eup %5388  ;;  %7557 = vst [vmem:[#allocation112_spill] sm:$0xff] %v6157_v3  ;;  %1136 = vmatpush.bf16.msrb.mxu2 %v6157_v3  ;;  %v6175_v56 = vor.u32 %v5155_v39, %v4509_v51  ;;  %v4519_v3 = vld [vmem:[#allocation2 + $0x78] sm:$0xf0]  ;;  %v5149_v11 = vld [vmem:[#allocation2 + $0x44] sm:$0xf] }
 0x145   :  { %v5391_v49 = vpop.eup %5390  ;;  %v6159_v58 = vadd.f32 1.0, %v5389_v61  ;;  %5392 = vpow2.f32 %v4330_v2  ;;  %7558 = vst [vmem:[#allocation113_spill] sm:$0xff] %v6162_v43  ;;  %1123 = vmatpush.bf16.msrb.mxu1 %v6154_v37  ;;  %1149 = vmatpush.bf16.msrb.mxu3 %v6162_v43  ;;  %v4517_v61 = vld [vmem:[#allocation2 + $0x68] sm:$0xf]  ;;  %v668_v37 = vadd.f32 %v667_v1, %v6168_v59  ;;  %v4493_v43 = vld [vmem:[#allocation2 + $0x40] sm:$0xf] }
 0x146   :  { %v6164_v7 = vadd.f32 1.0, %v5391_v49  ;;  %7559 = vst [vmem:[#allocation114_spill] sm:$0xff] %v6168_v59  ;;  %v5156_v49 = vld [vmem:[#allocation2 + $0x74] sm:$0xf0]  ;;  %1111 = vmatpush.bf16.msrb.mxu0 %v6175_v56  ;;  %v6192_v1 = vor.u32 %v5151_v47, %v4493_v43  ;;  %v4495_v59 = vld [vmem:[#allocation2 + $0x50] sm:$0xf0] }
 0x147   :  { %5394 = vrcp.f32 %v6159_v58  ;;  %7560 = vst [vmem:[#allocation115_spill] sm:$0xff] %v6175_v56  ;;  %v692_v48 = vand.u32 2147483647, %v6159_v58  ;;  %v694_v47 = vand.u32 2147483648, %v6159_v58  ;;  %v6205_v27 = vor.u32 %v5149_v11, %v4495_v59  ;;  %v4487_v11 = vld [vmem:[#allocation2 + $0x38] sm:$0xf0] }
 0x148   :  { %5396 = vrcp.f32 %v6164_v7  ;;  %v656_v16 = vpop.f32.mrf.mxu2  ;;  %v669_v2 = vpop.f32.mrf.mxu3  ;;  %7561 = vst [vmem:[#allocation116_spill] sm:$0xff] %v6178_v8  ;;  %v709_v43 = vand.u32 2147483648, %v6164_v7  ;;  %v707_v34 = vand.u32 2147483647, %v6164_v7  ;;  %v6222_v59 = vor.u32 %v5145_v23, %v4479_v19 }
 0x149   :  { %v6182_v16 = vor.u32 %v5156_v49, %v4517_v61  ;;  %v5154_v2 = vld [vmem:[#allocation2 + $0x6c] sm:$0xf]  ;;  %1124 = vmatpush.bf16.msrb.mxu1 %v6178_v8  ;;  %7564 = vst [vmem:[#allocation119_spill] sm:$0xff] %v6192_v1  ;;  %v4501_v61 = vld [vmem:[#allocation2 + $0x48] sm:$0xf]  ;;  %vm6211_vm13 = vcmp.eq.f32.partialorder %v692_v48, 8.507059e+37  ;;  %vm703_vm0 = vweird.f32 %v6164_v7  ;;  %vm688_vm1 = vweird.f32 %v6159_v58 }
 0x14a   :  { %v6187_v39 = vor.u32 %v5154_v2, %v4519_v3  ;;  %v5152_v49 = vld [vmem:[#allocation2 + $0x54] sm:$0xf0]  ;;  %v5150_v3 = vld [vmem:[#allocation2 + $0x4c] sm:$0xf]  ;;  %v4503_v2 = vld [vmem:[#allocation2 + $0x58] sm:$0xf0]  ;;  %1112 = vmatpush.bf16.msrb.mxu0 %v6192_v1 }
 0x14b   :  { %v5393_v46 = vpop.eup %5392  ;;  %7562 = vst [vmem:[#allocation117_spill] sm:$0xff] %v6182_v16  ;;  %1137 = vmatpush.bf16.msrb.mxu2 %v6182_v16  ;;  %v4477_v8 = vld [vmem:[#allocation2 + $0x20] sm:$0xf]  ;;  %v6207_v26 = vor.u32 %v5152_v49, %v4501_v61  ;;  %v4485_v1 = vld [vmem:[#allocation2 + $0x28] sm:$0xf]  ;;  %vm708_vm4 = vcmp.eq.f32.partialorder %v707_v34, 8.507059e+37 }
 0x14c   :  { %v6184_v51 = vadd.f32 1.0, %v5393_v46  ;;  %7563 = vst [vmem:[#allocation118_spill] sm:$0xff] %v6187_v39  ;;  %1150 = vmatpush.bf16.msrb.mxu3 %v6187_v39  ;;  %v6209_v39 = vor.u32 %v5150_v3, %v4503_v2  ;;  %v5146_v48 = vld [vmem:[#allocation2 + $0x2c] sm:$0xf]  ;;  %v5143_v49 = vld [vmem:[#allocation2 + $0xc] sm:$0xf0] }
 0x14d   :  { %v6189_v28 = vpop.eup %5394  ;;  %7565 = vst [vmem:[#allocation120_spill] sm:$0xff] %v6205_v27  ;;  %1125 = vmatpush.bf16.msrb.mxu1 %v6205_v27  ;;  %v5141_v3 = vld [vmem:[#allocation2 + $0x4] sm:$0xf]  ;;  %v4463_v2 = vld [vmem:[#allocation2 + $0x10] sm:$0xf0] }
 0x14e   :  { %v6194_v56 = vpop.eup %5396  ;;  %v684_v46 = vmul.f32 %v6189_v28, %v6159_v58  ;;  %5398 = vrcp.f32 %v6184_v51  ;;  %7566 = vst [vmem:[#allocation121_spill] sm:$0xff] %v6207_v26  ;;  %vm689_vm14 = vweird.f32 %v6189_v28  ;;  %v5142_v27 = vld [vmem:[#allocation2 + $0xc] sm:$0xf]  ;;  %v6248_v58 = vor.u32 %v5141_v3, %v4463_v2 }
 0x14f   :  { %v699_v16 = vmul.f32 %v6194_v56, %v6164_v7  ;;  %5400 = vtanh.f32 %v668_v37  ;;  %7567 = vst [vmem:[#allocation122_spill] sm:$0xff] %v6209_v39  ;;  %v6216_v37 = vor.u32 %v5147_v14, %v4477_v8  ;;  %1138 = vmatpush.bf16.msrb.mxu2 %v6207_v26  ;;  %vm704_vm15 = vweird.f32 %v6194_v56  ;;  %v4461_v8 = vld [vmem:[#allocation2] sm:$0xf]  ;;  %v5144_v26 = vld [vmem:[#allocation2 + $0x14] sm:$0xf0]  ;;  %vm690_vm2 = vmor %vm688_vm1, %vm689_vm14 }
 0x150   :  { %v685_v63 = vsub.f32 1.0, %v684_v46  ;;  %7571 = vst [vmem:[#allocation124_spill] sm:$0xff] %v6222_v59  ;;  %1151 = vmatpush.bf16.msrb.mxu3 %v6209_v39  ;;  %v6230_v14 = vor.u32 %v5146_v48, %v4487_v11  ;;  %v4469_v39 = vld [vmem:[#allocation2 + $0x8] sm:$0xf]  ;;  %v695_v48 = vor.u32 1.1754944e-38, %v694_v47  ;;  %vm705_vm3 = vmor %vm703_vm0, %vm704_vm15  ;;  %v6257_v7 = vor.u32 %v5142_v27, %v4471_v40 }
 0x151   :  { %v700_v20 = vsub.f32 1.0, %v699_v16  ;;  %7570 = vst [vmem:[#allocation123_spill] sm:$0xff] %v6216_v37  ;;  %v5148_v16 = vld [vmem:[#allocation2 + $0x34] sm:$0xf0]  ;;  %1113 = vmatpush.bf16.msrb.mxu0 %v6216_v37  ;;  %1126 = vmatpush.bf16.msrb.mxu1 %v6222_v59  ;;  %vm718_vm6 = vweird.f32 %v6184_v51  ;;  %v722_v40 = vand.u32 2147483647, %v6184_v51 }
 0x152   :  { %v686_v46 = vmul.f32 %v6189_v28, %v685_v63  ;;  %v6228_v63 = vor.u32 %v5148_v16, %v4485_v1  ;;  %7573 = vst [vmem:[#allocation126_spill] sm:$0xff] %v6230_v14  ;;  %v710_v1 = vor.u32 1.1754944e-38, %v709_v43  ;;  %v6250_v43 = vor.u32 %v5144_v26, %v4469_v39 }
 0x153   :  { %v701_v61 = vmul.f32 %v6194_v56, %v700_v20  ;;  %v6235_v20 = vor.u32 %v5143_v49, %v4461_v8  ;;  %7575 = vst [vmem:[#allocation128_spill] sm:$0xff] %v6248_v58  ;;  %vm723_vm8 = vcmp.eq.f32.partialorder %v722_v40, 8.507059e+37  ;;  %v7594_v40 = vld [vmem:[#allocation74_spill] sm:$0xff] }
 0x154   :  { %7572 = vst [vmem:[#allocation125_spill] sm:$0xff] %v6228_v63  ;;  %v5399_v19 = vpop.eup %5398  ;;  %v687_v23 = vadd.f32 %v6189_v28, %v686_v46  ;;  %1139 = vmatpush.bf16.msrb.mxu2 %v6228_v63  ;;  %1152 = vmatpush.bf16.msrb.mxu3 %v6230_v14 }
 0x155   :  { %7574 = vst [vmem:[#allocation127_spill] sm:$0xff] %v6235_v20  ;;  %v5401_v37 = vpop.eup %5400  ;;  %v714_v16 = vmul.f32 %v5399_v19, %v6184_v51  ;;  %v702_v11 = vadd.f32 %v6194_v56, %v701_v61  ;;  %1114 = vmatpush.bf16.msrb.mxu0 %v6235_v20  ;;  %1127 = vmatpush.bf16.msrb.mxu1 %v6248_v58  ;;  %vm719_vm5 = vweird.f32 %v5399_v19 }
 0x156   :  { %v691_v46 = vsel %vm690_vm2, %v6189_v28, %v687_v23  ;;  %7576 = vst [vmem:[#allocation129_spill] sm:$0xff] %v6250_v43  ;;  %vm720_vm7 = vmor %vm718_vm6, %vm719_vm5 }
 0x157   :  { %v715_v47 = vsub.f32 1.0, %v714_v16  ;;  %v696_v61 = vsel %vm6211_vm13, %v695_v48, %v691_v46  ;;  %v706_v28 = vsel %vm705_vm3, %v6194_v56, %v702_v11  ;;  %7577 = vst [vmem:[#allocation130_spill] sm:$0xff] %v6257_v7  ;;  %v724_v56 = vand.u32 2147483648, %v6184_v51  ;;  %v7579_v51 = vld [vmem:[#allocation55_spill] sm:$0xff]  ;;  %v7581_v16 = vld [vmem:[#allocation57_spill] sm:$0xff]  ;;  %v7582_v48 = vld [vmem:[#allocation58_spill] sm:$0xff] }
 0x158   :  { %v711_v34 = vsel %vm708_vm4, %v710_v1, %v706_v28  ;;  %v730_v8 = vmul.f32 %v5401_v37, %v696_v61  ;;  %1140 = vmatpush.bf16.msrb.mxu2 %v6250_v43  ;;  %1153 = vmatpush.bf16.msrb.mxu3 %v6257_v7  ;;  %v7583_v11 = vld [vmem:[#allocation59_spill] sm:$0xff]  ;;  %v7584_v46 = vld [vmem:[#allocation60_spill] sm:$0xff]  ;;  %v7587_v28 = vld [vmem:[#allocation65_spill] sm:$0xff] }
 0x159   :  { %v729_v49 = vmul.f32 0.0, %v711_v34  ;;  %v716_v23 = vmul.f32 %v5399_v19, %v715_v47  ;;  %v725_v39 = vor.u32 1.1754944e-38, %v724_v56  ;;  %v7585_v47 = vld [vmem:[#allocation63_spill] sm:$0xff]  ;;  %v7586_v61 = vld [vmem:[#allocation64_spill] sm:$0xff]  ;;  %v7588_v34 = vld [vmem:[#allocation66_spill] sm:$0xff] }
 0x15a   :  { %v7593_v56 = vld [vmem:[#allocation73_spill] sm:$0xff] }
 0x15b   :  { %v6261_v26 = vadd.f32 %v730_v8, %v729_v49  ;;  %v717_v36 = vadd.f32 %v5399_v19, %v716_v23  ;;  %v7589_v8 = vld [vmem:[#allocation69_spill] sm:$0xff]  ;;  %v7590_v49 = vld [vmem:[#allocation70_spill] sm:$0xff]  ;;  %v7591_v23 = vld [vmem:[#allocation71_spill] sm:$0xff] }
 0x15d   :  { %5402 = vtanh.f32 %v6261_v26  ;;  %v721_v27 = vsel %vm720_vm7, %v5399_v19, %v717_v36  ;;  %v7580_v19 = vld [vmem:[#allocation56_spill] sm:$0xff] }
 0x15e   :  { %v726_v3 = vsel %vm723_vm8, %v725_v39, %v721_v27  ;;  %v7592_v36 = vld [vmem:[#allocation72_spill] sm:$0xff]  ;;  %v7595_v27 = vld [vmem:[#allocation75_spill] sm:$0xff]  ;;  %v7596_v39 = vld [vmem:[#allocation78_spill] sm:$0xff] }
 0x163   :  { %v5403_v37 = vpop.eup %5402 }
 0x164   :  { %v733_v2 = vmul.f32 %v5403_v37, %v726_v3  ;;  %v7597_v37 = vld [vmem:[#allocation79_spill] sm:$0xff]  ;;  %v7598_v3 = vld [vmem:[#allocation82_spill] sm:$0xff] }
 0x166   :  { %v734_v1 = vpack.c.bf16 %v733_v2, %v733_v2  ;;  %v7599_v2 = vld [vmem:[#allocation83_spill] sm:$0xff] }
 0x168   :  { %903 = vmatmul.bf16.vlgmr.msra.gmra.mxu0 %v734_v1  ;;  %916 = vmatmul.bf16.vlgmr.msra.gmra.mxu1 %v734_v1 }
 0x169   :  { %929 = vmatmul.bf16.vlgmr.msra.gmra.mxu2 %v734_v1  ;;  %942 = vmatmul.bf16.vlgmr.msra.gmra.mxu3 %v734_v1  ;;  %v7600_v1 = vld [vmem:[#allocation84_spill] sm:$0xff] }
 0x16a   :  { %1227 = vmatpush.bf16.msra.mxu0 %v5773_v9  ;;  %1240 = vmatpush.bf16.msra.mxu1 %v5775_v10 }
 0x16b   :  { %1253 = vmatpush.bf16.msra.mxu2 %v5777_v13  ;;  %1266 = vmatpush.bf16.msra.mxu3 %v5790_v25 }
 0x16e   :  { %1228 = vmatpush.bf16.msra.mxu0 %v5781_v17  ;;  %1241 = vmatpush.bf16.msra.mxu1 %v5788_v22 }
 0x16f   :  { %1254 = vmatpush.bf16.msra.mxu2 %v5792_v29  ;;  %1267 = vmatpush.bf16.msra.mxu3 %v5829_v38 }
 0x172   :  { %1229 = vmatpush.bf16.msra.mxu0 %v5796_v31  ;;  %1242 = vmatpush.bf16.msra.mxu1 %v5800_v32 }
 0x173   :  { %1255 = vmatpush.bf16.msra.mxu2 %v5832_v42  ;;  %1268 = vmatpush.bf16.msra.mxu3 %v5834_v44 }
 0x176   :  { %1230 = vmatpush.bf16.msra.mxu0 %v5848_v50  ;;  %1243 = vmatpush.bf16.msra.mxu1 %v5852_v54 }
 0x177   :  { %1256 = vmatpush.bf16.msra.mxu2 %v5854_v55  ;;  %1269 = vmatpush.bf16.msra.mxu3 %v5863_v60 }
 0x178   :  { %1115 = vmatmul.bf16.vlgmr.msrb.gmra.mxu0 %v5943_v57  ;;  %1128 = vmatmul.bf16.vlgmr.msrb.gmra.mxu1 %v5943_v57 }
 0x179   :  { %1141 = vmatmul.bf16.vlgmr.msrb.gmra.mxu2 %v5943_v57  ;;  %1154 = vmatmul.bf16.vlgmr.msrb.gmra.mxu3 %v5943_v57  ;;  %v7578_v57 = vld [vmem:[#allocation54_spill] sm:$0xff] }
 0x17a   :  { %1231 = vmatpush.bf16.msra.mxu0 %v5867_v0  ;;  %1244 = vmatpush.bf16.msra.mxu1 %v5870_v4 }
 0x17b   :  { %1257 = vmatpush.bf16.msra.mxu2 %v5872_v5  ;;  %1270 = vmatpush.bf16.msra.mxu3 %v5878_v12 }
 0x17e   :  { %1232 = vmatpush.bf16.msra.mxu0 %v5889_v24  ;;  %1245 = vmatpush.bf16.msra.mxu1 %v5893_v30 }
 0x17f   :  { %1258 = vmatpush.bf16.msra.mxu2 %v5897_v35  ;;  %1271 = vmatpush.bf16.msra.mxu3 %v5900_v41 }
 0x182   :  { %1233 = vmatpush.bf16.msra.mxu0 %v5903_v45  ;;  %1246 = vmatpush.bf16.msra.mxu1 %v5906_v52 }
 0x183   :  { %1259 = vmatpush.bf16.msra.mxu2 %v5908_v53  ;;  %1272 = vmatpush.bf16.msra.mxu3 %v5915_v62  ;;  %v7617_v53 = vld [vmem:[#allocation34_spill] sm:$0xff] }
 0x186   :  { %1234 = vmatpush.bf16.msra.mxu0 %v5921_v6  ;;  %1247 = vmatpush.bf16.msra.mxu1 %v5925_v18 }
 0x187   :  { %1260 = vmatpush.bf16.msra.mxu2 %v5929_v21  ;;  %1273 = vmatpush.bf16.msra.mxu3 %v5936_v33 }
 0x18a   :  { %1343 = vmatpush.bf16.msrb.mxu0 %v5981_v15  ;;  %1356 = vmatpush.bf16.msrb.mxu1 %v7578_v57 }
 0x18b   :  { %1369 = vmatpush.bf16.msrb.mxu2 %v7579_v51  ;;  %1382 = vmatpush.bf16.msrb.mxu3 %v7580_v19  ;;  %v7613_v19 = vld [vmem:[#allocation20_spill] sm:$0xff]  ;;  %v7614_v51 = vld [vmem:[#allocation37_spill] sm:$0xff] }
 0x18c   :  { %v238_v57 = vadd.f32 %v7614_v51, %v7613_v19 }
 0x18e   :  { %1344 = vmatpush.bf16.msrb.mxu0 %v7581_v16  ;;  %1357 = vmatpush.bf16.msrb.mxu1 %v7582_v48 }
 0x18f   :  { %1370 = vmatpush.bf16.msrb.mxu2 %v7583_v11  ;;  %1383 = vmatpush.bf16.msrb.mxu3 %v7584_v46 }
 0x192   :  { %1345 = vmatpush.bf16.msrb.mxu0 %v7585_v47  ;;  %1358 = vmatpush.bf16.msrb.mxu1 %v7586_v61 }
 0x193   :  { %1371 = vmatpush.bf16.msrb.mxu2 %v7587_v28  ;;  %1384 = vmatpush.bf16.msrb.mxu3 %v7588_v34  ;;  %v7612_v28 = vld [vmem:[#allocation36_spill] sm:$0xff] }
 0x196   :  { %1346 = vmatpush.bf16.msrb.mxu0 %v7589_v8  ;;  %1359 = vmatpush.bf16.msrb.mxu1 %v7590_v49  ;;  %v7601_v49 = vld [vmem:[#allocation85_spill] sm:$0xff] }
 0x197   :  { %1372 = vmatpush.bf16.msrb.mxu2 %v7591_v23  ;;  %1385 = vmatpush.bf16.msrb.mxu3 %v7592_v36  ;;  %v7602_v23 = vld [vmem:[#allocation86_spill] sm:$0xff]  ;;  %v7603_v36 = vld [vmem:[#allocation87_spill] sm:$0xff]  ;;  %v7609_v8 = vld [vmem:[#allocation13_spill] sm:$0xff] }
 0x19a   :  { %1347 = vmatpush.bf16.msrb.mxu0 %v7593_v56  ;;  %1360 = vmatpush.bf16.msrb.mxu1 %v7594_v40  ;;  %v7604_v56 = vld [vmem:[#allocation91_spill] sm:$0xff]  ;;  %v7605_v40 = vld [vmem:[#allocation94_spill] sm:$0xff] }
 0x19b   :  { %1373 = vmatpush.bf16.msrb.mxu2 %v7595_v27  ;;  %1386 = vmatpush.bf16.msrb.mxu3 %v7596_v39  ;;  %v7606_v27 = vld [vmem:[#allocation95_spill] sm:$0xff]  ;;  %v7607_v39 = vld [vmem:[#allocation96_spill] sm:$0xff] }
 0x19e   :  { %1348 = vmatpush.bf16.msrb.mxu0 %v7597_v37  ;;  %1361 = vmatpush.bf16.msrb.mxu1 %v7598_v3  ;;  %v7608_v37 = vld [vmem:[#allocation97_spill] sm:$0xff] }
 0x19f   :  { %1374 = vmatpush.bf16.msrb.mxu2 %v7599_v2  ;;  %1387 = vmatpush.bf16.msrb.mxu3 %v7600_v1 }
 0x1a2   :  { %1349 = vmatpush.bf16.msrb.mxu0 %v7601_v49  ;;  %1362 = vmatpush.bf16.msrb.mxu1 %v7602_v23 }
 0x1a3   :  { %1375 = vmatpush.bf16.msrb.mxu2 %v7603_v36  ;;  %1388 = vmatpush.bf16.msrb.mxu3 %v7604_v56  ;;  %v7610_v56 = vld [vmem:[#allocation35_spill] sm:$0xff] }
 0x1a4   :  { %v156_v34 = vadd.f32 %v7610_v56, %v7609_v8 }
 0x1a6   :  { %1350 = vmatpush.bf16.msrb.mxu0 %v7605_v40  ;;  %1363 = vmatpush.bf16.msrb.mxu1 %v7606_v27  ;;  %v7611_v40 = vld [vmem:[#allocation14_spill] sm:$0xff] }
 0x1a7   :  { %1376 = vmatpush.bf16.msrb.mxu2 %v7607_v39  ;;  %1389 = vmatpush.bf16.msrb.mxu3 %v7608_v37  ;;  %v197_v27 = vadd.f32 %v7612_v28, %v7611_v40 }
 0x1e5   :  { %v6336_v3 = vpop.f32.mrf.mxu0  ;;  %v6338_v2 = vpop.f32.mrf.mxu1 }
 0x1ec   :  { %v6340_v1 = vpop.f32.mrf.mxu2  ;;  %v6342_v49 = vpop.f32.mrf.mxu3 }
 0x1ed   :  { %v906_v23 = vpop.f32.mrf.mxu0  ;;  %v919_v36 = vpop.f32.mrf.mxu1 }
 0x1f4   :  { %v932_v61 = vpop.f32.mrf.mxu2  ;;  %v945_v39 = vpop.f32.mrf.mxu3 }
 0x1f5   :  { %v1116_v47 = vpop.f32.mrf.mxu0  ;;  %v1129_v37 = vpop.f32.mrf.mxu1 }
 0x1f6   :  { %v1159_v46 = vadd.f32 %v1116_v47, %v156_v34  ;;  %v1160_v11 = vadd.f32 %v1129_v37, %v197_v27  ;;  %v7615_v47 = vld [vmem:[#allocation32_spill] sm:$0xff]  ;;  %v7616_v34 = vld [vmem:[#allocation38_spill] sm:$0xff] }
 0x1f7   :  { %v279_v51 = vadd.f32 %v7616_v34, %v7615_v47 }
 0x1f8   :  { %v4587_v48 = vmul.f32 -1.442695, %v1159_v46  ;;  %v4588_v16 = vmul.f32 -1.442695, %v1160_v11 }
 0x1fa   :  { %5404 = vpow2.f32 %v4587_v48 }
 0x1fb   :  { %5406 = vpow2.f32 %v4588_v16 }
 0x1fc   :  { %v1142_v23 = vpop.f32.mrf.mxu2  ;;  %v1155_v36 = vpop.f32.mrf.mxu3 }
 0x1fd   :  { %v1161_v15 = vadd.f32 %v1142_v23, %v238_v57  ;;  %v1118_v56 = vpop.f32.mrf.mxu0  ;;  %v1131_v8 = vpop.f32.mrf.mxu1  ;;  %v1162_v37 = vadd.f32 %v1155_v36, %v279_v51 }
 0x1ff   :  { %v4589_v33 = vmul.f32 -1.442695, %v1161_v15 }
 0x200   :  { %v5405_v28 = vpop.eup %5404 }
 0x201   :  { %v5407_v61 = vpop.eup %5406  ;;  %v1172_v39 = vadd.f32 1.0, %v5405_v28  ;;  %5408 = vpow2.f32 %v4589_v33 }
 0x202   :  { %v1173_v40 = vadd.f32 1.0, %v5407_v61 }
 0x203   :  { %5410 = vrcp.f32 %v1172_v39  ;;  %v1186_v28 = vand.u32 2147483648, %v1172_v39  ;;  %vm1180_vm11 = vweird.f32 %v1172_v39 }
 0x204   :  { %5412 = vrcp.f32 %v1173_v40  ;;  %v1144_v46 = vpop.f32.mrf.mxu2  ;;  %v1157_v11 = vpop.f32.mrf.mxu3  ;;  %v1201_v33 = vand.u32 2147483648, %v1173_v40  ;;  %v1199_v19 = vand.u32 2147483647, %v1173_v40  ;;  %vm1195_vm12 = vweird.f32 %v1173_v40 }
 0x205   :  { %v1184_v46 = vand.u32 2147483647, %v1172_v39 }
 0x206   :  { %vm1200_vm0 = vcmp.eq.f32.partialorder %v1199_v19, 8.507059e+37 }
 0x207   :  { %v5409_v48 = vpop.eup %5408  ;;  %vm1185_vm15 = vcmp.eq.f32.partialorder %v1184_v46, 8.507059e+37 }
 0x208   :  { %v1174_v16 = vadd.f32 1.0, %v5409_v48  ;;  %v1187_v48 = vor.u32 1.1754944e-38, %v1186_v28 }
 0x209   :  { %v5411_v27 = vpop.eup %5410 }
 0x20a   :  { %v5413_v57 = vpop.eup %5412  ;;  %v1176_v23 = vmul.f32 %v5411_v27, %v1172_v39  ;;  %5414 = vrcp.f32 %v1174_v16  ;;  %vm1181_vm9 = vweird.f32 %v5411_v27  ;;  %v1216_v28 = vand.u32 2147483648, %v1174_v16 }
 0x20b   :  { %v1191_v15 = vmul.f32 %v5413_v57, %v1173_v40  ;;  %5416 = vtanh.f32 %v1162_v37  ;;  %vm1196_vm10 = vweird.f32 %v5413_v57  ;;  %vm1182_vm13 = vmor %vm1180_vm11, %vm1181_vm9  ;;  %vm1210_vm2 = vweird.f32 %v1174_v16 }
 0x20c   :  { %v1177_v8 = vsub.f32 1.0, %v1176_v23  ;;  %vm1197_vm14 = vmor %vm1195_vm12, %vm1196_vm10  ;;  %v1202_v23 = vor.u32 1.1754944e-38, %v1201_v33  ;;  %v1217_v46 = vor.u32 1.1754944e-38, %v1216_v28  ;;  %v7635_v28 = vld [vmem:[#allocation116_spill] sm:$0xff] }
 0x20d   :  { %v1192_v56 = vsub.f32 1.0, %v1191_v15 }
 0x20e   :  { %v1178_v61 = vmul.f32 %v5411_v27, %v1177_v8 }
 0x20f   :  { %v1193_v11 = vmul.f32 %v5413_v57, %v1192_v56 }
 0x210   :  { %v5415_v21 = vpop.eup %5414  ;;  %v1179_v34 = vadd.f32 %v5411_v27, %v1178_v61 }
 0x211   :  { %v1206_v36 = vmul.f32 %v5415_v21, %v1174_v16  ;;  %v1194_v51 = vadd.f32 %v5413_v57, %v1193_v11  ;;  %v5417_v37 = vpop.eup %5416  ;;  %vm1211_vm1 = vweird.f32 %v5415_v21 }
 0x212   :  { %v1183_v15 = vsel %vm1182_vm13, %v5411_v27, %v1179_v34  ;;  %v1214_v27 = vand.u32 2147483647, %v1174_v16  ;;  %vm1212_vm3 = vmor %vm1210_vm2, %vm1211_vm1  ;;  %v7623_v16 = vld [vmem:[#allocation103_spill] sm:$0xff]  ;;  %v7624_v34 = vld [vmem:[#allocation104_spill] sm:$0xff] }
 0x213   :  { %v1207_v47 = vsub.f32 1.0, %v1206_v36  ;;  %v1188_v8 = vsel %vm1185_vm15, %v1187_v48, %v1183_v15  ;;  %v1198_v18 = vsel %vm1197_vm14, %v5413_v57, %v1194_v51  ;;  %v7625_v36 = vld [vmem:[#allocation105_spill] sm:$0xff]  ;;  %v7626_v48 = vld [vmem:[#allocation106_spill] sm:$0xff]  ;;  %v7627_v51 = vld [vmem:[#allocation107_spill] sm:$0xff] }
 0x214   :  { %v1203_v56 = vsel %vm1200_vm0, %v1202_v23, %v1198_v18  ;;  %v1222_v6 = vmul.f32 %v5417_v37, %v1188_v8  ;;  %vm1215_vm4 = vcmp.eq.f32.partialorder %v1214_v27, 8.507059e+37  ;;  %v7628_v23 = vld [vmem:[#allocation108_spill] sm:$0xff]  ;;  %v7629_v15 = vld [vmem:[#allocation109_spill] sm:$0xff]  ;;  %v7630_v37 = vld [vmem:[#allocation110_spill] sm:$0xff] }
 0x215   :  { %v1208_v62 = vmul.f32 %v5415_v21, %v1207_v47  ;;  %v1221_v61 = vmul.f32 %v1203_v56, %v7617_v53  ;;  %v7618_v53 = vld [vmem:[#allocation98_spill] sm:$0xff]  ;;  %v7631_v8 = vld [vmem:[#allocation111_spill] sm:$0xff]  ;;  %v7632_v56 = vld [vmem:[#allocation112_spill] sm:$0xff] }
 0x216   :  { %v7622_v47 = vld [vmem:[#allocation102_spill] sm:$0xff]  ;;  %v7636_v27 = vld [vmem:[#allocation117_spill] sm:$0xff] }
 0x217   :  { %v6353_v39 = vadd.f32 %v1222_v6, %v1221_v61  ;;  %v1209_v40 = vadd.f32 %v5415_v21, %v1208_v62  ;;  %v7619_v62 = vld [vmem:[#allocation99_spill] sm:$0xff]  ;;  %v7620_v6 = vld [vmem:[#allocation100_spill] sm:$0xff]  ;;  %v7633_v61 = vld [vmem:[#allocation113_spill] sm:$0xff] }
 0x219   :  { %5418 = vtanh.f32 %v6353_v39  ;;  %v1213_v33 = vsel %vm1212_vm3, %v5415_v21, %v1209_v40  ;;  %v7621_v21 = vld [vmem:[#allocation101_spill] sm:$0xff]  ;;  %v7634_v40 = vld [vmem:[#allocation115_spill] sm:$0xff] }
 0x21a   :  { %v1218_v19 = vsel %vm1215_vm4, %v1217_v46, %v1213_v33  ;;  %v7637_v33 = vld [vmem:[#allocation118_spill] sm:$0xff]  ;;  %v7638_v46 = vld [vmem:[#allocation119_spill] sm:$0xff] }
 0x21f   :  { %v5419_v57 = vpop.eup %5418 }
 0x220   :  { %v1225_v18 = vmul.f32 %v5419_v57, %v1218_v19  ;;  %v7639_v57 = vld [vmem:[#allocation120_spill] sm:$0xff]  ;;  %v7640_v19 = vld [vmem:[#allocation121_spill] sm:$0xff] }
 0x222   :  { %v6356_v11 = vpack.c.bf16 %v1225_v18, %v1225_v18  ;;  %v7641_v18 = vld [vmem:[#allocation122_spill] sm:$0xff] }
 0x224   :  { %1235 = vmatmul.bf16.vlgmr.msra.gmra.mxu0 %v6356_v11  ;;  %1248 = vmatmul.bf16.vlgmr.msra.gmra.mxu1 %v6356_v11 }
 0x225   :  { %1261 = vmatmul.bf16.vlgmr.msra.gmra.mxu2 %v6356_v11  ;;  %1274 = vmatmul.bf16.vlgmr.msra.gmra.mxu3 %v6356_v11 }
 0x226   :  { %1395 = vmatpush.bf16.msra.mxu0 %v7618_v53  ;;  %1408 = vmatpush.bf16.msra.mxu1 %v7619_v62 }
 0x227   :  { %1421 = vmatpush.bf16.msra.mxu2 %v7620_v6  ;;  %1434 = vmatpush.bf16.msra.mxu3 %v7621_v21 }
 0x22a   :  { %1396 = vmatpush.bf16.msra.mxu0 %v7622_v47  ;;  %1409 = vmatpush.bf16.msra.mxu1 %v7623_v16 }
 0x22b   :  { %1422 = vmatpush.bf16.msra.mxu2 %v7624_v34  ;;  %1435 = vmatpush.bf16.msra.mxu3 %v7625_v36 }
 0x22e   :  { %1397 = vmatpush.bf16.msra.mxu0 %v7626_v48  ;;  %1410 = vmatpush.bf16.msra.mxu1 %v7627_v51 }
 0x22f   :  { %1423 = vmatpush.bf16.msra.mxu2 %v7628_v23  ;;  %1436 = vmatpush.bf16.msra.mxu3 %v7629_v15 }
 0x232   :  { %1398 = vmatpush.bf16.msra.mxu0 %v7630_v37  ;;  %1411 = vmatpush.bf16.msra.mxu1 %v7631_v8  ;;  %v7642_v8 = vld [vmem:[#allocation123_spill] sm:$0xff] }
 0x233   :  { %1424 = vmatpush.bf16.msra.mxu2 %v7632_v56  ;;  %1437 = vmatpush.bf16.msra.mxu3 %v7633_v61 }
 0x236   :  { %1399 = vmatpush.bf16.msra.mxu0 %v7634_v40  ;;  %1412 = vmatpush.bf16.msra.mxu1 %v7635_v28 }
 0x237   :  { %1425 = vmatpush.bf16.msra.mxu2 %v7636_v27  ;;  %1438 = vmatpush.bf16.msra.mxu3 %v7637_v33 }
 0x23a   :  { %1400 = vmatpush.bf16.msra.mxu0 %v7638_v46  ;;  %1413 = vmatpush.bf16.msra.mxu1 %v7639_v57  ;;  %v7643_v57 = vld [vmem:[#allocation88_spill] sm:$0xff] }
 0x23b   :  { %1426 = vmatpush.bf16.msra.mxu2 %v7640_v19  ;;  %1439 = vmatpush.bf16.msra.mxu3 %v7641_v18  ;;  %v905_v19 = vadd.f32 %v6336_v3, %v7643_v57  ;;  %v7644_v18 = vld [vmem:[#allocation89_spill] sm:$0xff] }
 0x23e   :  { %1401 = vmatpush.bf16.msra.mxu0 %v7642_v8  ;;  %1414 = vmatpush.bf16.msra.mxu1 %v6222_v59  ;;  %v918_v8 = vadd.f32 %v6338_v2, %v7644_v18 }
 0x23f   :  { %1427 = vmatpush.bf16.msra.mxu2 %v6228_v63  ;;  %1440 = vmatpush.bf16.msra.mxu3 %v6230_v14 }
 0x242   :  { %1402 = vmatpush.bf16.msra.mxu0 %v6235_v20  ;;  %1415 = vmatpush.bf16.msra.mxu1 %v6248_v58  ;;  %v7645_v20 = vld [vmem:[#allocation90_spill] sm:$0xff] }
 0x243   :  { %1428 = vmatpush.bf16.msra.mxu2 %v6250_v43  ;;  %1441 = vmatpush.bf16.msra.mxu3 %v6257_v7  ;;  %v931_v58 = vadd.f32 %v6340_v1, %v7645_v20 }
 0x2a1   :  { %v1236_v46 = vpop.f32.mrf.mxu0  ;;  %v1249_v59 = vpop.f32.mrf.mxu1 }
 0x2a2   :  { %v1237_v33 = vadd.f32 %v1236_v46, %v905_v19  ;;  %v1250_v63 = vadd.f32 %v1249_v59, %v918_v8 }
 0x2a4   :  { %v4590_v27 = vmul.f32 -1.442695, %v1237_v33  ;;  %v4591_v14 = vmul.f32 -1.442695, %v1250_v63 }
 0x2a6   :  { %5420 = vpow2.f32 %v4590_v27  ;;  %v7646_v27 = vld [vmem:[#allocation114_spill] sm:$0xff] }
 0x2a7   :  { %5422 = vpow2.f32 %v4591_v14  ;;  %v944_v1 = vadd.f32 %v6342_v49, %v7646_v27 }
 0x2a8   :  { %v1262_v43 = vpop.f32.mrf.mxu2  ;;  %v1275_v28 = vpop.f32.mrf.mxu3 }
 0x2a9   :  { %v1263_v7 = vadd.f32 %v1262_v43, %v931_v58  ;;  %v1238_v40 = vpop.f32.mrf.mxu0  ;;  %v1251_v61 = vpop.f32.mrf.mxu1  ;;  %v1276_v46 = vadd.f32 %v1275_v28, %v944_v1 }
 0x2ab   :  { %v4592_v3 = vmul.f32 -1.442695, %v1263_v7 }
 0x2ac   :  { %v5421_v57 = vpop.eup %5420 }
 0x2ad   :  { %v5423_v56 = vpop.eup %5422  ;;  %v1288_v2 = vadd.f32 1.0, %v5421_v57  ;;  %5424 = vpow2.f32 %v4592_v3 }
 0x2ae   :  { %v1289_v18 = vadd.f32 1.0, %v5423_v56 }
 0x2af   :  { %5426 = vrcp.f32 %v1288_v2  ;;  %v1302_v57 = vand.u32 2147483648, %v1288_v2  ;;  %v1300_v3 = vand.u32 2147483647, %v1288_v2  ;;  %vm1296_vm7 = vweird.f32 %v1288_v2 }
 0x2b0   :  { %5428 = vrcp.f32 %v1289_v18  ;;  %v1264_v59 = vpop.f32.mrf.mxu2  ;;  %v1277_v63 = vpop.f32.mrf.mxu3  ;;  %v1317_v56 = vand.u32 2147483648, %v1289_v18  ;;  %vm1311_vm8 = vweird.f32 %v1289_v18 }
 0x2b1   :  { %v1315_v63 = vand.u32 2147483647, %v1289_v18  ;;  %vm1301_vm11 = vcmp.eq.f32.partialorder %v1300_v3, 8.507059e+37 }
 0x2b3   :  { %v5425_v8 = vpop.eup %5424  ;;  %vm1316_vm12 = vcmp.eq.f32.partialorder %v1315_v63, 8.507059e+37 }
 0x2b4   :  { %v1290_v14 = vadd.f32 1.0, %v5425_v8  ;;  %v1303_v8 = vor.u32 1.1754944e-38, %v1302_v57 }
 0x2b5   :  { %v5427_v33 = vpop.eup %5426 }
 0x2b6   :  { %v5429_v58 = vpop.eup %5428  ;;  %v1292_v43 = vmul.f32 %v5427_v33, %v1288_v2  ;;  %5430 = vrcp.f32 %v1290_v14  ;;  %vm1297_vm5 = vweird.f32 %v5427_v33  ;;  %v1332_v57 = vand.u32 2147483648, %v1290_v14 }
 0x2b7   :  { %v1307_v7 = vmul.f32 %v5429_v58, %v1289_v18  ;;  %5432 = vtanh.f32 %v1276_v46  ;;  %vm1312_vm6 = vweird.f32 %v5429_v58  ;;  %vm1298_vm9 = vmor %vm1296_vm7, %vm1297_vm5  ;;  %vm1326_vm14 = vweird.f32 %v1290_v14 }
 0x2b8   :  { %v1293_v61 = vsub.f32 1.0, %v1292_v43  ;;  %vm1313_vm10 = vmor %vm1311_vm8, %vm1312_vm6  ;;  %v1318_v43 = vor.u32 1.1754944e-38, %v1317_v56  ;;  %v1333_v3 = vor.u32 1.1754944e-38, %v1332_v57  ;;  %v7665_v57 = vld [vmem:[#allocation69_spill] sm:$0xff] }
 0x2b9   :  { %v1308_v40 = vsub.f32 1.0, %v1307_v7 }
 0x2ba   :  { %v1294_v19 = vmul.f32 %v5427_v33, %v1293_v61 }
 0x2bb   :  { %v1309_v59 = vmul.f32 %v5429_v58, %v1308_v40 }
 0x2bc   :  { %v5431_v20 = vpop.eup %5430  ;;  %v1295_v49 = vadd.f32 %v5427_v33, %v1294_v19 }
 0x2bd   :  { %v1322_v28 = vmul.f32 %v5431_v20, %v1290_v14  ;;  %v1310_v1 = vadd.f32 %v5429_v58, %v1309_v59  ;;  %v5433_v46 = vpop.eup %5432  ;;  %vm1327_vm13 = vweird.f32 %v5431_v20 }
 0x2be   :  { %v1299_v7 = vsel %vm1298_vm9, %v5427_v33, %v1295_v49  ;;  %v1330_v33 = vand.u32 2147483647, %v1290_v14  ;;  %vm1328_vm15 = vmor %vm1326_vm14, %vm1327_vm13  ;;  %v7653_v14 = vld [vmem:[#allocation51_spill] sm:$0xff]  ;;  %v7654_v49 = vld [vmem:[#allocation54_spill] sm:$0xff] }
 0x2bf   :  { %v1323_v27 = vsub.f32 1.0, %v1322_v28  ;;  %v1304_v61 = vsel %vm1301_vm11, %v1303_v8, %v1299_v7  ;;  %v1314_v37 = vsel %vm1313_vm10, %v5429_v58, %v1310_v1  ;;  %v7655_v28 = vld [vmem:[#allocation55_spill] sm:$0xff]  ;;  %v7656_v8 = vld [vmem:[#allocation56_spill] sm:$0xff]  ;;  %v7657_v1 = vld [vmem:[#allocation57_spill] sm:$0xff] }
 0x2c0   :  { %v1319_v40 = vsel %vm1316_vm12, %v1318_v43, %v1314_v37  ;;  %v1338_v15 = vmul.f32 %v5433_v46, %v1304_v61  ;;  %vm1331_vm0 = vcmp.eq.f32.partialorder %v1330_v33, 8.507059e+37  ;;  %v7658_v43 = vld [vmem:[#allocation58_spill] sm:$0xff]  ;;  %v7659_v7 = vld [vmem:[#allocation59_spill] sm:$0xff]  ;;  %v7660_v46 = vld [vmem:[#allocation60_spill] sm:$0xff] }
 0x2c1   :  { %v1337_v23 = vmul.f32 %v1319_v40, %v6261_v26  ;;  %v1324_v19 = vmul.f32 %v5431_v20, %v1323_v27  ;;  %v7648_v26 = vld [vmem:[#allocation28_spill] sm:$0xff]  ;;  %v7652_v27 = vld [vmem:[#allocation33_spill] sm:$0xff]  ;;  %v7661_v61 = vld [vmem:[#allocation63_spill] sm:$0xff] }
 0x2c2   :  { %v7662_v40 = vld [vmem:[#allocation64_spill] sm:$0xff]  ;;  %v7666_v33 = vld [vmem:[#allocation70_spill] sm:$0xff] }
 0x2c3   :  { %v6403_v2 = vadd.f32 %v1338_v15, %v1337_v23  ;;  %v1325_v18 = vadd.f32 %v5431_v20, %v1324_v19  ;;  %v7650_v23 = vld [vmem:[#allocation30_spill] sm:$0xff]  ;;  %v7651_v15 = vld [vmem:[#allocation31_spill] sm:$0xff]  ;;  %v7663_v19 = vld [vmem:[#allocation65_spill] sm:$0xff] }
 0x2c5   :  { %5434 = vtanh.f32 %v6403_v2  ;;  %v1329_v56 = vsel %vm1328_vm15, %v5431_v20, %v1325_v18  ;;  %v7647_v20 = vld [vmem:[#allocation27_spill] sm:$0xff]  ;;  %v7664_v18 = vld [vmem:[#allocation66_spill] sm:$0xff] }
 0x2c6   :  { %v1334_v59 = vsel %vm1331_vm0, %v1333_v3, %v1329_v56  ;;  %v7667_v56 = vld [vmem:[#allocation71_spill] sm:$0xff]  ;;  %v7668_v3 = vld [vmem:[#allocation72_spill] sm:$0xff] }
 0x2cb   :  { %v5435_v58 = vpop.eup %5434 }
 0x2cc   :  { %v1341_v37 = vmul.f32 %v5435_v58, %v1334_v59  ;;  %v7669_v58 = vld [vmem:[#allocation73_spill] sm:$0xff]  ;;  %v7670_v59 = vld [vmem:[#allocation74_spill] sm:$0xff] }
 0x2ce   :  { %v1342_v63 = vpack.c.bf16 %v1341_v37, %v1341_v37  ;;  %v7671_v37 = vld [vmem:[#allocation75_spill] sm:$0xff] }
 0x2d0   :  { %1351 = vmatmul.bf16.vlgmr.msrb.gmra.mxu0 %v1342_v63  ;;  %1364 = vmatmul.bf16.vlgmr.msrb.gmra.mxu1 %v1342_v63 }
 0x2d1   :  { %1377 = vmatmul.bf16.vlgmr.msrb.gmra.mxu2 %v1342_v63  ;;  %1390 = vmatmul.bf16.vlgmr.msrb.gmra.mxu3 %v1342_v63  ;;  %v7672_v63 = vld [vmem:[#allocation78_spill] sm:$0xff] }
 0x2d2   :  { %1515 = vmatpush.bf16.msrb.mxu0 %v5773_v9  ;;  %1528 = vmatpush.bf16.msrb.mxu1 %v5775_v10 }
 0x2d3   :  { %1541 = vmatpush.bf16.msrb.mxu2 %v5777_v13  ;;  %1554 = vmatpush.bf16.msrb.mxu3 %v5790_v25 }
 0x2d6   :  { %1516 = vmatpush.bf16.msrb.mxu0 %v5781_v17  ;;  %1529 = vmatpush.bf16.msrb.mxu1 %v5788_v22 }
 0x2d7   :  { %1542 = vmatpush.bf16.msrb.mxu2 %v5792_v29  ;;  %1555 = vmatpush.bf16.msrb.mxu3 %v5829_v38 }
 0x2da   :  { %1517 = vmatpush.bf16.msrb.mxu0 %v5796_v31  ;;  %1530 = vmatpush.bf16.msrb.mxu1 %v5800_v32 }
 0x2db   :  { %1543 = vmatpush.bf16.msrb.mxu2 %v5832_v42  ;;  %1556 = vmatpush.bf16.msrb.mxu3 %v5834_v44 }
 0x2de   :  { %1518 = vmatpush.bf16.msrb.mxu0 %v5848_v50  ;;  %1531 = vmatpush.bf16.msrb.mxu1 %v5852_v54 }
 0x2df   :  { %1544 = vmatpush.bf16.msrb.mxu2 %v5854_v55  ;;  %1557 = vmatpush.bf16.msrb.mxu3 %v5863_v60 }
 0x2e0   :  { %1403 = vmatmul.bf16.vlgmr.msra.gmra.mxu0 %v6356_v11  ;;  %1416 = vmatmul.bf16.vlgmr.msra.gmra.mxu1 %v6356_v11 }
 0x2e1   :  { %1429 = vmatmul.bf16.vlgmr.msra.gmra.mxu2 %v6356_v11  ;;  %1442 = vmatmul.bf16.vlgmr.msra.gmra.mxu3 %v6356_v11  ;;  %v7649_v11 = vld [vmem:[#allocation29_spill] sm:$0xff] }
 0x2e2   :  { %1519 = vmatpush.bf16.msrb.mxu0 %v5867_v0  ;;  %1532 = vmatpush.bf16.msrb.mxu1 %v5870_v4 }
 0x2e3   :  { %1545 = vmatpush.bf16.msrb.mxu2 %v5872_v5  ;;  %1558 = vmatpush.bf16.msrb.mxu3 %v5878_v12 }
 0x2e6   :  { %1520 = vmatpush.bf16.msrb.mxu0 %v5889_v24  ;;  %1533 = vmatpush.bf16.msrb.mxu1 %v5893_v30 }
 0x2e7   :  { %1546 = vmatpush.bf16.msrb.mxu2 %v5897_v35  ;;  %1559 = vmatpush.bf16.msrb.mxu3 %v5900_v41 }
 0x2ea   :  { %1521 = vmatpush.bf16.msrb.mxu0 %v5903_v45  ;;  %1534 = vmatpush.bf16.msrb.mxu1 %v5906_v52 }
 0x2eb   :  { %1547 = vmatpush.bf16.msrb.mxu2 %v7647_v20  ;;  %1560 = vmatpush.bf16.msrb.mxu3 %v7648_v26 }
 0x2ee   :  { %1522 = vmatpush.bf16.msrb.mxu0 %v7649_v11  ;;  %1535 = vmatpush.bf16.msrb.mxu1 %v7650_v23 }
 0x2ef   :  { %1548 = vmatpush.bf16.msrb.mxu2 %v7651_v15  ;;  %1561 = vmatpush.bf16.msrb.mxu3 %v7652_v27  ;;  %v7689_v27 = vld [vmem:[#allocation20_spill] sm:$0xff]  ;;  %v7690_v15 = vld [vmem:[#allocation41_spill] sm:$0xff] }
 0x2f0   :  { %v241_v23 = vadd.f32 %v7690_v15, %v7689_v27 }
 0x2f2   :  { %1631 = vmatpush.bf16.msra.mxu0 %v7653_v14  ;;  %1644 = vmatpush.bf16.msra.mxu1 %v7654_v49 }
 0x2f3   :  { %1657 = vmatpush.bf16.msra.mxu2 %v7655_v28  ;;  %1670 = vmatpush.bf16.msra.mxu3 %v7656_v8 }
 0x2f6   :  { %1632 = vmatpush.bf16.msra.mxu0 %v7657_v1  ;;  %1645 = vmatpush.bf16.msra.mxu1 %v7658_v43 }
 0x2f7   :  { %1658 = vmatpush.bf16.msra.mxu2 %v7659_v7  ;;  %1671 = vmatpush.bf16.msra.mxu3 %v7660_v46  ;;  %v7688_v7 = vld [vmem:[#allocation40_spill] sm:$0xff] }
 0x2fa   :  { %1633 = vmatpush.bf16.msra.mxu0 %v7661_v61  ;;  %1646 = vmatpush.bf16.msra.mxu1 %v7662_v40  ;;  %v7673_v40 = vld [vmem:[#allocation79_spill] sm:$0xff]  ;;  %v7685_v61 = vld [vmem:[#allocation13_spill] sm:$0xff] }
 0x2fb   :  { %1659 = vmatpush.bf16.msra.mxu2 %v7663_v19  ;;  %1672 = vmatpush.bf16.msra.mxu3 %v7664_v18  ;;  %v7674_v19 = vld [vmem:[#allocation82_spill] sm:$0xff]  ;;  %v7675_v18 = vld [vmem:[#allocation83_spill] sm:$0xff] }
 0x2fe   :  { %1634 = vmatpush.bf16.msra.mxu0 %v7665_v57  ;;  %1647 = vmatpush.bf16.msra.mxu1 %v7666_v33  ;;  %v7676_v57 = vld [vmem:[#allocation84_spill] sm:$0xff]  ;;  %v7677_v33 = vld [vmem:[#allocation85_spill] sm:$0xff] }
 0x2ff   :  { %1660 = vmatpush.bf16.msra.mxu2 %v7667_v56  ;;  %1673 = vmatpush.bf16.msra.mxu3 %v7668_v3  ;;  %v7678_v56 = vld [vmem:[#allocation86_spill] sm:$0xff]  ;;  %v7679_v3 = vld [vmem:[#allocation87_spill] sm:$0xff] }
 0x302   :  { %1635 = vmatpush.bf16.msra.mxu0 %v7669_v58  ;;  %1648 = vmatpush.bf16.msra.mxu1 %v7670_v59  ;;  %v7680_v58 = vld [vmem:[#allocation91_spill] sm:$0xff]  ;;  %v7681_v59 = vld [vmem:[#allocation94_spill] sm:$0xff] }
 0x303   :  { %1661 = vmatpush.bf16.msra.mxu2 %v7671_v37  ;;  %1674 = vmatpush.bf16.msra.mxu3 %v7672_v63  ;;  %v7682_v37 = vld [vmem:[#allocation95_spill] sm:$0xff]  ;;  %v7683_v63 = vld [vmem:[#allocation96_spill] sm:$0xff] }
 0x306   :  { %1636 = vmatpush.bf16.msra.mxu0 %v7673_v40  ;;  %1649 = vmatpush.bf16.msra.mxu1 %v7674_v19  ;;  %v7684_v40 = vld [vmem:[#allocation97_spill] sm:$0xff] }
 0x307   :  { %1662 = vmatpush.bf16.msra.mxu2 %v7675_v18  ;;  %1675 = vmatpush.bf16.msra.mxu3 %v7676_v57 }
 0x30a   :  { %1637 = vmatpush.bf16.msra.mxu0 %v7677_v33  ;;  %1650 = vmatpush.bf16.msra.mxu1 %v7678_v56 }
 0x30b   :  { %1663 = vmatpush.bf16.msra.mxu2 %v7679_v3  ;;  %1676 = vmatpush.bf16.msra.mxu3 %v7680_v58  ;;  %v7686_v58 = vld [vmem:[#allocation39_spill] sm:$0xff] }
 0x30c   :  { %v159_v46 = vadd.f32 %v7686_v58, %v7685_v61 }
 0x30e   :  { %1638 = vmatpush.bf16.msra.mxu0 %v7681_v59  ;;  %1651 = vmatpush.bf16.msra.mxu1 %v7682_v37  ;;  %v7687_v59 = vld [vmem:[#allocation14_spill] sm:$0xff] }
 0x30f   :  { %1664 = vmatpush.bf16.msra.mxu2 %v7683_v63  ;;  %1677 = vmatpush.bf16.msra.mxu3 %v7684_v40  ;;  %v200_v37 = vadd.f32 %v7688_v7, %v7687_v59 }
 0x34d   :  { %v6474_v19 = vpop.f32.mrf.mxu0  ;;  %v6476_v18 = vpop.f32.mrf.mxu1 }
 0x354   :  { %v6478_v57 = vpop.f32.mrf.mxu2  ;;  %v6480_v33 = vpop.f32.mrf.mxu3 }
 0x355   :  { %v1354_v56 = vpop.f32.mrf.mxu0  ;;  %v1367_v3 = vpop.f32.mrf.mxu1 }
 0x35c   :  { %v1380_v43 = vpop.f32.mrf.mxu2  ;;  %v1393_v63 = vpop.f32.mrf.mxu3 }
 0x35d   :  { %v1404_v1 = vpop.f32.mrf.mxu0  ;;  %v1417_v40 = vpop.f32.mrf.mxu1 }
 0x35e   :  { %v1447_v8 = vadd.f32 %v1404_v1, %v159_v46  ;;  %v1448_v28 = vadd.f32 %v1417_v40, %v200_v37  ;;  %v7691_v1 = vld [vmem:[#allocation32_spill] sm:$0xff]  ;;  %v7692_v46 = vld [vmem:[#allocation42_spill] sm:$0xff] }
 0x35f   :  { %v282_v15 = vadd.f32 %v7692_v46, %v7691_v1 }
 0x360   :  { %v4593_v49 = vmul.f32 -1.442695, %v1447_v8  ;;  %v4594_v14 = vmul.f32 -1.442695, %v1448_v28 }
 0x362   :  { %5436 = vpow2.f32 %v4593_v49 }
 0x363   :  { %5438 = vpow2.f32 %v4594_v14 }
 0x364   :  { %v1430_v56 = vpop.f32.mrf.mxu2  ;;  %v1443_v3 = vpop.f32.mrf.mxu3 }
 0x365   :  { %v1449_v11 = vadd.f32 %v1430_v56, %v241_v23  ;;  %v1406_v58 = vpop.f32.mrf.mxu0  ;;  %v1419_v61 = vpop.f32.mrf.mxu1  ;;  %v1450_v37 = vadd.f32 %v1443_v3, %v282_v15 }
 0x367   :  { %v4595_v26 = vmul.f32 -1.442695, %v1449_v11 }
 0x368   :  { %v5437_v7 = vpop.eup %5436 }
 0x369   :  { %v5439_v43 = vpop.eup %5438  ;;  %v1460_v63 = vadd.f32 1.0, %v5437_v7  ;;  %5440 = vpow2.f32 %v4595_v26 }
 0x36a   :  { %v1461_v59 = vadd.f32 1.0, %v5439_v43 }
 0x36b   :  { %5442 = vrcp.f32 %v1460_v63  ;;  %v1474_v7 = vand.u32 2147483648, %v1460_v63  ;;  %vm1468_vm3 = vweird.f32 %v1460_v63 }
 0x36c   :  { %5444 = vrcp.f32 %v1461_v59  ;;  %v1432_v8 = vpop.f32.mrf.mxu2  ;;  %v1445_v28 = vpop.f32.mrf.mxu3  ;;  %v1489_v26 = vand.u32 2147483648, %v1461_v59  ;;  %v1487_v27 = vand.u32 2147483647, %v1461_v59  ;;  %vm1483_vm4 = vweird.f32 %v1461_v59 }
 0x36d   :  { %v1472_v8 = vand.u32 2147483647, %v1460_v63 }
 0x36e   :  { %vm1488_vm8 = vcmp.eq.f32.partialorder %v1487_v27, 8.507059e+37 }
 0x36f   :  { %v5441_v49 = vpop.eup %5440  ;;  %vm1473_vm7 = vcmp.eq.f32.partialorder %v1472_v8, 8.507059e+37 }
 0x370   :  { %v1462_v14 = vadd.f32 1.0, %v5441_v49  ;;  %v1475_v49 = vor.u32 1.1754944e-38, %v1474_v7 }
 0x371   :  { %v5443_v40 = vpop.eup %5442 }
 0x372   :  { %v5445_v23 = vpop.eup %5444  ;;  %v1464_v56 = vmul.f32 %v5443_v40, %v1460_v63  ;;  %5446 = vrcp.f32 %v1462_v14  ;;  %vm1469_vm1 = vweird.f32 %v5443_v40  ;;  %v1504_v7 = vand.u32 2147483648, %v1462_v14 }
 0x373   :  { %v1479_v11 = vmul.f32 %v5445_v23, %v1461_v59  ;;  %5448 = vtanh.f32 %v1450_v37  ;;  %vm1484_vm2 = vweird.f32 %v5445_v23  ;;  %vm1470_vm5 = vmor %vm1468_vm3, %vm1469_vm1  ;;  %vm1498_vm10 = vweird.f32 %v1462_v14 }
 0x374   :  { %v1465_v61 = vsub.f32 1.0, %v1464_v56  ;;  %vm1485_vm6 = vmor %vm1483_vm4, %vm1484_vm2  ;;  %v1490_v56 = vor.u32 1.1754944e-38, %v1489_v26  ;;  %v1505_v8 = vor.u32 1.1754944e-38, %v1504_v7  ;;  %v7710_v7 = vld [vmem:[#allocation126_spill] sm:$0xff] }
 0x375   :  { %v1480_v58 = vsub.f32 1.0, %v1479_v11 }
 0x376   :  { %v1466_v43 = vmul.f32 %v5443_v40, %v1465_v61 }
 0x377   :  { %v1481_v28 = vmul.f32 %v5445_v23, %v1480_v58 }
 0x378   :  { %v5447_v20 = vpop.eup %5446  ;;  %v1467_v46 = vadd.f32 %v5443_v40, %v1466_v43 }
 0x379   :  { %v1494_v3 = vmul.f32 %v5447_v20, %v1462_v14  ;;  %v1482_v15 = vadd.f32 %v5445_v23, %v1481_v28  ;;  %v5449_v37 = vpop.eup %5448  ;;  %vm1499_vm9 = vweird.f32 %v5447_v20 }
 0x37a   :  { %v1471_v11 = vsel %vm1470_vm5, %v5443_v40, %v1467_v46  ;;  %v1502_v40 = vand.u32 2147483647, %v1462_v14  ;;  %vm1500_vm11 = vmor %vm1498_vm10, %vm1499_vm9  ;;  %v7698_v14 = vld [vmem:[#allocation113_spill] sm:$0xff]  ;;  %v7699_v46 = vld [vmem:[#allocation115_spill] sm:$0xff] }
 0x37b   :  { %v1495_v1 = vsub.f32 1.0, %v1494_v3  ;;  %v1476_v61 = vsel %vm1473_vm7, %v1475_v49, %v1471_v11  ;;  %v1486_v52 = vsel %vm1485_vm6, %v5445_v23, %v1482_v15  ;;  %v7700_v3 = vld [vmem:[#allocation116_spill] sm:$0xff]  ;;  %v7701_v49 = vld [vmem:[#allocation117_spill] sm:$0xff]  ;;  %v7702_v15 = vld [vmem:[#allocation118_spill] sm:$0xff] }
 0x37c   :  { %v1491_v58 = vsel %vm1488_vm8, %v1490_v56, %v1486_v52  ;;  %v1510_v45 = vmul.f32 %v5449_v37, %v1476_v61  ;;  %vm1503_vm12 = vcmp.eq.f32.partialorder %v1502_v40, 8.507059e+37  ;;  %v7703_v56 = vld [vmem:[#allocation119_spill] sm:$0xff]  ;;  %v7704_v11 = vld [vmem:[#allocation120_spill] sm:$0xff]  ;;  %v7705_v37 = vld [vmem:[#allocation121_spill] sm:$0xff] }
 0x37d   :  { %v1496_v41 = vmul.f32 %v5447_v20, %v1495_v1  ;;  %v1509_v43 = vmul.f32 %v1491_v58, %v6353_v39  ;;  %v7695_v39 = vld [vmem:[#allocation110_spill] sm:$0xff]  ;;  %v7697_v1 = vld [vmem:[#allocation112_spill] sm:$0xff]  ;;  %v7707_v58 = vld [vmem:[#allocation123_spill] sm:$0xff] }
 0x37e   :  { %v7706_v61 = vld [vmem:[#allocation122_spill] sm:$0xff]  ;;  %v7711_v40 = vld [vmem:[#allocation127_spill] sm:$0xff] }
 0x37f   :  { %v6491_v63 = vadd.f32 %v1510_v45, %v1509_v43  ;;  %v1497_v59 = vadd.f32 %v5447_v20, %v1496_v41  ;;  %v7693_v41 = vld [vmem:[#allocation108_spill] sm:$0xff]  ;;  %v7694_v45 = vld [vmem:[#allocation109_spill] sm:$0xff] }
 0x380   :  { %v7708_v43 = vld [vmem:[#allocation124_spill] sm:$0xff] }
 0x381   :  { %5450 = vtanh.f32 %v6491_v63  ;;  %v1501_v26 = vsel %vm1500_vm11, %v5447_v20, %v1497_v59  ;;  %v7696_v20 = vld [vmem:[#allocation111_spill] sm:$0xff]  ;;  %v7709_v59 = vld [vmem:[#allocation125_spill] sm:$0xff] }
 0x382   :  { %v1506_v27 = vsel %vm1503_vm12, %v1505_v8, %v1501_v26  ;;  %v7712_v26 = vld [vmem:[#allocation128_spill] sm:$0xff]  ;;  %v7713_v8 = vld [vmem:[#allocation129_spill] sm:$0xff] }
 0x387   :  { %v5451_v23 = vpop.eup %5450 }
 0x388   :  { %v1513_v52 = vmul.f32 %v5451_v23, %v1506_v27  ;;  %v7714_v23 = vld [vmem:[#allocation130_spill] sm:$0xff]  ;;  %v7715_v27 = vld [vmem:[#allocation88_spill] sm:$0xff] }
 0x38a   :  { %v6494_v28 = vpack.c.bf16 %v1513_v52, %v1513_v52  ;;  %v1353_v52 = vadd.f32 %v6474_v19, %v7715_v27 }
 0x38c   :  { %1523 = vmatmul.bf16.vlgmr.msrb.gmra.mxu0 %v6494_v28  ;;  %1536 = vmatmul.bf16.vlgmr.msrb.gmra.mxu1 %v6494_v28 }
 0x38d   :  { %1549 = vmatmul.bf16.vlgmr.msrb.gmra.mxu2 %v6494_v28  ;;  %1562 = vmatmul.bf16.vlgmr.msrb.gmra.mxu3 %v6494_v28 }
 0x38e   :  { %1683 = vmatpush.bf16.msrb.mxu0 %v7618_v53  ;;  %1696 = vmatpush.bf16.msrb.mxu1 %v7619_v62 }
 0x38f   :  { %1709 = vmatpush.bf16.msrb.mxu2 %v7620_v6  ;;  %1722 = vmatpush.bf16.msrb.mxu3 %v7621_v21 }
 0x392   :  { %1684 = vmatpush.bf16.msrb.mxu0 %v7622_v47  ;;  %1697 = vmatpush.bf16.msrb.mxu1 %v7623_v16 }
 0x393   :  { %1710 = vmatpush.bf16.msrb.mxu2 %v7624_v34  ;;  %1723 = vmatpush.bf16.msrb.mxu3 %v7625_v36 }
 0x396   :  { %1685 = vmatpush.bf16.msrb.mxu0 %v7626_v48  ;;  %1698 = vmatpush.bf16.msrb.mxu1 %v7627_v51 }
 0x397   :  { %1711 = vmatpush.bf16.msrb.mxu2 %v7693_v41  ;;  %1724 = vmatpush.bf16.msrb.mxu3 %v7694_v45 }
 0x39a   :  { %1686 = vmatpush.bf16.msrb.mxu0 %v7695_v39  ;;  %1699 = vmatpush.bf16.msrb.mxu1 %v7696_v20 }
 0x39b   :  { %1712 = vmatpush.bf16.msrb.mxu2 %v7697_v1  ;;  %1725 = vmatpush.bf16.msrb.mxu3 %v7698_v14 }
 0x39e   :  { %1687 = vmatpush.bf16.msrb.mxu0 %v7699_v46  ;;  %1700 = vmatpush.bf16.msrb.mxu1 %v7700_v3 }
 0x39f   :  { %1713 = vmatpush.bf16.msrb.mxu2 %v7701_v49  ;;  %1726 = vmatpush.bf16.msrb.mxu3 %v7702_v15 }
 0x3a2   :  { %1688 = vmatpush.bf16.msrb.mxu0 %v7703_v56  ;;  %1701 = vmatpush.bf16.msrb.mxu1 %v7704_v11 }
 0x3a3   :  { %1714 = vmatpush.bf16.msrb.mxu2 %v7705_v37  ;;  %1727 = vmatpush.bf16.msrb.mxu3 %v7706_v61  ;;  %v7716_v61 = vld [vmem:[#allocation89_spill] sm:$0xff] }
 0x3a6   :  { %1689 = vmatpush.bf16.msrb.mxu0 %v7707_v58  ;;  %1702 = vmatpush.bf16.msrb.mxu1 %v7708_v43  ;;  %v1366_v58 = vadd.f32 %v6476_v18, %v7716_v61 }
 0x3a7   :  { %1715 = vmatpush.bf16.msrb.mxu2 %v7709_v59  ;;  %1728 = vmatpush.bf16.msrb.mxu3 %v7710_v7 }
 0x3aa   :  { %1690 = vmatpush.bf16.msrb.mxu0 %v7711_v40  ;;  %1703 = vmatpush.bf16.msrb.mxu1 %v7712_v26  ;;  %v7717_v40 = vld [vmem:[#allocation90_spill] sm:$0xff] }
 0x3ab   :  { %1716 = vmatpush.bf16.msrb.mxu2 %v7713_v8  ;;  %1729 = vmatpush.bf16.msrb.mxu3 %v7714_v23  ;;  %v1379_v26 = vadd.f32 %v6478_v57, %v7717_v40 }
 0x409   :  { %v1524_v37 = vpop.f32.mrf.mxu0  ;;  %v1537_v43 = vpop.f32.mrf.mxu1 }
 0x40a   :  { %v1525_v11 = vadd.f32 %v1524_v37, %v1353_v52  ;;  %v1538_v59 = vadd.f32 %v1537_v43, %v1366_v58  ;;  %v7718_v58 = vld [vmem:[#allocation114_spill] sm:$0xff] }
 0x40b   :  { %v1392_v57 = vadd.f32 %v6480_v33, %v7718_v58 }
 0x40c   :  { %v4596_v56 = vmul.f32 -1.442695, %v1525_v11  ;;  %v4597_v7 = vmul.f32 -1.442695, %v1538_v59 }
 0x40e   :  { %5452 = vpow2.f32 %v4596_v56 }
 0x40f   :  { %5454 = vpow2.f32 %v4597_v7 }
 0x410   :  { %v1550_v8 = vpop.f32.mrf.mxu2  ;;  %v1563_v15 = vpop.f32.mrf.mxu3 }
 0x411   :  { %v1551_v23 = vadd.f32 %v1550_v8, %v1379_v26  ;;  %v1526_v49 = vpop.f32.mrf.mxu0  ;;  %v1539_v3 = vpop.f32.mrf.mxu1  ;;  %v1564_v7 = vadd.f32 %v1563_v15, %v1392_v57 }
 0x413   :  { %v4598_v19 = vmul.f32 -1.442695, %v1551_v23 }
 0x414   :  { %v5453_v27 = vpop.eup %5452 }
 0x415   :  { %v5455_v46 = vpop.eup %5454  ;;  %v1576_v18 = vadd.f32 1.0, %v5453_v27  ;;  %5456 = vpow2.f32 %v4598_v19 }
 0x416   :  { %v1577_v61 = vadd.f32 1.0, %v5455_v46 }
 0x417   :  { %5458 = vrcp.f32 %v1576_v18  ;;  %v1590_v27 = vand.u32 2147483648, %v1576_v18  ;;  %v1588_v19 = vand.u32 2147483647, %v1576_v18  ;;  %vm1584_vm15 = vweird.f32 %v1576_v18 }
 0x418   :  { %5460 = vrcp.f32 %v1577_v61  ;;  %v1552_v11 = vpop.f32.mrf.mxu2  ;;  %v1565_v37 = vpop.f32.mrf.mxu3  ;;  %v1605_v46 = vand.u32 2147483648, %v1577_v61  ;;  %vm1599_vm0 = vweird.f32 %v1577_v61 }
 0x419   :  { %v1603_v37 = vand.u32 2147483647, %v1577_v61  ;;  %vm1589_vm3 = vcmp.eq.f32.partialorder %v1588_v19, 8.507059e+37 }
 0x41b   :  { %v5457_v56 = vpop.eup %5456  ;;  %vm1604_vm4 = vcmp.eq.f32.partialorder %v1603_v37, 8.507059e+37 }
 0x41c   :  { %v1578_v43 = vadd.f32 1.0, %v5457_v56  ;;  %v1591_v56 = vor.u32 1.1754944e-38, %v1590_v27 }
 0x41d   :  { %v5459_v59 = vpop.eup %5458 }
 0x41e   :  { %v5461_v26 = vpop.eup %5460  ;;  %v1580_v49 = vmul.f32 %v5459_v59, %v1576_v18  ;;  %5462 = vrcp.f32 %v1578_v43  ;;  %vm1585_vm13 = vweird.f32 %v5459_v59  ;;  %v1620_v27 = vand.u32 2147483648, %v1578_v43 }
 0x41f   :  { %v1595_v3 = vmul.f32 %v5461_v26, %v1577_v61  ;;  %5464 = vtanh.f32 %v1564_v7  ;;  %vm1600_vm14 = vweird.f32 %v5461_v26  ;;  %vm1586_vm1 = vmor %vm1584_vm15, %vm1585_vm13  ;;  %vm1614_vm6 = vweird.f32 %v1578_v43 }
 0x420   :  { %v1581_v8 = vsub.f32 1.0, %v1580_v49  ;;  %vm1601_vm2 = vmor %vm1599_vm0, %vm1600_vm14  ;;  %v1606_v49 = vor.u32 1.1754944e-38, %v1605_v46  ;;  %v1621_v19 = vor.u32 1.1754944e-38, %v1620_v27  ;;  %v7737_v27 = vld [vmem:[#allocation64_spill] sm:$0xff] }
 0x421   :  { %v1596_v23 = vsub.f32 1.0, %v1595_v3 }
 0x422   :  { %v1582_v52 = vmul.f32 %v5459_v59, %v1581_v8 }
 0x423   :  { %v1597_v11 = vmul.f32 %v5461_v26, %v1596_v23 }
 0x424   :  { %v5463_v40 = vpop.eup %5462  ;;  %v1583_v33 = vadd.f32 %v5459_v59, %v1582_v52 }
 0x425   :  { %v1610_v15 = vmul.f32 %v5463_v40, %v1578_v43  ;;  %v1598_v57 = vadd.f32 %v5461_v26, %v1597_v11  ;;  %v5465_v7 = vpop.eup %5464  ;;  %vm1615_vm5 = vweird.f32 %v5463_v40 }
 0x426   :  { %v1587_v3 = vsel %vm1586_vm1, %v5459_v59, %v1583_v33  ;;  %v1618_v59 = vand.u32 2147483647, %v1578_v43  ;;  %vm1616_vm7 = vmor %vm1614_vm6, %vm1615_vm5  ;;  %v7725_v43 = vld [vmem:[#allocation30_spill] sm:$0xff]  ;;  %v7726_v33 = vld [vmem:[#allocation31_spill] sm:$0xff] }
 0x427   :  { %v1611_v58 = vsub.f32 1.0, %v1610_v15  ;;  %v1592_v8 = vsel %vm1589_vm3, %v1591_v56, %v1587_v3  ;;  %v1602_v14 = vsel %vm1601_vm2, %v5461_v26, %v1598_v57  ;;  %v7727_v15 = vld [vmem:[#allocation33_spill] sm:$0xff]  ;;  %v7728_v56 = vld [vmem:[#allocation51_spill] sm:$0xff]  ;;  %v7729_v57 = vld [vmem:[#allocation54_spill] sm:$0xff] }
 0x428   :  { %v1607_v23 = vsel %vm1604_vm4, %v1606_v49, %v1602_v14  ;;  %v1626_v1 = vmul.f32 %v5465_v7, %v1592_v8  ;;  %vm1619_vm8 = vcmp.eq.f32.partialorder %v1618_v59, 8.507059e+37  ;;  %v7730_v49 = vld [vmem:[#allocation55_spill] sm:$0xff]  ;;  %v7731_v3 = vld [vmem:[#allocation56_spill] sm:$0xff]  ;;  %v7732_v7 = vld [vmem:[#allocation57_spill] sm:$0xff] }
 0x429   :  { %v1625_v20 = vmul.f32 %v1607_v23, %v6403_v2  ;;  %v1612_v52 = vmul.f32 %v5463_v40, %v1611_v58  ;;  %v7719_v2 = vld [vmem:[#allocation24_spill] sm:$0xff]  ;;  %v7724_v58 = vld [vmem:[#allocation29_spill] sm:$0xff]  ;;  %v7733_v8 = vld [vmem:[#allocation58_spill] sm:$0xff] }
 0x42a   :  { %v7734_v23 = vld [vmem:[#allocation59_spill] sm:$0xff]  ;;  %v7738_v59 = vld [vmem:[#allocation65_spill] sm:$0xff] }
 0x42b   :  { %v6541_v18 = vadd.f32 %v1626_v1, %v1625_v20  ;;  %v1613_v61 = vadd.f32 %v5463_v40, %v1612_v52  ;;  %v7720_v20 = vld [vmem:[#allocation25_spill] sm:$0xff]  ;;  %v7721_v1 = vld [vmem:[#allocation26_spill] sm:$0xff]  ;;  %v7735_v52 = vld [vmem:[#allocation60_spill] sm:$0xff] }
 0x42d   :  { %5466 = vtanh.f32 %v6541_v18  ;;  %v1617_v46 = vsel %vm1616_vm7, %v5463_v40, %v1613_v61  ;;  %v7723_v40 = vld [vmem:[#allocation28_spill] sm:$0xff]  ;;  %v7736_v61 = vld [vmem:[#allocation63_spill] sm:$0xff] }
 0x42e   :  { %v1622_v11 = vsel %vm1619_vm8, %v1621_v19, %v1617_v46  ;;  %v7739_v46 = vld [vmem:[#allocation66_spill] sm:$0xff]  ;;  %v7740_v19 = vld [vmem:[#allocation69_spill] sm:$0xff] }
 0x433   :  { %v5467_v26 = vpop.eup %5466 }
 0x434   :  { %v1629_v14 = vmul.f32 %v5467_v26, %v1622_v11  ;;  %v7741_v26 = vld [vmem:[#allocation70_spill] sm:$0xff]  ;;  %v7742_v11 = vld [vmem:[#allocation71_spill] sm:$0xff] }
 0x436   :  { %v1630_v37 = vpack.c.bf16 %v1629_v14, %v1629_v14  ;;  %v7743_v14 = vld [vmem:[#allocation72_spill] sm:$0xff] }
 0x438   :  { %1639 = vmatmul.bf16.vlgmr.msra.gmra.mxu0 %v1630_v37  ;;  %1652 = vmatmul.bf16.vlgmr.msra.gmra.mxu1 %v1630_v37 }
 0x439   :  { %1665 = vmatmul.bf16.vlgmr.msra.gmra.mxu2 %v1630_v37  ;;  %1678 = vmatmul.bf16.vlgmr.msra.gmra.mxu3 %v1630_v37  ;;  %v7744_v37 = vld [vmem:[#allocation73_spill] sm:$0xff] }
 0x43a   :  { %1803 = vmatpush.bf16.msra.mxu0 %v5773_v9  ;;  %1816 = vmatpush.bf16.msra.mxu1 %v5775_v10 }
 0x43b   :  { %1829 = vmatpush.bf16.msra.mxu2 %v5777_v13  ;;  %1842 = vmatpush.bf16.msra.mxu3 %v5790_v25 }
 0x43e   :  { %1804 = vmatpush.bf16.msra.mxu0 %v5781_v17  ;;  %1817 = vmatpush.bf16.msra.mxu1 %v5788_v22 }
 0x43f   :  { %1830 = vmatpush.bf16.msra.mxu2 %v5792_v29  ;;  %1843 = vmatpush.bf16.msra.mxu3 %v5829_v38 }
 0x442   :  { %1805 = vmatpush.bf16.msra.mxu0 %v5796_v31  ;;  %1818 = vmatpush.bf16.msra.mxu1 %v5800_v32 }
 0x443   :  { %1831 = vmatpush.bf16.msra.mxu2 %v5832_v42  ;;  %1844 = vmatpush.bf16.msra.mxu3 %v5834_v44 }
 0x446   :  { %1806 = vmatpush.bf16.msra.mxu0 %v5848_v50  ;;  %1819 = vmatpush.bf16.msra.mxu1 %v5852_v54 }
 0x447   :  { %1832 = vmatpush.bf16.msra.mxu2 %v5854_v55  ;;  %1845 = vmatpush.bf16.msra.mxu3 %v5863_v60 }
 0x448   :  { %1691 = vmatmul.bf16.vlgmr.msrb.gmra.mxu0 %v6494_v28  ;;  %1704 = vmatmul.bf16.vlgmr.msrb.gmra.mxu1 %v6494_v28 }
 0x449   :  { %1717 = vmatmul.bf16.vlgmr.msrb.gmra.mxu2 %v6494_v28  ;;  %1730 = vmatmul.bf16.vlgmr.msrb.gmra.mxu3 %v6494_v28  ;;  %v7722_v28 = vld [vmem:[#allocation27_spill] sm:$0xff] }
 0x44a   :  { %1807 = vmatpush.bf16.msra.mxu0 %v5867_v0  ;;  %1820 = vmatpush.bf16.msra.mxu1 %v5870_v4 }
 0x44b   :  { %1833 = vmatpush.bf16.msra.mxu2 %v5872_v5  ;;  %1846 = vmatpush.bf16.msra.mxu3 %v5878_v12 }
 0x44e   :  { %1808 = vmatpush.bf16.msra.mxu0 %v5889_v24  ;;  %1821 = vmatpush.bf16.msra.mxu1 %v5893_v30 }
 0x44f   :  { %1834 = vmatpush.bf16.msra.mxu2 %v5897_v35  ;;  %1847 = vmatpush.bf16.msra.mxu3 %v7719_v2 }
 0x452   :  { %1809 = vmatpush.bf16.msra.mxu0 %v7720_v20  ;;  %1822 = vmatpush.bf16.msra.mxu1 %v7721_v1 }
 0x453   :  { %1835 = vmatpush.bf16.msra.mxu2 %v7722_v28  ;;  %1848 = vmatpush.bf16.msra.mxu3 %v7723_v40  ;;  %v7765_v40 = vld [vmem:[#allocation45_spill] sm:$0xff] }
 0x456   :  { %1810 = vmatpush.bf16.msra.mxu0 %v7724_v58  ;;  %1823 = vmatpush.bf16.msra.mxu1 %v7725_v43  ;;  %v7764_v58 = vld [vmem:[#allocation20_spill] sm:$0xff] }
 0x457   :  { %1836 = vmatpush.bf16.msra.mxu2 %v7726_v33  ;;  %1849 = vmatpush.bf16.msra.mxu3 %v7727_v15  ;;  %v244_v28 = vadd.f32 %v7765_v40, %v7764_v58 }
 0x45a   :  { %1919 = vmatpush.bf16.msrb.mxu0 %v7728_v56  ;;  %1932 = vmatpush.bf16.msrb.mxu1 %v7729_v57 }
 0x45b   :  { %1945 = vmatpush.bf16.msrb.mxu2 %v7730_v49  ;;  %1958 = vmatpush.bf16.msrb.mxu3 %v7731_v3  ;;  %v7763_v3 = vld [vmem:[#allocation44_spill] sm:$0xff] }
 0x45e   :  { %1920 = vmatpush.bf16.msrb.mxu0 %v7732_v7  ;;  %1933 = vmatpush.bf16.msrb.mxu1 %v7733_v8  ;;  %v7760_v8 = vld [vmem:[#allocation13_spill] sm:$0xff] }
 0x45f   :  { %1946 = vmatpush.bf16.msrb.mxu2 %v7734_v23  ;;  %1959 = vmatpush.bf16.msrb.mxu3 %v7735_v52  ;;  %v7745_v23 = vld [vmem:[#allocation74_spill] sm:$0xff]  ;;  %v7746_v52 = vld [vmem:[#allocation75_spill] sm:$0xff] }
 0x462   :  { %1921 = vmatpush.bf16.msrb.mxu0 %v7736_v61  ;;  %1934 = vmatpush.bf16.msrb.mxu1 %v7737_v27  ;;  %v7747_v61 = vld [vmem:[#allocation78_spill] sm:$0xff]  ;;  %v7748_v27 = vld [vmem:[#allocation79_spill] sm:$0xff] }
 0x463   :  { %1947 = vmatpush.bf16.msrb.mxu2 %v7738_v59  ;;  %1960 = vmatpush.bf16.msrb.mxu3 %v7739_v46  ;;  %v7749_v59 = vld [vmem:[#allocation82_spill] sm:$0xff]  ;;  %v7750_v46 = vld [vmem:[#allocation83_spill] sm:$0xff] }
 0x466   :  { %1922 = vmatpush.bf16.msrb.mxu0 %v7740_v19  ;;  %1935 = vmatpush.bf16.msrb.mxu1 %v7741_v26  ;;  %v7751_v19 = vld [vmem:[#allocation84_spill] sm:$0xff]  ;;  %v7752_v26 = vld [vmem:[#allocation85_spill] sm:$0xff] }
 0x467   :  { %1948 = vmatpush.bf16.msrb.mxu2 %v7742_v11  ;;  %1961 = vmatpush.bf16.msrb.mxu3 %v7743_v14  ;;  %v7753_v11 = vld [vmem:[#allocation86_spill] sm:$0xff]  ;;  %v7754_v14 = vld [vmem:[#allocation87_spill] sm:$0xff] }
 0x46a   :  { %1923 = vmatpush.bf16.msrb.mxu0 %v7744_v37  ;;  %1936 = vmatpush.bf16.msrb.mxu1 %v7745_v23  ;;  %v7755_v37 = vld [vmem:[#allocation91_spill] sm:$0xff]  ;;  %v7756_v23 = vld [vmem:[#allocation94_spill] sm:$0xff] }
 0x46b   :  { %1949 = vmatpush.bf16.msrb.mxu2 %v7746_v52  ;;  %1962 = vmatpush.bf16.msrb.mxu3 %v7747_v61  ;;  %v7757_v52 = vld [vmem:[#allocation95_spill] sm:$0xff]  ;;  %v7758_v61 = vld [vmem:[#allocation96_spill] sm:$0xff] }
 0x46e   :  { %1924 = vmatpush.bf16.msrb.mxu0 %v7748_v27  ;;  %1937 = vmatpush.bf16.msrb.mxu1 %v7749_v59  ;;  %v7759_v27 = vld [vmem:[#allocation97_spill] sm:$0xff] }
 0x46f   :  { %1950 = vmatpush.bf16.msrb.mxu2 %v7750_v46  ;;  %1963 = vmatpush.bf16.msrb.mxu3 %v7751_v19 }
 0x472   :  { %1925 = vmatpush.bf16.msrb.mxu0 %v7752_v26  ;;  %1938 = vmatpush.bf16.msrb.mxu1 %v7753_v11 }
 0x473   :  { %1951 = vmatpush.bf16.msrb.mxu2 %v7754_v14  ;;  %1964 = vmatpush.bf16.msrb.mxu3 %v7755_v37  ;;  %v7761_v37 = vld [vmem:[#allocation43_spill] sm:$0xff] }
 0x474   :  { %v162_v7 = vadd.f32 %v7761_v37, %v7760_v8 }
 0x476   :  { %1926 = vmatpush.bf16.msrb.mxu0 %v7756_v23  ;;  %1939 = vmatpush.bf16.msrb.mxu1 %v7757_v52  ;;  %v7762_v23 = vld [vmem:[#allocation14_spill] sm:$0xff] }
 0x477   :  { %1952 = vmatpush.bf16.msrb.mxu2 %v7758_v61  ;;  %1965 = vmatpush.bf16.msrb.mxu3 %v7759_v27  ;;  %v203_v52 = vadd.f32 %v7763_v3, %v7762_v23 }
 0x4b5   :  { %v6612_v59 = vpop.f32.mrf.mxu0  ;;  %v6614_v46 = vpop.f32.mrf.mxu1 }
 0x4bc   :  { %v6616_v19 = vpop.f32.mrf.mxu2  ;;  %v6618_v26 = vpop.f32.mrf.mxu3 }
 0x4bd   :  { %v1642_v11 = vpop.f32.mrf.mxu0  ;;  %v1655_v14 = vpop.f32.mrf.mxu1 }
 0x4c4   :  { %v1668_v49 = vpop.f32.mrf.mxu2  ;;  %v1681_v61 = vpop.f32.mrf.mxu3 }
 0x4c5   :  { %v1692_v57 = vpop.f32.mrf.mxu0  ;;  %v1705_v27 = vpop.f32.mrf.mxu1 }
 0x4c6   :  { %v1735_v56 = vadd.f32 %v1692_v57, %v162_v7  ;;  %v1736_v15 = vadd.f32 %v1705_v27, %v203_v52  ;;  %v7766_v57 = vld [vmem:[#allocation32_spill] sm:$0xff]  ;;  %v7767_v7 = vld [vmem:[#allocation46_spill] sm:$0xff] }
 0x4c7   :  { %v285_v40 = vadd.f32 %v7767_v7, %v7766_v57 }
 0x4c8   :  { %v4599_v33 = vmul.f32 -1.442695, %v1735_v56  ;;  %v4600_v43 = vmul.f32 -1.442695, %v1736_v15 }
 0x4ca   :  { %5468 = vpow2.f32 %v4599_v33 }
 0x4cb   :  { %5470 = vpow2.f32 %v4600_v43 }
 0x4cc   :  { %v1718_v11 = vpop.f32.mrf.mxu2  ;;  %v1731_v14 = vpop.f32.mrf.mxu3 }
 0x4cd   :  { %v1737_v1 = vadd.f32 %v1718_v11, %v244_v28  ;;  %v1694_v37 = vpop.f32.mrf.mxu0  ;;  %v1707_v8 = vpop.f32.mrf.mxu1  ;;  %v1738_v27 = vadd.f32 %v1731_v14, %v285_v40 }
 0x4cf   :  { %v4601_v20 = vmul.f32 -1.442695, %v1737_v1 }
 0x4d0   :  { %v5469_v3 = vpop.eup %5468 }
 0x4d1   :  { %v5471_v49 = vpop.eup %5470  ;;  %v1748_v61 = vadd.f32 1.0, %v5469_v3  ;;  %5472 = vpow2.f32 %v4601_v20 }
 0x4d2   :  { %v1749_v23 = vadd.f32 1.0, %v5471_v49 }
 0x4d3   :  { %5474 = vrcp.f32 %v1748_v61  ;;  %v1762_v3 = vand.u32 2147483648, %v1748_v61  ;;  %vm1756_vm11 = vweird.f32 %v1748_v61 }
 0x4d4   :  { %5476 = vrcp.f32 %v1749_v23  ;;  %v1720_v56 = vpop.f32.mrf.mxu2  ;;  %v1733_v15 = vpop.f32.mrf.mxu3  ;;  %v1777_v20 = vand.u32 2147483648, %v1749_v23  ;;  %v1775_v58 = vand.u32 2147483647, %v1749_v23  ;;  %vm1771_vm12 = vweird.f32 %v1749_v23 }
 0x4d5   :  { %v1760_v56 = vand.u32 2147483647, %v1748_v61 }
 0x4d6   :  { %vm1776_vm0 = vcmp.eq.f32.partialorder %v1775_v58, 8.507059e+37 }
 0x4d7   :  { %v5473_v33 = vpop.eup %5472  ;;  %vm1761_vm15 = vcmp.eq.f32.partialorder %v1760_v56, 8.507059e+37 }
 0x4d8   :  { %v1750_v43 = vadd.f32 1.0, %v5473_v33  ;;  %v1763_v33 = vor.u32 1.1754944e-38, %v1762_v3 }
 0x4d9   :  { %v5475_v52 = vpop.eup %5474 }
 0x4da   :  { %v5477_v28 = vpop.eup %5476  ;;  %v1752_v11 = vmul.f32 %v5475_v52, %v1748_v61  ;;  %5478 = vrcp.f32 %v1750_v43  ;;  %vm1757_vm9 = vweird.f32 %v5475_v52  ;;  %v1792_v3 = vand.u32 2147483648, %v1750_v43 }
 0x4db   :  { %v1767_v1 = vmul.f32 %v5477_v28, %v1749_v23  ;;  %5480 = vtanh.f32 %v1738_v27  ;;  %vm1772_vm10 = vweird.f32 %v5477_v28  ;;  %vm1758_vm13 = vmor %vm1756_vm11, %vm1757_vm9  ;;  %vm1786_vm2 = vweird.f32 %v1750_v43 }
 0x4dc   :  { %v1753_v8 = vsub.f32 1.0, %v1752_v11  ;;  %vm1773_vm14 = vmor %vm1771_vm12, %vm1772_vm10  ;;  %v1778_v11 = vor.u32 1.1754944e-38, %v1777_v20  ;;  %v1793_v56 = vor.u32 1.1754944e-38, %v1792_v3  ;;  %v7785_v3 = vld [vmem:[#allocation129_spill] sm:$0xff] }
 0x4dd   :  { %v1768_v37 = vsub.f32 1.0, %v1767_v1 }
 0x4de   :  { %v1754_v49 = vmul.f32 %v5475_v52, %v1753_v8 }
 0x4df   :  { %v1769_v15 = vmul.f32 %v5477_v28, %v1768_v37 }
 0x4e0   :  { %v5479_v2 = vpop.eup %5478  ;;  %v1755_v7 = vadd.f32 %v5475_v52, %v1754_v49 }
 0x4e1   :  { %v1782_v14 = vmul.f32 %v5479_v2, %v1750_v43  ;;  %v1770_v40 = vadd.f32 %v5477_v28, %v1769_v15  ;;  %v5481_v27 = vpop.eup %5480  ;;  %vm1787_vm1 = vweird.f32 %v5479_v2 }
 0x4e2   :  { %v1759_v1 = vsel %vm1758_vm13, %v5475_v52, %v1755_v7  ;;  %v1790_v52 = vand.u32 2147483647, %v1750_v43  ;;  %vm1788_vm3 = vmor %vm1786_vm2, %vm1787_vm1  ;;  %v7773_v43 = vld [vmem:[#allocation117_spill] sm:$0xff]  ;;  %v7774_v7 = vld [vmem:[#allocation118_spill] sm:$0xff] }
 0x4e3   :  { %v1783_v57 = vsub.f32 1.0, %v1782_v14  ;;  %v1764_v8 = vsel %vm1761_vm15, %v1763_v33, %v1759_v1  ;;  %v1774_v35 = vsel %vm1773_vm14, %v5477_v28, %v1770_v40  ;;  %v7775_v14 = vld [vmem:[#allocation119_spill] sm:$0xff]  ;;  %v7776_v33 = vld [vmem:[#allocation120_spill] sm:$0xff]  ;;  %v7777_v40 = vld [vmem:[#allocation121_spill] sm:$0xff] }
 0x4e4   :  { %v1779_v37 = vsel %vm1776_vm0, %v1778_v11, %v1774_v35  ;;  %v1798_v30 = vmul.f32 %v5481_v27, %v1764_v8  ;;  %vm1791_vm4 = vcmp.eq.f32.partialorder %v1790_v52, 8.507059e+37  ;;  %v7778_v11 = vld [vmem:[#allocation122_spill] sm:$0xff]  ;;  %v7779_v1 = vld [vmem:[#allocation123_spill] sm:$0xff]  ;;  %v7780_v27 = vld [vmem:[#allocation124_spill] sm:$0xff] }
 0x4e5   :  { %v1784_v24 = vmul.f32 %v5479_v2, %v1783_v57  ;;  %v1797_v49 = vmul.f32 %v1779_v37, %v6491_v63  ;;  %v7770_v63 = vld [vmem:[#allocation113_spill] sm:$0xff]  ;;  %v7772_v57 = vld [vmem:[#allocation116_spill] sm:$0xff]  ;;  %v7782_v37 = vld [vmem:[#allocation126_spill] sm:$0xff] }
 0x4e6   :  { %v7781_v8 = vld [vmem:[#allocation125_spill] sm:$0xff]  ;;  %v7786_v52 = vld [vmem:[#allocation130_spill] sm:$0xff] }
 0x4e7   :  { %v6629_v61 = vadd.f32 %v1798_v30, %v1797_v49  ;;  %v1785_v23 = vadd.f32 %v5479_v2, %v1784_v24  ;;  %v7768_v24 = vld [vmem:[#allocation111_spill] sm:$0xff]  ;;  %v7769_v30 = vld [vmem:[#allocation112_spill] sm:$0xff] }
 0x4e8   :  { %v7783_v49 = vld [vmem:[#allocation127_spill] sm:$0xff] }
 0x4e9   :  { %5482 = vtanh.f32 %v6629_v61  ;;  %v1789_v20 = vsel %vm1788_vm3, %v5479_v2, %v1785_v23  ;;  %v7771_v2 = vld [vmem:[#allocation115_spill] sm:$0xff]  ;;  %v7784_v23 = vld [vmem:[#allocation128_spill] sm:$0xff] }
 0x4ea   :  { %v1794_v58 = vsel %vm1791_vm4, %v1793_v56, %v1789_v20  ;;  %v7787_v20 = vld [vmem:[#allocation88_spill] sm:$0xff] }
 0x4eb   :  { %v1641_v56 = vadd.f32 %v6612_v59, %v7787_v20 }
 0x4ef   :  { %v5483_v28 = vpop.eup %5482 }
 0x4f0   :  { %v1801_v35 = vmul.f32 %v5483_v28, %v1794_v58  ;;  %v7788_v28 = vld [vmem:[#allocation89_spill] sm:$0xff] }
 0x4f1   :  { %v1654_v58 = vadd.f32 %v6614_v46, %v7788_v28 }
 0x4f2   :  { %v6632_v15 = vpack.c.bf16 %v1801_v35, %v1801_v35 }
 0x4f4   :  { %1811 = vmatmul.bf16.vlgmr.msra.gmra.mxu0 %v6632_v15  ;;  %1824 = vmatmul.bf16.vlgmr.msra.gmra.mxu1 %v6632_v15 }
 0x4f5   :  { %1837 = vmatmul.bf16.vlgmr.msra.gmra.mxu2 %v6632_v15  ;;  %1850 = vmatmul.bf16.vlgmr.msra.gmra.mxu3 %v6632_v15 }
 0x4f6   :  { %1971 = vmatpush.bf16.msra.mxu0 %v7618_v53  ;;  %1984 = vmatpush.bf16.msra.mxu1 %v7619_v62 }
 0x4f7   :  { %1997 = vmatpush.bf16.msra.mxu2 %v7620_v6  ;;  %2010 = vmatpush.bf16.msra.mxu3 %v7621_v21 }
 0x4fa   :  { %1972 = vmatpush.bf16.msra.mxu0 %v7622_v47  ;;  %1985 = vmatpush.bf16.msra.mxu1 %v7623_v16 }
 0x4fb   :  { %1998 = vmatpush.bf16.msra.mxu2 %v7624_v34  ;;  %2011 = vmatpush.bf16.msra.mxu3 %v7625_v36 }
 0x4fe   :  { %1973 = vmatpush.bf16.msra.mxu0 %v7626_v48  ;;  %1986 = vmatpush.bf16.msra.mxu1 %v7627_v51 }
 0x4ff   :  { %1999 = vmatpush.bf16.msra.mxu2 %v7693_v41  ;;  %2012 = vmatpush.bf16.msra.mxu3 %v7694_v45 }
 0x502   :  { %1974 = vmatpush.bf16.msra.mxu0 %v7695_v39  ;;  %1987 = vmatpush.bf16.msra.mxu1 %v7768_v24 }
 0x503   :  { %2000 = vmatpush.bf16.msra.mxu2 %v7769_v30  ;;  %2013 = vmatpush.bf16.msra.mxu3 %v7770_v63 }
 0x506   :  { %1975 = vmatpush.bf16.msra.mxu0 %v7771_v2  ;;  %1988 = vmatpush.bf16.msra.mxu1 %v7772_v57 }
 0x507   :  { %2001 = vmatpush.bf16.msra.mxu2 %v7773_v43  ;;  %2014 = vmatpush.bf16.msra.mxu3 %v7774_v7 }
 0x50a   :  { %1976 = vmatpush.bf16.msra.mxu0 %v7775_v14  ;;  %1989 = vmatpush.bf16.msra.mxu1 %v7776_v33 }
 0x50b   :  { %2002 = vmatpush.bf16.msra.mxu2 %v7777_v40  ;;  %2015 = vmatpush.bf16.msra.mxu3 %v7778_v11 }
 0x50e   :  { %1977 = vmatpush.bf16.msra.mxu0 %v7779_v1  ;;  %1990 = vmatpush.bf16.msra.mxu1 %v7780_v27 }
 0x50f   :  { %2003 = vmatpush.bf16.msra.mxu2 %v7781_v8  ;;  %2016 = vmatpush.bf16.msra.mxu3 %v7782_v37 }
 0x512   :  { %1978 = vmatpush.bf16.msra.mxu0 %v7783_v49  ;;  %1991 = vmatpush.bf16.msra.mxu1 %v7784_v23  ;;  %v7789_v49 = vld [vmem:[#allocation90_spill] sm:$0xff] }
 0x513   :  { %2004 = vmatpush.bf16.msra.mxu2 %v7785_v3  ;;  %2017 = vmatpush.bf16.msra.mxu3 %v7786_v52  ;;  %v1667_v23 = vadd.f32 %v6616_v19, %v7789_v49 }
 0x571   :  { %v1812_v35 = vpop.f32.mrf.mxu0  ;;  %v1825_v27 = vpop.f32.mrf.mxu1 }
 0x572   :  { %v1813_v1 = vadd.f32 %v1812_v35, %v1641_v56  ;;  %v1826_v8 = vadd.f32 %v1825_v27, %v1654_v58 }
 0x574   :  { %v4602_v11 = vmul.f32 -1.442695, %v1813_v1  ;;  %v4603_v37 = vmul.f32 -1.442695, %v1826_v8  ;;  %v7790_v8 = vld [vmem:[#allocation114_spill] sm:$0xff] }
 0x575   :  { %v1680_v19 = vadd.f32 %v6618_v26, %v7790_v8 }
 0x576   :  { %5484 = vpow2.f32 %v4602_v11 }
 0x577   :  { %5486 = vpow2.f32 %v4603_v37 }
 0x578   :  { %v1838_v3 = vpop.f32.mrf.mxu2  ;;  %v1851_v40 = vpop.f32.mrf.mxu3 }
 0x579   :  { %v1839_v52 = vadd.f32 %v1838_v3, %v1667_v23  ;;  %v1814_v33 = vpop.f32.mrf.mxu0  ;;  %v1827_v14 = vpop.f32.mrf.mxu1  ;;  %v1852_v58 = vadd.f32 %v1851_v40, %v1680_v19 }
 0x57b   :  { %v4604_v59 = vmul.f32 -1.442695, %v1839_v52 }
 0x57c   :  { %v5485_v20 = vpop.eup %5484 }
 0x57d   :  { %v5487_v7 = vpop.eup %5486  ;;  %v1864_v46 = vadd.f32 1.0, %v5485_v20  ;;  %5488 = vpow2.f32 %v4604_v59 }
 0x57e   :  { %v1865_v28 = vadd.f32 1.0, %v5487_v7 }
 0x57f   :  { %5490 = vrcp.f32 %v1864_v46  ;;  %v1878_v20 = vand.u32 2147483648, %v1864_v46  ;;  %v1876_v59 = vand.u32 2147483647, %v1864_v46  ;;  %vm1872_vm7 = vweird.f32 %v1864_v46 }
 0x580   :  { %5492 = vrcp.f32 %v1865_v28  ;;  %v1840_v1 = vpop.f32.mrf.mxu2  ;;  %v1853_v27 = vpop.f32.mrf.mxu3  ;;  %v1893_v7 = vand.u32 2147483648, %v1865_v28  ;;  %vm1887_vm8 = vweird.f32 %v1865_v28 }
 0x581   :  { %v1891_v27 = vand.u32 2147483647, %v1865_v28  ;;  %vm1877_vm11 = vcmp.eq.f32.partialorder %v1876_v59, 8.507059e+37 }
 0x583   :  { %v5489_v11 = vpop.eup %5488  ;;  %vm1892_vm12 = vcmp.eq.f32.partialorder %v1891_v27, 8.507059e+37 }
 0x584   :  { %v1866_v37 = vadd.f32 1.0, %v5489_v11  ;;  %v1879_v11 = vor.u32 1.1754944e-38, %v1878_v20 }
 0x585   :  { %v5491_v56 = vpop.eup %5490 }
 0x586   :  { %v5493_v23 = vpop.eup %5492  ;;  %v1868_v33 = vmul.f32 %v5491_v56, %v1864_v46  ;;  %5494 = vrcp.f32 %v1866_v37  ;;  %vm1873_vm5 = vweird.f32 %v5491_v56  ;;  %v1908_v20 = vand.u32 2147483648, %v1866_v37 }
 0x587   :  { %v1883_v14 = vmul.f32 %v5493_v23, %v1865_v28  ;;  %5496 = vtanh.f32 %v1852_v58  ;;  %vm1888_vm6 = vweird.f32 %v5493_v23  ;;  %vm1874_vm9 = vmor %vm1872_vm7, %vm1873_vm5  ;;  %vm1902_vm14 = vweird.f32 %v1866_v37 }
 0x588   :  { %v1869_v3 = vsub.f32 1.0, %v1868_v33  ;;  %vm1889_vm10 = vmor %vm1887_vm8, %vm1888_vm6  ;;  %v1894_v33 = vor.u32 1.1754944e-38, %v1893_v7  ;;  %v1909_v59 = vor.u32 1.1754944e-38, %v1908_v20  ;;  %v7809_v20 = vld [vmem:[#allocation59_spill] sm:$0xff] }
 0x589   :  { %v1884_v52 = vsub.f32 1.0, %v1883_v14 }
 0x58a   :  { %v1870_v35 = vmul.f32 %v5491_v56, %v1869_v3 }
 0x58b   :  { %v1885_v1 = vmul.f32 %v5493_v23, %v1884_v52 }
 0x58c   :  { %v5495_v49 = vpop.eup %5494  ;;  %v1871_v26 = vadd.f32 %v5491_v56, %v1870_v35 }
 0x58d   :  { %v1898_v40 = vmul.f32 %v5495_v49, %v1866_v37  ;;  %v1886_v19 = vadd.f32 %v5493_v23, %v1885_v1  ;;  %v5497_v58 = vpop.eup %5496  ;;  %vm1903_vm13 = vweird.f32 %v5495_v49 }
 0x58e   :  { %v1875_v14 = vsel %vm1874_vm9, %v5491_v56, %v1871_v26  ;;  %v1906_v56 = vand.u32 2147483647, %v1866_v37  ;;  %vm1904_vm15 = vmor %vm1902_vm14, %vm1903_vm13  ;;  %v7796_v37 = vld [vmem:[#allocation26_spill] sm:$0xff]  ;;  %v7798_v26 = vld [vmem:[#allocation28_spill] sm:$0xff] }
 0x58f   :  { %v1899_v8 = vsub.f32 1.0, %v1898_v40  ;;  %v1880_v3 = vsel %vm1877_vm11, %v1879_v11, %v1875_v14  ;;  %v1890_v43 = vsel %vm1889_vm10, %v5493_v23, %v1886_v19  ;;  %v7799_v40 = vld [vmem:[#allocation29_spill] sm:$0xff]  ;;  %v7800_v11 = vld [vmem:[#allocation30_spill] sm:$0xff]  ;;  %v7801_v19 = vld [vmem:[#allocation31_spill] sm:$0xff] }
 0x590   :  { %v1895_v52 = vsel %vm1892_vm12, %v1894_v33, %v1890_v43  ;;  %v1914_v57 = vmul.f32 %v5497_v58, %v1880_v3  ;;  %vm1907_vm0 = vcmp.eq.f32.partialorder %v1906_v56, 8.507059e+37  ;;  %v7802_v33 = vld [vmem:[#allocation33_spill] sm:$0xff]  ;;  %v7803_v14 = vld [vmem:[#allocation51_spill] sm:$0xff]  ;;  %v7804_v58 = vld [vmem:[#allocation54_spill] sm:$0xff] }
 0x591   :  { %v1900_v2 = vmul.f32 %v5495_v49, %v1899_v8  ;;  %v1913_v35 = vmul.f32 %v1895_v52, %v6541_v18  ;;  %v7791_v18 = vld [vmem:[#allocation21_spill] sm:$0xff]  ;;  %v7805_v3 = vld [vmem:[#allocation55_spill] sm:$0xff]  ;;  %v7806_v52 = vld [vmem:[#allocation56_spill] sm:$0xff] }
 0x592   :  { %v7795_v8 = vld [vmem:[#allocation25_spill] sm:$0xff]  ;;  %v7810_v56 = vld [vmem:[#allocation60_spill] sm:$0xff] }
 0x593   :  { %v6679_v46 = vadd.f32 %v1914_v57, %v1913_v35  ;;  %v1901_v28 = vadd.f32 %v5495_v49, %v1900_v2  ;;  %v7792_v2 = vld [vmem:[#allocation22_spill] sm:$0xff]  ;;  %v7793_v57 = vld [vmem:[#allocation23_spill] sm:$0xff]  ;;  %v7807_v35 = vld [vmem:[#allocation57_spill] sm:$0xff] }
 0x595   :  { %5498 = vtanh.f32 %v6679_v46  ;;  %v1905_v7 = vsel %vm1904_vm15, %v5495_v49, %v1901_v28  ;;  %v7794_v49 = vld [vmem:[#allocation24_spill] sm:$0xff]  ;;  %v7808_v28 = vld [vmem:[#allocation58_spill] sm:$0xff] }
 0x596   :  { %v1910_v1 = vsel %vm1907_vm0, %v1909_v59, %v1905_v7  ;;  %v7811_v7 = vld [vmem:[#allocation63_spill] sm:$0xff]  ;;  %v7812_v59 = vld [vmem:[#allocation64_spill] sm:$0xff] }
 0x59b   :  { %v5499_v23 = vpop.eup %5498 }
 0x59c   :  { %v1917_v43 = vmul.f32 %v5499_v23, %v1910_v1  ;;  %v7813_v23 = vld [vmem:[#allocation65_spill] sm:$0xff]  ;;  %v7814_v1 = vld [vmem:[#allocation66_spill] sm:$0xff] }
 0x59e   :  { %v1918_v27 = vpack.c.bf16 %v1917_v43, %v1917_v43  ;;  %v7815_v43 = vld [vmem:[#allocation69_spill] sm:$0xff] }
 0x5a0   :  { %1927 = vmatmul.bf16.vlgmr.msrb.gmra.mxu0 %v1918_v27  ;;  %1940 = vmatmul.bf16.vlgmr.msrb.gmra.mxu1 %v1918_v27 }
 0x5a1   :  { %1953 = vmatmul.bf16.vlgmr.msrb.gmra.mxu2 %v1918_v27  ;;  %1966 = vmatmul.bf16.vlgmr.msrb.gmra.mxu3 %v1918_v27  ;;  %v7816_v27 = vld [vmem:[#allocation70_spill] sm:$0xff] }
 0x5a2   :  { %2091 = vmatpush.bf16.msrb.mxu0 %v5773_v9  ;;  %2104 = vmatpush.bf16.msrb.mxu1 %v5775_v10 }
 0x5a3   :  { %2117 = vmatpush.bf16.msrb.mxu2 %v5777_v13  ;;  %2130 = vmatpush.bf16.msrb.mxu3 %v5790_v25 }
 0x5a6   :  { %2092 = vmatpush.bf16.msrb.mxu0 %v5781_v17  ;;  %2105 = vmatpush.bf16.msrb.mxu1 %v5788_v22 }
 0x5a7   :  { %2118 = vmatpush.bf16.msrb.mxu2 %v5792_v29  ;;  %2131 = vmatpush.bf16.msrb.mxu3 %v5829_v38 }
 0x5aa   :  { %2093 = vmatpush.bf16.msrb.mxu0 %v5796_v31  ;;  %2106 = vmatpush.bf16.msrb.mxu1 %v5800_v32 }
 0x5ab   :  { %2119 = vmatpush.bf16.msrb.mxu2 %v5832_v42  ;;  %2132 = vmatpush.bf16.msrb.mxu3 %v5834_v44 }
 0x5ae   :  { %2094 = vmatpush.bf16.msrb.mxu0 %v5848_v50  ;;  %2107 = vmatpush.bf16.msrb.mxu1 %v5852_v54 }
 0x5af   :  { %2120 = vmatpush.bf16.msrb.mxu2 %v5854_v55  ;;  %2133 = vmatpush.bf16.msrb.mxu3 %v5863_v60 }
 0x5b0   :  { %1979 = vmatmul.bf16.vlgmr.msra.gmra.mxu0 %v6632_v15  ;;  %1992 = vmatmul.bf16.vlgmr.msra.gmra.mxu1 %v6632_v15 }
 0x5b1   :  { %2005 = vmatmul.bf16.vlgmr.msra.gmra.mxu2 %v6632_v15  ;;  %2018 = vmatmul.bf16.vlgmr.msra.gmra.mxu3 %v6632_v15  ;;  %v7797_v15 = vld [vmem:[#allocation27_spill] sm:$0xff] }
 0x5b2   :  { %2095 = vmatpush.bf16.msrb.mxu0 %v5867_v0  ;;  %2108 = vmatpush.bf16.msrb.mxu1 %v5870_v4 }
 0x5b3   :  { %2121 = vmatpush.bf16.msrb.mxu2 %v5872_v5  ;;  %2134 = vmatpush.bf16.msrb.mxu3 %v5878_v12 }
 0x5b6   :  { %2096 = vmatpush.bf16.msrb.mxu0 %v7791_v18  ;;  %2109 = vmatpush.bf16.msrb.mxu1 %v7792_v2 }
 0x5b7   :  { %2122 = vmatpush.bf16.msrb.mxu2 %v7793_v57  ;;  %2135 = vmatpush.bf16.msrb.mxu3 %v7794_v49 }
 0x5ba   :  { %2097 = vmatpush.bf16.msrb.mxu0 %v7795_v8  ;;  %2110 = vmatpush.bf16.msrb.mxu1 %v7796_v37  ;;  %v7839_v37 = vld [vmem:[#allocation20_spill] sm:$0xff]  ;;  %v7840_v8 = vld [vmem:[#allocation49_spill] sm:$0xff] }
 0x5bb   :  { %2123 = vmatpush.bf16.msrb.mxu2 %v7797_v15  ;;  %2136 = vmatpush.bf16.msrb.mxu3 %v7798_v26  ;;  %v247_v49 = vadd.f32 %v7840_v8, %v7839_v37 }
 0x5be   :  { %2098 = vmatpush.bf16.msrb.mxu0 %v7799_v40  ;;  %2111 = vmatpush.bf16.msrb.mxu1 %v7800_v11 }
 0x5bf   :  { %2124 = vmatpush.bf16.msrb.mxu2 %v7801_v19  ;;  %2137 = vmatpush.bf16.msrb.mxu3 %v7802_v33 }
 0x5c2   :  { %2207 = vmatpush.bf16.msra.mxu0 %v7803_v14  ;;  %2220 = vmatpush.bf16.msra.mxu1 %v7804_v58  ;;  %v7838_v14 = vld [vmem:[#allocation48_spill] sm:$0xff] }
 0x5c3   :  { %2233 = vmatpush.bf16.msra.mxu2 %v7805_v3  ;;  %2246 = vmatpush.bf16.msra.mxu3 %v7806_v52  ;;  %v7817_v52 = vld [vmem:[#allocation71_spill] sm:$0xff]  ;;  %v7835_v3 = vld [vmem:[#allocation13_spill] sm:$0xff] }
 0x5c6   :  { %2208 = vmatpush.bf16.msra.mxu0 %v7807_v35  ;;  %2221 = vmatpush.bf16.msra.mxu1 %v7808_v28  ;;  %v7818_v35 = vld [vmem:[#allocation72_spill] sm:$0xff]  ;;  %v7819_v28 = vld [vmem:[#allocation73_spill] sm:$0xff] }
 0x5c7   :  { %2234 = vmatpush.bf16.msra.mxu2 %v7809_v20  ;;  %2247 = vmatpush.bf16.msra.mxu3 %v7810_v56  ;;  %v7820_v20 = vld [vmem:[#allocation74_spill] sm:$0xff]  ;;  %v7821_v56 = vld [vmem:[#allocation75_spill] sm:$0xff] }
 0x5ca   :  { %2209 = vmatpush.bf16.msra.mxu0 %v7811_v7  ;;  %2222 = vmatpush.bf16.msra.mxu1 %v7812_v59  ;;  %v7822_v7 = vld [vmem:[#allocation78_spill] sm:$0xff]  ;;  %v7823_v59 = vld [vmem:[#allocation79_spill] sm:$0xff] }
 0x5cb   :  { %2235 = vmatpush.bf16.msra.mxu2 %v7813_v23  ;;  %2248 = vmatpush.bf16.msra.mxu3 %v7814_v1  ;;  %v7824_v23 = vld [vmem:[#allocation82_spill] sm:$0xff]  ;;  %v7825_v1 = vld [vmem:[#allocation83_spill] sm:$0xff] }
 0x5ce   :  { %2210 = vmatpush.bf16.msra.mxu0 %v7815_v43  ;;  %2223 = vmatpush.bf16.msra.mxu1 %v7816_v27  ;;  %v7826_v43 = vld [vmem:[#allocation84_spill] sm:$0xff]  ;;  %v7827_v27 = vld [vmem:[#allocation85_spill] sm:$0xff] }
 0x5cf   :  { %2236 = vmatpush.bf16.msra.mxu2 %v7817_v52  ;;  %2249 = vmatpush.bf16.msra.mxu3 %v7818_v35  ;;  %v7828_v52 = vld [vmem:[#allocation86_spill] sm:$0xff]  ;;  %v7829_v35 = vld [vmem:[#allocation87_spill] sm:$0xff] }
 0x5d2   :  { %2211 = vmatpush.bf16.msra.mxu0 %v7819_v28  ;;  %2224 = vmatpush.bf16.msra.mxu1 %v7820_v20  ;;  %v7830_v28 = vld [vmem:[#allocation91_spill] sm:$0xff]  ;;  %v7831_v20 = vld [vmem:[#allocation94_spill] sm:$0xff] }
 0x5d3   :  { %2237 = vmatpush.bf16.msra.mxu2 %v7821_v56  ;;  %2250 = vmatpush.bf16.msra.mxu3 %v7822_v7  ;;  %v7832_v56 = vld [vmem:[#allocation95_spill] sm:$0xff]  ;;  %v7833_v7 = vld [vmem:[#allocation96_spill] sm:$0xff] }
 0x5d6   :  { %2212 = vmatpush.bf16.msra.mxu0 %v7823_v59  ;;  %2225 = vmatpush.bf16.msra.mxu1 %v7824_v23  ;;  %v7834_v59 = vld [vmem:[#allocation97_spill] sm:$0xff] }
 0x5d7   :  { %2238 = vmatpush.bf16.msra.mxu2 %v7825_v1  ;;  %2251 = vmatpush.bf16.msra.mxu3 %v7826_v43 }
 0x5da   :  { %2213 = vmatpush.bf16.msra.mxu0 %v7827_v27  ;;  %2226 = vmatpush.bf16.msra.mxu1 %v7828_v52 }
 0x5db   :  { %2239 = vmatpush.bf16.msra.mxu2 %v7829_v35  ;;  %2252 = vmatpush.bf16.msra.mxu3 %v7830_v28  ;;  %v7836_v28 = vld [vmem:[#allocation47_spill] sm:$0xff] }
 0x5dc   :  { %v165_v58 = vadd.f32 %v7836_v28, %v7835_v3 }
 0x5de   :  { %2214 = vmatpush.bf16.msra.mxu0 %v7831_v20  ;;  %2227 = vmatpush.bf16.msra.mxu1 %v7832_v56  ;;  %v7837_v20 = vld [vmem:[#allocation14_spill] sm:$0xff] }
 0x5df   :  { %2240 = vmatpush.bf16.msra.mxu2 %v7833_v7  ;;  %2253 = vmatpush.bf16.msra.mxu3 %v7834_v59  ;;  %v206_v56 = vadd.f32 %v7838_v14, %v7837_v20 }
 0x61d   :  { %v6750_v23 = vpop.f32.mrf.mxu0  ;;  %v6752_v1 = vpop.f32.mrf.mxu1 }
 0x624   :  { %v6754_v43 = vpop.f32.mrf.mxu2  ;;  %v6756_v27 = vpop.f32.mrf.mxu3 }
 0x625   :  { %v1930_v52 = vpop.f32.mrf.mxu0  ;;  %v1943_v35 = vpop.f32.mrf.mxu1 }
 0x62c   :  { %v1956_v33 = vpop.f32.mrf.mxu2  ;;  %v1969_v7 = vpop.f32.mrf.mxu3 }
 0x62d   :  { %v1980_v19 = vpop.f32.mrf.mxu0  ;;  %v1993_v59 = vpop.f32.mrf.mxu1 }
 0x62e   :  { %v2023_v11 = vadd.f32 %v1980_v19, %v165_v58  ;;  %v2024_v40 = vadd.f32 %v1993_v59, %v206_v56  ;;  %v7841_v19 = vld [vmem:[#allocation32_spill] sm:$0xff]  ;;  %v7842_v58 = vld [vmem:[#allocation50_spill] sm:$0xff] }
 0x62f   :  { %v288_v8 = vadd.f32 %v7842_v58, %v7841_v19 }
 0x630   :  { %v4605_v26 = vmul.f32 -1.442695, %v2023_v11  ;;  %v4606_v15 = vmul.f32 -1.442695, %v2024_v40 }
 0x632   :  { %5500 = vpow2.f32 %v4605_v26 }
 0x633   :  { %5502 = vpow2.f32 %v4606_v15 }
 0x634   :  { %v2006_v52 = vpop.f32.mrf.mxu2  ;;  %v2019_v35 = vpop.f32.mrf.mxu3 }
 0x635   :  { %v2025_v57 = vadd.f32 %v2006_v52, %v247_v49  ;;  %v1982_v28 = vpop.f32.mrf.mxu0  ;;  %v1995_v3 = vpop.f32.mrf.mxu1  ;;  %v2026_v59 = vadd.f32 %v2019_v35, %v288_v8 }
 0x637   :  { %v4607_v2 = vmul.f32 -1.442695, %v2025_v57 }
 0x638   :  { %v5501_v14 = vpop.eup %5500 }
 0x639   :  { %v5503_v33 = vpop.eup %5502  ;;  %v2036_v7 = vadd.f32 1.0, %v5501_v14  ;;  %5504 = vpow2.f32 %v4607_v2 }
 0x63a   :  { %v2037_v20 = vadd.f32 1.0, %v5503_v33 }
 0x63b   :  { %5506 = vrcp.f32 %v2036_v7  ;;  %v2050_v14 = vand.u32 2147483648, %v2036_v7  ;;  %vm2044_vm3 = vweird.f32 %v2036_v7 }
 0x63c   :  { %5508 = vrcp.f32 %v2037_v20  ;;  %v2008_v11 = vpop.f32.mrf.mxu2  ;;  %v2021_v40 = vpop.f32.mrf.mxu3  ;;  %v2065_v2 = vand.u32 2147483648, %v2037_v20  ;;  %v2063_v37 = vand.u32 2147483647, %v2037_v20  ;;  %vm2059_vm4 = vweird.f32 %v2037_v20 }
 0x63d   :  { %v2048_v11 = vand.u32 2147483647, %v2036_v7 }
 0x63e   :  { %vm2064_vm8 = vcmp.eq.f32.partialorder %v2063_v37, 8.507059e+37 }
 0x63f   :  { %v5505_v26 = vpop.eup %5504  ;;  %vm2049_vm7 = vcmp.eq.f32.partialorder %v2048_v11, 8.507059e+37 }
 0x640   :  { %v2038_v15 = vadd.f32 1.0, %v5505_v26  ;;  %v2051_v26 = vor.u32 1.1754944e-38, %v2050_v14 }
 0x641   :  { %v5507_v56 = vpop.eup %5506 }
 0x642   :  { %v5509_v49 = vpop.eup %5508  ;;  %v2040_v52 = vmul.f32 %v5507_v56, %v2036_v7  ;;  %5510 = vrcp.f32 %v2038_v15  ;;  %vm2045_vm1 = vweird.f32 %v5507_v56  ;;  %v2080_v14 = vand.u32 2147483648, %v2038_v15 }
 0x643   :  { %v2055_v57 = vmul.f32 %v5509_v49, %v2037_v20  ;;  %5512 = vtanh.f32 %v2026_v59  ;;  %vm2060_vm2 = vweird.f32 %v5509_v49  ;;  %vm2046_vm5 = vmor %vm2044_vm3, %vm2045_vm1  ;;  %vm2074_vm10 = vweird.f32 %v2038_v15 }
 0x644   :  { %v2041_v3 = vsub.f32 1.0, %v2040_v52  ;;  %vm2061_vm6 = vmor %vm2059_vm4, %vm2060_vm2  ;;  %v2066_v52 = vor.u32 1.1754944e-38, %v2065_v2  ;;  %v2081_v11 = vor.u32 1.1754944e-38, %v2080_v14 }
 0x645   :  { %v2056_v28 = vsub.f32 1.0, %v2055_v57 }
 0x646   :  { %v2042_v33 = vmul.f32 %v5507_v56, %v2041_v3 }
 0x647   :  { %v2057_v40 = vmul.f32 %v5509_v49, %v2056_v28 }
 0x648   :  { %v5511_v18 = vpop.eup %5510  ;;  %v2043_v58 = vadd.f32 %v5507_v56, %v2042_v33 }
 0x649   :  { %v2070_v35 = vmul.f32 %v5511_v18, %v2038_v15  ;;  %v2058_v8 = vadd.f32 %v5509_v49, %v2057_v40  ;;  %v5513_v59 = vpop.eup %5512  ;;  %vm2075_vm9 = vweird.f32 %v5511_v18 }
 0x64a   :  { %v2047_v57 = vsel %vm2046_vm5, %v5507_v56, %v2043_v58  ;;  %v2078_v56 = vand.u32 2147483647, %v2038_v15  ;;  %vm2076_vm11 = vmor %vm2074_vm10, %vm2075_vm9  ;;  %v7848_v15 = vld [vmem:[#allocation120_spill] sm:$0xff]  ;;  %v7849_v58 = vld [vmem:[#allocation121_spill] sm:$0xff] }
 0x64b   :  { %v2071_v19 = vsub.f32 1.0, %v2070_v35  ;;  %v2052_v3 = vsel %vm2049_vm7, %v2051_v26, %v2047_v57  ;;  %v2062_v12 = vsel %vm2061_vm6, %v5509_v49, %v2058_v8  ;;  %v7850_v35 = vld [vmem:[#allocation122_spill] sm:$0xff]  ;;  %v7851_v26 = vld [vmem:[#allocation123_spill] sm:$0xff]  ;;  %v7852_v8 = vld [vmem:[#allocation124_spill] sm:$0xff] }
 0x64c   :  { %v2067_v28 = vsel %vm2064_vm8, %v2066_v52, %v2062_v12  ;;  %v2086_v5 = vmul.f32 %v5513_v59, %v2052_v3  ;;  %vm2079_vm12 = vcmp.eq.f32.partialorder %v2078_v56, 8.507059e+37  ;;  %v7853_v52 = vld [vmem:[#allocation125_spill] sm:$0xff]  ;;  %v7854_v57 = vld [vmem:[#allocation126_spill] sm:$0xff]  ;;  %v7855_v59 = vld [vmem:[#allocation127_spill] sm:$0xff] }
 0x64d   :  { %v2072_v4 = vmul.f32 %v5511_v18, %v2071_v19  ;;  %v2085_v33 = vmul.f32 %v2067_v28, %v6629_v61  ;;  %v7845_v61 = vld [vmem:[#allocation117_spill] sm:$0xff]  ;;  %v7847_v19 = vld [vmem:[#allocation119_spill] sm:$0xff]  ;;  %v7856_v3 = vld [vmem:[#allocation128_spill] sm:$0xff] }
 0x64e   :  { %v7857_v28 = vld [vmem:[#allocation129_spill] sm:$0xff] }
 0x64f   :  { %v6767_v7 = vadd.f32 %v2086_v5, %v2085_v33  ;;  %v2073_v20 = vadd.f32 %v5511_v18, %v2072_v4  ;;  %v7843_v4 = vld [vmem:[#allocation115_spill] sm:$0xff]  ;;  %v7844_v5 = vld [vmem:[#allocation116_spill] sm:$0xff]  ;;  %v7858_v33 = vld [vmem:[#allocation130_spill] sm:$0xff] }
 0x650   :  { %v7860_v56 = vld [vmem:[#allocation89_spill] sm:$0xff] }
 0x651   :  { %5514 = vtanh.f32 %v6767_v7  ;;  %v2077_v2 = vsel %vm2076_vm11, %v5511_v18, %v2073_v20  ;;  %v7846_v18 = vld [vmem:[#allocation118_spill] sm:$0xff]  ;;  %v7859_v20 = vld [vmem:[#allocation88_spill] sm:$0xff] }
 0x652   :  { %v2082_v37 = vsel %vm2079_vm12, %v2081_v11, %v2077_v2  ;;  %v1929_v14 = vadd.f32 %v6750_v23, %v7859_v20  ;;  %v1942_v2 = vadd.f32 %v6752_v1, %v7860_v56 }
 0x657   :  { %v5515_v49 = vpop.eup %5514 }
 0x658   :  { %v2089_v12 = vmul.f32 %v5515_v49, %v2082_v37 }
 0x65a   :  { %v6770_v40 = vpack.c.bf16 %v2089_v12, %v2089_v12 }
 0x65c   :  { %2099 = vmatmul.bf16.vlgmr.msrb.gmra.mxu0 %v6770_v40  ;;  %2112 = vmatmul.bf16.vlgmr.msrb.gmra.mxu1 %v6770_v40 }
 0x65d   :  { %2125 = vmatmul.bf16.vlgmr.msrb.gmra.mxu2 %v6770_v40  ;;  %2138 = vmatmul.bf16.vlgmr.msrb.gmra.mxu3 %v6770_v40 }
 0x65e   :  { %2259 = vmatpush.bf16.msrb.mxu0 %v7618_v53  ;;  %2272 = vmatpush.bf16.msrb.mxu1 %v7619_v62 }
 0x65f   :  { %2285 = vmatpush.bf16.msrb.mxu2 %v7620_v6  ;;  %2298 = vmatpush.bf16.msrb.mxu3 %v7621_v21 }
 0x662   :  { %2260 = vmatpush.bf16.msrb.mxu0 %v7622_v47  ;;  %2273 = vmatpush.bf16.msrb.mxu1 %v7623_v16 }
 0x663   :  { %2286 = vmatpush.bf16.msrb.mxu2 %v7624_v34  ;;  %2299 = vmatpush.bf16.msrb.mxu3 %v7625_v36 }
 0x666   :  { %2261 = vmatpush.bf16.msrb.mxu0 %v7626_v48  ;;  %2274 = vmatpush.bf16.msrb.mxu1 %v7627_v51 }
 0x667   :  { %2287 = vmatpush.bf16.msrb.mxu2 %v7693_v41  ;;  %2300 = vmatpush.bf16.msrb.mxu3 %v7694_v45 }
 0x66a   :  { %2262 = vmatpush.bf16.msrb.mxu0 %v7695_v39  ;;  %2275 = vmatpush.bf16.msrb.mxu1 %v7768_v24 }
 0x66b   :  { %2288 = vmatpush.bf16.msrb.mxu2 %v7769_v30  ;;  %2301 = vmatpush.bf16.msrb.mxu3 %v7770_v63 }
 0x66e   :  { %2263 = vmatpush.bf16.msrb.mxu0 %v7843_v4  ;;  %2276 = vmatpush.bf16.msrb.mxu1 %v7844_v5 }
 0x66f   :  { %2289 = vmatpush.bf16.msrb.mxu2 %v7845_v61  ;;  %2302 = vmatpush.bf16.msrb.mxu3 %v7846_v18 }
 0x672   :  { %2264 = vmatpush.bf16.msrb.mxu0 %v7847_v19  ;;  %2277 = vmatpush.bf16.msrb.mxu1 %v7848_v15 }
 0x673   :  { %2290 = vmatpush.bf16.msrb.mxu2 %v7849_v58  ;;  %2303 = vmatpush.bf16.msrb.mxu3 %v7850_v35 }
 0x676   :  { %2265 = vmatpush.bf16.msrb.mxu0 %v7851_v26  ;;  %2278 = vmatpush.bf16.msrb.mxu1 %v7852_v8 }
 0x677   :  { %2291 = vmatpush.bf16.msrb.mxu2 %v7853_v52  ;;  %2304 = vmatpush.bf16.msrb.mxu3 %v7854_v57 }
 0x67a   :  { %2266 = vmatpush.bf16.msrb.mxu0 %v7855_v59  ;;  %2279 = vmatpush.bf16.msrb.mxu1 %v7856_v3  ;;  %v7861_v59 = vld [vmem:[#allocation90_spill] sm:$0xff] }
 0x67b   :  { %2292 = vmatpush.bf16.msrb.mxu2 %v7857_v28  ;;  %2305 = vmatpush.bf16.msrb.mxu3 %v7858_v33  ;;  %v1955_v3 = vadd.f32 %v6754_v43, %v7861_v59 }
 0x6d9   :  { %v2100_v11 = vpop.f32.mrf.mxu0  ;;  %v2113_v49 = vpop.f32.mrf.mxu1 }
 0x6da   :  { %v2101_v37 = vadd.f32 %v2100_v11, %v1929_v14  ;;  %v2114_v12 = vadd.f32 %v2113_v49, %v1942_v2  ;;  %v7862_v11 = vld [vmem:[#allocation114_spill] sm:$0xff] }
 0x6db   :  { %v1968_v43 = vadd.f32 %v6756_v27, %v7862_v11 }
 0x6dc   :  { %v4608_v52 = vmul.f32 -1.442695, %v2101_v37  ;;  %v4609_v57 = vmul.f32 -1.442695, %v2114_v12 }
 0x6de   :  { %5516 = vpow2.f32 %v4608_v52 }
 0x6df   :  { %5518 = vpow2.f32 %v4609_v57 }
 0x6e0   :  { %v2126_v28 = vpop.f32.mrf.mxu2  ;;  %v2139_v8 = vpop.f32.mrf.mxu3 }
 0x6e1   :  { %v2127_v33 = vadd.f32 %v2126_v28, %v1955_v3  ;;  %v2102_v26 = vpop.f32.mrf.mxu0  ;;  %v2115_v35 = vpop.f32.mrf.mxu1  ;;  %v2140_v37 = vadd.f32 %v2139_v8, %v1968_v43 }
 0x6e3   :  { %v4610_v23 = vmul.f32 -1.442695, %v2127_v33 }
 0x6e4   :  { %v5517_v20 = vpop.eup %5516 }
 0x6e5   :  { %v5519_v58 = vpop.eup %5518  ;;  %v2152_v1 = vadd.f32 1.0, %v5517_v20  ;;  %5520 = vpow2.f32 %v4610_v23 }
 0x6e6   :  { %v2153_v56 = vadd.f32 1.0, %v5519_v58 }
 0x6e7   :  { %5522 = vrcp.f32 %v2152_v1  ;;  %v2166_v20 = vand.u32 2147483648, %v2152_v1  ;;  %v2164_v23 = vand.u32 2147483647, %v2152_v1  ;;  %vm2160_vm15 = vweird.f32 %v2152_v1 }
 0x6e8   :  { %5524 = vrcp.f32 %v2153_v56  ;;  %v2128_v14 = vpop.f32.mrf.mxu2  ;;  %v2141_v2 = vpop.f32.mrf.mxu3  ;;  %v2181_v58 = vand.u32 2147483648, %v2153_v56  ;;  %vm2175_vm0 = vweird.f32 %v2153_v56 }
 0x6e9   :  { %v2179_v2 = vand.u32 2147483647, %v2153_v56  ;;  %vm2165_vm3 = vcmp.eq.f32.partialorder %v2164_v23, 8.507059e+37 }
 0x6eb   :  { %v5521_v52 = vpop.eup %5520  ;;  %vm2180_vm4 = vcmp.eq.f32.partialorder %v2179_v2, 8.507059e+37 }
 0x6ec   :  { %v2154_v57 = vadd.f32 1.0, %v5521_v52  ;;  %v2167_v52 = vor.u32 1.1754944e-38, %v2166_v20 }
 0x6ed   :  { %v5523_v49 = vpop.eup %5522 }
 0x6ee   :  { %v5525_v3 = vpop.eup %5524  ;;  %v2156_v26 = vmul.f32 %v5523_v49, %v2152_v1  ;;  %5526 = vrcp.f32 %v2154_v57  ;;  %vm2161_vm13 = vweird.f32 %v5523_v49  ;;  %v2196_v20 = vand.u32 2147483648, %v2154_v57 }
 0x6ef   :  { %v2171_v35 = vmul.f32 %v5525_v3, %v2153_v56  ;;  %5528 = vtanh.f32 %v2140_v37  ;;  %vm2176_vm14 = vweird.f32 %v5525_v3  ;;  %vm2162_vm1 = vmor %vm2160_vm15, %vm2161_vm13  ;;  %vm2190_vm6 = vweird.f32 %v2154_v57 }
 0x6f0   :  { %v2157_v28 = vsub.f32 1.0, %v2156_v26  ;;  %vm2177_vm2 = vmor %vm2175_vm0, %vm2176_vm14  ;;  %v2182_v26 = vor.u32 1.1754944e-38, %v2181_v58  ;;  %v2197_v23 = vor.u32 1.1754944e-38, %v2196_v20  ;;  %v7881_v20 = vld [vmem:[#allocation56_spill] sm:$0xff] }
 0x6f1   :  { %v2172_v33 = vsub.f32 1.0, %v2171_v35 }
 0x6f2   :  { %v2158_v12 = vmul.f32 %v5523_v49, %v2157_v28 }
 0x6f3   :  { %v2173_v14 = vmul.f32 %v5525_v3, %v2172_v33 }
 0x6f4   :  { %v5527_v59 = vpop.eup %5526  ;;  %v2159_v27 = vadd.f32 %v5523_v49, %v2158_v12 }
 0x6f5   :  { %v2186_v8 = vmul.f32 %v5527_v59, %v2154_v57  ;;  %v2174_v43 = vadd.f32 %v5525_v3, %v2173_v14  ;;  %v5529_v37 = vpop.eup %5528  ;;  %vm2191_vm5 = vweird.f32 %v5527_v59 }
 0x6f6   :  { %v2163_v35 = vsel %vm2162_vm1, %v5523_v49, %v2159_v27  ;;  %v2194_v49 = vand.u32 2147483647, %v2154_v57  ;;  %vm2192_vm7 = vmor %vm2190_vm6, %vm2191_vm5  ;;  %v7868_v57 = vld [vmem:[#allocation23_spill] sm:$0xff]  ;;  %v7869_v27 = vld [vmem:[#allocation24_spill] sm:$0xff] }
 0x6f7   :  { %v2187_v11 = vsub.f32 1.0, %v2186_v8  ;;  %v2168_v28 = vsel %vm2165_vm3, %v2167_v52, %v2163_v35  ;;  %v2178_v15 = vsel %vm2177_vm2, %v5525_v3, %v2174_v43  ;;  %v7870_v8 = vld [vmem:[#allocation25_spill] sm:$0xff]  ;;  %v7871_v52 = vld [vmem:[#allocation26_spill] sm:$0xff]  ;;  %v7873_v43 = vld [vmem:[#allocation28_spill] sm:$0xff] }
 0x6f8   :  { %v2183_v33 = vsel %vm2180_vm4, %v2182_v26, %v2178_v15  ;;  %v2202_v19 = vmul.f32 %v5529_v37, %v2168_v28  ;;  %vm2195_vm8 = vcmp.eq.f32.partialorder %v2194_v49, 8.507059e+37  ;;  %v7874_v26 = vld [vmem:[#allocation29_spill] sm:$0xff]  ;;  %v7875_v35 = vld [vmem:[#allocation30_spill] sm:$0xff]  ;;  %v7876_v37 = vld [vmem:[#allocation31_spill] sm:$0xff] }
 0x6f9   :  { %v2188_v18 = vmul.f32 %v5527_v59, %v2187_v11  ;;  %v2201_v12 = vmul.f32 %v2183_v33, %v6679_v46  ;;  %v7863_v46 = vld [vmem:[#allocation17_spill] sm:$0xff]  ;;  %v7867_v11 = vld [vmem:[#allocation22_spill] sm:$0xff]  ;;  %v7878_v33 = vld [vmem:[#allocation51_spill] sm:$0xff] }
 0x6fa   :  { %v7877_v28 = vld [vmem:[#allocation33_spill] sm:$0xff] }
 0x6fb   :  { %v6817_v1 = vadd.f32 %v2202_v19, %v2201_v12  ;;  %v2189_v56 = vadd.f32 %v5527_v59, %v2188_v18  ;;  %v7864_v18 = vld [vmem:[#allocation18_spill] sm:$0xff]  ;;  %v7865_v19 = vld [vmem:[#allocation19_spill] sm:$0xff]  ;;  %v7882_v49 = vld [vmem:[#allocation57_spill] sm:$0xff] }
 0x6fc   :  { %v7879_v12 = vld [vmem:[#allocation54_spill] sm:$0xff] }
 0x6fd   :  { %5530 = vtanh.f32 %v6817_v1  ;;  %v2193_v58 = vsel %vm2192_vm7, %v5527_v59, %v2189_v56  ;;  %v7866_v59 = vld [vmem:[#allocation21_spill] sm:$0xff]  ;;  %v7880_v56 = vld [vmem:[#allocation55_spill] sm:$0xff] }
 0x6fe   :  { %v2198_v14 = vsel %vm2195_vm8, %v2197_v23, %v2193_v58  ;;  %v7883_v58 = vld [vmem:[#allocation58_spill] sm:$0xff]  ;;  %v7884_v23 = vld [vmem:[#allocation59_spill] sm:$0xff] }
 0x703   :  { %v5531_v3 = vpop.eup %5530 }
 0x704   :  { %v2205_v15 = vmul.f32 %v5531_v3, %v2198_v14  ;;  %v7885_v3 = vld [vmem:[#allocation60_spill] sm:$0xff]  ;;  %v7886_v14 = vld [vmem:[#allocation63_spill] sm:$0xff] }
 0x706   :  { %v2206_v2 = vpack.c.bf16 %v2205_v15, %v2205_v15  ;;  %v7887_v15 = vld [vmem:[#allocation64_spill] sm:$0xff] }
 0x708   :  { %2215 = vmatmul.bf16.vlgmr.msra.gmra.mxu0 %v2206_v2  ;;  %2228 = vmatmul.bf16.vlgmr.msra.gmra.mxu1 %v2206_v2 }
 0x709   :  { %2241 = vmatmul.bf16.vlgmr.msra.gmra.mxu2 %v2206_v2  ;;  %2254 = vmatmul.bf16.vlgmr.msra.gmra.mxu3 %v2206_v2  ;;  %v7888_v2 = vld [vmem:[#allocation65_spill] sm:$0xff] }
 0x70a   :  { %2379 = vmatpush.bf16.msra.mxu0 %v5773_v9  ;;  %2392 = vmatpush.bf16.msra.mxu1 %v5775_v10 }
 0x70b   :  { %2405 = vmatpush.bf16.msra.mxu2 %v5777_v13  ;;  %2418 = vmatpush.bf16.msra.mxu3 %v5790_v25 }
 0x70e   :  { %2380 = vmatpush.bf16.msra.mxu0 %v5781_v17  ;;  %2393 = vmatpush.bf16.msra.mxu1 %v5788_v22 }
 0x70f   :  { %2406 = vmatpush.bf16.msra.mxu2 %v5792_v29  ;;  %2419 = vmatpush.bf16.msra.mxu3 %v5829_v38 }
 0x712   :  { %2381 = vmatpush.bf16.msra.mxu0 %v5796_v31  ;;  %2394 = vmatpush.bf16.msra.mxu1 %v5800_v32 }
 0x713   :  { %2407 = vmatpush.bf16.msra.mxu2 %v5832_v42  ;;  %2420 = vmatpush.bf16.msra.mxu3 %v5834_v44 }
 0x716   :  { %2382 = vmatpush.bf16.msra.mxu0 %v5848_v50  ;;  %2395 = vmatpush.bf16.msra.mxu1 %v5852_v54 }
 0x717   :  { %2408 = vmatpush.bf16.msra.mxu2 %v5854_v55  ;;  %2421 = vmatpush.bf16.msra.mxu3 %v5863_v60 }
 0x718   :  { %2267 = vmatmul.bf16.vlgmr.msrb.gmra.mxu0 %v6770_v40  ;;  %2280 = vmatmul.bf16.vlgmr.msrb.gmra.mxu1 %v6770_v40 }
 0x719   :  { %2293 = vmatmul.bf16.vlgmr.msrb.gmra.mxu2 %v6770_v40  ;;  %2306 = vmatmul.bf16.vlgmr.msrb.gmra.mxu3 %v6770_v40  ;;  %v7872_v40 = vld [vmem:[#allocation27_spill] sm:$0xff] }
 0x71a   :  { %2383 = vmatpush.bf16.msra.mxu0 %v5867_v0  ;;  %2396 = vmatpush.bf16.msra.mxu1 %v7863_v46 }
 0x71b   :  { %2409 = vmatpush.bf16.msra.mxu2 %v7864_v18  ;;  %2422 = vmatpush.bf16.msra.mxu3 %v7865_v19 }
 0x71e   :  { %2384 = vmatpush.bf16.msra.mxu0 %v7866_v59  ;;  %2397 = vmatpush.bf16.msra.mxu1 %v7867_v11  ;;  %v7915_v11 = vld [vmem:[#allocation61_spill] sm:$0xff] }
 0x71f   :  { %2410 = vmatpush.bf16.msra.mxu2 %v7868_v57  ;;  %2423 = vmatpush.bf16.msra.mxu3 %v7869_v27  ;;  %v7914_v57 = vld [vmem:[#allocation20_spill] sm:$0xff] }
 0x720   :  { %v250_v59 = vadd.f32 %v7915_v11, %v7914_v57 }
 0x722   :  { %2385 = vmatpush.bf16.msra.mxu0 %v7870_v8  ;;  %2398 = vmatpush.bf16.msra.mxu1 %v7871_v52 }
 0x723   :  { %2411 = vmatpush.bf16.msra.mxu2 %v7872_v40  ;;  %2424 = vmatpush.bf16.msra.mxu3 %v7873_v43 }
 0x726   :  { %2386 = vmatpush.bf16.msra.mxu0 %v7874_v26  ;;  %2399 = vmatpush.bf16.msra.mxu1 %v7875_v35  ;;  %v7913_v35 = vld [vmem:[#allocation53_spill] sm:$0xff] }
 0x727   :  { %2412 = vmatpush.bf16.msra.mxu2 %v7876_v37  ;;  %2425 = vmatpush.bf16.msra.mxu3 %v7877_v28  ;;  %v7910_v28 = vld [vmem:[#allocation13_spill] sm:$0xff] }
 0x72a   :  { %2495 = vmatpush.bf16.msrb.mxu0 %v7878_v33  ;;  %2508 = vmatpush.bf16.msrb.mxu1 %v7879_v12  ;;  %v7889_v33 = vld [vmem:[#allocation66_spill] sm:$0xff]  ;;  %v7890_v12 = vld [vmem:[#allocation69_spill] sm:$0xff] }
 0x72b   :  { %2521 = vmatpush.bf16.msrb.mxu2 %v7880_v56  ;;  %2534 = vmatpush.bf16.msrb.mxu3 %v7881_v20  ;;  %v7891_v56 = vld [vmem:[#allocation70_spill] sm:$0xff]  ;;  %v7892_v20 = vld [vmem:[#allocation71_spill] sm:$0xff] }
 0x72e   :  { %2496 = vmatpush.bf16.msrb.mxu0 %v7882_v49  ;;  %2509 = vmatpush.bf16.msrb.mxu1 %v7883_v58  ;;  %v7893_v49 = vld [vmem:[#allocation72_spill] sm:$0xff]  ;;  %v7894_v58 = vld [vmem:[#allocation73_spill] sm:$0xff] }
 0x72f   :  { %2522 = vmatpush.bf16.msrb.mxu2 %v7884_v23  ;;  %2535 = vmatpush.bf16.msrb.mxu3 %v7885_v3  ;;  %v7895_v23 = vld [vmem:[#allocation74_spill] sm:$0xff]  ;;  %v7896_v3 = vld [vmem:[#allocation75_spill] sm:$0xff] }
 0x732   :  { %2497 = vmatpush.bf16.msrb.mxu0 %v7886_v14  ;;  %2510 = vmatpush.bf16.msrb.mxu1 %v7887_v15  ;;  %v7897_v14 = vld [vmem:[#allocation78_spill] sm:$0xff]  ;;  %v7898_v15 = vld [vmem:[#allocation79_spill] sm:$0xff] }
 0x733   :  { %2523 = vmatpush.bf16.msrb.mxu2 %v7888_v2  ;;  %2536 = vmatpush.bf16.msrb.mxu3 %v7889_v33  ;;  %v7899_v2 = vld [vmem:[#allocation82_spill] sm:$0xff]  ;;  %v7900_v33 = vld [vmem:[#allocation83_spill] sm:$0xff] }
 0x736   :  { %2498 = vmatpush.bf16.msrb.mxu0 %v7890_v12  ;;  %2511 = vmatpush.bf16.msrb.mxu1 %v7891_v56  ;;  %v7901_v12 = vld [vmem:[#allocation84_spill] sm:$0xff]  ;;  %v7902_v56 = vld [vmem:[#allocation85_spill] sm:$0xff] }
 0x737   :  { %2524 = vmatpush.bf16.msrb.mxu2 %v7892_v20  ;;  %2537 = vmatpush.bf16.msrb.mxu3 %v7893_v49  ;;  %v7903_v20 = vld [vmem:[#allocation86_spill] sm:$0xff]  ;;  %v7904_v49 = vld [vmem:[#allocation87_spill] sm:$0xff] }
 0x73a   :  { %2499 = vmatpush.bf16.msrb.mxu0 %v7894_v58  ;;  %2512 = vmatpush.bf16.msrb.mxu1 %v7895_v23  ;;  %v7905_v58 = vld [vmem:[#allocation91_spill] sm:$0xff]  ;;  %v7906_v23 = vld [vmem:[#allocation94_spill] sm:$0xff] }
 0x73b   :  { %2525 = vmatpush.bf16.msrb.mxu2 %v7896_v3  ;;  %2538 = vmatpush.bf16.msrb.mxu3 %v7897_v14  ;;  %v7907_v3 = vld [vmem:[#allocation95_spill] sm:$0xff]  ;;  %v7908_v14 = vld [vmem:[#allocation96_spill] sm:$0xff] }
 0x73e   :  { %2500 = vmatpush.bf16.msrb.mxu0 %v7898_v15  ;;  %2513 = vmatpush.bf16.msrb.mxu1 %v7899_v2  ;;  %v7909_v15 = vld [vmem:[#allocation97_spill] sm:$0xff] }
 0x73f   :  { %2526 = vmatpush.bf16.msrb.mxu2 %v7900_v33  ;;  %2539 = vmatpush.bf16.msrb.mxu3 %v7901_v12 }
 0x742   :  { %2501 = vmatpush.bf16.msrb.mxu0 %v7902_v56  ;;  %2514 = vmatpush.bf16.msrb.mxu1 %v7903_v20 }
 0x743   :  { %2527 = vmatpush.bf16.msrb.mxu2 %v7904_v49  ;;  %2540 = vmatpush.bf16.msrb.mxu3 %v7905_v58  ;;  %v7911_v58 = vld [vmem:[#allocation52_spill] sm:$0xff] }
 0x744   :  { %v168_v37 = vadd.f32 %v7911_v58, %v7910_v28 }
 0x746   :  { %2502 = vmatpush.bf16.msrb.mxu0 %v7906_v23  ;;  %2515 = vmatpush.bf16.msrb.mxu1 %v7907_v3  ;;  %v7912_v23 = vld [vmem:[#allocation14_spill] sm:$0xff] }
 0x747   :  { %2528 = vmatpush.bf16.msrb.mxu2 %v7908_v14  ;;  %2541 = vmatpush.bf16.msrb.mxu3 %v7909_v15  ;;  %v209_v3 = vadd.f32 %v7913_v35, %v7912_v23 }
 0x785   :  { %v6888_v2 = vpop.f32.mrf.mxu0  ;;  %v6890_v33 = vpop.f32.mrf.mxu1 }
 0x78c   :  { %v6892_v12 = vpop.f32.mrf.mxu2  ;;  %v6894_v56 = vpop.f32.mrf.mxu3 }
 0x78d   :  { %v2218_v20 = vpop.f32.mrf.mxu0  ;;  %v2231_v49 = vpop.f32.mrf.mxu1 }
 0x794   :  { %v2244_v26 = vpop.f32.mrf.mxu2  ;;  %v2257_v14 = vpop.f32.mrf.mxu3 }
 0x795   :  { %v2268_v43 = vpop.f32.mrf.mxu0  ;;  %v2281_v15 = vpop.f32.mrf.mxu1 }
 0x796   :  { %v2311_v40 = vadd.f32 %v2268_v43, %v168_v37  ;;  %v2312_v52 = vadd.f32 %v2281_v15, %v209_v3  ;;  %v7916_v43 = vld [vmem:[#allocation32_spill] sm:$0xff]  ;;  %v7917_v37 = vld [vmem:[#allocation62_spill] sm:$0xff] }
 0x797   :  { %v291_v11 = vadd.f32 %v7917_v37, %v7916_v43 }
 0x798   :  { %v4611_v8 = vmul.f32 -1.442695, %v2311_v40  ;;  %v4612_v27 = vmul.f32 -1.442695, %v2312_v52 }
 0x79a   :  { %5532 = vpow2.f32 %v4611_v8 }
 0x79b   :  { %5534 = vpow2.f32 %v4612_v27 }
 0x79c   :  { %v2294_v20 = vpop.f32.mrf.mxu2  ;;  %v2307_v49 = vpop.f32.mrf.mxu3 }
 0x79d   :  { %v2313_v19 = vadd.f32 %v2294_v20, %v250_v59  ;;  %v2270_v58 = vpop.f32.mrf.mxu0  ;;  %v2283_v28 = vpop.f32.mrf.mxu1  ;;  %v2314_v15 = vadd.f32 %v2307_v49, %v291_v11 }
 0x79f   :  { %v4613_v18 = vmul.f32 -1.442695, %v2313_v19 }
 0x7a0   :  { %v5533_v35 = vpop.eup %5532 }
 0x7a1   :  { %v5535_v26 = vpop.eup %5534  ;;  %v2324_v14 = vadd.f32 1.0, %v5533_v35  ;;  %5536 = vpow2.f32 %v4613_v18 }
 0x7a2   :  { %v2325_v23 = vadd.f32 1.0, %v5535_v26 }
 0x7a3   :  { %5538 = vrcp.f32 %v2324_v14  ;;  %v2338_v35 = vand.u32 2147483648, %v2324_v14  ;;  %vm2332_vm11 = vweird.f32 %v2324_v14 }
 0x7a4   :  { %5540 = vrcp.f32 %v2325_v23  ;;  %v2296_v40 = vpop.f32.mrf.mxu2  ;;  %v2309_v52 = vpop.f32.mrf.mxu3  ;;  %v2353_v18 = vand.u32 2147483648, %v2325_v23  ;;  %v2351_v57 = vand.u32 2147483647, %v2325_v23  ;;  %vm2347_vm12 = vweird.f32 %v2325_v23 }
 0x7a5   :  { %v2336_v40 = vand.u32 2147483647, %v2324_v14 }
 0x7a6   :  { %vm2352_vm0 = vcmp.eq.f32.partialorder %v2351_v57, 8.507059e+37 }
 0x7a7   :  { %v5537_v8 = vpop.eup %5536  ;;  %vm2337_vm15 = vcmp.eq.f32.partialorder %v2336_v40, 8.507059e+37 }
 0x7a8   :  { %v2326_v27 = vadd.f32 1.0, %v5537_v8  ;;  %v2339_v8 = vor.u32 1.1754944e-38, %v2338_v35 }
 0x7a9   :  { %v5539_v3 = vpop.eup %5538 }
 0x7aa   :  { %v5541_v59 = vpop.eup %5540  ;;  %v2328_v20 = vmul.f32 %v5539_v3, %v2324_v14  ;;  %5542 = vrcp.f32 %v2326_v27  ;;  %vm2333_vm9 = vweird.f32 %v5539_v3  ;;  %v2368_v35 = vand.u32 2147483648, %v2326_v27 }
 0x7ab   :  { %v2343_v19 = vmul.f32 %v5541_v59, %v2325_v23  ;;  %5544 = vtanh.f32 %v2314_v15  ;;  %vm2348_vm10 = vweird.f32 %v5541_v59  ;;  %vm2334_vm13 = vmor %vm2332_vm11, %vm2333_vm9  ;;  %vm2362_vm2 = vweird.f32 %v2326_v27 }
 0x7ac   :  { %v2329_v28 = vsub.f32 1.0, %v2328_v20  ;;  %vm2349_vm14 = vmor %vm2347_vm12, %vm2348_vm10  ;;  %v2354_v20 = vor.u32 1.1754944e-38, %v2353_v18  ;;  %v2369_v40 = vor.u32 1.1754944e-38, %v2368_v35 }
 0x7ad   :  { %v2344_v58 = vsub.f32 1.0, %v2343_v19 }
 0x7ae   :  { %v2330_v26 = vmul.f32 %v5539_v3, %v2329_v28 }
 0x7af   :  { %v2345_v52 = vmul.f32 %v5541_v59, %v2344_v58 }
 0x7b0   :  { %v5543_v46 = vpop.eup %5542  ;;  %v2331_v37 = vadd.f32 %v5539_v3, %v2330_v26 }
 0x7b1   :  { %v2358_v49 = vmul.f32 %v5543_v46, %v2326_v27  ;;  %v2346_v11 = vadd.f32 %v5541_v59, %v2345_v52  ;;  %v5545_v15 = vpop.eup %5544  ;;  %vm2363_vm1 = vweird.f32 %v5543_v46 }
 0x7b2   :  { %v2335_v19 = vsel %vm2334_vm13, %v5539_v3, %v2331_v37  ;;  %v2366_v3 = vand.u32 2147483647, %v2326_v27  ;;  %vm2364_vm3 = vmor %vm2362_vm2, %vm2363_vm1  ;;  %v7923_v27 = vld [vmem:[#allocation123_spill] sm:$0xff]  ;;  %v7924_v37 = vld [vmem:[#allocation124_spill] sm:$0xff] }
 0x7b3   :  { %v2359_v43 = vsub.f32 1.0, %v2358_v49  ;;  %v2340_v28 = vsel %vm2337_vm15, %v2339_v8, %v2335_v19  ;;  %v2350_v0 = vsel %vm2349_vm14, %v5541_v59, %v2346_v11  ;;  %v7925_v49 = vld [vmem:[#allocation125_spill] sm:$0xff]  ;;  %v7926_v8 = vld [vmem:[#allocation126_spill] sm:$0xff]  ;;  %v7927_v11 = vld [vmem:[#allocation127_spill] sm:$0xff] }
 0x7b4   :  { %v2355_v58 = vsel %vm2352_vm0, %v2354_v20, %v2350_v0  ;;  %v2374_v60 = vmul.f32 %v5545_v15, %v2340_v28  ;;  %vm2367_vm4 = vcmp.eq.f32.partialorder %v2366_v3, 8.507059e+37  ;;  %v7928_v20 = vld [vmem:[#allocation128_spill] sm:$0xff]  ;;  %v7929_v19 = vld [vmem:[#allocation129_spill] sm:$0xff]  ;;  %v7930_v15 = vld [vmem:[#allocation130_spill] sm:$0xff] }
 0x7b5   :  { %v2360_v55 = vmul.f32 %v5543_v46, %v2359_v43  ;;  %v2373_v26 = vmul.f32 %v2355_v58, %v6767_v7  ;;  %v7920_v7 = vld [vmem:[#allocation120_spill] sm:$0xff]  ;;  %v7922_v43 = vld [vmem:[#allocation122_spill] sm:$0xff] }
 0x7b6   :  { %v7931_v28 = vld [vmem:[#allocation88_spill] sm:$0xff] }
 0x7b7   :  { %v6905_v14 = vadd.f32 %v2374_v60, %v2373_v26  ;;  %v2361_v23 = vadd.f32 %v5543_v46, %v2360_v55  ;;  %v7918_v55 = vld [vmem:[#allocation118_spill] sm:$0xff]  ;;  %v7919_v60 = vld [vmem:[#allocation119_spill] sm:$0xff]  ;;  %v2217_v58 = vadd.f32 %v6888_v2, %v7931_v28  ;;  %v7932_v26 = vld [vmem:[#allocation89_spill] sm:$0xff] }
 0x7b9   :  { %5546 = vtanh.f32 %v6905_v14  ;;  %v2365_v18 = vsel %vm2364_vm3, %v5543_v46, %v2361_v23  ;;  %v7921_v46 = vld [vmem:[#allocation121_spill] sm:$0xff]  ;;  %v2230_v23 = vadd.f32 %v6890_v33, %v7932_v26 }
 0x7ba   :  { %v2370_v57 = vsel %vm2367_vm4, %v2369_v40, %v2365_v18 }
 0x7bf   :  { %v5547_v59 = vpop.eup %5546 }
 0x7c0   :  { %v2377_v0 = vmul.f32 %v5547_v59, %v2370_v57 }
 0x7c2   :  { %v6908_v52 = vpack.c.bf16 %v2377_v0, %v2377_v0  ;;  %v7933_v0 = vld [vmem:[#allocation90_spill] sm:$0xff] }
 0x7c4   :  { %2387 = vmatmul.bf16.vlgmr.msra.gmra.mxu0 %v6908_v52  ;;  %2400 = vmatmul.bf16.vlgmr.msra.gmra.mxu1 %v6908_v52 }
 0x7c5   :  { %2413 = vmatmul.bf16.vlgmr.msra.gmra.mxu2 %v6908_v52  ;;  %2426 = vmatmul.bf16.vlgmr.msra.gmra.mxu3 %v6908_v52 }
 0x7c6   :  { %2547 = vmatpush.bf16.msra.mxu0 %v7618_v53  ;;  %2560 = vmatpush.bf16.msra.mxu1 %v7619_v62 }
 0x7c7   :  { %2573 = vmatpush.bf16.msra.mxu2 %v7620_v6  ;;  %2586 = vmatpush.bf16.msra.mxu3 %v7621_v21 }
 0x7ca   :  { %2548 = vmatpush.bf16.msra.mxu0 %v7622_v47  ;;  %2561 = vmatpush.bf16.msra.mxu1 %v7623_v16 }
 0x7cb   :  { %2574 = vmatpush.bf16.msra.mxu2 %v7624_v34  ;;  %2587 = vmatpush.bf16.msra.mxu3 %v7625_v36 }
 0x7ce   :  { %2549 = vmatpush.bf16.msra.mxu0 %v7626_v48  ;;  %2562 = vmatpush.bf16.msra.mxu1 %v7627_v51 }
 0x7cf   :  { %2575 = vmatpush.bf16.msra.mxu2 %v7693_v41  ;;  %2588 = vmatpush.bf16.msra.mxu3 %v7694_v45 }
 0x7d2   :  { %2550 = vmatpush.bf16.msra.mxu0 %v7695_v39  ;;  %2563 = vmatpush.bf16.msra.mxu1 %v7768_v24 }
 0x7d3   :  { %2576 = vmatpush.bf16.msra.mxu2 %v7769_v30  ;;  %2589 = vmatpush.bf16.msra.mxu3 %v7770_v63 }
 0x7d6   :  { %2551 = vmatpush.bf16.msra.mxu0 %v7843_v4  ;;  %2564 = vmatpush.bf16.msra.mxu1 %v7844_v5 }
 0x7d7   :  { %2577 = vmatpush.bf16.msra.mxu2 %v7845_v61  ;;  %2590 = vmatpush.bf16.msra.mxu3 %v7918_v55 }
 0x7da   :  { %2552 = vmatpush.bf16.msra.mxu0 %v7919_v60  ;;  %2565 = vmatpush.bf16.msra.mxu1 %v7920_v7 }
 0x7db   :  { %2578 = vmatpush.bf16.msra.mxu2 %v7921_v46  ;;  %2591 = vmatpush.bf16.msra.mxu3 %v7922_v43 }
 0x7de   :  { %2553 = vmatpush.bf16.msra.mxu0 %v7923_v27  ;;  %2566 = vmatpush.bf16.msra.mxu1 %v7924_v37 }
 0x7df   :  { %2579 = vmatpush.bf16.msra.mxu2 %v7925_v49  ;;  %2592 = vmatpush.bf16.msra.mxu3 %v7926_v8 }
 0x7e2   :  { %2554 = vmatpush.bf16.msra.mxu0 %v7927_v11  ;;  %2567 = vmatpush.bf16.msra.mxu1 %v7928_v20  ;;  %v2243_v20 = vadd.f32 %v6892_v12, %v7933_v0 }
 0x7e3   :  { %2580 = vmatpush.bf16.msra.mxu2 %v7929_v19  ;;  %2593 = vmatpush.bf16.msra.mxu3 %v7930_v15 }
 0x841   :  { %v2388_v35 = vpop.f32.mrf.mxu0  ;;  %v2401_v3 = vpop.f32.mrf.mxu1 }
 0x842   :  { %v2389_v18 = vadd.f32 %v2388_v35, %v2217_v58  ;;  %v2402_v40 = vadd.f32 %v2401_v3, %v2230_v23  ;;  %v7934_v3 = vld [vmem:[#allocation114_spill] sm:$0xff] }
 0x843   :  { %v2256_v12 = vadd.f32 %v6894_v56, %v7934_v3 }
 0x844   :  { %v4614_v59 = vmul.f32 -1.442695, %v2389_v18  ;;  %v4615_v57 = vmul.f32 -1.442695, %v2402_v40 }
 0x846   :  { %5548 = vpow2.f32 %v4614_v59 }
 0x847   :  { %5550 = vpow2.f32 %v4615_v57 }
 0x848   :  { %v2414_v19 = vpop.f32.mrf.mxu2  ;;  %v2427_v11 = vpop.f32.mrf.mxu3 }
 0x849   :  { %v2415_v15 = vadd.f32 %v2414_v19, %v2243_v20  ;;  %v2390_v8 = vpop.f32.mrf.mxu0  ;;  %v2403_v49 = vpop.f32.mrf.mxu1  ;;  %v2428_v59 = vadd.f32 %v2427_v11, %v2256_v12 }
 0x84b   :  { %v4616_v2 = vmul.f32 -1.442695, %v2415_v15 }
 0x84c   :  { %v5549_v28 = vpop.eup %5548 }
 0x84d   :  { %v5551_v37 = vpop.eup %5550  ;;  %v2440_v33 = vadd.f32 1.0, %v5549_v28  ;;  %5552 = vpow2.f32 %v4616_v2 }
 0x84e   :  { %v2441_v26 = vadd.f32 1.0, %v5551_v37 }
 0x84f   :  { %5554 = vrcp.f32 %v2440_v33  ;;  %v2454_v28 = vand.u32 2147483648, %v2440_v33  ;;  %v2452_v2 = vand.u32 2147483647, %v2440_v33  ;;  %vm2448_vm7 = vweird.f32 %v2440_v33 }
 0x850   :  { %5556 = vrcp.f32 %v2441_v26  ;;  %v2416_v58 = vpop.f32.mrf.mxu2  ;;  %v2429_v23 = vpop.f32.mrf.mxu3  ;;  %v2469_v37 = vand.u32 2147483648, %v2441_v26  ;;  %vm2463_vm8 = vweird.f32 %v2441_v26 }
 0x851   :  { %v2467_v23 = vand.u32 2147483647, %v2441_v26  ;;  %vm2453_vm11 = vcmp.eq.f32.partialorder %v2452_v2, 8.507059e+37 }
 0x853   :  { %v5553_v35 = vpop.eup %5552  ;;  %vm2468_vm12 = vcmp.eq.f32.partialorder %v2467_v23, 8.507059e+37 }
 0x854   :  { %v2442_v18 = vadd.f32 1.0, %v5553_v35  ;;  %v2455_v35 = vor.u32 1.1754944e-38, %v2454_v28 }
 0x855   :  { %v5555_v40 = vpop.eup %5554 }
 0x856   :  { %v5557_v20 = vpop.eup %5556  ;;  %v2444_v8 = vmul.f32 %v5555_v40, %v2440_v33  ;;  %5558 = vrcp.f32 %v2442_v18  ;;  %vm2449_vm5 = vweird.f32 %v5555_v40  ;;  %v2484_v28 = vand.u32 2147483648, %v2442_v18 }
 0x857   :  { %v2459_v49 = vmul.f32 %v5557_v20, %v2441_v26  ;;  %5560 = vtanh.f32 %v2428_v59  ;;  %vm2464_vm6 = vweird.f32 %v5557_v20  ;;  %vm2450_vm9 = vmor %vm2448_vm7, %vm2449_vm5  ;;  %vm2478_vm14 = vweird.f32 %v2442_v18 }
 0x858   :  { %v2445_v19 = vsub.f32 1.0, %v2444_v8  ;;  %vm2465_vm10 = vmor %vm2463_vm8, %vm2464_vm6  ;;  %v2470_v8 = vor.u32 1.1754944e-38, %v2469_v37  ;;  %v2485_v2 = vor.u32 1.1754944e-38, %v2484_v28  ;;  %v7953_v28 = vld [vmem:[#allocation51_spill] sm:$0xff] }
 0x859   :  { %v2460_v15 = vsub.f32 1.0, %v2459_v49 }
 0x85a   :  { %v2446_v57 = vmul.f32 %v5555_v40, %v2445_v19 }
 0x85b   :  { %v2461_v58 = vmul.f32 %v5557_v20, %v2460_v15 }
 0x85c   :  { %v5559_v0 = vpop.eup %5558  ;;  %v2447_v56 = vadd.f32 %v5555_v40, %v2446_v57 }
 0x85d   :  { %v2474_v11 = vmul.f32 %v5559_v0, %v2442_v18  ;;  %v2462_v12 = vadd.f32 %v5557_v20, %v2461_v58  ;;  %v5561_v59 = vpop.eup %5560  ;;  %vm2479_vm13 = vweird.f32 %v5559_v0 }
 0x85e   :  { %v2451_v49 = vsel %vm2450_vm9, %v5555_v40, %v2447_v56  ;;  %v2482_v40 = vand.u32 2147483647, %v2442_v18  ;;  %vm2480_vm15 = vmor %vm2478_vm14, %vm2479_vm13  ;;  %v7940_v18 = vld [vmem:[#allocation19_spill] sm:$0xff]  ;;  %v7941_v56 = vld [vmem:[#allocation21_spill] sm:$0xff] }
 0x85f   :  { %v2475_v3 = vsub.f32 1.0, %v2474_v11  ;;  %v2456_v19 = vsel %vm2453_vm11, %v2455_v35, %v2451_v49  ;;  %v2466_v27 = vsel %vm2465_vm10, %v5557_v20, %v2462_v12  ;;  %v7942_v11 = vld [vmem:[#allocation22_spill] sm:$0xff]  ;;  %v7943_v35 = vld [vmem:[#allocation23_spill] sm:$0xff]  ;;  %v7944_v12 = vld [vmem:[#allocation24_spill] sm:$0xff] }
 0x860   :  { %v2471_v15 = vsel %vm2468_vm12, %v2470_v8, %v2466_v27  ;;  %v2490_v43 = vmul.f32 %v5561_v59, %v2456_v19  ;;  %vm2483_vm0 = vcmp.eq.f32.partialorder %v2482_v40, 8.507059e+37  ;;  %v7945_v8 = vld [vmem:[#allocation25_spill] sm:$0xff]  ;;  %v7946_v49 = vld [vmem:[#allocation26_spill] sm:$0xff]  ;;  %v7948_v59 = vld [vmem:[#allocation28_spill] sm:$0xff] }
 0x861   :  { %v2476_v46 = vmul.f32 %v5559_v0, %v2475_v3  ;;  %v2489_v57 = vmul.f32 %v2471_v15, %v6817_v1  ;;  %v7935_v1 = vld [vmem:[#allocation12_spill] sm:$0xff]  ;;  %v7939_v3 = vld [vmem:[#allocation18_spill] sm:$0xff]  ;;  %v7949_v19 = vld [vmem:[#allocation29_spill] sm:$0xff] }
 0x862   :  { %v7950_v15 = vld [vmem:[#allocation30_spill] sm:$0xff] }
 0x863   :  { %v6955_v33 = vadd.f32 %v2490_v43, %v2489_v57  ;;  %v2477_v26 = vadd.f32 %v5559_v0, %v2476_v46  ;;  %v7936_v46 = vld [vmem:[#allocation15_spill] sm:$0xff]  ;;  %v7937_v43 = vld [vmem:[#allocation16_spill] sm:$0xff]  ;;  %v7954_v40 = vld [vmem:[#allocation54_spill] sm:$0xff] }
 0x864   :  { %v7951_v57 = vld [vmem:[#allocation31_spill] sm:$0xff] }
 0x865   :  { %5562 = vtanh.f32 %v6955_v33  ;;  %v2481_v37 = vsel %vm2480_vm15, %v5559_v0, %v2477_v26  ;;  %v7938_v0 = vld [vmem:[#allocation17_spill] sm:$0xff] }
 0x866   :  { %v2486_v58 = vsel %vm2483_vm0, %v2485_v2, %v2481_v37  ;;  %v7952_v26 = vld [vmem:[#allocation33_spill] sm:$0xff]  ;;  %v7955_v37 = vld [vmem:[#allocation55_spill] sm:$0xff]  ;;  %v7956_v2 = vld [vmem:[#allocation56_spill] sm:$0xff] }
 0x86b   :  { %v5563_v20 = vpop.eup %5562 }
 0x86c   :  { %v2493_v27 = vmul.f32 %v5563_v20, %v2486_v58  ;;  %v7957_v20 = vld [vmem:[#allocation57_spill] sm:$0xff]  ;;  %v7958_v58 = vld [vmem:[#allocation58_spill] sm:$0xff] }
 0x86e   :  { %v2494_v23 = vpack.c.bf16 %v2493_v27, %v2493_v27  ;;  %v7959_v27 = vld [vmem:[#allocation59_spill] sm:$0xff] }
 0x870   :  { %2503 = vmatmul.bf16.vlgmr.msrb.gmra.mxu0 %v2494_v23  ;;  %2516 = vmatmul.bf16.vlgmr.msrb.gmra.mxu1 %v2494_v23 }
 0x871   :  { %2529 = vmatmul.bf16.vlgmr.msrb.gmra.mxu2 %v2494_v23  ;;  %2542 = vmatmul.bf16.vlgmr.msrb.gmra.mxu3 %v2494_v23  ;;  %v7960_v23 = vld [vmem:[#allocation60_spill] sm:$0xff] }
 0x872   :  { %2667 = vmatpush.bf16.msrb.mxu0 %v5773_v9  ;;  %2680 = vmatpush.bf16.msrb.mxu1 %v5775_v10 }
 0x873   :  { %2693 = vmatpush.bf16.msrb.mxu2 %v5777_v13  ;;  %2706 = vmatpush.bf16.msrb.mxu3 %v5790_v25 }
 0x876   :  { %2668 = vmatpush.bf16.msrb.mxu0 %v5781_v17  ;;  %2681 = vmatpush.bf16.msrb.mxu1 %v5788_v22 }
 0x877   :  { %2694 = vmatpush.bf16.msrb.mxu2 %v5792_v29  ;;  %2707 = vmatpush.bf16.msrb.mxu3 %v5829_v38 }
 0x87a   :  { %2669 = vmatpush.bf16.msrb.mxu0 %v5796_v31  ;;  %2682 = vmatpush.bf16.msrb.mxu1 %v5800_v32 }
 0x87b   :  { %2695 = vmatpush.bf16.msrb.mxu2 %v5832_v42  ;;  %2708 = vmatpush.bf16.msrb.mxu3 %v5834_v44 }
 0x87e   :  { %2670 = vmatpush.bf16.msrb.mxu0 %v5848_v50  ;;  %2683 = vmatpush.bf16.msrb.mxu1 %v5852_v54 }
 0x87f   :  { %2696 = vmatpush.bf16.msrb.mxu2 %v7935_v1  ;;  %2709 = vmatpush.bf16.msrb.mxu3 %v7936_v46 }
 0x880   :  { %2555 = vmatmul.bf16.vlgmr.msra.gmra.mxu0 %v6908_v52  ;;  %2568 = vmatmul.bf16.vlgmr.msra.gmra.mxu1 %v6908_v52 }
 0x881   :  { %2581 = vmatmul.bf16.vlgmr.msra.gmra.mxu2 %v6908_v52  ;;  %2594 = vmatmul.bf16.vlgmr.msra.gmra.mxu3 %v6908_v52  ;;  %v7947_v52 = vld [vmem:[#allocation27_spill] sm:$0xff] }
 0x882   :  { %2671 = vmatpush.bf16.msrb.mxu0 %v7937_v43  ;;  %2684 = vmatpush.bf16.msrb.mxu1 %v7938_v0 }
 0x883   :  { %2697 = vmatpush.bf16.msrb.mxu2 %v7939_v3  ;;  %2710 = vmatpush.bf16.msrb.mxu3 %v7940_v18  ;;  %v7989_v18 = vld [vmem:[#allocation20_spill] sm:$0xff] }
 0x884   :  { %v7990_v3 = vld [vmem:[#allocation76_spill] sm:$0xff] }
 0x885   :  { %v253_v0 = vadd.f32 %v7990_v3, %v7989_v18 }
 0x886   :  { %2672 = vmatpush.bf16.msrb.mxu0 %v7941_v56  ;;  %2685 = vmatpush.bf16.msrb.mxu1 %v7942_v11 }
 0x887   :  { %2698 = vmatpush.bf16.msrb.mxu2 %v7943_v35  ;;  %2711 = vmatpush.bf16.msrb.mxu3 %v7944_v12 }
 0x88a   :  { %2673 = vmatpush.bf16.msrb.mxu0 %v7945_v8  ;;  %2686 = vmatpush.bf16.msrb.mxu1 %v7946_v49 }
 0x88b   :  { %2699 = vmatpush.bf16.msrb.mxu2 %v7947_v52  ;;  %2712 = vmatpush.bf16.msrb.mxu3 %v7948_v59  ;;  %v7988_v52 = vld [vmem:[#allocation68_spill] sm:$0xff] }
 0x88e   :  { %2674 = vmatpush.bf16.msrb.mxu0 %v7949_v19  ;;  %2687 = vmatpush.bf16.msrb.mxu1 %v7950_v15  ;;  %v7961_v15 = vld [vmem:[#allocation63_spill] sm:$0xff]  ;;  %v7985_v19 = vld [vmem:[#allocation13_spill] sm:$0xff] }
 0x88f   :  { %2700 = vmatpush.bf16.msrb.mxu2 %v7951_v57  ;;  %2713 = vmatpush.bf16.msrb.mxu3 %v7952_v26  ;;  %v7962_v57 = vld [vmem:[#allocation64_spill] sm:$0xff]  ;;  %v7963_v26 = vld [vmem:[#allocation65_spill] sm:$0xff] }
 0x892   :  { %2783 = vmatpush.bf16.msra.mxu0 %v7953_v28  ;;  %2796 = vmatpush.bf16.msra.mxu1 %v7954_v40  ;;  %v7964_v28 = vld [vmem:[#allocation66_spill] sm:$0xff]  ;;  %v7965_v40 = vld [vmem:[#allocation69_spill] sm:$0xff] }
 0x893   :  { %2809 = vmatpush.bf16.msra.mxu2 %v7955_v37  ;;  %2822 = vmatpush.bf16.msra.mxu3 %v7956_v2  ;;  %v7966_v37 = vld [vmem:[#allocation70_spill] sm:$0xff]  ;;  %v7967_v2 = vld [vmem:[#allocation71_spill] sm:$0xff] }
 0x896   :  { %2784 = vmatpush.bf16.msra.mxu0 %v7957_v20  ;;  %2797 = vmatpush.bf16.msra.mxu1 %v7958_v58  ;;  %v7968_v20 = vld [vmem:[#allocation72_spill] sm:$0xff]  ;;  %v7969_v58 = vld [vmem:[#allocation73_spill] sm:$0xff] }
 0x897   :  { %2810 = vmatpush.bf16.msra.mxu2 %v7959_v27  ;;  %2823 = vmatpush.bf16.msra.mxu3 %v7960_v23  ;;  %v7970_v27 = vld [vmem:[#allocation74_spill] sm:$0xff]  ;;  %v7971_v23 = vld [vmem:[#allocation75_spill] sm:$0xff] }
 0x89a   :  { %2785 = vmatpush.bf16.msra.mxu0 %v7961_v15  ;;  %2798 = vmatpush.bf16.msra.mxu1 %v7962_v57  ;;  %v7972_v15 = vld [vmem:[#allocation78_spill] sm:$0xff]  ;;  %v7973_v57 = vld [vmem:[#allocation79_spill] sm:$0xff] }
 0x89b   :  { %2811 = vmatpush.bf16.msra.mxu2 %v7963_v26  ;;  %2824 = vmatpush.bf16.msra.mxu3 %v7964_v28  ;;  %v7974_v26 = vld [vmem:[#allocation82_spill] sm:$0xff]  ;;  %v7975_v28 = vld [vmem:[#allocation83_spill] sm:$0xff] }
 0x89e   :  { %2786 = vmatpush.bf16.msra.mxu0 %v7965_v40  ;;  %2799 = vmatpush.bf16.msra.mxu1 %v7966_v37  ;;  %v7976_v40 = vld [vmem:[#allocation84_spill] sm:$0xff]  ;;  %v7977_v37 = vld [vmem:[#allocation85_spill] sm:$0xff] }
 0x89f   :  { %2812 = vmatpush.bf16.msra.mxu2 %v7967_v2  ;;  %2825 = vmatpush.bf16.msra.mxu3 %v7968_v20  ;;  %v7978_v2 = vld [vmem:[#allocation86_spill] sm:$0xff]  ;;  %v7979_v20 = vld [vmem:[#allocation87_spill] sm:$0xff] }
 0x8a2   :  { %2787 = vmatpush.bf16.msra.mxu0 %v7969_v58  ;;  %2800 = vmatpush.bf16.msra.mxu1 %v7970_v27  ;;  %v7980_v58 = vld [vmem:[#allocation91_spill] sm:$0xff]  ;;  %v7981_v27 = vld [vmem:[#allocation94_spill] sm:$0xff] }
 0x8a3   :  { %2813 = vmatpush.bf16.msra.mxu2 %v7971_v23  ;;  %2826 = vmatpush.bf16.msra.mxu3 %v7972_v15  ;;  %v7982_v23 = vld [vmem:[#allocation95_spill] sm:$0xff]  ;;  %v7983_v15 = vld [vmem:[#allocation96_spill] sm:$0xff] }
 0x8a6   :  { %2788 = vmatpush.bf16.msra.mxu0 %v7973_v57  ;;  %2801 = vmatpush.bf16.msra.mxu1 %v7974_v26  ;;  %v7984_v57 = vld [vmem:[#allocation97_spill] sm:$0xff] }
 0x8a7   :  { %2814 = vmatpush.bf16.msra.mxu2 %v7975_v28  ;;  %2827 = vmatpush.bf16.msra.mxu3 %v7976_v40 }
 0x8aa   :  { %2789 = vmatpush.bf16.msra.mxu0 %v7977_v37  ;;  %2802 = vmatpush.bf16.msra.mxu1 %v7978_v2 }
 0x8ab   :  { %2815 = vmatpush.bf16.msra.mxu2 %v7979_v20  ;;  %2828 = vmatpush.bf16.msra.mxu3 %v7980_v58  ;;  %v7986_v58 = vld [vmem:[#allocation67_spill] sm:$0xff] }
 0x8ac   :  { %v171_v59 = vadd.f32 %v7986_v58, %v7985_v19 }
 0x8ae   :  { %2790 = vmatpush.bf16.msra.mxu0 %v7981_v27  ;;  %2803 = vmatpush.bf16.msra.mxu1 %v7982_v23  ;;  %v7987_v27 = vld [vmem:[#allocation14_spill] sm:$0xff] }
 0x8af   :  { %2816 = vmatpush.bf16.msra.mxu2 %v7983_v15  ;;  %2829 = vmatpush.bf16.msra.mxu3 %v7984_v57  ;;  %v212_v23 = vadd.f32 %v7988_v52, %v7987_v27 }
 0x8ed   :  { %v7026_v26 = vpop.f32.mrf.mxu0  ;;  %v7028_v28 = vpop.f32.mrf.mxu1 }
 0x8f4   :  { %v7030_v40 = vpop.f32.mrf.mxu2  ;;  %v7032_v37 = vpop.f32.mrf.mxu3 }
 0x8f5   :  { %v2506_v2 = vpop.f32.mrf.mxu0  ;;  %v2519_v20 = vpop.f32.mrf.mxu1 }
 0x8fc   :  { %v2532_v49 = vpop.f32.mrf.mxu2  ;;  %v2545_v15 = vpop.f32.mrf.mxu3 }
 0x8fd   :  { %v2556_v8 = vpop.f32.mrf.mxu0  ;;  %v2569_v57 = vpop.f32.mrf.mxu1 }
 0x8fe   :  { %v2599_v12 = vadd.f32 %v2556_v8, %v171_v59  ;;  %v2600_v35 = vadd.f32 %v2569_v57, %v212_v23  ;;  %v7991_v8 = vld [vmem:[#allocation32_spill] sm:$0xff]  ;;  %v7992_v59 = vld [vmem:[#allocation77_spill] sm:$0xff] }
 0x8ff   :  { %v294_v3 = vadd.f32 %v7992_v59, %v7991_v8 }
 0x900   :  { %v4617_v11 = vmul.f32 -1.442695, %v2599_v12  ;;  %v4618_v56 = vmul.f32 -1.442695, %v2600_v35 }
 0x902   :  { %5564 = vpow2.f32 %v4617_v11 }
 0x903   :  { %5566 = vpow2.f32 %v4618_v56 }
 0x904   :  { %v2582_v2 = vpop.f32.mrf.mxu2  ;;  %v2595_v20 = vpop.f32.mrf.mxu3 }
 0x905   :  { %v2601_v43 = vadd.f32 %v2582_v2, %v253_v0  ;;  %v2558_v58 = vpop.f32.mrf.mxu0  ;;  %v2571_v19 = vpop.f32.mrf.mxu1  ;;  %v2602_v57 = vadd.f32 %v2595_v20, %v294_v3 }
 0x907   :  { %v4619_v46 = vmul.f32 -1.442695, %v2601_v43 }
 0x908   :  { %v5565_v52 = vpop.eup %5564 }
 0x909   :  { %v5567_v49 = vpop.eup %5566  ;;  %v2612_v15 = vadd.f32 1.0, %v5565_v52  ;;  %5568 = vpow2.f32 %v4619_v46 }
 0x90a   :  { %v2613_v27 = vadd.f32 1.0, %v5567_v49 }
 0x90b   :  { %5570 = vrcp.f32 %v2612_v15  ;;  %v2626_v52 = vand.u32 2147483648, %v2612_v15  ;;  %vm2620_vm3 = vweird.f32 %v2612_v15 }
 0x90c   :  { %5572 = vrcp.f32 %v2613_v27  ;;  %v2584_v12 = vpop.f32.mrf.mxu2  ;;  %v2597_v35 = vpop.f32.mrf.mxu3  ;;  %v2641_v46 = vand.u32 2147483648, %v2613_v27  ;;  %v2639_v18 = vand.u32 2147483647, %v2613_v27  ;;  %vm2635_vm4 = vweird.f32 %v2613_v27 }
 0x90d   :  { %v2624_v12 = vand.u32 2147483647, %v2612_v15 }
 0x90e   :  { %vm2640_vm8 = vcmp.eq.f32.partialorder %v2639_v18, 8.507059e+37 }
 0x90f   :  { %v5569_v11 = vpop.eup %5568  ;;  %vm2625_vm7 = vcmp.eq.f32.partialorder %v2624_v12, 8.507059e+37 }
 0x910   :  { %v2614_v56 = vadd.f32 1.0, %v5569_v11  ;;  %v2627_v11 = vor.u32 1.1754944e-38, %v2626_v52 }
 0x911   :  { %v5571_v23 = vpop.eup %5570 }
 0x912   :  { %v5573_v0 = vpop.eup %5572  ;;  %v2616_v2 = vmul.f32 %v5571_v23, %v2612_v15  ;;  %5574 = vrcp.f32 %v2614_v56  ;;  %vm2621_vm1 = vweird.f32 %v5571_v23  ;;  %v2656_v52 = vand.u32 2147483648, %v2614_v56 }
 0x913   :  { %v2631_v43 = vmul.f32 %v5573_v0, %v2613_v27  ;;  %5576 = vtanh.f32 %v2602_v57  ;;  %vm2636_vm2 = vweird.f32 %v5573_v0  ;;  %vm2622_vm5 = vmor %vm2620_vm3, %vm2621_vm1  ;;  %vm2650_vm10 = vweird.f32 %v2614_v56 }
 0x914   :  { %v2617_v19 = vsub.f32 1.0, %v2616_v2  ;;  %vm2637_vm6 = vmor %vm2635_vm4, %vm2636_vm2  ;;  %v2642_v2 = vor.u32 1.1754944e-38, %v2641_v46  ;;  %v2657_v12 = vor.u32 1.1754944e-38, %v2656_v52 }
 0x915   :  { %v2632_v58 = vsub.f32 1.0, %v2631_v43 }
 0x916   :  { %v2618_v49 = vmul.f32 %v5571_v23, %v2617_v19 }
 0x917   :  { %v2633_v35 = vmul.f32 %v5573_v0, %v2632_v58 }
 0x918   :  { %v5575_v1 = vpop.eup %5574  ;;  %v2619_v59 = vadd.f32 %v5571_v23, %v2618_v49 }
 0x919   :  { %v2646_v20 = vmul.f32 %v5575_v1, %v2614_v56  ;;  %v2634_v3 = vadd.f32 %v5573_v0, %v2633_v35  ;;  %v5577_v57 = vpop.eup %5576  ;;  %vm2651_vm9 = vweird.f32 %v5575_v1 }
 0x91a   :  { %v2623_v43 = vsel %vm2622_vm5, %v5571_v23, %v2619_v59  ;;  %v2654_v23 = vand.u32 2147483647, %v2614_v56  ;;  %vm2652_vm11 = vmor %vm2650_vm10, %vm2651_vm9 }
 0x91b   :  { %v2647_v8 = vsub.f32 1.0, %v2646_v20  ;;  %v2628_v19 = vsel %vm2625_vm7, %v2627_v11, %v2623_v43  ;;  %v2638_v54 = vsel %vm2637_vm6, %v5573_v0, %v2634_v3  ;;  %v8006_v43 = vld [vmem:[#allocation114_spill] sm:$0xff] }
 0x91c   :  { %v2643_v58 = vsel %vm2640_vm8, %v2642_v2, %v2638_v54  ;;  %v2662_v50 = vmul.f32 %v5577_v57, %v2628_v19  ;;  %vm2655_vm12 = vcmp.eq.f32.partialorder %v2654_v23, 8.507059e+37 }
 0x91d   :  { %v2648_v44 = vmul.f32 %v5575_v1, %v2647_v8  ;;  %v2661_v49 = vmul.f32 %v2643_v58, %v6905_v14 }
 0x91f   :  { %v7043_v15 = vadd.f32 %v2662_v50, %v2661_v49  ;;  %v2649_v27 = vadd.f32 %v5575_v1, %v2648_v44  ;;  %v7993_v44 = vld [vmem:[#allocation121_spill] sm:$0xff]  ;;  %v7994_v50 = vld [vmem:[#allocation122_spill] sm:$0xff] }
 0x921   :  { %5578 = vtanh.f32 %v7043_v15  ;;  %v2653_v46 = vsel %vm2652_vm11, %v5575_v1, %v2649_v27 }
 0x922   :  { %v2658_v18 = vsel %vm2655_vm12, %v2657_v12, %v2653_v46 }
 0x927   :  { %v5579_v0 = vpop.eup %5578 }
 0x928   :  { %v2665_v54 = vmul.f32 %v5579_v0, %v2658_v18 }
 0x92a   :  { %v7046_v35 = vpack.c.bf16 %v2665_v54, %v2665_v54 }
 0x92c   :  { %2675 = vmatmul.bf16.vlgmr.msrb.gmra.mxu0 %v7046_v35  ;;  %2688 = vmatmul.bf16.vlgmr.msrb.gmra.mxu1 %v7046_v35 }
 0x92d   :  { %2701 = vmatmul.bf16.vlgmr.msrb.gmra.mxu2 %v7046_v35  ;;  %2714 = vmatmul.bf16.vlgmr.msrb.gmra.mxu3 %v7046_v35 }
 0x92e   :  { %2835 = vmatpush.bf16.msrb.mxu0 %v7618_v53  ;;  %2848 = vmatpush.bf16.msrb.mxu1 %v7619_v62  ;;  %v7995_v53 = vld [vmem:[#allocation123_spill] sm:$0xff]  ;;  %v7996_v62 = vld [vmem:[#allocation124_spill] sm:$0xff] }
 0x92f   :  { %2861 = vmatpush.bf16.msrb.mxu2 %v7620_v6  ;;  %2874 = vmatpush.bf16.msrb.mxu3 %v7621_v21  ;;  %v7997_v6 = vld [vmem:[#allocation125_spill] sm:$0xff]  ;;  %v7998_v21 = vld [vmem:[#allocation126_spill] sm:$0xff] }
 0x932   :  { %2836 = vmatpush.bf16.msrb.mxu0 %v7622_v47  ;;  %2849 = vmatpush.bf16.msrb.mxu1 %v7623_v16  ;;  %v7999_v47 = vld [vmem:[#allocation127_spill] sm:$0xff]  ;;  %v8000_v16 = vld [vmem:[#allocation128_spill] sm:$0xff] }
 0x933   :  { %2862 = vmatpush.bf16.msrb.mxu2 %v7624_v34  ;;  %2875 = vmatpush.bf16.msrb.mxu3 %v7625_v36  ;;  %v8001_v34 = vld [vmem:[#allocation129_spill] sm:$0xff]  ;;  %v8002_v36 = vld [vmem:[#allocation130_spill] sm:$0xff] }
 0x936   :  { %2837 = vmatpush.bf16.msrb.mxu0 %v7626_v48  ;;  %2850 = vmatpush.bf16.msrb.mxu1 %v7627_v51  ;;  %v8003_v48 = vld [vmem:[#allocation88_spill] sm:$0xff] }
 0x937   :  { %2863 = vmatpush.bf16.msrb.mxu2 %v7693_v41  ;;  %2876 = vmatpush.bf16.msrb.mxu3 %v7694_v45  ;;  %v2505_v51 = vadd.f32 %v7026_v26, %v8003_v48  ;;  %v8004_v41 = vld [vmem:[#allocation89_spill] sm:$0xff] }
 0x938   :  { %v2518_v45 = vadd.f32 %v7028_v28, %v8004_v41 }
 0x93a   :  { %2838 = vmatpush.bf16.msrb.mxu0 %v7695_v39  ;;  %2851 = vmatpush.bf16.msrb.mxu1 %v7768_v24 }
 0x93b   :  { %2864 = vmatpush.bf16.msrb.mxu2 %v7769_v30  ;;  %2877 = vmatpush.bf16.msrb.mxu3 %v7770_v63 }
 0x93e   :  { %2839 = vmatpush.bf16.msrb.mxu0 %v7843_v4  ;;  %2852 = vmatpush.bf16.msrb.mxu1 %v7844_v5 }
 0x93f   :  { %2865 = vmatpush.bf16.msrb.mxu2 %v7845_v61  ;;  %2878 = vmatpush.bf16.msrb.mxu3 %v7918_v55  ;;  %v8005_v61 = vld [vmem:[#allocation90_spill] sm:$0xff] }
 0x940   :  { %v2531_v14 = vadd.f32 %v7030_v40, %v8005_v61  ;;  %v2544_v40 = vadd.f32 %v7032_v37, %v8006_v43 }
 0x942   :  { %2840 = vmatpush.bf16.msrb.mxu0 %v7919_v60  ;;  %2853 = vmatpush.bf16.msrb.mxu1 %v7920_v7 }
 0x943   :  { %2866 = vmatpush.bf16.msrb.mxu2 %v7993_v44  ;;  %2879 = vmatpush.bf16.msrb.mxu3 %v7994_v50 }
 0x946   :  { %2841 = vmatpush.bf16.msrb.mxu0 %v7995_v53  ;;  %2854 = vmatpush.bf16.msrb.mxu1 %v7996_v62 }
 0x947   :  { %2867 = vmatpush.bf16.msrb.mxu2 %v7997_v6  ;;  %2880 = vmatpush.bf16.msrb.mxu3 %v7998_v21 }
 0x94a   :  { %2842 = vmatpush.bf16.msrb.mxu0 %v7999_v47  ;;  %2855 = vmatpush.bf16.msrb.mxu1 %v8000_v16 }
 0x94b   :  { %2868 = vmatpush.bf16.msrb.mxu2 %v8001_v34  ;;  %2881 = vmatpush.bf16.msrb.mxu3 %v8002_v36 }
 0x9a9   :  { %v2676_v39 = vpop.f32.mrf.mxu0  ;;  %v2689_v24 = vpop.f32.mrf.mxu1 }
 0x9aa   :  { %v2677_v30 = vadd.f32 %v2676_v39, %v2505_v51  ;;  %v2690_v63 = vadd.f32 %v2689_v24, %v2518_v45 }
 0x9ac   :  { %v4620_v4 = vmul.f32 -1.442695, %v2677_v30  ;;  %v4621_v5 = vmul.f32 -1.442695, %v2690_v63 }
 0x9ae   :  { %5580 = vpow2.f32 %v4620_v4 }
 0x9af   :  { %5582 = vpow2.f32 %v4621_v5 }
 0x9b0   :  { %v2702_v55 = vpop.f32.mrf.mxu2  ;;  %v2715_v60 = vpop.f32.mrf.mxu3 }
 0x9b1   :  { %v2703_v7 = vadd.f32 %v2702_v55, %v2531_v14  ;;  %v2678_v1 = vpop.f32.mrf.mxu0  ;;  %v2691_v8 = vpop.f32.mrf.mxu1  ;;  %v2716_v58 = vadd.f32 %v2715_v60, %v2544_v40  ;;  %v8026_v40 = vld [vmem:[#allocation31_spill] sm:$0xff] }
 0x9b3   :  { %v4622_v26 = vmul.f32 -1.442695, %v2703_v7 }
 0x9b4   :  { %v5581_v56 = vpop.eup %5580 }
 0x9b5   :  { %v5583_v59 = vpop.eup %5582  ;;  %v2728_v28 = vadd.f32 1.0, %v5581_v56  ;;  %5584 = vpow2.f32 %v4622_v26 }
 0x9b6   :  { %v2729_v20 = vadd.f32 1.0, %v5583_v59  ;;  %v8019_v59 = vld [vmem:[#allocation24_spill] sm:$0xff] }
 0x9b7   :  { %5586 = vrcp.f32 %v2728_v28  ;;  %v2742_v12 = vand.u32 2147483648, %v2728_v28  ;;  %v2740_v54 = vand.u32 2147483647, %v2728_v28  ;;  %vm2736_vm15 = vweird.f32 %v2728_v28 }
 0x9b8   :  { %5588 = vrcp.f32 %v2729_v20  ;;  %v2704_v11 = vpop.f32.mrf.mxu2  ;;  %v2717_v3 = vpop.f32.mrf.mxu3  ;;  %v2757_v0 = vand.u32 2147483648, %v2729_v20  ;;  %v2755_v50 = vand.u32 2147483647, %v2729_v20  ;;  %vm2751_vm0 = vweird.f32 %v2729_v20 }
 0x9b9   :  { %v2743_v6 = vor.u32 1.1754944e-38, %v2742_v12  ;;  %vm2741_vm3 = vcmp.eq.f32.partialorder %v2740_v54, 8.507059e+37  ;;  %v8023_v11 = vld [vmem:[#allocation28_spill] sm:$0xff]  ;;  %v8024_v3 = vld [vmem:[#allocation29_spill] sm:$0xff] }
 0x9ba   :  { %v2758_v47 = vor.u32 1.1754944e-38, %v2757_v0  ;;  %vm2756_vm4 = vcmp.eq.f32.partialorder %v2755_v50, 8.507059e+37  ;;  %v8029_v12 = vld [vmem:[#allocation80_spill] sm:$0xff]  ;;  %v8031_v54 = vld [vmem:[#allocation81_spill] sm:$0xff] }
 0x9bb   :  { %v5585_v2 = vpop.eup %5584 }
 0x9bc   :  { %v2730_v57 = vadd.f32 1.0, %v5585_v2  ;;  %v8025_v2 = vld [vmem:[#allocation30_spill] sm:$0xff] }
 0x9bd   :  { %v5587_v19 = vpop.eup %5586 }
 0x9be   :  { %v5589_v49 = vpop.eup %5588  ;;  %v2732_v27 = vmul.f32 %v5587_v19, %v2728_v28  ;;  %5590 = vrcp.f32 %v2730_v57  ;;  %vm2737_vm13 = vweird.f32 %v5587_v19  ;;  %v2772_v14 = vand.u32 2147483648, %v2730_v57  ;;  %v8020_v28 = vld [vmem:[#allocation25_spill] sm:$0xff] }
 0x9bf   :  { %v2747_v52 = vmul.f32 %v5589_v49, %v2729_v20  ;;  %5592 = vtanh.f32 %v2716_v58  ;;  %vm2752_vm14 = vweird.f32 %v5589_v49  ;;  %vm2738_vm1 = vmor %vm2736_vm15, %vm2737_vm13  ;;  %vm2766_vm6 = vweird.f32 %v2730_v57  ;;  %v8021_v20 = vld [vmem:[#allocation26_spill] sm:$0xff] }
 0x9c0   :  { %v2733_v23 = vsub.f32 1.0, %v2732_v27  ;;  %vm2753_vm2 = vmor %vm2751_vm0, %vm2752_vm14  ;;  %v2770_v55 = vand.u32 2147483647, %v2730_v57  ;;  %v2773_v7 = vor.u32 1.1754944e-38, %v2772_v14 }
 0x9c1   :  { %v2748_v46 = vsub.f32 1.0, %v2747_v52 }
 0x9c2   :  { %v2734_v18 = vmul.f32 %v5587_v19, %v2733_v23  ;;  %vm2771_vm8 = vcmp.eq.f32.partialorder %v2770_v55, 8.507059e+37 }
 0x9c3   :  { %v2749_v44 = vmul.f32 %v5589_v49, %v2748_v46  ;;  %v8028_v46 = vld [vmem:[#allocation13_spill] sm:$0xff] }
 0x9c4   :  { %v5591_v53 = vpop.eup %5590  ;;  %v2735_v37 = vadd.f32 %v5587_v19, %v2734_v18  ;;  %v174_v0 = vadd.f32 %v8029_v12, %v8028_v46  ;;  %v8030_v18 = vld [vmem:[#allocation14_spill] sm:$0xff] }
 0x9c5   :  { %v2762_v62 = vmul.f32 %v5591_v53, %v2730_v57  ;;  %v2750_v21 = vadd.f32 %v5589_v49, %v2749_v44  ;;  %v5593_v34 = vpop.eup %5592  ;;  %vm2767_vm5 = vweird.f32 %v5591_v53  ;;  %v8027_v57 = vld [vmem:[#allocation33_spill] sm:$0xff]  ;;  %v215_v44 = vadd.f32 %v8031_v54, %v8030_v18 }
 0x9c6   :  { %v2739_v16 = vsel %vm2738_vm1, %v5587_v19, %v2735_v37  ;;  %vm2768_vm7 = vmor %vm2766_vm6, %vm2767_vm5 }
 0x9c7   :  { %v2763_v36 = vsub.f32 1.0, %v2762_v62  ;;  %v2744_v51 = vsel %vm2741_vm3, %v2743_v6, %v2739_v16  ;;  %v2754_v45 = vsel %vm2753_vm2, %v5589_v49, %v2750_v21 }
 0x9c8   :  { %v2759_v39 = vsel %vm2756_vm4, %v2758_v47, %v2754_v45  ;;  %v2778_v24 = vmul.f32 %v5593_v34, %v2744_v51  ;;  %v8032_v34 = vld [vmem:[#allocation20_spill] sm:$0xff] }
 0x9c9   :  { %v2764_v30 = vmul.f32 %v5591_v53, %v2763_v36  ;;  %v2777_v63 = vmul.f32 %v2759_v39, %v6955_v33  ;;  %v8018_v33 = vld [vmem:[#allocation23_spill] sm:$0xff]  ;;  %v8033_v36 = vld [vmem:[#allocation92_spill] sm:$0xff] }
 0x9ca   :  { %v256_v51 = vadd.f32 %v8033_v36, %v8032_v34 }
 0x9cb   :  { %v7093_v4 = vadd.f32 %v2778_v24, %v2777_v63  ;;  %v2765_v5 = vadd.f32 %v5591_v53, %v2764_v30 }
 0x9cd   :  { %5594 = vtanh.f32 %v7093_v4  ;;  %v2769_v60 = vsel %vm2768_vm7, %v5591_v53, %v2765_v5 }
 0x9ce   :  { %v2774_v8 = vsel %vm2771_vm8, %v2773_v7, %v2769_v60 }
 0x9d3   :  { %v5595_v1 = vpop.eup %5594 }
 0x9d4   :  { %v2781_v26 = vmul.f32 %v5595_v1, %v2774_v8 }
 0x9d6   :  { %v2782_v56 = vpack.c.bf16 %v2781_v26, %v2781_v26 }
 0x9d8   :  { %2791 = vmatmul.bf16.vlgmr.msra.gmra.mxu0 %v2782_v56  ;;  %2804 = vmatmul.bf16.vlgmr.msra.gmra.mxu1 %v2782_v56 }
 0x9d9   :  { %2817 = vmatmul.bf16.vlgmr.msra.gmra.mxu2 %v2782_v56  ;;  %2830 = vmatmul.bf16.vlgmr.msra.gmra.mxu3 %v2782_v56  ;;  %v8034_v56 = vld [vmem:[#allocation32_spill] sm:$0xff] }
 0x9da   :  { %2955 = vmatpush.bf16.msra.mxu0 %v5773_v9  ;;  %2968 = vmatpush.bf16.msra.mxu1 %v5775_v10  ;;  %v8007_v9 = vld [vmem:[#allocation9_spill] sm:$0xff]  ;;  %v8008_v10 = vld [vmem:[#allocation10_spill] sm:$0xff] }
 0x9db   :  { %2981 = vmatpush.bf16.msra.mxu2 %v5777_v13  ;;  %2994 = vmatpush.bf16.msra.mxu3 %v5790_v25  ;;  %v8009_v13 = vld [vmem:[#allocation11_spill] sm:$0xff]  ;;  %v8010_v25 = vld [vmem:[#allocation12_spill] sm:$0xff] }
 0x9de   :  { %2956 = vmatpush.bf16.msra.mxu0 %v5781_v17  ;;  %2969 = vmatpush.bf16.msra.mxu1 %v5788_v22  ;;  %v8011_v17 = vld [vmem:[#allocation15_spill] sm:$0xff]  ;;  %v8012_v22 = vld [vmem:[#allocation16_spill] sm:$0xff] }
 0x9df   :  { %2982 = vmatpush.bf16.msra.mxu2 %v5792_v29  ;;  %2995 = vmatpush.bf16.msra.mxu3 %v5829_v38  ;;  %v8013_v29 = vld [vmem:[#allocation17_spill] sm:$0xff] }
 0x9e0   :  { %v8016_v38 = vld [vmem:[#allocation21_spill] sm:$0xff] }
 0x9e2   :  { %2957 = vmatpush.bf16.msra.mxu0 %v5796_v31  ;;  %2970 = vmatpush.bf16.msra.mxu1 %v5800_v32  ;;  %v8014_v31 = vld [vmem:[#allocation18_spill] sm:$0xff]  ;;  %v8015_v32 = vld [vmem:[#allocation19_spill] sm:$0xff] }
 0x9e3   :  { %2983 = vmatpush.bf16.msra.mxu2 %v5832_v42  ;;  %2996 = vmatpush.bf16.msra.mxu3 %v8007_v9  ;;  %v8017_v42 = vld [vmem:[#allocation22_spill] sm:$0xff]  ;;  %v8035_v9 = vld [vmem:[#allocation93_spill] sm:$0xff] }
 0x9e6   :  { %2958 = vmatpush.bf16.msra.mxu0 %v8008_v10  ;;  %2971 = vmatpush.bf16.msra.mxu1 %v8009_v13  ;;  %v297_v10 = vadd.f32 %v8035_v9, %v8034_v56  ;;  %v5263_v56 = vld [vmem:[#allocation4 + $0xcc] sm:$0xf0]  ;;  %v5261_v9 = vld [vmem:[#allocation4 + $0xc4] sm:$0xf] }
 0x9e7   :  { %2984 = vmatpush.bf16.msra.mxu2 %v8010_v25  ;;  %2997 = vmatpush.bf16.msra.mxu3 %v8011_v17 }
 0x9e8   :  { %2843 = vmatmul.bf16.vlgmr.msrb.gmra.mxu0 %v7046_v35  ;;  %2856 = vmatmul.bf16.vlgmr.msrb.gmra.mxu1 %v7046_v35 }
 0x9e9   :  { %2869 = vmatmul.bf16.vlgmr.msrb.gmra.mxu2 %v7046_v35  ;;  %2882 = vmatmul.bf16.vlgmr.msrb.gmra.mxu3 %v7046_v35  ;;  %v8022_v35 = vld [vmem:[#allocation27_spill] sm:$0xff] }
 0x9ea   :  { %2959 = vmatpush.bf16.msra.mxu0 %v8012_v22  ;;  %2972 = vmatpush.bf16.msra.mxu1 %v8013_v29 }
 0x9eb   :  { %2985 = vmatpush.bf16.msra.mxu2 %v8014_v31  ;;  %2998 = vmatpush.bf16.msra.mxu3 %v8015_v32 }
 0x9ee   :  { %2960 = vmatpush.bf16.msra.mxu0 %v8016_v38  ;;  %2973 = vmatpush.bf16.msra.mxu1 %v8017_v42 }
 0x9ef   :  { %2986 = vmatpush.bf16.msra.mxu2 %v8018_v33  ;;  %2999 = vmatpush.bf16.msra.mxu3 %v8019_v59 }
 0x9f2   :  { %2961 = vmatpush.bf16.msra.mxu0 %v8020_v28  ;;  %2974 = vmatpush.bf16.msra.mxu1 %v8021_v20 }
 0x9f3   :  { %2987 = vmatpush.bf16.msra.mxu2 %v8022_v35  ;;  %3000 = vmatpush.bf16.msra.mxu3 %v8023_v11 }
 0x9f6   :  { %2962 = vmatpush.bf16.msra.mxu0 %v8024_v3  ;;  %2975 = vmatpush.bf16.msra.mxu1 %v8025_v2 }
 0x9f7   :  { %2988 = vmatpush.bf16.msra.mxu2 %v8026_v40  ;;  %3001 = vmatpush.bf16.msra.mxu3 %v8027_v57 }
 0xa55   :  { %v7132_v19 = vpop.f32.mrf.mxu0  ;;  %v7134_v58 = vpop.f32.mrf.mxu1 }
 0xa5c   :  { %v7136_v49 = vpop.f32.mrf.mxu2  ;;  %v7138_v27 = vpop.f32.mrf.mxu3 }
 0xa5d   :  { %v2794_v52 = vpop.f32.mrf.mxu0  ;;  %v2807_v23 = vpop.f32.mrf.mxu1 }
 0xa64   :  { %v2820_v50 = vpop.f32.mrf.mxu2  ;;  %v2833_v53 = vpop.f32.mrf.mxu3 }
 0xa65   :  { %v2844_v37 = vpop.f32.mrf.mxu0  ;;  %v2857_v62 = vpop.f32.mrf.mxu1 }
 0xa66   :  { %v2887_v6 = vadd.f32 %v2844_v37, %v174_v0  ;;  %v2888_v21 = vadd.f32 %v2857_v62, %v215_v44 }
 0xa68   :  { %v4623_v47 = vmul.f32 -1.442695, %v2887_v6  ;;  %v4624_v16 = vmul.f32 -1.442695, %v2888_v21 }
 0xa6a   :  { %5596 = vpow2.f32 %v4623_v47 }
 0xa6b   :  { %5598 = vpow2.f32 %v4624_v16 }
 0xa6c   :  { %v2870_v45 = vpop.f32.mrf.mxu2  ;;  %v2883_v39 = vpop.f32.mrf.mxu3 }
 0xa6d   :  { %v2889_v24 = vadd.f32 %v2870_v45, %v256_v51  ;;  %v2846_v30 = vpop.f32.mrf.mxu0  ;;  %v2859_v63 = vpop.f32.mrf.mxu1  ;;  %v2890_v17 = vadd.f32 %v2883_v39, %v297_v10  ;;  %v5267_v39 = vld [vmem:[#allocation4 + $0xec] sm:$0xf0] }
 0xa6e   :  { %v4745_v63 = vld [vmem:[#allocation4 + $0xf0] sm:$0xf0] }
 0xa6f   :  { %v4625_v5 = vmul.f32 -1.442695, %v2889_v24  ;;  %v5265_v24 = vld [vmem:[#allocation4 + $0xe4] sm:$0xf] }
 0xa70   :  { %v5597_v14 = vpop.eup %5596 }
 0xa71   :  { %v5599_v55 = vpop.eup %5598  ;;  %v2900_v60 = vadd.f32 1.0, %v5597_v14  ;;  %5600 = vpow2.f32 %v4625_v5  ;;  %v4751_v5 = vld [vmem:[#allocation4 + $0xe8] sm:$0xf]  ;;  %v5268_v14 = vld [vmem:[#allocation4 + $0xf4] sm:$0xf0] }
 0xa72   :  { %v2901_v7 = vadd.f32 1.0, %v5599_v55  ;;  %v4748_v55 = vor.u32 %v5265_v24, %v4745_v63 }
 0xa73   :  { %5602 = vrcp.f32 %v2900_v60  ;;  %v2914_v42 = vand.u32 2147483648, %v2900_v60  ;;  %v2912_v28 = vand.u32 2147483647, %v2900_v60  ;;  %vm2908_vm11 = vweird.f32 %v2900_v60 }
 0xa74   :  { %5604 = vrcp.f32 %v2901_v7  ;;  %v2872_v1 = vpop.f32.mrf.mxu2  ;;  %v2885_v8 = vpop.f32.mrf.mxu3  ;;  %v2929_v33 = vand.u32 2147483648, %v2901_v7  ;;  %v2927_v35 = vand.u32 2147483647, %v2901_v7  ;;  %vm2923_vm12 = vweird.f32 %v2901_v7  ;;  %3285 = vmatpush.bf16.msrb.mxu1 %v4748_v55  ;;  %v4689_v55 = vld [vmem:[#allocation4 + $0x78] sm:$0xf0] }
 0xa75   :  { %v2915_v40 = vor.u32 1.1754944e-38, %v2914_v42  ;;  %vm2913_vm15 = vcmp.eq.f32.partialorder %v2912_v28, 8.507059e+37  ;;  %v4753_v1 = vld [vmem:[#allocation4 + $0xf8] sm:$0xf0]  ;;  %v4711_v42 = vld [vmem:[#allocation4 + $0xa0] sm:$0xf] }
 0xa76   :  { %v2930_v52 = vor.u32 1.1754944e-38, %v2929_v33  ;;  %vm2928_vm0 = vcmp.eq.f32.partialorder %v2927_v35, 8.507059e+37  ;;  %v5259_v33 = vld [vmem:[#allocation4 + $0xac] sm:$0xf0]  ;;  %v4719_v35 = vld [vmem:[#allocation4 + $0xa8] sm:$0xf] }
 0xa77   :  { %v5601_v26 = vpop.eup %5600  ;;  %v4712_v28 = vor.u32 %v5259_v33, %v4711_v42  ;;  %v5241_v33 = vld [vmem:[#allocation4 + $0x24] sm:$0xf] }
 0xa78   :  { %v2902_v13 = vadd.f32 1.0, %v5601_v26  ;;  %v4727_v26 = vld [vmem:[#allocation4 + $0xc0] sm:$0xf] }
 0xa79   :  { %v5603_v25 = vpop.eup %5602  ;;  %v4728_v10 = vor.u32 %v5263_v56, %v4727_v26  ;;  %v4665_v56 = vld [vmem:[#allocation4 + $0x50] sm:$0xf0] }
 0xa7a   :  { %v5605_v22 = vpop.eup %5604  ;;  %v2904_v29 = vmul.f32 %v5603_v25, %v2900_v60  ;;  %5606 = vrcp.f32 %v2902_v13  ;;  %vm2909_vm9 = vweird.f32 %v5603_v25  ;;  %v2944_v6 = vand.u32 2147483648, %v2902_v13 }
 0xa7b   :  { %v2919_v31 = vmul.f32 %v5605_v22, %v2901_v7  ;;  %5608 = vtanh.f32 %v2890_v17  ;;  %vm2924_vm10 = vweird.f32 %v5605_v22  ;;  %vm2910_vm13 = vmor %vm2908_vm11, %vm2909_vm9  ;;  %vm2938_vm2 = vweird.f32 %v2902_v13  ;;  %v5266_v7 = vld [vmem:[#allocation4 + $0xec] sm:$0xf]  ;;  %v5264_v17 = vld [vmem:[#allocation4 + $0xd4] sm:$0xf0] }
 0xa7c   :  { %v2905_v32 = vsub.f32 1.0, %v2904_v29  ;;  %vm2925_vm14 = vmor %vm2923_vm12, %vm2924_vm10  ;;  %v2942_v21 = vand.u32 2147483647, %v2902_v13  ;;  %v2945_v16 = vor.u32 1.1754944e-38, %v2944_v6  ;;  %v4752_v60 = vor.u32 %v5268_v14, %v4751_v5  ;;  %v5250_v14 = vld [vmem:[#allocation4 + $0x6c] sm:$0xf] }
 0xa7d   :  { %v2920_v38 = vsub.f32 1.0, %v2919_v31  ;;  %v4756_v8 = vor.u32 %v5266_v7, %v4753_v1  ;;  %v5262_v31 = vld [vmem:[#allocation4 + $0xcc] sm:$0xf]  ;;  %v4692_v1 = vor.u32 %v5250_v14, %v4689_v55  ;;  %v4939_v55 = vld [vmem:[#allocation6 + $0x168] sm:$0xf] }
 0xa7e   :  { %v2906_v59 = vmul.f32 %v5603_v25, %v2905_v32  ;;  %vm2943_vm4 = vcmp.eq.f32.partialorder %v2942_v21, 8.507059e+37  ;;  %3298 = vmatpush.bf16.msrb.mxu2 %v4752_v60  ;;  %v4737_v32 = vld [vmem:[#allocation4 + $0xd8] sm:$0xf0]  ;;  %v4679_v21 = vld [vmem:[#allocation4 + $0x60] sm:$0xf] }
 0xa7f   :  { %v2921_v20 = vmul.f32 %v5605_v22, %v2920_v38  ;;  %3311 = vmatpush.bf16.msrb.mxu3 %v4756_v8  ;;  %v4740_v38 = vor.u32 %v5262_v31, %v4737_v32  ;;  %v5243_v31 = vld [vmem:[#allocation4 + $0x2c] sm:$0xf0]  ;;  %v2819_v32 = vadd.f32 %v7136_v49, %v8005_v61  ;;  %v4631_v49 = vld [vmem:[#allocation4] sm:$0xf] }
 0xa80   :  { %v5607_v11 = vpop.eup %5606  ;;  %v2907_v3 = vadd.f32 %v5603_v25, %v2906_v59  ;;  %v5257_v59 = vld [vmem:[#allocation4 + $0xa4] sm:$0xf] }
 0xa81   :  { %v2934_v2 = vmul.f32 %v5607_v11, %v2902_v13  ;;  %v2922_v57 = vadd.f32 %v5605_v22, %v2921_v20  ;;  %v5609_v46 = vpop.eup %5608  ;;  %vm2939_vm1 = vweird.f32 %v5607_v11  ;;  %v4729_v13 = vld [vmem:[#allocation4 + $0xd0] sm:$0xf0] }
 0xa82   :  { %v2911_v23 = vsel %vm2910_vm13, %v5603_v25, %v2907_v3  ;;  %vm2940_vm3 = vmor %vm2938_vm2, %vm2939_vm1  ;;  %v4735_v25 = vld [vmem:[#allocation4 + $0xc8] sm:$0xf]  ;;  %v4713_v20 = vld [vmem:[#allocation4 + $0xb0] sm:$0xf0]  ;;  %vm4153_vm1 = vcmask 7168  }
 0xa83   :  { %v2935_v12 = vsub.f32 1.0, %v2934_v2  ;;  %v2916_v0 = vsel %vm2913_vm15, %v2915_v40, %v2911_v23  ;;  %v2926_v18 = vsel %vm2925_vm14, %v5605_v22, %v2922_v57  ;;  %v4732_v22 = vor.u32 %v5261_v9, %v4729_v13  ;;  %3312 = vmatpush.bf16.msrb.mxu3 %v4740_v38  ;;  %v5258_v40 = vld [vmem:[#allocation4 + $0xac] sm:$0xf]  ;;  %v4721_v57 = vld [vmem:[#allocation4 + $0xb8] sm:$0xf0] }
 0xa84   :  { %v2931_v54 = vsel %vm2928_vm0, %v2930_v52, %v2926_v18  ;;  %v2950_v44 = vmul.f32 %v5609_v46, %v2916_v0  ;;  %v4736_v29 = vor.u32 %v5264_v17, %v4735_v25  ;;  %v4716_v3 = vor.u32 %v5257_v59, %v4713_v20  ;;  %v4695_v23 = vld [vmem:[#allocation4 + $0x80] sm:$0xf]  ;;  %v5255_v46 = vld [vmem:[#allocation4 + $0x8c] sm:$0xf0]  ;;  %v4697_v18 = vld [vmem:[#allocation4 + $0x90] sm:$0xf0] }
 0xa85   :  { %v2936_v50 = vmul.f32 %v5607_v11, %v2935_v12  ;;  %v2949_v53 = vmul.f32 %v2931_v54, %v7043_v15  ;;  %v4743_v15 = vld [vmem:[#allocation4 + $0xe0] sm:$0xf]  ;;  %3286 = vmatpush.bf16.msrb.mxu1 %v4732_v22  ;;  %v4724_v52 = vor.u32 %v5258_v40, %v4721_v57  ;;  %v5253_v12 = vld [vmem:[#allocation4 + $0x84] sm:$0xf]  ;;  %v4696_v0 = vor.u32 %v5255_v46, %v4695_v23  ;;  %v4703_v54 = vld [vmem:[#allocation4 + $0x88] sm:$0xf] }
 0xa86   :  { %v4744_v30 = vor.u32 %v5267_v39, %v4743_v15  ;;  %3299 = vmatpush.bf16.msrb.mxu2 %v4736_v29  ;;  %v4687_v15 = vld [vmem:[#allocation4 + $0x68] sm:$0xf]  ;;  %v5252_v39 = vld [vmem:[#allocation4 + $0x74] sm:$0xf0]  ;;  %v5246_v25 = vld [vmem:[#allocation4 + $0x4c] sm:$0xf] }
 0xa87   :  { %v2951_v37 = vadd.f32 %v2950_v44, %v2949_v53  ;;  %v2937_v62 = vadd.f32 %v5607_v11, %v2936_v50  ;;  %3313 = vmatpush.bf16.msrb.mxu3 %v4724_v52  ;;  %v5256_v44 = vld [vmem:[#allocation4 + $0x94] sm:$0xf0]  ;;  %v4700_v50 = vor.u32 %v5253_v12, %v4697_v18  ;;  %v4688_v5 = vor.u32 %v5252_v39, %v4687_v15  ;;  %v4673_v22 = vld [vmem:[#allocation4 + $0x58] sm:$0xf0]  ;;  %v4647_v29 = vld [vmem:[#allocation4 + $0x20] sm:$0xf] }
 0xa88   :  { %3272 = vmatpush.bf16.msrb.mxu0 %v4744_v30  ;;  %v4704_v53 = vor.u32 %v5256_v44, %v4703_v54  ;;  %v5248_v13 = vld [vmem:[#allocation4 + $0x54] sm:$0xf0]  ;;  %v4676_v38 = vor.u32 %v5246_v25, %v4673_v22  ;;  %v4648_v42 = vor.u32 %v5243_v31, %v4647_v29  ;;  %v4649_v59 = vld [vmem:[#allocation4 + $0x30] sm:$0xf0]  ;;  %v4657_v40 = vld [vmem:[#allocation4 + $0x38] sm:$0xf0] }
 0xa89   :  { %5610 = vtanh.f32 %v2951_v37  ;;  %v2941_v47 = vsel %vm2940_vm3, %v5607_v11, %v2937_v62  ;;  %v5260_v11 = vld [vmem:[#allocation4 + $0xb4] sm:$0xf0]  ;;  %3287 = vmatpush.bf16.msrb.mxu1 %v4716_v3  ;;  %v5254_v37 = vld [vmem:[#allocation4 + $0x8c] sm:$0xf]  ;;  %v4705_v62 = vld [vmem:[#allocation4 + $0x98] sm:$0xf0] }
 0xa8a   :  { %v2946_v36 = vsel %vm2943_vm4, %v2945_v16, %v2941_v47  ;;  %v4720_v2 = vor.u32 %v5260_v11, %v4719_v35  ;;  %v4708_v6 = vor.u32 %v5254_v37, %v4705_v62  ;;  %v5251_v47 = vld [vmem:[#allocation4 + $0x6c] sm:$0xf0]  ;;  %v5249_v16 = vld [vmem:[#allocation4 + $0x64] sm:$0xf]  ;;  %v4652_v11 = vor.u32 %v5241_v33, %v4649_v59  ;;  %v5244_v3 = vld [vmem:[#allocation4 + $0x34] sm:$0xf0] }
 0xa8b   :  { %v5239_v12 = vld [vmem:[#allocation4 + $0xc] sm:$0xf0]  ;;  %v4633_v54 = vld [vmem:[#allocation4 + $0x10] sm:$0xf0]  ;;  %v4639_v44 = vld [vmem:[#allocation4 + $0x8] sm:$0xf] }
 0xa8c   :  { %3273 = vmatpush.bf16.msrb.mxu0 %v4728_v10  ;;  %3300 = vmatpush.bf16.msrb.mxu2 %v4720_v2  ;;  %v4671_v10 = vld [vmem:[#allocation4 + $0x48] sm:$0xf]  ;;  %v5242_v2 = vld [vmem:[#allocation4 + $0x2c] sm:$0xf]  ;;  %v4632_v18 = vor.u32 %v5239_v12, %v4631_v49  ;;  %v4819_v31 = vld [vmem:[#allocation6 + $0x78] sm:$0xf] }
 0xa8d   :  { %3288 = vmatpush.bf16.msrb.mxu1 %v4700_v50  ;;  %3314 = vmatpush.bf16.msrb.mxu3 %v4708_v6  ;;  %v4672_v17 = vor.u32 %v5248_v13, %v4671_v10  ;;  %v4660_v61 = vor.u32 %v5242_v2, %v4657_v40  ;;  %v5240_v50 = vld [vmem:[#allocation4 + $0x14] sm:$0xf0]  ;;  %v5238_v62 = vld [vmem:[#allocation4 + $0xc] sm:$0xf]  ;;  %v4641_v6 = vld [vmem:[#allocation4 + $0x18] sm:$0xf0] }
 0xa8e   :  { %v5131_v10 = vld [vmem:[#allocation6 + $0x2e8] sm:$0xf]  ;;  %v5363_v13 = vld [vmem:[#allocation6 + $0x2f0] sm:$0xf0]  ;;  %v4915_v33 = vld [vmem:[#allocation6 + $0x138] sm:$0xf] }
 0xa8f   :  { %v5611_v34 = vpop.eup %5610  ;;  %v5309_v59 = vld [vmem:[#allocation6 + $0x140] sm:$0xf0]  ;;  %v5336_v2 = vld [vmem:[#allocation6 + $0x218] sm:$0xf0] }
 0xa90   :  { %v2953_v51 = vmul.f32 %v5611_v34, %v2946_v36  ;;  %3274 = vmatpush.bf16.msrb.mxu0 %v4712_v28  ;;  %3301 = vmatpush.bf16.msrb.mxu2 %v4704_v53  ;;  %v2793_v34 = vadd.f32 %v7132_v19, %v8003_v48  ;;  %v2806_v36 = vadd.f32 %v7134_v58, %v8004_v41  ;;  %v4663_v48 = vld [vmem:[#allocation4 + $0x40] sm:$0xf]  ;;  %v5247_v19 = vld [vmem:[#allocation4 + $0x4c] sm:$0xf0]  ;;  %v5245_v41 = vld [vmem:[#allocation4 + $0x44] sm:$0xf] }
 0xa91   :  { %3315 = vmatpush.bf16.msrb.mxu3 %v4692_v1  ;;  %v4664_v26 = vor.u32 %v5247_v19, %v4663_v48  ;;  %v4668_v9 = vor.u32 %v5245_v41, %v4665_v56  ;;  %v4655_v28 = vld [vmem:[#allocation4 + $0x28] sm:$0xf]  ;;  %v4927_v48 = vld [vmem:[#allocation6 + $0x150] sm:$0xf] }
 0xa92   :  { %v2954_v45 = vpack.c.bf16 %v2953_v51, %v2953_v51  ;;  %v4680_v51 = vor.u32 %v5251_v47, %v4679_v21  ;;  %v4656_v46 = vor.u32 %v5244_v3, %v4655_v28  ;;  %v4640_v47 = vor.u32 %v5240_v50, %v4639_v44  ;;  %v5023_v3 = vld [vmem:[#allocation6 + $0x210] sm:$0xf]  ;;  %v4903_v44 = vld [vmem:[#allocation6 + $0x120] sm:$0xf] }
 0xa93   :  { %v5024_v12 = vor.u32 %v5336_v2, %v5023_v3  ;;  %v5025_v2 = vld [vmem:[#allocation6 + $0x21c] sm:$0xf0] }
 0xa94   :  { %2963 = vmatmul.bf16.vlgmr.msra.gmra.mxu0 %v2954_v45  ;;  %2976 = vmatmul.bf16.vlgmr.msra.gmra.mxu1 %v2954_v45 }
 0xa95   :  { %2989 = vmatmul.bf16.vlgmr.msra.gmra.mxu2 %v2954_v45  ;;  %3002 = vmatmul.bf16.vlgmr.msra.gmra.mxu3 %v2954_v45  ;;  %v4681_v45 = vld [vmem:[#allocation4 + $0x70] sm:$0xf0] }
 0xa96   :  { %3275 = vmatpush.bf16.msrb.mxu0 %v4696_v0  ;;  %v4684_v63 = vor.u32 %v5249_v16, %v4681_v45  ;;  %3302 = vmatpush.bf16.msrb.mxu2 %v4688_v5  ;;  %v5237_v0 = vld [vmem:[#allocation4 + $0x4] sm:$0xf]  ;;  %v2832_v45 = vadd.f32 %v7138_v27, %v8006_v43  ;;  %v4831_v43 = vld [vmem:[#allocation6 + $0x90] sm:$0xf]  ;;  %v5288_v27 = vld [vmem:[#allocation6 + $0x98] sm:$0xf0] }
 0xa97   :  { %3316 = vmatpush.bf16.msrb.mxu3 %v4676_v38  ;;  %v4636_v37 = vor.u32 %v5237_v0, %v4633_v54  ;;  %v4832_v41 = vor.u32 %v5288_v27, %v4831_v43  ;;  %v5282_v54 = vld [vmem:[#allocation6 + $0x68] sm:$0xf0]  ;;  %v4999_v43 = vld [vmem:[#allocation6 + $0x1e0] sm:$0xf] }
 0xa98   :  { %3289 = vmatpush.bf16.msrb.mxu1 %v4684_v63  ;;  %v5291_v63 = vld [vmem:[#allocation6 + $0xb0] sm:$0xf0]  ;;  %v5330_v27 = vld [vmem:[#allocation6 + $0x1e8] sm:$0xf0] }
 0xa9a   :  { %3276 = vmatpush.bf16.msrb.mxu0 %v4680_v51  ;;  %3303 = vmatpush.bf16.msrb.mxu2 %v4672_v17 }
 0xa9b   :  { %3317 = vmatpush.bf16.msrb.mxu3 %v4660_v61  ;;  %v5360_v61 = vld [vmem:[#allocation6 + $0x2d8] sm:$0xf0] }
 0xa9c   :  { %3290 = vmatpush.bf16.msrb.mxu1 %v4668_v9  ;;  %v5339_v9 = vld [vmem:[#allocation6 + $0x230] sm:$0xf0] }
 0xa9e   :  { %3277 = vmatpush.bf16.msrb.mxu0 %v4664_v26  ;;  %3304 = vmatpush.bf16.msrb.mxu2 %v4656_v46  ;;  %v5119_v46 = vld [vmem:[#allocation6 + $0x2d0] sm:$0xf] }
 0xa9f   :  { %v5120_v0 = vor.u32 %v5360_v61, %v5119_v46 }
 0xaa0   :  { %3291 = vmatpush.bf16.msrb.mxu1 %v4652_v11  ;;  %v5132_v11 = vor.u32 %v5363_v13, %v5131_v10 }
 0xaa2   :  { %3278 = vmatpush.bf16.msrb.mxu0 %v4648_v42  ;;  %3305 = vmatpush.bf16.msrb.mxu2 %v4640_v47 }
 0xaa4   :  { %3292 = vmatpush.bf16.msrb.mxu1 %v4636_v37  ;;  %v5306_v37 = vld [vmem:[#allocation6 + $0x128] sm:$0xf0] }
 0xaa6   :  { %3279 = vmatpush.bf16.msrb.mxu0 %v4632_v18  ;;  %v4807_v18 = vld [vmem:[#allocation6 + $0x60] sm:$0xf] }
 0xb11   :  { %v2964_v24 = vpop.f32.mrf.mxu0  ;;  %v2977_v30 = vpop.f32.mrf.mxu1 }
 0xb12   :  { %v2965_v60 = vadd.f32 %v2964_v24, %v2793_v34  ;;  %v2978_v7 = vadd.f32 %v2977_v30, %v2806_v36  ;;  %v4644_v36 = vor.u32 %v5238_v62, %v4641_v6  ;;  %v4843_v30 = vld [vmem:[#allocation6 + $0xa8] sm:$0xf]  ;;  %v5011_v62 = vld [vmem:[#allocation6 + $0x1f8] sm:$0xf]  ;;  %v5333_v6 = vld [vmem:[#allocation6 + $0x200] sm:$0xf0] }
 0xb13   :  { %v4844_v14 = vor.u32 %v5291_v63, %v4843_v30  ;;  %v4904_v30 = vor.u32 %v5306_v37, %v4903_v44  ;;  %v4795_v63 = vld [vmem:[#allocation6 + $0x48] sm:$0xf]  ;;  %v5348_v44 = vld [vmem:[#allocation6 + $0x278] sm:$0xf0] }
 0xb14   :  { %v4626_v58 = vmul.f32 -1.442695, %v2965_v60  ;;  %v4627_v8 = vmul.f32 -1.442695, %v2978_v7  ;;  %3318 = vmatpush.bf16.msrb.mxu3 %v4644_v36  ;;  %v5315_v60 = vld [vmem:[#allocation6 + $0x170] sm:$0xf0] }
 0xb15   :  { %v4940_v1 = vor.u32 %v5315_v60, %v4939_v55  ;;  %3979 = vmatpush.bf16.msra.mxu0 %v4844_v14  ;;  %v4891_v14 = vld [vmem:[#allocation6 + $0x108] sm:$0xf]  ;;  %v5012_v60 = vor.u32 %v5333_v6, %v5011_v62  ;;  %v4855_v36 = vld [vmem:[#allocation6 + $0xc0] sm:$0xf] }
 0xb16   :  { %5612 = vpow2.f32 %v4626_v58  ;;  %v5312_v58 = vld [vmem:[#allocation6 + $0x158] sm:$0xf0] }
 0xb17   :  { %5614 = vpow2.f32 %v4627_v8  ;;  %v5035_v8 = vld [vmem:[#allocation6 + $0x228] sm:$0xf]  ;;  %3992 = vmatpush.bf16.msra.mxu1 %v4940_v1  ;;  %v4928_v56 = vor.u32 %v5312_v58, %v4927_v48  ;;  %v5303_v1 = vld [vmem:[#allocation6 + $0x110] sm:$0xf0] }
 0xb18   :  { %v2990_v20 = vpop.f32.mrf.mxu2  ;;  %v3003_v35 = vpop.f32.mrf.mxu3  ;;  %4018 = vmatpush.bf16.msra.mxu3 %v5132_v11 }
 0xb19   :  { %v2991_v57 = vadd.f32 %v2990_v20, %v2819_v32  ;;  %v2966_v52 = vpop.f32.mrf.mxu0  ;;  %v2979_v23 = vpop.f32.mrf.mxu1  ;;  %v3004_v24 = vadd.f32 %v3003_v35, %v2832_v45  ;;  %v5285_v32 = vld [vmem:[#allocation6 + $0x80] sm:$0xf0]  ;;  %3980 = vmatpush.bf16.msra.mxu0 %v4832_v41  ;;  %v5036_v35 = vor.u32 %v5339_v9, %v5035_v8  ;;  %v4808_v45 = vor.u32 %v5282_v54, %v4807_v18  ;;  %v5095_v8 = vld [vmem:[#allocation6 + $0x2a0] sm:$0xf]  ;;  %v5083_v20 = vld [vmem:[#allocation6 + $0x288] sm:$0xf] }
 0xb1a   :  { %v4820_v52 = vor.u32 %v5285_v32, %v4819_v31  ;;  %v4916_v23 = vor.u32 %v5309_v59, %v4915_v33  ;;  %v5276_v31 = vld [vmem:[#allocation6 + $0x38] sm:$0xf0]  ;;  %v4987_v33 = vld [vmem:[#allocation6 + $0x1c8] sm:$0xf]  ;;  %v5071_v54 = vld [vmem:[#allocation6 + $0x270] sm:$0xf] }
 0xb1b   :  { %v4628_v53 = vmul.f32 -1.442695, %v2991_v57  ;;  %3993 = vmatpush.bf16.msra.mxu1 %v4928_v56  ;;  %4005 = vmatpush.bf16.msra.mxu2 %v5036_v35  ;;  %v5354_v56 = vld [vmem:[#allocation6 + $0x2a8] sm:$0xf0]  ;;  %v5351_v35 = vld [vmem:[#allocation6 + $0x290] sm:$0xf0]  ;;  %v5072_v6 = vor.u32 %v5348_v44, %v5071_v54 }
 0xb1c   :  { %v5613_v21 = vpop.eup %5612  ;;  %4019 = vmatpush.bf16.msra.mxu3 %v5120_v0  ;;  %v5096_v32 = vor.u32 %v5354_v56, %v5095_v8  ;;  %v5084_v61 = vor.u32 %v5351_v35, %v5083_v20  ;;  %v4975_v0 = vld [vmem:[#allocation6 + $0x1b0] sm:$0xf]  ;;  %v5324_v18 = vld [vmem:[#allocation6 + $0x1b8] sm:$0xf0]  ;;  %v4917_v35 = vld [vmem:[#allocation6 + $0x144] sm:$0xf0] }
 0xb1d   :  { %v5615_v16 = vpop.eup %5614  ;;  %v7155_v34 = vadd.f32 1.0, %v5613_v21  ;;  %5616 = vpow2.f32 %v4628_v53  ;;  %3981 = vmatpush.bf16.msra.mxu0 %v4820_v52  ;;  %v4771_v52 = vld [vmem:[#allocation6 + $0x18] sm:$0xf]  ;;  %v4976_v62 = vor.u32 %v5324_v18, %v4975_v0  ;;  %v5308_v20 = vld [vmem:[#allocation6 + $0x13c] sm:$0xf] }
 0xb1e   :  { %v7157_v51 = vadd.f32 1.0, %v5615_v16  ;;  %v5332_v54 = vld [vmem:[#allocation6 + $0x1fc] sm:$0xf]  ;;  %v5013_v44 = vld [vmem:[#allocation6 + $0x204] sm:$0xf0] }
 0xb1f   :  { %5618 = vrcp.f32 %v7155_v34  ;;  %v3028_v5 = vand.u32 2147483647, %v7155_v34  ;;  %v3030_v29 = vand.u32 2147483648, %v7155_v34  ;;  %vm3024_vm10 = vweird.f32 %v7155_v34  ;;  %3994 = vmatpush.bf16.msra.mxu1 %v4916_v23  ;;  %4006 = vmatpush.bf16.msra.mxu2 %v5024_v12  ;;  %v5273_v23 = vld [vmem:[#allocation6 + $0x20] sm:$0xf0] }
 0xb20   :  { %5620 = vrcp.f32 %v7157_v51  ;;  %v2992_v15 = vpop.f32.mrf.mxu2  ;;  %v3005_v39 = vpop.f32.mrf.mxu3  ;;  %v3045_v22 = vand.u32 2147483648, %v7157_v51  ;;  %vm3039_vm5 = vweird.f32 %v7157_v51  ;;  %v3043_v42 = vand.u32 2147483647, %v7157_v51  ;;  %v5297_v12 = vld [vmem:[#allocation6 + $0xe0] sm:$0xf0] }
 0xb21   :  { %5622 = vtanh.f32 %v3004_v24  ;;  %vm7180_vm7 = vcmp.eq.f32.partialorder %v3028_v5, 8.507059e+37  ;;  %v5107_v15 = vld [vmem:[#allocation6 + $0x2b8] sm:$0xf]  ;;  %v5357_v39 = vld [vmem:[#allocation6 + $0x2c0] sm:$0xf0]  ;;  %3982 = vmatpush.bf16.msra.mxu0 %v4808_v45 }
 0xb22   :  { %v3046_v47 = vor.u32 1.1754944e-38, %v3045_v22  ;;  %v5279_v5 = vld [vmem:[#allocation6 + $0x50] sm:$0xf0]  ;;  %vm3044_vm12 = vcmp.eq.f32.partialorder %v3043_v42, 8.507059e+37  ;;  %v4892_v22 = vor.u32 %v5303_v1, %v4891_v14  ;;  %v5300_v42 = vld [vmem:[#allocation6 + $0xf8] sm:$0xf0] }
 0xb23   :  { %v5617_v7 = vpop.eup %5616  ;;  %v4796_v10 = vor.u32 %v5279_v5, %v4795_v63  ;;  %3995 = vmatpush.bf16.msra.mxu1 %v4904_v30  ;;  %4007 = vmatpush.bf16.msra.mxu2 %v5012_v60  ;;  %v4941_v30 = vld [vmem:[#allocation6 + $0x174] sm:$0xf0]  ;;  %v5321_v5 = vld [vmem:[#allocation6 + $0x1a0] sm:$0xf0] }
 0xb24   :  { %v7164_v19 = vadd.f32 1.0, %v5617_v7  ;;  %v5108_v7 = vor.u32 %v5357_v39, %v5107_v15  ;;  %v5294_v15 = vld [vmem:[#allocation6 + $0xc8] sm:$0xf0]  ;;  %v4963_v63 = vld [vmem:[#allocation6 + $0x198] sm:$0xf] }
 0xb25   :  { %v7166_v26 = vpop.eup %5618  ;;  %3983 = vmatpush.bf16.msra.mxu0 %v4796_v10  ;;  %v5290_v39 = vld [vmem:[#allocation6 + $0xac] sm:$0xf]  ;;  %v5059_v14 = vld [vmem:[#allocation6 + $0x258] sm:$0xf]  ;;  %v4856_v1 = vor.u32 %v5294_v15, %v4855_v36  ;;  %v4964_v8 = vor.u32 %v5321_v5, %v4963_v63  ;;  %v5016_v36 = vor.u32 %v5332_v54, %v5013_v44  ;;  %v5001_v15 = vld [vmem:[#allocation6 + $0x1ec] sm:$0xf0] }
 0xb26   :  { %v7168_v25 = vpop.eup %5620  ;;  %v3020_v17 = vmul.f32 %v7166_v26, %v7155_v34  ;;  %5624 = vrcp.f32 %v7164_v19  ;;  %vm3025_vm9 = vweird.f32 %v7166_v26  ;;  %4020 = vmatpush.bf16.msra.mxu3 %v5108_v7  ;;  %vm3054_vm14 = vweird.f32 %v7164_v19  ;;  %v5318_v10 = vld [vmem:[#allocation6 + $0x188] sm:$0xf0]  ;;  %v4785_v63 = vld [vmem:[#allocation6 + $0x3c] sm:$0xf0]  ;;  %v5299_v5 = vld [vmem:[#allocation6 + $0xf4] sm:$0xf] }
 0xb27   :  { %v3035_v38 = vmul.f32 %v7168_v25, %v7157_v51  ;;  %vm3040_vm6 = vweird.f32 %v7168_v25  ;;  %v5623_v50 = vpop.eup %5622  ;;  %vm7197_vm11 = vmor %vm3024_vm10, %vm3025_vm9  ;;  %v3031_v51 = vor.u32 1.1754944e-38, %v3030_v29  ;;  %v4783_v29 = vld [vmem:[#allocation6 + $0x30] sm:$0xf]  ;;  %3996 = vmatpush.bf16.msra.mxu1 %v4892_v22  ;;  %v5338_v22 = vld [vmem:[#allocation6 + $0x22c] sm:$0xf] }
 0xb28   :  { %v3021_v28 = vsub.f32 1.0, %v3020_v17  ;;  %vm7184_vm8 = vmor %vm3039_vm5, %vm3040_vm6  ;;  %v4784_v3 = vor.u32 %v5276_v31, %v4783_v29  ;;  %v5037_v29 = vld [vmem:[#allocation6 + $0x234] sm:$0xf0]  ;;  %v5362_v31 = vld [vmem:[#allocation6 + $0x2ec] sm:$0xf] }
 0xb29   :  { %v3036_v40 = vsub.f32 1.0, %v3035_v38  ;;  %v4879_v38 = vld [vmem:[#allocation6 + $0xf0] sm:$0xf] }
 0xb2a   :  { %v3022_v49 = vmul.f32 %v7166_v26, %v3021_v28  ;;  %v5327_v28 = vld [vmem:[#allocation6 + $0x1d0] sm:$0xf0]  ;;  %v4880_v57 = vor.u32 %v5300_v42, %v4879_v38  ;;  %4021 = vmatpush.bf16.msra.mxu3 %v5096_v32  ;;  %3984 = vmatpush.bf16.msra.mxu0 %v4784_v3  ;;  %v5284_v42 = vld [vmem:[#allocation6 + $0x7c] sm:$0xf] }
 0xb2b   :  { %v3037_v53 = vmul.f32 %v7168_v25, %v3036_v40  ;;  %v3060_v40 = vand.u32 2147483648, %v7164_v19  ;;  %v4988_v46 = vor.u32 %v5327_v28, %v4987_v33  ;;  %v4821_v28 = vld [vmem:[#allocation6 + $0x84] sm:$0xf0]  ;;  %v5335_v3 = vld [vmem:[#allocation6 + $0x214] sm:$0xf] }
 0xb2c   :  { %v7192_v21 = vpop.eup %5624  ;;  %v3023_v16 = vadd.f32 %v7166_v26, %v3022_v49  ;;  %v4867_v49 = vld [vmem:[#allocation6 + $0xd8] sm:$0xf]  ;;  %3997 = vmatpush.bf16.msra.mxu1 %v4880_v57  ;;  %v5121_v57 = vld [vmem:[#allocation6 + $0x2dc] sm:$0xf0]  ;;  %v5028_v0 = vor.u32 %v5335_v3, %v5025_v2  ;;  %v5344_v2 = vld [vmem:[#allocation6 + $0x25c] sm:$0xf] }
 0xb2d   :  { %v3050_v34 = vmul.f32 %v7192_v21, %v7164_v19  ;;  %v3038_v24 = vadd.f32 %v7168_v25, %v3037_v53  ;;  %vm3055_vm13 = vweird.f32 %v7192_v21  ;;  %v3061_v53 = vor.u32 1.1754944e-38, %v3060_v40  ;;  %v5359_v40 = vld [vmem:[#allocation6 + $0x2d4] sm:$0xf] }
 0xb2e   :  { %v3027_v55 = vsel %vm7197_vm11, %v7166_v26, %v3023_v16  ;;  %vm7220_vm15 = vmor %vm3054_vm14, %vm3055_vm13  ;;  %v4868_v37 = vor.u32 %v5297_v12, %v4867_v49  ;;  %4022 = vmatpush.bf16.msra.mxu3 %v5084_v61  ;;  %v5270_v16 = vld [vmem:[#allocation6 + $0x8] sm:$0xf0]  ;;  %v4809_v61 = vld [vmem:[#allocation6 + $0x6c] sm:$0xf0]  ;;  %v5124_v18 = vor.u32 %v5359_v40, %v5121_v57 }
 0xb2f   :  { %v3051_v48 = vsub.f32 1.0, %v3050_v34  ;;  %v3032_v41 = vsel %vm7180_vm7, %v3031_v51, %v3027_v55  ;;  %v3042_v58 = vsel %vm7184_vm8, %v7168_v25, %v3038_v24  ;;  %v5000_v25 = vor.u32 %v5330_v27, %v4999_v43  ;;  %v4845_v34 = vld [vmem:[#allocation6 + $0xb4] sm:$0xf0]  ;;  %v5345_v55 = vld [vmem:[#allocation6 + $0x260] sm:$0xf0] }
 0xb30   :  { %v3047_v9 = vsel %vm3044_vm12, %v3046_v47, %v3042_v58  ;;  %v3066_v26 = vmul.f32 %v5623_v50, %v3032_v41  ;;  %v4759_v47 = vld [vmem:[#allocation6] sm:$0xf]  ;;  %3998 = vmatpush.bf16.msra.mxu1 %v4868_v37  ;;  %v4848_v43 = vor.u32 %v5290_v39, %v4845_v34  ;;  %v5311_v58 = vld [vmem:[#allocation6 + $0x154] sm:$0xf]  ;;  %v5060_v56 = vor.u32 %v5345_v55, %v5059_v14  ;;  %v5305_v49 = vld [vmem:[#allocation6 + $0x124] sm:$0xf] }
 0xb31   :  { %v3052_v13 = vmul.f32 %v7192_v21, %v3051_v48  ;;  %v3065_v17 = vmul.f32 %v3047_v9, %v7093_v4  ;;  %v3058_v4 = vand.u32 2147483647, %v7164_v19  ;;  %4008 = vmatpush.bf16.msra.mxu2 %v5000_v25  ;;  %v4772_v19 = vor.u32 %v5273_v23, %v4771_v52  ;;  %v5287_v48 = vld [vmem:[#allocation6 + $0x94] sm:$0xf]  ;;  %v4833_v41 = vld [vmem:[#allocation6 + $0x9c] sm:$0xf0] }
 0xb32   :  { %4023 = vmatpush.bf16.msra.mxu3 %v5072_v6  ;;  %v4760_v7 = vor.u32 %v5270_v16, %v4759_v47  ;;  %v4929_v9 = vld [vmem:[#allocation6 + $0x15c] sm:$0xf0]  ;;  %v5133_v25 = vld [vmem:[#allocation6 + $0x2f4] sm:$0xf0]  ;;  %v4836_v32 = vor.u32 %v5287_v48, %v4833_v41  ;;  %v4824_v52 = vor.u32 %v5284_v42, %v4821_v28  ;;  %v4920_v23 = vor.u32 %v5308_v20, %v4917_v35  ;;  %v4905_v12 = vld [vmem:[#allocation6 + $0x12c] sm:$0xf0] }
 0xb33   :  { %v3067_v59 = vadd.f32 %v3066_v26, %v3065_v17  ;;  %v3053_v11 = vadd.f32 %v7192_v21, %v3052_v13  ;;  %vm3059_vm0 = vcmp.eq.f32.partialorder %v3058_v4, 8.507059e+37  ;;  %3985 = vmatpush.bf16.msra.mxu0 %v4772_v19  ;;  %v4951_v26 = vld [vmem:[#allocation6 + $0x180] sm:$0xf]  ;;  %v5342_v17 = vld [vmem:[#allocation6 + $0x248] sm:$0xf0]  ;;  %v4932_v38 = vor.u32 %v5311_v58, %v4929_v9 }
 0xb34   :  { %v5047_v13 = vld [vmem:[#allocation6 + $0x240] sm:$0xf]  ;;  %3999 = vmatpush.bf16.msra.mxu1 %v4856_v1  ;;  %v4952_v33 = vor.u32 %v5318_v10, %v4951_v26  ;;  %v5040_v4 = vor.u32 %v5338_v22, %v5037_v29  ;;  %v5109_v19 = vld [vmem:[#allocation6 + $0x2c4] sm:$0xf0]  ;;  %v4908_v37 = vor.u32 %v5305_v49, %v4905_v12  ;;  %v4797_v6 = vld [vmem:[#allocation6 + $0x54] sm:$0xf0] }
 0xb35   :  { %5626 = vtanh.f32 %v3067_v59  ;;  %v3057_v50 = vsel %vm7220_vm15, %v7192_v21, %v3053_v11  ;;  %4009 = vmatpush.bf16.msra.mxu2 %v4988_v46  ;;  %v5314_v21 = vld [vmem:[#allocation6 + $0x16c] sm:$0xf]  ;;  %v5048_v59 = vor.u32 %v5342_v17, %v5047_v13  ;;  %v5136_v11 = vor.u32 %v5362_v31, %v5133_v25  ;;  %v5281_v46 = vld [vmem:[#allocation6 + $0x64] sm:$0xf]  ;;  %v4893_v16 = vld [vmem:[#allocation6 + $0x114] sm:$0xf0] }
 0xb36   :  { %v3062_v45 = vsel %vm3059_vm0, %v3061_v53, %v3057_v50  ;;  %v4944_v27 = vor.u32 %v5314_v21, %v4941_v30  ;;  %4024 = vmatpush.bf16.msra.mxu3 %v5060_v56  ;;  %v5356_v50 = vld [vmem:[#allocation6 + $0x2bc] sm:$0xf]  ;;  %v4812_v53 = vor.u32 %v5281_v46, %v4809_v61  ;;  %v5302_v47 = vld [vmem:[#allocation6 + $0x10c] sm:$0xf]  ;;  %v5353_v39 = vld [vmem:[#allocation6 + $0x2a4] sm:$0xf] }
 0xb37   :  { %3986 = vmatpush.bf16.msra.mxu0 %v4760_v7  ;;  %v5097_v34 = vld [vmem:[#allocation6 + $0x2ac] sm:$0xf0]  ;;  %v4896_v21 = vor.u32 %v5302_v47, %v4893_v16  ;;  %v5275_v30 = vld [vmem:[#allocation6 + $0x34] sm:$0xf]  ;;  %v4881_v14 = vld [vmem:[#allocation6 + $0xfc] sm:$0xf0] }
 0xb38   :  { %v4788_v7 = vor.u32 %v5275_v30, %v4785_v63  ;;  %v4884_v1 = vor.u32 %v5299_v5, %v4881_v14  ;;  %v5350_v48 = vld [vmem:[#allocation6 + $0x28c] sm:$0xf]  ;;  %v5085_v58 = vld [vmem:[#allocation6 + $0x294] sm:$0xf0]  ;;  %v5272_v56 = vld [vmem:[#allocation6 + $0x1c] sm:$0xf] }
 0xb39   :  { %4010 = vmatpush.bf16.msra.mxu2 %v4976_v62  ;;  %v5278_v62 = vld [vmem:[#allocation6 + $0x4c] sm:$0xf]  ;;  %v4773_v9 = vld [vmem:[#allocation6 + $0x24] sm:$0xf0]  ;;  %v5296_v26 = vld [vmem:[#allocation6 + $0xdc] sm:$0xf] }
 0xb3a   :  { %4025 = vmatpush.bf16.msra.mxu3 %v5048_v59  ;;  %v4776_v10 = vor.u32 %v5272_v56, %v4773_v9  ;;  %v4869_v13 = vld [vmem:[#allocation6 + $0xe4] sm:$0xf0]  ;;  %v5323_v22 = vld [vmem:[#allocation6 + $0x1b4] sm:$0xf]  ;;  %v4977_v29 = vld [vmem:[#allocation6 + $0x1bc] sm:$0xf0] }
 0xb3b   :  { %v5627_v51 = vpop.eup %5626  ;;  %v4872_v17 = vor.u32 %v5296_v26, %v4869_v13  ;;  %v5347_v31 = vld [vmem:[#allocation6 + $0x274] sm:$0xf]  ;;  %v4980_v25 = vor.u32 %v5323_v22, %v4977_v29  ;;  %v5269_v42 = vld [vmem:[#allocation6 + $0x4] sm:$0xf]  ;;  %v4857_v20 = vld [vmem:[#allocation6 + $0xcc] sm:$0xf0] }
 0xb3c   :  { %v3069_v24 = vmul.f32 %v5627_v51, %v3062_v45  ;;  %v5112_v51 = vor.u32 %v5356_v50, %v5109_v19  ;;  %v5329_v45 = vld [vmem:[#allocation6 + $0x1e4] sm:$0xf]  ;;  %v5061_v40 = vld [vmem:[#allocation6 + $0x264] sm:$0xf0]  ;;  %v5049_v49 = vld [vmem:[#allocation6 + $0x24c] sm:$0xf0] }
 0xb3d   :  { %4011 = vmatpush.bf16.msra.mxu2 %v4964_v8  ;;  %v5004_v55 = vor.u32 %v5329_v45, %v5001_v15  ;;  %v5088_v8 = vor.u32 %v5350_v48, %v5085_v58  ;;  %v5293_v28 = vld [vmem:[#allocation6 + $0xc4] sm:$0xf]  ;;  %v5064_v57 = vor.u32 %v5344_v2, %v5061_v40  ;;  %v4851_v19 = vld [vmem:[#allocation6 + $0xb0] sm:$0xf]  ;;  %v5316_v47 = vld [vmem:[#allocation6 + $0x178] sm:$0xf0] }
 0xb3e   :  { %v3070_v60 = vpack.c.bf16 %v3069_v24, %v3069_v24  ;;  %v4800_v24 = vor.u32 %v5278_v62, %v4797_v6  ;;  %v4860_v35 = vor.u32 %v5293_v28, %v4857_v20  ;;  %v5341_v61 = vld [vmem:[#allocation6 + $0x244] sm:$0xf]  ;;  %v5292_v62 = vld [vmem:[#allocation6 + $0xb8] sm:$0xf0]  ;;  %v4947_v6 = vld [vmem:[#allocation6 + $0x170] sm:$0xf] }
 0xb3f   :  { %v5052_v12 = vor.u32 %v5341_v61, %v5049_v49  ;;  %v4852_v15 = vor.u32 %v5292_v62, %v4851_v19  ;;  %v4935_v63 = vld [vmem:[#allocation6 + $0x158] sm:$0xf]  ;;  %v5313_v5 = vld [vmem:[#allocation6 + $0x160] sm:$0xf0]  ;;  %v5364_v56 = vld [vmem:[#allocation6 + $0x2f8] sm:$0xf0] }
 0xb40   :  { %3280 = vmatmul.bf16.vlgmr.msrb.gmra.mxu0 %v3070_v60  ;;  %3293 = vmatmul.bf16.vlgmr.msrb.gmra.mxu1 %v3070_v60  ;;  %v4827_v9 = vld [vmem:[#allocation6 + $0x80] sm:$0xf]  ;;  %v5286_v26 = vld [vmem:[#allocation6 + $0x88] sm:$0xf0]  ;;  %v5127_v28 = vld [vmem:[#allocation6 + $0x2d8] sm:$0xf] }
 0xb41   :  { %3306 = vmatmul.bf16.vlgmr.msrb.gmra.mxu2 %v3070_v60  ;;  %3319 = vmatmul.bf16.vlgmr.msrb.gmra.mxu3 %v3070_v60  ;;  %v5100_v60 = vor.u32 %v5353_v39, %v5097_v34  ;;  %v4948_v39 = vor.u32 %v5316_v47, %v4947_v6  ;;  %v4839_v34 = vld [vmem:[#allocation6 + $0x98] sm:$0xf]  ;;  %v5310_v13 = vld [vmem:[#allocation6 + $0x148] sm:$0xf0]  ;;  %v5361_v20 = vld [vmem:[#allocation6 + $0x2e0] sm:$0xf0] }
 0xb42   :  { %4031 = vmatpush.bf16.msrb.mxu0 %v4848_v43  ;;  %4044 = vmatpush.bf16.msrb.mxu1 %v4944_v27  ;;  %v5326_v43 = vld [vmem:[#allocation6 + $0x1cc] sm:$0xf]  ;;  %v4989_v27 = vld [vmem:[#allocation6 + $0x1d4] sm:$0xf0]  ;;  %v5331_v62 = vld [vmem:[#allocation6 + $0x1f0] sm:$0xf0] }
 0xb43   :  { %4012 = vmatpush.bf16.msra.mxu2 %v4952_v33  ;;  %4070 = vmatpush.bf16.msrb.mxu3 %v5136_v11  ;;  %v4992_v41 = vor.u32 %v5326_v43, %v4989_v27  ;;  %v4761_v33 = vld [vmem:[#allocation6 + $0xc] sm:$0xf0]  ;;  %v4965_v11 = vld [vmem:[#allocation6 + $0x1a4] sm:$0xf0]  ;;  %v5334_v49 = vld [vmem:[#allocation6 + $0x208] sm:$0xf0] }
 0xb44   :  { %v4764_v59 = vor.u32 %v5269_v42, %v4761_v33  ;;  %v5139_v43 = vld [vmem:[#allocation6 + $0x2f0] sm:$0xf]  ;;  %v5103_v6 = vld [vmem:[#allocation6 + $0x2a8] sm:$0xf]  ;;  %v5355_v47 = vld [vmem:[#allocation6 + $0x2b0] sm:$0xf0] }
 0xb46   :  { %4032 = vmatpush.bf16.msrb.mxu0 %v4836_v32  ;;  %4045 = vmatpush.bf16.msrb.mxu1 %v4932_v38  ;;  %v5073_v32 = vld [vmem:[#allocation6 + $0x27c] sm:$0xf0] }
 0xb47   :  { %4057 = vmatpush.bf16.msrb.mxu2 %v5040_v4  ;;  %4071 = vmatpush.bf16.msrb.mxu3 %v5124_v18  ;;  %v5076_v38 = vor.u32 %v5347_v31, %v5073_v32  ;;  %v5320_v4 = vld [vmem:[#allocation6 + $0x19c] sm:$0xf]  ;;  %v5140_v31 = vor.u32 %v5364_v56, %v5139_v43  ;;  %v5031_v32 = vld [vmem:[#allocation6 + $0x218] sm:$0xf]  ;;  %v5274_v43 = vld [vmem:[#allocation6 + $0x28] sm:$0xf0] }
 0xb48   :  { %v4968_v3 = vor.u32 %v5320_v4, %v4965_v11  ;;  %v5283_v4 = vld [vmem:[#allocation6 + $0x70] sm:$0xf0]  ;;  %v4911_v11 = vld [vmem:[#allocation6 + $0x128] sm:$0xf]  ;;  %v5325_v56 = vld [vmem:[#allocation6 + $0x1c0] sm:$0xf0] }
 0xb4a   :  { %4033 = vmatpush.bf16.msrb.mxu0 %v4824_v52  ;;  %4046 = vmatpush.bf16.msrb.mxu1 %v4920_v23  ;;  %v5317_v52 = vld [vmem:[#allocation6 + $0x184] sm:$0xf]  ;;  %v4953_v23 = vld [vmem:[#allocation6 + $0x18c] sm:$0xf0] }
 0xb4b   :  { %4058 = vmatpush.bf16.msrb.mxu2 %v5028_v0  ;;  %4072 = vmatpush.bf16.msrb.mxu3 %v5112_v51  ;;  %v4956_v46 = vor.u32 %v5317_v52, %v4953_v23  ;;  %v4162_v0 = vld [vmem:[%s7268_s5 + $0x2] ss:$8 sm:$0xf]  ;;  %v5128_v52 = vor.u32 %v5361_v20, %v5127_v28  ;;  %v5346_v20 = vld [vmem:[#allocation6 + $0x268] sm:$0xf0] }
 0xb4c   :  { %v3104_v18 = vperm.slane %v4162_v0, 0  ;;  %v3105_v54 = vperm.slane %v4162_v0, 1  ;;  %v3106_v51 = vperm.slane %v4162_v0, 2  ;;  %v3107_v45 = vperm.slane %v4162_v0, 3  ;;  %v5019_v23 = vld [vmem:[#allocation6 + $0x200] sm:$0xf] }
 0xb4d   :  { %v5358_v0 = vld [vmem:[#allocation6 + $0x2c8] sm:$0xf0]  ;;  %v5020_v19 = vor.u32 %v5334_v49, %v5019_v23  ;;  %v5067_v28 = vld [vmem:[#allocation6 + $0x260] sm:$0xf] }
 0xb4e   :  { %4034 = vmatpush.bf16.msrb.mxu0 %v4812_v53  ;;  %4047 = vmatpush.bf16.msrb.mxu1 %v4908_v37 }
 0xb4f   :  { %4059 = vmatpush.bf16.msrb.mxu2 %v5016_v36  ;;  %4073 = vmatpush.bf16.msrb.mxu3 %v5100_v60 }
 0xb52   :  { %4035 = vmatpush.bf16.msrb.mxu0 %v4800_v24  ;;  %4048 = vmatpush.bf16.msrb.mxu1 %v4896_v21  ;;  %v5289_v24 = vld [vmem:[#allocation6 + $0xa0] sm:$0xf0] }
 0xb53   :  { %4060 = vmatpush.bf16.msrb.mxu2 %v5004_v55  ;;  %4074 = vmatpush.bf16.msrb.mxu3 %v5088_v8  ;;  %v4840_v60 = vor.u32 %v5289_v24, %v4839_v34  ;;  %v4936_v8 = vor.u32 %v5313_v5, %v4935_v63  ;;  %v5104_v24 = vor.u32 %v5355_v47, %v5103_v6  ;;  %v4995_v63 = vld [vmem:[#allocation6 + $0x1d0] sm:$0xf]  ;;  %v5328_v5 = vld [vmem:[#allocation6 + $0x1d8] sm:$0xf0] }
 0xb56   :  { %4036 = vmatpush.bf16.msrb.mxu0 %v4788_v7  ;;  %4049 = vmatpush.bf16.msrb.mxu1 %v4884_v1  ;;  %v5043_v7 = vld [vmem:[#allocation6 + $0x230] sm:$0xf]  ;;  %v5340_v1 = vld [vmem:[#allocation6 + $0x238] sm:$0xf0] }
 0xb57   :  { %4061 = vmatpush.bf16.msrb.mxu2 %v4992_v41  ;;  %4075 = vmatpush.bf16.msrb.mxu3 %v5076_v38  ;;  %v5044_v29 = vor.u32 %v5340_v1, %v5043_v7  ;;  %v5337_v38 = vld [vmem:[#allocation6 + $0x220] sm:$0xf0]  ;;  %v4779_v1 = vld [vmem:[#allocation6 + $0x20] sm:$0xf] }
 0xb5a   :  { %4037 = vmatpush.bf16.msrb.mxu0 %v4776_v10  ;;  %4050 = vmatpush.bf16.msrb.mxu1 %v4872_v17  ;;  %v4923_v10 = vld [vmem:[#allocation6 + $0x140] sm:$0xf] }
 0xb5b   :  { %4062 = vmatpush.bf16.msrb.mxu2 %v4980_v25  ;;  %4076 = vmatpush.bf16.msrb.mxu3 %v5064_v57  ;;  %v4828_v25 = vor.u32 %v5286_v26, %v4827_v9  ;;  %v5032_v57 = vor.u32 %v5337_v38, %v5031_v32  ;;  %v5079_v9 = vld [vmem:[#allocation6 + $0x278] sm:$0xf]  ;;  %v5349_v26 = vld [vmem:[#allocation6 + $0x280] sm:$0xf0]  ;;  %v4971_v38 = vld [vmem:[#allocation6 + $0x1a0] sm:$0xf] }
 0xb5c   :  { %v5080_v32 = vor.u32 %v5349_v26, %v5079_v9 }
 0xb5e   :  { %4038 = vmatpush.bf16.msrb.mxu0 %v4764_v59  ;;  %4051 = vmatpush.bf16.msrb.mxu1 %v4860_v35  ;;  %v4924_v59 = vor.u32 %v5310_v13, %v4923_v10  ;;  %v4815_v35 = vld [vmem:[#allocation6 + $0x68] sm:$0xf]  ;;  %v4780_v10 = vor.u32 %v5274_v43, %v4779_v1  ;;  %v4164_v43 = vld [vmem:[%s7268_s5 + $0x4] ss:$8 sm:$0x7] }
 0xb5f   :  { %4063 = vmatpush.bf16.msrb.mxu2 %v4968_v3  ;;  %4077 = vmatpush.bf16.msrb.mxu3 %v5052_v12  ;;  %v5307_v3 = vld [vmem:[#allocation6 + $0x130] sm:$0xf0]  ;;  %v5115_v12 = vld [vmem:[#allocation6 + $0x2c0] sm:$0xf]  ;;  %v4139_v9 = vperm.slane %v4164_v43, 0 }
 0xb60   :  { %v4912_v61 = vor.u32 %v5307_v3, %v4911_v11  ;;  %v5068_v3 = vor.u32 %v5346_v20, %v5067_v28  ;;  %v88_v28 = vld [vmem:[%s7268_s5 + $0x5] ss:$0 sm:$0xff] }
 0xb63   :  { %4064 = vmatpush.bf16.msrb.mxu2 %v4956_v46  ;;  %v4816_v46 = vor.u32 %v5283_v4, %v4815_v35 }
 0xbbd   :  { %v3281_v44 = vpop.f32.mrf.mxu0  ;;  %v3294_v50 = vpop.f32.mrf.mxu1 }
 0xbbe   :  { %v3282_v53 = vadd.f32 %v3281_v44, %v3104_v18  ;;  %v3295_v37 = vadd.f32 %v3294_v50, %v3105_v54  ;;  %v4803_v18 = vld [vmem:[#allocation6 + $0x50] sm:$0xf]  ;;  %v5280_v54 = vld [vmem:[#allocation6 + $0x58] sm:$0xf0] }
 0xbbf   :  { %v4899_v44 = vld [vmem:[#allocation6 + $0x110] sm:$0xf]  ;;  %v5304_v50 = vld [vmem:[#allocation6 + $0x118] sm:$0xf0] }
 0xbc0   :  { %v3324_v16 = vmax.f32 %v3282_v53, 0.0  ;;  %v3325_v36 = vmax.f32 %v3295_v37, 0.0  ;;  %v5116_v53 = vor.u32 %v5358_v0, %v5115_v12  ;;  %v5007_v37 = vld [vmem:[#allocation6 + $0x1e8] sm:$0xf] }
 0xbc1   :  { %v5008_v34 = vor.u32 %v5331_v62, %v5007_v37 }
 0xbc2   :  { %v7231_v21 = vpack.c.bf16 %v3324_v16, %v3324_v16  ;;  %v7233_v30 = vpack.c.bf16 %v3325_v36, %v3325_v36  ;;  %v4804_v16 = vor.u32 %v5280_v54, %v4803_v18  ;;  %v4900_v36 = vor.u32 %v5304_v50, %v4899_v44 }
 0xbc4   :  { %v3307_v14 = vpop.f32.mrf.mxu2  ;;  %v3320_v55 = vpop.f32.mrf.mxu3  ;;  %3987 = vmatmul.bf16.vlgmr.msra.gmra.mxu0 %v7231_v21  ;;  %4000 = vmatmul.bf16.vlgmr.msra.gmra.mxu1 %v7233_v30 }
 0xbc5   :  { %v3308_v27 = vadd.f32 %v3307_v14, %v3106_v51  ;;  %v3321_v48 = vadd.f32 %v3320_v55, %v3107_v45  ;;  %v3283_v41 = vpop.f32.mrf.mxu0  ;;  %v3296_v58 = vpop.f32.mrf.mxu1  ;;  %4083 = vmatpush.bf16.msra.mxu0 %v4852_v15  ;;  %4096 = vmatpush.bf16.msra.mxu1 %v4948_v39  ;;  %v4791_v51 = vld [vmem:[#allocation6 + $0x38] sm:$0xf]  ;;  %v5277_v45 = vld [vmem:[#allocation6 + $0x40] sm:$0xf0]  ;;  %v5091_v14 = vld [vmem:[#allocation6 + $0x290] sm:$0xf] }
 0xbc6   :  { %v4887_v15 = vld [vmem:[#allocation6 + $0xf8] sm:$0xf]  ;;  %v5301_v39 = vld [vmem:[#allocation6 + $0x100] sm:$0xf0]  ;;  %v5352_v55 = vld [vmem:[#allocation6 + $0x298] sm:$0xf0]  ;;  %v4996_v41 = vor.u32 %v5328_v5, %v4995_v63 }
 0xbc7   :  { %v3326_v17 = vmax.f32 %v3308_v27, 0.0  ;;  %v3327_v22 = vmax.f32 %v3321_v48, 0.0  ;;  %v4888_v7 = vor.u32 %v5301_v39, %v4887_v15  ;;  %v4875_v27 = vld [vmem:[#allocation6 + $0xe0] sm:$0xf]  ;;  %v5298_v48 = vld [vmem:[#allocation6 + $0xe8] sm:$0xf0]  ;;  %v5092_v58 = vor.u32 %v5352_v55, %v5091_v14 }
 0xbc8   :  { %v4876_v13 = vor.u32 %v5298_v48, %v4875_v27  ;;  %v4140_v48 = vperm.slane %v4164_v43, 1 }
 0xbc9   :  { %v7237_v42 = vpack.c.bf16 %v3326_v17, %v3326_v17  ;;  %v7239_v33 = vpack.c.bf16 %v3327_v22, %v3327_v22  ;;  %4084 = vmatpush.bf16.msra.mxu0 %v4840_v60  ;;  %4097 = vmatpush.bf16.msra.mxu1 %v4936_v8  ;;  %v4792_v60 = vor.u32 %v5277_v45, %v4791_v51  ;;  %v4983_v8 = vld [vmem:[#allocation6 + $0x1b8] sm:$0xf]  ;;  %v4767_v17 = vld [vmem:[#allocation6 + $0x8] sm:$0xf]  ;;  %v5271_v22 = vld [vmem:[#allocation6 + $0x10] sm:$0xf0] }
 0xbca   :  { %v4768_v35 = vor.u32 %v5271_v22, %v4767_v17  ;;  %v4141_v17 = vperm.slane %v4164_v43, 2 }
 0xbcb   :  { %4013 = vmatmul.bf16.vlgmr.msra.gmra.mxu2 %v7237_v42  ;;  %4026 = vmatmul.bf16.vlgmr.msra.gmra.mxu3 %v7239_v33 }
 0xbcc   :  { %v3309_v2 = vpop.f32.mrf.mxu2  ;;  %v3322_v40 = vpop.f32.mrf.mxu3  ;;  %4109 = vmatpush.bf16.msra.mxu2 %v5044_v29  ;;  %4122 = vmatpush.bf16.msra.mxu3 %v5140_v31  ;;  %v4863_v29 = vld [vmem:[#allocation6 + $0xc8] sm:$0xf]  ;;  %v5295_v31 = vld [vmem:[#allocation6 + $0xd0] sm:$0xf0] }
 0xbcd   :  { %4085 = vmatpush.bf16.msra.mxu0 %v4828_v25  ;;  %4098 = vmatpush.bf16.msra.mxu1 %v4924_v59  ;;  %v4984_v25 = vor.u32 %v5325_v56, %v4983_v8  ;;  %v5322_v59 = vld [vmem:[#allocation6 + $0x1a8] sm:$0xf0]  ;;  %v4864_v4 = vor.u32 %v5295_v31, %v4863_v29  ;;  %v4959_v2 = vld [vmem:[#allocation6 + $0x188] sm:$0xf]  ;;  %v5319_v40 = vld [vmem:[#allocation6 + $0x190] sm:$0xf0] }
 0xbce   :  { %v4972_v11 = vor.u32 %v5322_v59, %v4971_v38  ;;  %v4960_v23 = vor.u32 %v5319_v40, %v4959_v2 }
 0xbd0   :  { %4110 = vmatpush.bf16.msra.mxu2 %v5032_v57  ;;  %4123 = vmatpush.bf16.msra.mxu3 %v5128_v52  ;;  %v5055_v57 = vld [vmem:[#allocation6 + $0x248] sm:$0xf]  ;;  %v5343_v52 = vld [vmem:[#allocation6 + $0x250] sm:$0xf0] }
 0xbd1   :  { %4086 = vmatpush.bf16.msra.mxu0 %v4816_v46  ;;  %4099 = vmatpush.bf16.msra.mxu1 %v4912_v61  ;;  %v5056_v46 = vor.u32 %v5343_v52, %v5055_v57 }
 0xbd4   :  { %4111 = vmatpush.bf16.msra.mxu2 %v5020_v19  ;;  %4124 = vmatpush.bf16.msra.mxu3 %v5116_v53 }
 0xbd5   :  { %4039 = vmatmul.bf16.vlgmr.msrb.gmra.mxu0 %v7231_v21  ;;  %4052 = vmatmul.bf16.vlgmr.msrb.gmra.mxu1 %v7233_v30 }
 0xbd6   :  { %4087 = vmatpush.bf16.msra.mxu0 %v4804_v16  ;;  %4100 = vmatpush.bf16.msra.mxu1 %v4900_v36 }
 0xbd8   :  { %4112 = vmatpush.bf16.msra.mxu2 %v5008_v34  ;;  %4125 = vmatpush.bf16.msra.mxu3 %v5104_v24 }
 0xbda   :  { %4088 = vmatpush.bf16.msra.mxu0 %v4792_v60  ;;  %4101 = vmatpush.bf16.msra.mxu1 %v4888_v7 }
 0xbdb   :  { %4065 = vmatmul.bf16.vlgmr.msrb.gmra.mxu2 %v7237_v42  ;;  %4078 = vmatmul.bf16.vlgmr.msrb.gmra.mxu3 %v7239_v33 }
 0xbdc   :  { %4113 = vmatpush.bf16.msra.mxu2 %v4996_v41  ;;  %4126 = vmatpush.bf16.msra.mxu3 %v5092_v58 }
 0xbde   :  { %4089 = vmatpush.bf16.msra.mxu0 %v4780_v10  ;;  %4102 = vmatpush.bf16.msra.mxu1 %v4876_v13 }
 0xbe0   :  { %4114 = vmatpush.bf16.msra.mxu2 %v4984_v25  ;;  %4127 = vmatpush.bf16.msra.mxu3 %v5080_v32 }
 0xbe2   :  { %4090 = vmatpush.bf16.msra.mxu0 %v4768_v35  ;;  %4103 = vmatpush.bf16.msra.mxu1 %v4864_v4 }
 0xbe4   :  { %4115 = vmatpush.bf16.msra.mxu2 %v4972_v11  ;;  %4128 = vmatpush.bf16.msra.mxu3 %v5068_v3 }
 0xbe5   :  { %4091 = vmatmul.bf16.vlgmr.msra.gmra.mxu0 %v7231_v21  ;;  %4104 = vmatmul.bf16.vlgmr.msra.gmra.mxu1 %v7233_v30  ;;  %v4163_v21 = vld [vmem:[%s7268_s5 + $0x3] ss:$8 sm:$0x7] }
 0xbe6   :  { %v3462_v62 = vperm.slane %v4163_v21, 1  ;;  %v3463_v34 = vperm.slane %v4163_v21, 2 }
 0xbe8   :  { %4116 = vmatpush.bf16.msra.mxu2 %v4960_v23  ;;  %4129 = vmatpush.bf16.msra.mxu3 %v5056_v46 }
 0xbeb   :  { %4117 = vmatmul.bf16.vlgmr.msra.gmra.mxu2 %v7237_v42  ;;  %4130 = vmatmul.bf16.vlgmr.msra.gmra.mxu3 %v7239_v33  ;;  %v3461_v42 = vperm.slane %v4163_v21, 0 }
 0xc41   :  { %v3988_v61 = vpop.f32.mrf.mxu0  ;;  %v4001_v49 = vpop.f32.mrf.mxu1 }
 0xc42   :  { %v3989_v16 = vadd.f32 %v3988_v61, %v3461_v42 }
 0xc44   :  { %v4002_v15 = vadd.f32 %v4001_v49, %v3989_v16 }
 0xc49   :  { %v3990_v12 = vpop.f32.mrf.mxu0  ;;  %v4003_v0 = vpop.f32.mrf.mxu1 }
 0xc4e   :  { %v4014_v18 = vpop.f32.mrf.mxu2  ;;  %v4027_v54 = vpop.f32.mrf.mxu3 }
 0xc4f   :  { %v4015_v5 = vadd.f32 %v4014_v18, %v4002_v15 }
 0xc51   :  { %v4028_v1 = vadd.f32 %v4027_v54, %v4015_v5 }
 0xc52   :  { %v4040_v44 = vpop.f32.mrf.mxu0  ;;  %v4053_v50 = vpop.f32.mrf.mxu1 }
 0xc53   :  { %v4041_v47 = vadd.f32 %v4040_v44, %v3462_v62  ;;  %v4135_v56 = vmax.f32 %v4028_v1, 0.0 }
 0xc55   :  { %v4054_v45 = vadd.f32 %v4053_v50, %v4041_v47  ;;  %v4145_v22 = vmul.f32 %v4139_v9, %v4135_v56 }
 0xc56   :  { %v4016_v19 = vpop.f32.mrf.mxu2  ;;  %v4029_v53 = vpop.f32.mrf.mxu3 }
 0xc5a   :  { %v4042_v30 = vpop.f32.mrf.mxu0  ;;  %v4055_v37 = vpop.f32.mrf.mxu1 }
 0xc5e   :  { %v4066_v6 = vpop.f32.mrf.mxu2  ;;  %v4079_v33 = vpop.f32.mrf.mxu3 }
 0xc5f   :  { %v4067_v39 = vadd.f32 %v4066_v6, %v4054_v45 }
 0xc61   :  { %v4080_v14 = vadd.f32 %v4079_v33, %v4067_v39 }
 0xc62   :  { %v4092_v36 = vpop.f32.mrf.mxu0  ;;  %v4105_v51 = vpop.f32.mrf.mxu1 }
 0xc63   :  { %v4093_v55 = vadd.f32 %v4092_v36, %v3463_v34  ;;  %v4136_v27 = vmax.f32 %v4080_v14, 0.0 }
 0xc65   :  { %v4106_v41 = vadd.f32 %v4105_v51, %v4093_v55  ;;  %v4146_v10 = vmul.f32 %v4140_v48, %v4136_v27 }
 0xc66   :  { %v4068_v24 = vpop.f32.mrf.mxu2  ;;  %v4081_v63 = vpop.f32.mrf.mxu3 }
 0xc67   :  { %v4148_v25 = vadd.f32 %v4146_v10, %v4145_v22 }
 0xc6a   :  { %v4094_v60 = vpop.f32.mrf.mxu0  ;;  %v4107_v7 = vpop.f32.mrf.mxu1 }
 0xc6e   :  { %v4118_v58 = vpop.f32.mrf.mxu2  ;;  %v4131_v8 = vpop.f32.mrf.mxu3 }
 0xc6f   :  { %v4119_v26 = vadd.f32 %v4118_v58, %v4106_v41 }
 0xc71   :  { %v4132_v13 = vadd.f32 %v4131_v8, %v4119_v26 }
 0xc73   :  { %v4137_v29 = vmax.f32 %v4132_v13, 0.0 }
 0xc75   :  { %v4147_v31 = vmul.f32 %v4141_v17, %v4137_v29 }
 0xc76   :  { %v4120_v32 = vpop.f32.mrf.mxu2  ;;  %v4133_v38 = vpop.f32.mrf.mxu3 }
 0xc77   :  { %v4149_v59 = vadd.f32 %v4148_v25, %v4147_v31 }
 0xc79   :  { %4150 = vadd.xlane.f32.xlu0 %v4149_v59 }
 0xcec   :  { %v4151_v20 = vpop.xlane.xlu0 %4150 }
 0xced   :  { %v4152_v35 = vadd.f32 %v4151_v20, %v88_v28 }
 0xcef   :  { %4154 = vst.msk [vmem:[%s7269_s6] sm:$0xff] %vm4153_vm1, %v4152_v35 }
 0xcf0   :  { %4159 = vsyncpa [#allocation3], 1 }
 0xcf1   :  { %4160 = vsyncpa [#allocation5], 1 }

</bundles_post_ra>
